<compile_context>
chip_gen: v7x
topology: tpu7x:2x2x1
jax: 0.10.0
libtpu: 0.0.40
codegen_flags: <defaults>
</compile_context>

<pallas_src>
import functools
import math

import jax
import jax.numpy as jnp
from jax.experimental import pallas as pl
from jax.experimental.pallas import tpu as pltpu

LANE = 128


def _round_up(v, m):
    return ((v + m - 1) // m) * m


# -----------------------------------------------------------------------------
# Pallas kernel: grid = (batch, block); all weights streamed per block.
# -----------------------------------------------------------------------------
def sspn_kernel(x_ref,
                spa_w1, spa_b1, spa_w2, spa_b2,
                spc_w1, spc_b1, spc_w2, spc_b2,
                ca_w1, ca_b1, ca_w2, ca_b2,
                o_ref,
                cur_f32, pad_bf,
                *, H, W, res_scale):
    blk = pl.program_id(1)
    Wp = W + 2
    S = Wp + 1                      # padded flat index of interior pixel (0, 0)
    L = (H - 1) * Wp + W            # computed rows: cover every interior pixel
    HW = H * W
    offs = [sh * Wp + sw for sh in (-1, 0, 1) for sw in (-1, 0, 1)]

    # Interior (non-pad-column) mask over the L computed rows.
    p_col = (jax.lax.broadcasted_iota(jnp.int32, (L, 1), 0) + S) % Wp
    interior = (p_col >= 1) & (p_col <= W)                       # (L, 1) bool

    # ---- blk == 0: load this image into the working buffers (in-kernel pad) --
    @pl.when(blk == 0)
    def _init():
        cur_f32[...] = jnp.zeros_like(cur_f32)
        pad_bf[...] = jnp.zeros_like(pad_bf)
        for h in range(H):
            row = x_ref[0, pl.ds(h * W, W), :].astype(jnp.float32)
            cur_f32[pl.ds(h * Wp, W), :] = row
            pad_bf[pl.ds(S + h * Wp, W), :] = row.astype(jnp.bfloat16)

    def conv3x3(w_ref, b_ref):
        # 9 accumulating MXU matmuls; each tap is a static row-slice of the
        # bf16 padded mirror (no concat, no im2col transient).
        acc = jnp.dot(pad_bf[pl.ds(S + offs[0], L), :], w_ref[0, 0],
                      preferred_element_type=jnp.float32)
        for t in range(1, 9):
            acc = acc + jnp.dot(pad_bf[pl.ds(S + offs[t], L), :], w_ref[0, t],
                                preferred_element_type=jnp.float32)
        return acc + b_ref[0]

    # ---- SpatialResBlock: x + res_scale * conv3x3(ReLU(conv3x3(x))) ----------
    t1 = conv3x3(spa_w1, spa_b1)
    # Fused ReLU + pad-column re-zeroing; the mirror's old contents are no
    # longer needed once t1 has been accumulated, so overwrite it in place.
    pad_bf[pl.ds(S, L), :] = jnp.where(interior & (t1 > 0.0), t1,
                                       0.0).astype(jnp.bfloat16)
    t2 = conv3x3(spa_w2, spa_b2)            # res_scale pre-folded into w2 / b2
    cur = cur_f32[...] + jnp.where(interior, t2, 0.0)
    cur_f32[...] = cur

    # ---- SpectralAttentionResBlock: x + res_scale * CA(1x1(ReLU(1x1(x)))) ----
    cb = cur.astype(jnp.bfloat16)
    u = jnp.dot(cb, spc_w1[0], preferred_element_type=jnp.float32) + spc_b1[0]
    u = jnp.maximum(u, 0.0)
    u = jnp.dot(u.astype(jnp.bfloat16), spc_w2[0],
                preferred_element_type=jnp.float32) + spc_b2[0]
    u = jnp.where(interior, u, 0.0)         # makes the global avg pool exact
    m = jnp.sum(u, axis=0, keepdims=True) * (1.0 / HW)           # (1, Cp)
    h1 = jnp.maximum(
        jnp.dot(m.astype(jnp.bfloat16), ca_w1[0],
                preferred_element_type=jnp.float32) + ca_b1[0], 0.0)
    att = jax.nn.sigmoid(
        jnp.dot(h1.astype(jnp.bfloat16), ca_w2[0],
                preferred_element_type=jnp.float32) + ca_b2[0])
    new = cur_f32[...] + res_scale * (u * att)
    cur_f32[...] = new
    pad_bf[pl.ds(S, L), :] = new.astype(jnp.bfloat16)    # mirror for next block

    # ---- last block: SSPN outer residual + spatially unpadded output ---------
    @pl.when(blk == pl.num_programs(1) - 1)
    def _finalize():
        for h in range(H):
            o_ref[0, pl.ds(h * W, W), :] = (
                cur_f32[pl.ds(h * Wp, W), :]
                + x_ref[0, pl.ds(h * W, W), :].astype(jnp.float32)
            ).astype(o_ref.dtype)


# -----------------------------------------------------------------------------
# Wrapper: channel padding, per-tap weight layout, pallas_call
# -----------------------------------------------------------------------------
def sspn_forward(x_nhwc, params, res_scale=0.1):
    N, H, W, C = x_nhwc.shape
    n_blocks = params["spa_w1"].shape[0]
    Cr = params["ca_w1"].shape[-1]
    Cp = _round_up(C, LANE)
    Crp = _round_up(Cr, LANE)
    Wp = W + 2
    P = (H + 2) * Wp
    L = (H - 1) * Wp + W
    HW = H * W

    def pad_last(a, t):
        return jnp.pad(a, [(0, 0)] * (a.ndim - 1) + [(0, t - a.shape[-1])])

    def pad_last2(a, t0, t1):
        return jnp.pad(a, [(0, 0)] * (a.ndim - 2)
                       + [(0, t0 - a.shape[-2]), (0, t1 - a.shape[-1])])

    bf16 = jnp.bfloat16
    # 3x3 conv weights -> per-tap (Cp, Cp) bf16 slabs; res_scale folded into the
    # (linear) second spatial conv so the kernel skips that elementwise multiply.
    spa_w1 = pad_last2(params["spa_w1"], Cp, Cp).reshape(n_blocks, 9, Cp, Cp).astype(bf16)
    spa_w2 = (pad_last2(params["spa_w2"], Cp, Cp) * res_scale
              ).reshape(n_blocks, 9, Cp, Cp).astype(bf16)
    spa_b1 = pad_last(params["spa_b1"], Cp)
    spa_b2 = pad_last(params["spa_b2"], Cp) * res_scale
    spc_w1 = pad_last2(params["spc_w1"], Cp, Cp).astype(bf16)
    spc_w2 = pad_last2(params["spc_w2"], Cp, Cp).astype(bf16)
    spc_b1 = pad_last(params["spc_b1"], Cp)
    spc_b2 = pad_last(params["spc_b2"], Cp)
    ca_w1 = pad_last2(params["ca_w1"], Cp, Crp).astype(bf16)
    ca_b1 = pad_last(params["ca_b1"], Crp)
    ca_w2 = pad_last2(params["ca_w2"], Crp, Cp).astype(bf16)
    ca_b2 = pad_last(params["ca_b2"], Cp)

    weights = [spa_w1, spa_b1, spa_w2, spa_b2,
               spc_w1, spc_b1, spc_w2, spc_b2,
               ca_w1, ca_b1, ca_w2, ca_b2]

    # Lane-dense channels, NO spatial padding in HBM (padding is in-kernel).
    # TODO(synk): for very small C (Cp >> C) the channel pad/slice passes could
    # also move in-kernel by using C-wide HBM blocks (masked stores).
    xp = pad_last(x_nhwc, Cp).reshape(N, HW, Cp)

    kernel = functools.partial(sspn_kernel, H=H, W=W, res_scale=res_scale)

    # Weight BlockSpecs: indexed by the block axis so Pallas streams (and
    # double-buffers) one SSB's weights at a time instead of all n_blocks.
    def blk_spec(a):
        shape = (1,) + a.shape[1:]
        nd = len(shape)
        return pl.BlockSpec(shape, lambda n, b, _nd=nd: (b,) + (0,) * (_nd - 1))

    in_specs = ([pl.BlockSpec((1, HW, Cp), lambda n, b: (n, 0, 0))]
                + [blk_spec(w) for w in weights])
    out_spec = pl.BlockSpec((1, HW, Cp), lambda n, b: (n, 0, 0))

    # Resident-VMEM estimate -> explicit scoped-VMEM limit (v7x: 64 MiB physical).
    per_block_w = sum(int(math.prod(w.shape[1:])) * w.dtype.itemsize for w in weights)
    resident = (L * Cp * 4 + P * Cp * 2            # scratch buffers
                + 2 * 2 * HW * Cp * 4              # double-buffered x / out blocks
                + 2 * per_block_w)                 # double-buffered block weights
    vmem_limit = int(min(max(2 * resident, 32 * 1024 * 1024), 64 * 1024 * 1024))

    dot_flops = 2 * L * Cp * (20 * Cp) + 4 * Cp * Crp
    weight_bytes = sum(int(math.prod(w.shape)) * w.dtype.itemsize for w in weights)
    cost = pl.CostEstimate(
        flops=int(N * n_blocks * dot_flops),
        transcendentals=int(N * n_blocks * Cp),
        bytes_accessed=int(2 * N * HW * Cp * xp.dtype.itemsize + N * weight_bytes))

    out = pl.pallas_call(
        kernel,
        out_shape=jax.ShapeDtypeStruct((N, HW, Cp), x_nhwc.dtype),
        grid=(N, n_blocks),
        in_specs=in_specs,
        out_specs=out_spec,
        scratch_shapes=[pltpu.VMEM((L, Cp), jnp.float32),     # f32 residual stream
                        pltpu.VMEM((P, Cp), jnp.bfloat16)],   # padded bf16 mirror
        compiler_params=pltpu.CompilerParams(
            dimension_semantics=("parallel", "arbitrary"),
            vmem_limit_bytes=vmem_limit),
        cost_estimate=cost,
    )(xp, *weights)

    # TODO(synk): for N=1 workloads on v7x add a row-tile parallel axis (1-row
    # halo); the CA global average pool then needs a cross-core reduction.
    return out.reshape(N, H, W, Cp)[..., :C]


# -----------------------------------------------------------------------------
# Deterministic parameter init (shapes per module __init__; HWIO conv weights)
# -----------------------------------------------------------------------------
def init_params(key, in_feats, n_blocks, reduction=16, scale=0.05):
    C = in_feats
    Cr = max(C // reduction, 1)
    ks = jax.random.split(key, 12)
    n = lambda k, shp: (jax.random.normal(k, shp, jnp.float32) * scale)
    return {
        "spa_w1": n(ks[0], (n_blocks, 3, 3, C, C)),
        "spa_b1": n(ks[1], (n_blocks, 1, C)),
        "spa_w2": n(ks[2], (n_blocks, 3, 3, C, C)),
        "spa_b2": n(ks[3], (n_blocks, 1, C)),
        "spc_w1": n(ks[4], (n_blocks, C, C)),
        "spc_b1": n(ks[5], (n_blocks, 1, C)),
        "spc_w2": n(ks[6], (n_blocks, C, C)),
        "spc_b2": n(ks[7], (n_blocks, 1, C)),
        "ca_w1":  n(ks[8], (n_blocks, C, Cr)),
        "ca_b1":  n(ks[9], (n_blocks, 1, Cr)),
        "ca_w2":  n(ks[10], (n_blocks, Cr, C)),
        "ca_b2":  n(ks[11], (n_blocks, 1, C)),
    }


# -----------------------------------------------------------------------------
# Pure-JAX f32 reference (same math, lax conv / einsum) for validation
# -----------------------------------------------------------------------------
def sspn_reference(x, p, res_scale):
    hi = jax.lax.Precision.HIGHEST

    def conv3(inp, w, b):
        y = jax.lax.conv_general_dilated(
            inp, w, window_strides=(1, 1), padding=((1, 1), (1, 1)),
            dimension_numbers=("NHWC", "HWIO", "NHWC"), precision=hi)
        return y + b

    cur = x
    nb = p["spa_w1"].shape[0]
    for blk in range(nb):
        t = conv3(cur, p["spa_w1"][blk], p["spa_b1"][blk, 0])
        t = jnp.maximum(t, 0.0)
        t = conv3(t, p["spa_w2"][blk], p["spa_b2"][blk, 0])
        cur = cur + res_scale * t

        t = jnp.einsum("nhwc,cd->nhwd", cur, p["spc_w1"][blk], precision=hi) + p["spc_b1"][blk, 0]
        t = jnp.maximum(t, 0.0)
        t = jnp.einsum("nhwc,cd->nhwd", t, p["spc_w2"][blk], precision=hi) + p["spc_b2"][blk, 0]
        y = jnp.mean(t, axis=(1, 2), keepdims=True)
        y = jnp.maximum(
            jnp.einsum("nhwc,cd->nhwd", y, p["ca_w1"][blk], precision=hi) + p["ca_b1"][blk, 0], 0.0)
        y = jax.nn.sigmoid(
            jnp.einsum("nhwc,cd->nhwd", y, p["ca_w2"][blk], precision=hi) + p["ca_b2"][blk, 0])
        t = t * y
        cur = cur + res_scale * t
    return cur + x


if __name__ == "__main__":
    key = jax.random.PRNGKey(0)
    N, C, H, W = 2, 32, 16, 16          # in_feats = 32 (so CALayer reduction=16 is valid)
    n_blocks = 2
    res_scale = 0.1

    kx, kp = jax.random.split(key)
    x_nchw = jax.random.normal(kx, (N, C, H, W), jnp.float32)   # PyTorch-style input
    x_nhwc = jnp.transpose(x_nchw, (0, 2, 3, 1))                # kernel layout
    params = init_params(kp, C, n_blocks)

    out = sspn_forward(x_nhwc, params, res_scale)
    out = jax.block_until_ready(out)

    ref = sspn_reference(x_nhwc, params, res_scale)
    assert out.shape == x_nhwc.shape
    err = float(jnp.max(jnp.abs(out - ref)))
    # bf16 MXU operands (f32 accumulation): tolerance relaxed to 2e-2.
    assert err < 2e-2, f"max abs error vs reference: {err}"

    print("KERNEL_OK")
</pallas_src>

<mosaic_0001>
module attributes {stable_mosaic.version = 11 : i64} {
  func.func @sspn_kernel(%arg0: i32, %arg1: i32, %arg2: memref<1x256x128xf32, #tpu.memory_space<vmem>>, %arg3: memref<1x9x128x128xbf16, #tpu.memory_space<vmem>>, %arg4: memref<1x1x128xf32, #tpu.memory_space<vmem>>, %arg5: memref<1x9x128x128xbf16, #tpu.memory_space<vmem>>, %arg6: memref<1x1x128xf32, #tpu.memory_space<vmem>>, %arg7: memref<1x128x128xbf16, #tpu.memory_space<vmem>>, %arg8: memref<1x1x128xf32, #tpu.memory_space<vmem>>, %arg9: memref<1x128x128xbf16, #tpu.memory_space<vmem>>, %arg10: memref<1x1x128xf32, #tpu.memory_space<vmem>>, %arg11: memref<1x128x128xbf16, #tpu.memory_space<vmem>>, %arg12: memref<1x1x128xf32, #tpu.memory_space<vmem>>, %arg13: memref<1x128x128xbf16, #tpu.memory_space<vmem>>, %arg14: memref<1x1x128xf32, #tpu.memory_space<vmem>>, %arg15: memref<1x256x128xf32, #tpu.memory_space<vmem>>, %arg16: memref<286x128xf32, #tpu.memory_space<vmem>>, %arg17: memref<324x128xbf16, #tpu.memory_space<vmem>>) attributes {dimension_semantics = [#tpu.dimension_semantics<parallel>, #tpu.dimension_semantics<arbitrary>], iteration_bounds = array<i64: 2, 2>, scalar_prefetch = 0 : i64, scratch_operands = 2 : i64, tpu.core_type = #tpu.core_type<tc>, window_params = [{transform_indices = @transform_0, window_bounds = array<i64: 1, 256, 128>}, {transform_indices = @transform_1, window_bounds = array<i64: 1, 9, 128, 128>}, {transform_indices = @transform_2, window_bounds = array<i64: 1, 1, 128>}, {transform_indices = @transform_3, window_bounds = array<i64: 1, 9, 128, 128>}, {transform_indices = @transform_4, window_bounds = array<i64: 1, 1, 128>}, {transform_indices = @transform_5, window_bounds = array<i64: 1, 128, 128>}, {transform_indices = @transform_6, window_bounds = array<i64: 1, 1, 128>}, {transform_indices = @transform_7, window_bounds = array<i64: 1, 128, 128>}, {transform_indices = @transform_8, window_bounds = array<i64: 1, 1, 128>}, {transform_indices = @transform_9, window_bounds = array<i64: 1, 128, 128>}, {transform_indices = @transform_10, window_bounds = array<i64: 1, 1, 128>}, {transform_indices = @transform_11, window_bounds = array<i64: 1, 128, 128>}, {transform_indices = @transform_12, window_bounds = array<i64: 1, 1, 128>}, {transform_indices = @transform_13, window_bounds = array<i64: 1, 256, 128>}]} {
    %0 = tpu.iota {dimensions = array<i32: 0>} : vector<286x1xi32>
    %c19_i32 = arith.constant 19 : i32
    %1 = vector.broadcast %c19_i32 : i32 to vector<286x1xi32>
    %2 = arith.addi %0, %1 : vector<286x1xi32>
    %c18_i32 = arith.constant 18 : i32
    %c0_i32 = arith.constant 0 : i32
    %3 = arith.cmpi eq, %c18_i32, %c0_i32 : i32
    %c1_i32 = arith.constant 1 : i32
    %4 = arith.select %3, %c1_i32, %c18_i32 : i32
    %5 = vector.broadcast %4 : i32 to vector<286x1xi32>
    %6 = arith.remsi %2, %5 : vector<286x1xi32>
    %c0_i32_0 = arith.constant 0 : i32
    %7 = vector.broadcast %c0_i32_0 : i32 to vector<286x1xi32>
    %8 = arith.cmpi ne, %6, %7 : vector<286x1xi32>
    %c0_i32_1 = arith.constant 0 : i32
    %9 = vector.broadcast %c0_i32_1 : i32 to vector<286x1xi32>
    %10 = arith.cmpi slt, %6, %9 : vector<286x1xi32>
    %c0_i32_2 = arith.constant 0 : i32
    %11 = arith.cmpi slt, %4, %c0_i32_2 : i32
    %12 = vector.broadcast %11 : i1 to vector<286x1xi1>
    %13 = vector.broadcast %12 : vector<286x1xi1> to vector<286x1xi1>
    %14 = arith.xori %10, %13 : vector<286x1xi1>
    %15 = arith.andi %14, %8 : vector<286x1xi1>
    %16 = vector.broadcast %4 : i32 to vector<286x1xi32>
    %17 = arith.addi %6, %16 : vector<286x1xi32>
    %18 = arith.select %15, %17, %6 : vector<286x1xi1>, vector<286x1xi32>
    %c1_i32_3 = arith.constant 1 : i32
    %19 = vector.broadcast %c1_i32_3 : i32 to vector<286x1xi32>
    %20 = arith.cmpi sge, %18, %19 : vector<286x1xi32>
    %c16_i32 = arith.constant 16 : i32
    %21 = vector.broadcast %c16_i32 : i32 to vector<286x1xi32>
    %22 = arith.cmpi sle, %18, %21 : vector<286x1xi32>
    %23 = arith.andi %20, %22 : vector<286x1xi1>
    %c0_i32_4 = arith.constant 0 : i32
    %24 = arith.cmpi eq, %arg1, %c0_i32_4 : i32
    %25 = arith.extui %24 : i1 to i32
    %c0_i32_5 = arith.constant 0 : i32
    %26 = arith.cmpi ne, %25, %c0_i32_5 : i32
    scf.if %26 {
      %cst_174 = arith.constant 0.000000e+00 : f32
      %197 = vector.broadcast %cst_174 : f32 to vector<286x128xf32>
      %c0_175 = arith.constant 0 : index
      %c0_176 = arith.constant 0 : index
      %198 = vector.load %arg16[%c0_175, %c0_176] : memref<286x128xf32, #tpu.memory_space<vmem>>, vector<286x128xf32>
      tpu.vector_store %arg16[%c0_175, %c0_176], %197 {strides = array<i32>} : memref<286x128xf32, #tpu.memory_space<vmem>>, vector<286x128xf32>,
      %cst_177 = arith.constant 0.000000e+00 : bf16
      %199 = vector.broadcast %cst_177 : bf16 to vector<324x128xbf16>
      %c0_178 = arith.constant 0 : index
      %c0_179 = arith.constant 0 : index
      %200 = vector.load %arg17[%c0_178, %c0_179] : memref<324x128xbf16, #tpu.memory_space<vmem>>, vector<324x128xbf16>
      tpu.vector_store %arg17[%c0_178, %c0_179], %199 {strides = array<i32>} : memref<324x128xbf16, #tpu.memory_space<vmem>>, vector<324x128xbf16>,
      %c0_180 = arith.constant 0 : index
      %c0_181 = arith.constant 0 : index
      %c0_182 = arith.constant 0 : index
      %201 = vector.load %arg2[%c0_180, %c0_181, %c0_182] : memref<1x256x128xf32, #tpu.memory_space<vmem>>, vector<1x16x128xf32>
      %202 = vector.shape_cast %201 : vector<1x16x128xf32> to vector<16x128xf32>
      %c0_183 = arith.constant 0 : index
      %c0_184 = arith.constant 0 : index
      %203 = vector.load %arg16[%c0_183, %c0_184] : memref<286x128xf32, #tpu.memory_space<vmem>>, vector<16x128xf32>
      tpu.vector_store %arg16[%c0_183, %c0_184], %202 {strides = array<i32>} : memref<286x128xf32, #tpu.memory_space<vmem>>, vector<16x128xf32>,
      %204 = arith.truncf %202 : vector<16x128xf32> to vector<16x128xbf16>
      %c19_185 = arith.constant 19 : index
      %c0_186 = arith.constant 0 : index
      %205 = vector.load %arg17[%c19_185, %c0_186] : memref<324x128xbf16, #tpu.memory_space<vmem>>, vector<16x128xbf16>
      tpu.vector_store %arg17[%c19_185, %c0_186], %204 {strides = array<i32>} : memref<324x128xbf16, #tpu.memory_space<vmem>>, vector<16x128xbf16>,
      %c0_187 = arith.constant 0 : index
      %c16 = arith.constant 16 : index
      %c0_188 = arith.constant 0 : index
      %206 = vector.load %arg2[%c0_187, %c16, %c0_188] : memref<1x256x128xf32, #tpu.memory_space<vmem>>, vector<1x16x128xf32>
      %207 = vector.shape_cast %206 : vector<1x16x128xf32> to vector<16x128xf32>
      %c18_189 = arith.constant 18 : index
      %c0_190 = arith.constant 0 : index
      %208 = vector.load %arg16[%c18_189, %c0_190] : memref<286x128xf32, #tpu.memory_space<vmem>>, vector<16x128xf32>
      tpu.vector_store %arg16[%c18_189, %c0_190], %207 {strides = array<i32>} : memref<286x128xf32, #tpu.memory_space<vmem>>, vector<16x128xf32>,
      %209 = arith.truncf %207 : vector<16x128xf32> to vector<16x128xbf16>
      %c37_191 = arith.constant 37 : index
      %c0_192 = arith.constant 0 : index
      %210 = vector.load %arg17[%c37_191, %c0_192] : memref<324x128xbf16, #tpu.memory_space<vmem>>, vector<16x128xbf16>
      tpu.vector_store %arg17[%c37_191, %c0_192], %209 {strides = array<i32>} : memref<324x128xbf16, #tpu.memory_space<vmem>>, vector<16x128xbf16>,
      %c0_193 = arith.constant 0 : index
      %c32 = arith.constant 32 : index
      %c0_194 = arith.constant 0 : index
      %211 = vector.load %arg2[%c0_193, %c32, %c0_194] : memref<1x256x128xf32, #tpu.memory_space<vmem>>, vector<1x16x128xf32>
      %212 = vector.shape_cast %211 : vector<1x16x128xf32> to vector<16x128xf32>
      %c36_195 = arith.constant 36 : index
      %c0_196 = arith.constant 0 : index
      %213 = vector.load %arg16[%c36_195, %c0_196] : memref<286x128xf32, #tpu.memory_space<vmem>>, vector<16x128xf32>
      tpu.vector_store %arg16[%c36_195, %c0_196], %212 {strides = array<i32>} : memref<286x128xf32, #tpu.memory_space<vmem>>, vector<16x128xf32>,
      %214 = arith.truncf %212 : vector<16x128xf32> to vector<16x128xbf16>
      %c55 = arith.constant 55 : index
      %c0_197 = arith.constant 0 : index
      %215 = vector.load %arg17[%c55, %c0_197] : memref<324x128xbf16, #tpu.memory_space<vmem>>, vector<16x128xbf16>
      tpu.vector_store %arg17[%c55, %c0_197], %214 {strides = array<i32>} : memref<324x128xbf16, #tpu.memory_space<vmem>>, vector<16x128xbf16>,
      %c0_198 = arith.constant 0 : index
      %c48 = arith.constant 48 : index
      %c0_199 = arith.constant 0 : index
      %216 = vector.load %arg2[%c0_198, %c48, %c0_199] : memref<1x256x128xf32, #tpu.memory_space<vmem>>, vector<1x16x128xf32>
      %217 = vector.shape_cast %216 : vector<1x16x128xf32> to vector<16x128xf32>
      %c54 = arith.constant 54 : index
      %c0_200 = arith.constant 0 : index
      %218 = vector.load %arg16[%c54, %c0_200] : memref<286x128xf32, #tpu.memory_space<vmem>>, vector<16x128xf32>
      tpu.vector_store %arg16[%c54, %c0_200], %217 {strides = array<i32>} : memref<286x128xf32, #tpu.memory_space<vmem>>, vector<16x128xf32>,
      %219 = arith.truncf %217 : vector<16x128xf32> to vector<16x128xbf16>
      %c73 = arith.constant 73 : index
      %c0_201 = arith.constant 0 : index
      %220 = vector.load %arg17[%c73, %c0_201] : memref<324x128xbf16, #tpu.memory_space<vmem>>, vector<16x128xbf16>
      tpu.vector_store %arg17[%c73, %c0_201], %219 {strides = array<i32>} : memref<324x128xbf16, #tpu.memory_space<vmem>>, vector<16x128xbf16>,
      %c0_202 = arith.constant 0 : index
      %c64 = arith.constant 64 : index
      %c0_203 = arith.constant 0 : index
      %221 = vector.load %arg2[%c0_202, %c64, %c0_203] : memref<1x256x128xf32, #tpu.memory_space<vmem>>, vector<1x16x128xf32>
      %222 = vector.shape_cast %221 : vector<1x16x128xf32> to vector<16x128xf32>
      %c72 = arith.constant 72 : index
      %c0_204 = arith.constant 0 : index
      %223 = vector.load %arg16[%c72, %c0_204] : memref<286x128xf32, #tpu.memory_space<vmem>>, vector<16x128xf32>
      tpu.vector_store %arg16[%c72, %c0_204], %222 {strides = array<i32>} : memref<286x128xf32, #tpu.memory_space<vmem>>, vector<16x128xf32>,
      %224 = arith.truncf %222 : vector<16x128xf32> to vector<16x128xbf16>
      %c91 = arith.constant 91 : index
      %c0_205 = arith.constant 0 : index
      %225 = vector.load %arg17[%c91, %c0_205] : memref<324x128xbf16, #tpu.memory_space<vmem>>, vector<16x128xbf16>
      tpu.vector_store %arg17[%c91, %c0_205], %224 {strides = array<i32>} : memref<324x128xbf16, #tpu.memory_space<vmem>>, vector<16x128xbf16>,
      %c0_206 = arith.constant 0 : index
      %c80 = arith.constant 80 : index
      %c0_207 = arith.constant 0 : index
      %226 = vector.load %arg2[%c0_206, %c80, %c0_207] : memref<1x256x128xf32, #tpu.memory_space<vmem>>, vector<1x16x128xf32>
      %227 = vector.shape_cast %226 : vector<1x16x128xf32> to vector<16x128xf32>
      %c90 = arith.constant 90 : index
      %c0_208 = arith.constant 0 : index
      %228 = vector.load %arg16[%c90, %c0_208] : memref<286x128xf32, #tpu.memory_space<vmem>>, vector<16x128xf32>
      tpu.vector_store %arg16[%c90, %c0_208], %227 {strides = array<i32>} : memref<286x128xf32, #tpu.memory_space<vmem>>, vector<16x128xf32>,
      %229 = arith.truncf %227 : vector<16x128xf32> to vector<16x128xbf16>
      %c109 = arith.constant 109 : index
      %c0_209 = arith.constant 0 : index
      %230 = vector.load %arg17[%c109, %c0_209] : memref<324x128xbf16, #tpu.memory_space<vmem>>, vector<16x128xbf16>
      tpu.vector_store %arg17[%c109, %c0_209], %229 {strides = array<i32>} : memref<324x128xbf16, #tpu.memory_space<vmem>>, vector<16x128xbf16>,
      %c0_210 = arith.constant 0 : index
      %c96 = arith.constant 96 : index
      %c0_211 = arith.constant 0 : index
      %231 = vector.load %arg2[%c0_210, %c96, %c0_211] : memref<1x256x128xf32, #tpu.memory_space<vmem>>, vector<1x16x128xf32>
      %232 = vector.shape_cast %231 : vector<1x16x128xf32> to vector<16x128xf32>
      %c108 = arith.constant 108 : index
      %c0_212 = arith.constant 0 : index
      %233 = vector.load %arg16[%c108, %c0_212] : memref<286x128xf32, #tpu.memory_space<vmem>>, vector<16x128xf32>
      tpu.vector_store %arg16[%c108, %c0_212], %232 {strides = array<i32>} : memref<286x128xf32, #tpu.memory_space<vmem>>, vector<16x128xf32>,
      %234 = arith.truncf %232 : vector<16x128xf32> to vector<16x128xbf16>
      %c127 = arith.constant 127 : index
      %c0_213 = arith.constant 0 : index
      %235 = vector.load %arg17[%c127, %c0_213] : memref<324x128xbf16, #tpu.memory_space<vmem>>, vector<16x128xbf16>
      tpu.vector_store %arg17[%c127, %c0_213], %234 {strides = array<i32>} : memref<324x128xbf16, #tpu.memory_space<vmem>>, vector<16x128xbf16>,
      %c0_214 = arith.constant 0 : index
      %c112 = arith.constant 112 : index
      %c0_215 = arith.constant 0 : index
      %236 = vector.load %arg2[%c0_214, %c112, %c0_215] : memref<1x256x128xf32, #tpu.memory_space<vmem>>, vector<1x16x128xf32>
      %237 = vector.shape_cast %236 : vector<1x16x128xf32> to vector<16x128xf32>
      %c126 = arith.constant 126 : index
      %c0_216 = arith.constant 0 : index
      %238 = vector.load %arg16[%c126, %c0_216] : memref<286x128xf32, #tpu.memory_space<vmem>>, vector<16x128xf32>
      tpu.vector_store %arg16[%c126, %c0_216], %237 {strides = array<i32>} : memref<286x128xf32, #tpu.memory_space<vmem>>, vector<16x128xf32>,
      %239 = arith.truncf %237 : vector<16x128xf32> to vector<16x128xbf16>
      %c145 = arith.constant 145 : index
      %c0_217 = arith.constant 0 : index
      %240 = vector.load %arg17[%c145, %c0_217] : memref<324x128xbf16, #tpu.memory_space<vmem>>, vector<16x128xbf16>
      tpu.vector_store %arg17[%c145, %c0_217], %239 {strides = array<i32>} : memref<324x128xbf16, #tpu.memory_space<vmem>>, vector<16x128xbf16>,
      %c0_218 = arith.constant 0 : index
      %c128 = arith.constant 128 : index
      %c0_219 = arith.constant 0 : index
      %241 = vector.load %arg2[%c0_218, %c128, %c0_219] : memref<1x256x128xf32, #tpu.memory_space<vmem>>, vector<1x16x128xf32>
      %242 = vector.shape_cast %241 : vector<1x16x128xf32> to vector<16x128xf32>
      %c144 = arith.constant 144 : index
      %c0_220 = arith.constant 0 : index
      %243 = vector.load %arg16[%c144, %c0_220] : memref<286x128xf32, #tpu.memory_space<vmem>>, vector<16x128xf32>
      tpu.vector_store %arg16[%c144, %c0_220], %242 {strides = array<i32>} : memref<286x128xf32, #tpu.memory_space<vmem>>, vector<16x128xf32>,
      %244 = arith.truncf %242 : vector<16x128xf32> to vector<16x128xbf16>
      %c163 = arith.constant 163 : index
      %c0_221 = arith.constant 0 : index
      %245 = vector.load %arg17[%c163, %c0_221] : memref<324x128xbf16, #tpu.memory_space<vmem>>, vector<16x128xbf16>
      tpu.vector_store %arg17[%c163, %c0_221], %244 {strides = array<i32>} : memref<324x128xbf16, #tpu.memory_space<vmem>>, vector<16x128xbf16>,
      %c0_222 = arith.constant 0 : index
      %c144_223 = arith.constant 144 : index
      %c0_224 = arith.constant 0 : index
      %246 = vector.load %arg2[%c0_222, %c144_223, %c0_224] : memref<1x256x128xf32, #tpu.memory_space<vmem>>, vector<1x16x128xf32>
      %247 = vector.shape_cast %246 : vector<1x16x128xf32> to vector<16x128xf32>
      %c162 = arith.constant 162 : index
      %c0_225 = arith.constant 0 : index
      %248 = vector.load %arg16[%c162, %c0_225] : memref<286x128xf32, #tpu.memory_space<vmem>>, vector<16x128xf32>
      tpu.vector_store %arg16[%c162, %c0_225], %247 {strides = array<i32>} : memref<286x128xf32, #tpu.memory_space<vmem>>, vector<16x128xf32>,
      %249 = arith.truncf %247 : vector<16x128xf32> to vector<16x128xbf16>
      %c181 = arith.constant 181 : index
      %c0_226 = arith.constant 0 : index
      %250 = vector.load %arg17[%c181, %c0_226] : memref<324x128xbf16, #tpu.memory_space<vmem>>, vector<16x128xbf16>
      tpu.vector_store %arg17[%c181, %c0_226], %249 {strides = array<i32>} : memref<324x128xbf16, #tpu.memory_space<vmem>>, vector<16x128xbf16>,
      %c0_227 = arith.constant 0 : index
      %c160 = arith.constant 160 : index
      %c0_228 = arith.constant 0 : index
      %251 = vector.load %arg2[%c0_227, %c160, %c0_228] : memref<1x256x128xf32, #tpu.memory_space<vmem>>, vector<1x16x128xf32>
      %252 = vector.shape_cast %251 : vector<1x16x128xf32> to vector<16x128xf32>
      %c180 = arith.constant 180 : index
      %c0_229 = arith.constant 0 : index
      %253 = vector.load %arg16[%c180, %c0_229] : memref<286x128xf32, #tpu.memory_space<vmem>>, vector<16x128xf32>
      tpu.vector_store %arg16[%c180, %c0_229], %252 {strides = array<i32>} : memref<286x128xf32, #tpu.memory_space<vmem>>, vector<16x128xf32>,
      %254 = arith.truncf %252 : vector<16x128xf32> to vector<16x128xbf16>
      %c199 = arith.constant 199 : index
      %c0_230 = arith.constant 0 : index
      %255 = vector.load %arg17[%c199, %c0_230] : memref<324x128xbf16, #tpu.memory_space<vmem>>, vector<16x128xbf16>
      tpu.vector_store %arg17[%c199, %c0_230], %254 {strides = array<i32>} : memref<324x128xbf16, #tpu.memory_space<vmem>>, vector<16x128xbf16>,
      %c0_231 = arith.constant 0 : index
      %c176 = arith.constant 176 : index
      %c0_232 = arith.constant 0 : index
      %256 = vector.load %arg2[%c0_231, %c176, %c0_232] : memref<1x256x128xf32, #tpu.memory_space<vmem>>, vector<1x16x128xf32>
      %257 = vector.shape_cast %256 : vector<1x16x128xf32> to vector<16x128xf32>
      %c198 = arith.constant 198 : index
      %c0_233 = arith.constant 0 : index
      %258 = vector.load %arg16[%c198, %c0_233] : memref<286x128xf32, #tpu.memory_space<vmem>>, vector<16x128xf32>
      tpu.vector_store %arg16[%c198, %c0_233], %257 {strides = array<i32>} : memref<286x128xf32, #tpu.memory_space<vmem>>, vector<16x128xf32>,
      %259 = arith.truncf %257 : vector<16x128xf32> to vector<16x128xbf16>
      %c217 = arith.constant 217 : index
      %c0_234 = arith.constant 0 : index
      %260 = vector.load %arg17[%c217, %c0_234] : memref<324x128xbf16, #tpu.memory_space<vmem>>, vector<16x128xbf16>
      tpu.vector_store %arg17[%c217, %c0_234], %259 {strides = array<i32>} : memref<324x128xbf16, #tpu.memory_space<vmem>>, vector<16x128xbf16>,
      %c0_235 = arith.constant 0 : index
      %c192 = arith.constant 192 : index
      %c0_236 = arith.constant 0 : index
      %261 = vector.load %arg2[%c0_235, %c192, %c0_236] : memref<1x256x128xf32, #tpu.memory_space<vmem>>, vector<1x16x128xf32>
      %262 = vector.shape_cast %261 : vector<1x16x128xf32> to vector<16x128xf32>
      %c216 = arith.constant 216 : index
      %c0_237 = arith.constant 0 : index
      %263 = vector.load %arg16[%c216, %c0_237] : memref<286x128xf32, #tpu.memory_space<vmem>>, vector<16x128xf32>
      tpu.vector_store %arg16[%c216, %c0_237], %262 {strides = array<i32>} : memref<286x128xf32, #tpu.memory_space<vmem>>, vector<16x128xf32>,
      %264 = arith.truncf %262 : vector<16x128xf32> to vector<16x128xbf16>
      %c235 = arith.constant 235 : index
      %c0_238 = arith.constant 0 : index
      %265 = vector.load %arg17[%c235, %c0_238] : memref<324x128xbf16, #tpu.memory_space<vmem>>, vector<16x128xbf16>
      tpu.vector_store %arg17[%c235, %c0_238], %264 {strides = array<i32>} : memref<324x128xbf16, #tpu.memory_space<vmem>>, vector<16x128xbf16>,
      %c0_239 = arith.constant 0 : index
      %c208 = arith.constant 208 : index
      %c0_240 = arith.constant 0 : index
      %266 = vector.load %arg2[%c0_239, %c208, %c0_240] : memref<1x256x128xf32, #tpu.memory_space<vmem>>, vector<1x16x128xf32>
      %267 = vector.shape_cast %266 : vector<1x16x128xf32> to vector<16x128xf32>
      %c234 = arith.constant 234 : index
      %c0_241 = arith.constant 0 : index
      %268 = vector.load %arg16[%c234, %c0_241] : memref<286x128xf32, #tpu.memory_space<vmem>>, vector<16x128xf32>
      tpu.vector_store %arg16[%c234, %c0_241], %267 {strides = array<i32>} : memref<286x128xf32, #tpu.memory_space<vmem>>, vector<16x128xf32>,
      %269 = arith.truncf %267 : vector<16x128xf32> to vector<16x128xbf16>
      %c253 = arith.constant 253 : index
      %c0_242 = arith.constant 0 : index
      %270 = vector.load %arg17[%c253, %c0_242] : memref<324x128xbf16, #tpu.memory_space<vmem>>, vector<16x128xbf16>
      tpu.vector_store %arg17[%c253, %c0_242], %269 {strides = array<i32>} : memref<324x128xbf16, #tpu.memory_space<vmem>>, vector<16x128xbf16>,
      %c0_243 = arith.constant 0 : index
      %c224 = arith.constant 224 : index
      %c0_244 = arith.constant 0 : index
      %271 = vector.load %arg2[%c0_243, %c224, %c0_244] : memref<1x256x128xf32, #tpu.memory_space<vmem>>, vector<1x16x128xf32>
      %272 = vector.shape_cast %271 : vector<1x16x128xf32> to vector<16x128xf32>
      %c252 = arith.constant 252 : index
      %c0_245 = arith.constant 0 : index
      %273 = vector.load %arg16[%c252, %c0_245] : memref<286x128xf32, #tpu.memory_space<vmem>>, vector<16x128xf32>
      tpu.vector_store %arg16[%c252, %c0_245], %272 {strides = array<i32>} : memref<286x128xf32, #tpu.memory_space<vmem>>, vector<16x128xf32>,
      %274 = arith.truncf %272 : vector<16x128xf32> to vector<16x128xbf16>
      %c271 = arith.constant 271 : index
      %c0_246 = arith.constant 0 : index
      %275 = vector.load %arg17[%c271, %c0_246] : memref<324x128xbf16, #tpu.memory_space<vmem>>, vector<16x128xbf16>
      tpu.vector_store %arg17[%c271, %c0_246], %274 {strides = array<i32>} : memref<324x128xbf16, #tpu.memory_space<vmem>>, vector<16x128xbf16>,
      %c0_247 = arith.constant 0 : index
      %c240 = arith.constant 240 : index
      %c0_248 = arith.constant 0 : index
      %276 = vector.load %arg2[%c0_247, %c240, %c0_248] : memref<1x256x128xf32, #tpu.memory_space<vmem>>, vector<1x16x128xf32>
      %277 = vector.shape_cast %276 : vector<1x16x128xf32> to vector<16x128xf32>
      %c270 = arith.constant 270 : index
      %c0_249 = arith.constant 0 : index
      %278 = vector.load %arg16[%c270, %c0_249] : memref<286x128xf32, #tpu.memory_space<vmem>>, vector<16x128xf32>
      tpu.vector_store %arg16[%c270, %c0_249], %277 {strides = array<i32>} : memref<286x128xf32, #tpu.memory_space<vmem>>, vector<16x128xf32>,
      %279 = arith.truncf %277 : vector<16x128xf32> to vector<16x128xbf16>
      %c289 = arith.constant 289 : index
      %c0_250 = arith.constant 0 : index
      %280 = vector.load %arg17[%c289, %c0_250] : memref<324x128xbf16, #tpu.memory_space<vmem>>, vector<16x128xbf16>
      tpu.vector_store %arg17[%c289, %c0_250], %279 {strides = array<i32>} : memref<324x128xbf16, #tpu.memory_space<vmem>>, vector<16x128xbf16>,
    } else {
    }
    %c0 = arith.constant 0 : index
    %c0_6 = arith.constant 0 : index
    %27 = vector.load %arg17[%c0, %c0_6] : memref<324x128xbf16, #tpu.memory_space<vmem>>, vector<286x128xbf16>
    %c0_7 = arith.constant 0 : index
    %c0_8 = arith.constant 0 : index
    %c0_9 = arith.constant 0 : index
    %c0_10 = arith.constant 0 : index
    %28 = vector.load %arg3[%c0_7, %c0_8, %c0_9, %c0_10] : memref<1x9x128x128xbf16, #tpu.memory_space<vmem>>, vector<1x1x128x128xbf16>
    %29 = vector.shape_cast %28 : vector<1x1x128x128xbf16> to vector<128x128xbf16>
    %cst = arith.constant dense<0.000000e+00> : vector<286x128xf32>
    %30 = tpu.matmul %27, %29, %cst {dimension_numbers = #tpu.dot_dimension_numbers<[1], [0], [0], [1], [0, 0, 1, 1], [], []>} : vector<286x128xbf16>, vector<128x128xbf16>, vector<286x128xf32> -> vector<286x128xf32>
    %c1 = arith.constant 1 : index
    %c0_11 = arith.constant 0 : index
    %31 = vector.load %arg17[%c1, %c0_11] : memref<324x128xbf16, #tpu.memory_space<vmem>>, vector<286x128xbf16>
    %c0_12 = arith.constant 0 : index
    %c1_13 = arith.constant 1 : index
    %c0_14 = arith.constant 0 : index
    %c0_15 = arith.constant 0 : index
    %32 = vector.load %arg3[%c0_12, %c1_13, %c0_14, %c0_15] : memref<1x9x128x128xbf16, #tpu.memory_space<vmem>>, vector<1x1x128x128xbf16>
    %33 = vector.shape_cast %32 : vector<1x1x128x128xbf16> to vector<128x128xbf16>
    %cst_16 = arith.constant dense<0.000000e+00> : vector<286x128xf32>
    %34 = tpu.matmul %31, %33, %cst_16 {dimension_numbers = #tpu.dot_dimension_numbers<[1], [0], [0], [1], [0, 0, 1, 1], [], []>} : vector<286x128xbf16>, vector<128x128xbf16>, vector<286x128xf32> -> vector<286x128xf32>
    %35 = arith.addf %30, %34 : vector<286x128xf32>
    %c2 = arith.constant 2 : index
    %c0_17 = arith.constant 0 : index
    %36 = vector.load %arg17[%c2, %c0_17] : memref<324x128xbf16, #tpu.memory_space<vmem>>, vector<286x128xbf16>
    %c0_18 = arith.constant 0 : index
    %c2_19 = arith.constant 2 : index
    %c0_20 = arith.constant 0 : index
    %c0_21 = arith.constant 0 : index
    %37 = vector.load %arg3[%c0_18, %c2_19, %c0_20, %c0_21] : memref<1x9x128x128xbf16, #tpu.memory_space<vmem>>, vector<1x1x128x128xbf16>
    %38 = vector.shape_cast %37 : vector<1x1x128x128xbf16> to vector<128x128xbf16>
    %cst_22 = arith.constant dense<0.000000e+00> : vector<286x128xf32>
    %39 = tpu.matmul %36, %38, %cst_22 {dimension_numbers = #tpu.dot_dimension_numbers<[1], [0], [0], [1], [0, 0, 1, 1], [], []>} : vector<286x128xbf16>, vector<128x128xbf16>, vector<286x128xf32> -> vector<286x128xf32>
    %40 = arith.addf %35, %39 : vector<286x128xf32>
    %c18 = arith.constant 18 : index
    %c0_23 = arith.constant 0 : index
    %41 = vector.load %arg17[%c18, %c0_23] : memref<324x128xbf16, #tpu.memory_space<vmem>>, vector<286x128xbf16>
    %c0_24 = arith.constant 0 : index
    %c3 = arith.constant 3 : index
    %c0_25 = arith.constant 0 : index
    %c0_26 = arith.constant 0 : index
    %42 = vector.load %arg3[%c0_24, %c3, %c0_25, %c0_26] : memref<1x9x128x128xbf16, #tpu.memory_space<vmem>>, vector<1x1x128x128xbf16>
    %43 = vector.shape_cast %42 : vector<1x1x128x128xbf16> to vector<128x128xbf16>
    %cst_27 = arith.constant dense<0.000000e+00> : vector<286x128xf32>
    %44 = tpu.matmul %41, %43, %cst_27 {dimension_numbers = #tpu.dot_dimension_numbers<[1], [0], [0], [1], [0, 0, 1, 1], [], []>} : vector<286x128xbf16>, vector<128x128xbf16>, vector<286x128xf32> -> vector<286x128xf32>
    %45 = arith.addf %40, %44 : vector<286x128xf32>
    %c19 = arith.constant 19 : index
    %c0_28 = arith.constant 0 : index
    %46 = vector.load %arg17[%c19, %c0_28] : memref<324x128xbf16, #tpu.memory_space<vmem>>, vector<286x128xbf16>
    %c0_29 = arith.constant 0 : index
    %c4 = arith.constant 4 : index
    %c0_30 = arith.constant 0 : index
    %c0_31 = arith.constant 0 : index
    %47 = vector.load %arg3[%c0_29, %c4, %c0_30, %c0_31] : memref<1x9x128x128xbf16, #tpu.memory_space<vmem>>, vector<1x1x128x128xbf16>
    %48 = vector.shape_cast %47 : vector<1x1x128x128xbf16> to vector<128x128xbf16>
    %cst_32 = arith.constant dense<0.000000e+00> : vector<286x128xf32>
    %49 = tpu.matmul %46, %48, %cst_32 {dimension_numbers = #tpu.dot_dimension_numbers<[1], [0], [0], [1], [0, 0, 1, 1], [], []>} : vector<286x128xbf16>, vector<128x128xbf16>, vector<286x128xf32> -> vector<286x128xf32>
    %50 = arith.addf %45, %49 : vector<286x128xf32>
    %c20 = arith.constant 20 : index
    %c0_33 = arith.constant 0 : index
    %51 = vector.load %arg17[%c20, %c0_33] : memref<324x128xbf16, #tpu.memory_space<vmem>>, vector<286x128xbf16>
    %c0_34 = arith.constant 0 : index
    %c5 = arith.constant 5 : index
    %c0_35 = arith.constant 0 : index
    %c0_36 = arith.constant 0 : index
    %52 = vector.load %arg3[%c0_34, %c5, %c0_35, %c0_36] : memref<1x9x128x128xbf16, #tpu.memory_space<vmem>>, vector<1x1x128x128xbf16>
    %53 = vector.shape_cast %52 : vector<1x1x128x128xbf16> to vector<128x128xbf16>
    %cst_37 = arith.constant dense<0.000000e+00> : vector<286x128xf32>
    %54 = tpu.matmul %51, %53, %cst_37 {dimension_numbers = #tpu.dot_dimension_numbers<[1], [0], [0], [1], [0, 0, 1, 1], [], []>} : vector<286x128xbf16>, vector<128x128xbf16>, vector<286x128xf32> -> vector<286x128xf32>
    %55 = arith.addf %50, %54 : vector<286x128xf32>
    %c36 = arith.constant 36 : index
    %c0_38 = arith.constant 0 : index
    %56 = vector.load %arg17[%c36, %c0_38] : memref<324x128xbf16, #tpu.memory_space<vmem>>, vector<286x128xbf16>
    %c0_39 = arith.constant 0 : index
    %c6 = arith.constant 6 : index
    %c0_40 = arith.constant 0 : index
    %c0_41 = arith.constant 0 : index
    %57 = vector.load %arg3[%c0_39, %c6, %c0_40, %c0_41] : memref<1x9x128x128xbf16, #tpu.memory_space<vmem>>, vector<1x1x128x128xbf16>
    %58 = vector.shape_cast %57 : vector<1x1x128x128xbf16> to vector<128x128xbf16>
    %cst_42 = arith.constant dense<0.000000e+00> : vector<286x128xf32>
    %59 = tpu.matmul %56, %58, %cst_42 {dimension_numbers = #tpu.dot_dimension_numbers<[1], [0], [0], [1], [0, 0, 1, 1], [], []>} : vector<286x128xbf16>, vector<128x128xbf16>, vector<286x128xf32> -> vector<286x128xf32>
    %60 = arith.addf %55, %59 : vector<286x128xf32>
    %c37 = arith.constant 37 : index
    %c0_43 = arith.constant 0 : index
    %61 = vector.load %arg17[%c37, %c0_43] : memref<324x128xbf16, #tpu.memory_space<vmem>>, vector<286x128xbf16>
    %c0_44 = arith.constant 0 : index
    %c7 = arith.constant 7 : index
    %c0_45 = arith.constant 0 : index
    %c0_46 = arith.constant 0 : index
    %62 = vector.load %arg3[%c0_44, %c7, %c0_45, %c0_46] : memref<1x9x128x128xbf16, #tpu.memory_space<vmem>>, vector<1x1x128x128xbf16>
    %63 = vector.shape_cast %62 : vector<1x1x128x128xbf16> to vector<128x128xbf16>
    %cst_47 = arith.constant dense<0.000000e+00> : vector<286x128xf32>
    %64 = tpu.matmul %61, %63, %cst_47 {dimension_numbers = #tpu.dot_dimension_numbers<[1], [0], [0], [1], [0, 0, 1, 1], [], []>} : vector<286x128xbf16>, vector<128x128xbf16>, vector<286x128xf32> -> vector<286x128xf32>
    %65 = arith.addf %60, %64 : vector<286x128xf32>
    %c38 = arith.constant 38 : index
    %c0_48 = arith.constant 0 : index
    %66 = vector.load %arg17[%c38, %c0_48] : memref<324x128xbf16, #tpu.memory_space<vmem>>, vector<286x128xbf16>
    %c0_49 = arith.constant 0 : index
    %c8 = arith.constant 8 : index
    %c0_50 = arith.constant 0 : index
    %c0_51 = arith.constant 0 : index
    %67 = vector.load %arg3[%c0_49, %c8, %c0_50, %c0_51] : memref<1x9x128x128xbf16, #tpu.memory_space<vmem>>, vector<1x1x128x128xbf16>
    %68 = vector.shape_cast %67 : vector<1x1x128x128xbf16> to vector<128x128xbf16>
    %cst_52 = arith.constant dense<0.000000e+00> : vector<286x128xf32>
    %69 = tpu.matmul %66, %68, %cst_52 {dimension_numbers = #tpu.dot_dimension_numbers<[1], [0], [0], [1], [0, 0, 1, 1], [], []>} : vector<286x128xbf16>, vector<128x128xbf16>, vector<286x128xf32> -> vector<286x128xf32>
    %70 = arith.addf %65, %69 : vector<286x128xf32>
    %c0_53 = arith.constant 0 : index
    %c0_54 = arith.constant 0 : index
    %c0_55 = arith.constant 0 : index
    %71 = vector.load %arg4[%c0_53, %c0_54, %c0_55] : memref<1x1x128xf32, #tpu.memory_space<vmem>>, vector<1x1x128xf32>
    %72 = vector.shape_cast %71 : vector<1x1x128xf32> to vector<1x128xf32>
    %73 = vector.broadcast %72 : vector<1x128xf32> to vector<286x128xf32>
    %74 = arith.addf %70, %73 : vector<286x128xf32>
    %cst_56 = arith.constant 0.000000e+00 : f32
    %75 = vector.broadcast %cst_56 : f32 to vector<286x128xf32>
    %76 = arith.cmpf ogt, %74, %75 : vector<286x128xf32>
    %77 = vector.broadcast %23 : vector<286x1xi1> to vector<286x128xi1>
    %78 = arith.andi %77, %76 : vector<286x128xi1>
    %cst_57 = arith.constant 0.000000e+00 : f32
    %79 = vector.broadcast %cst_57 : f32 to vector<286x128xf32>
    %80 = arith.select %78, %74, %79 : vector<286x128xi1>, vector<286x128xf32>
    %81 = arith.truncf %80 : vector<286x128xf32> to vector<286x128xbf16>
    %c19_58 = arith.constant 19 : index
    %c0_59 = arith.constant 0 : index
    %82 = vector.load %arg17[%c19_58, %c0_59] : memref<324x128xbf16, #tpu.memory_space<vmem>>, vector<286x128xbf16>
    tpu.vector_store %arg17[%c19_58, %c0_59], %81 {strides = array<i32>} : memref<324x128xbf16, #tpu.memory_space<vmem>>, vector<286x128xbf16>,
    %c0_60 = arith.constant 0 : index
    %c0_61 = arith.constant 0 : index
    %83 = vector.load %arg17[%c0_60, %c0_61] : memref<324x128xbf16, #tpu.memory_space<vmem>>, vector<286x128xbf16>
    %c0_62 = arith.constant 0 : index
    %c0_63 = arith.constant 0 : index
    %c0_64 = arith.constant 0 : index
    %c0_65 = arith.constant 0 : index
    %84 = vector.load %arg5[%c0_62, %c0_63, %c0_64, %c0_65] : memref<1x9x128x128xbf16, #tpu.memory_space<vmem>>, vector<1x1x128x128xbf16>
    %85 = vector.shape_cast %84 : vector<1x1x128x128xbf16> to vector<128x128xbf16>
    %cst_66 = arith.constant dense<0.000000e+00> : vector<286x128xf32>
    %86 = tpu.matmul %83, %85, %cst_66 {dimension_numbers = #tpu.dot_dimension_numbers<[1], [0], [0], [1], [0, 0, 1, 1], [], []>} : vector<286x128xbf16>, vector<128x128xbf16>, vector<286x128xf32> -> vector<286x128xf32>
    %c1_67 = arith.constant 1 : index
    %c0_68 = arith.constant 0 : index
    %87 = vector.load %arg17[%c1_67, %c0_68] : memref<324x128xbf16, #tpu.memory_space<vmem>>, vector<286x128xbf16>
    %c0_69 = arith.constant 0 : index
    %c1_70 = arith.constant 1 : index
    %c0_71 = arith.constant 0 : index
    %c0_72 = arith.constant 0 : index
    %88 = vector.load %arg5[%c0_69, %c1_70, %c0_71, %c0_72] : memref<1x9x128x128xbf16, #tpu.memory_space<vmem>>, vector<1x1x128x128xbf16>
    %89 = vector.shape_cast %88 : vector<1x1x128x128xbf16> to vector<128x128xbf16>
    %cst_73 = arith.constant dense<0.000000e+00> : vector<286x128xf32>
    %90 = tpu.matmul %87, %89, %cst_73 {dimension_numbers = #tpu.dot_dimension_numbers<[1], [0], [0], [1], [0, 0, 1, 1], [], []>} : vector<286x128xbf16>, vector<128x128xbf16>, vector<286x128xf32> -> vector<286x128xf32>
    %91 = arith.addf %86, %90 : vector<286x128xf32>
    %c2_74 = arith.constant 2 : index
    %c0_75 = arith.constant 0 : index
    %92 = vector.load %arg17[%c2_74, %c0_75] : memref<324x128xbf16, #tpu.memory_space<vmem>>, vector<286x128xbf16>
    %c0_76 = arith.constant 0 : index
    %c2_77 = arith.constant 2 : index
    %c0_78 = arith.constant 0 : index
    %c0_79 = arith.constant 0 : index
    %93 = vector.load %arg5[%c0_76, %c2_77, %c0_78, %c0_79] : memref<1x9x128x128xbf16, #tpu.memory_space<vmem>>, vector<1x1x128x128xbf16>
    %94 = vector.shape_cast %93 : vector<1x1x128x128xbf16> to vector<128x128xbf16>
    %cst_80 = arith.constant dense<0.000000e+00> : vector<286x128xf32>
    %95 = tpu.matmul %92, %94, %cst_80 {dimension_numbers = #tpu.dot_dimension_numbers<[1], [0], [0], [1], [0, 0, 1, 1], [], []>} : vector<286x128xbf16>, vector<128x128xbf16>, vector<286x128xf32> -> vector<286x128xf32>
    %96 = arith.addf %91, %95 : vector<286x128xf32>
    %c18_81 = arith.constant 18 : index
    %c0_82 = arith.constant 0 : index
    %97 = vector.load %arg17[%c18_81, %c0_82] : memref<324x128xbf16, #tpu.memory_space<vmem>>, vector<286x128xbf16>
    %c0_83 = arith.constant 0 : index
    %c3_84 = arith.constant 3 : index
    %c0_85 = arith.constant 0 : index
    %c0_86 = arith.constant 0 : index
    %98 = vector.load %arg5[%c0_83, %c3_84, %c0_85, %c0_86] : memref<1x9x128x128xbf16, #tpu.memory_space<vmem>>, vector<1x1x128x128xbf16>
    %99 = vector.shape_cast %98 : vector<1x1x128x128xbf16> to vector<128x128xbf16>
    %cst_87 = arith.constant dense<0.000000e+00> : vector<286x128xf32>
    %100 = tpu.matmul %97, %99, %cst_87 {dimension_numbers = #tpu.dot_dimension_numbers<[1], [0], [0], [1], [0, 0, 1, 1], [], []>} : vector<286x128xbf16>, vector<128x128xbf16>, vector<286x128xf32> -> vector<286x128xf32>
    %101 = arith.addf %96, %100 : vector<286x128xf32>
    %c19_88 = arith.constant 19 : index
    %c0_89 = arith.constant 0 : index
    %102 = vector.load %arg17[%c19_88, %c0_89] : memref<324x128xbf16, #tpu.memory_space<vmem>>, vector<286x128xbf16>
    %c0_90 = arith.constant 0 : index
    %c4_91 = arith.constant 4 : index
    %c0_92 = arith.constant 0 : index
    %c0_93 = arith.constant 0 : index
    %103 = vector.load %arg5[%c0_90, %c4_91, %c0_92, %c0_93] : memref<1x9x128x128xbf16, #tpu.memory_space<vmem>>, vector<1x1x128x128xbf16>
    %104 = vector.shape_cast %103 : vector<1x1x128x128xbf16> to vector<128x128xbf16>
    %cst_94 = arith.constant dense<0.000000e+00> : vector<286x128xf32>
    %105 = tpu.matmul %102, %104, %cst_94 {dimension_numbers = #tpu.dot_dimension_numbers<[1], [0], [0], [1], [0, 0, 1, 1], [], []>} : vector<286x128xbf16>, vector<128x128xbf16>, vector<286x128xf32> -> vector<286x128xf32>
    %106 = arith.addf %101, %105 : vector<286x128xf32>
    %c20_95 = arith.constant 20 : index
    %c0_96 = arith.constant 0 : index
    %107 = vector.load %arg17[%c20_95, %c0_96] : memref<324x128xbf16, #tpu.memory_space<vmem>>, vector<286x128xbf16>
    %c0_97 = arith.constant 0 : index
    %c5_98 = arith.constant 5 : index
    %c0_99 = arith.constant 0 : index
    %c0_100 = arith.constant 0 : index
    %108 = vector.load %arg5[%c0_97, %c5_98, %c0_99, %c0_100] : memref<1x9x128x128xbf16, #tpu.memory_space<vmem>>, vector<1x1x128x128xbf16>
    %109 = vector.shape_cast %108 : vector<1x1x128x128xbf16> to vector<128x128xbf16>
    %cst_101 = arith.constant dense<0.000000e+00> : vector<286x128xf32>
    %110 = tpu.matmul %107, %109, %cst_101 {dimension_numbers = #tpu.dot_dimension_numbers<[1], [0], [0], [1], [0, 0, 1, 1], [], []>} : vector<286x128xbf16>, vector<128x128xbf16>, vector<286x128xf32> -> vector<286x128xf32>
    %111 = arith.addf %106, %110 : vector<286x128xf32>
    %c36_102 = arith.constant 36 : index
    %c0_103 = arith.constant 0 : index
    %112 = vector.load %arg17[%c36_102, %c0_103] : memref<324x128xbf16, #tpu.memory_space<vmem>>, vector<286x128xbf16>
    %c0_104 = arith.constant 0 : index
    %c6_105 = arith.constant 6 : index
    %c0_106 = arith.constant 0 : index
    %c0_107 = arith.constant 0 : index
    %113 = vector.load %arg5[%c0_104, %c6_105, %c0_106, %c0_107] : memref<1x9x128x128xbf16, #tpu.memory_space<vmem>>, vector<1x1x128x128xbf16>
    %114 = vector.shape_cast %113 : vector<1x1x128x128xbf16> to vector<128x128xbf16>
    %cst_108 = arith.constant dense<0.000000e+00> : vector<286x128xf32>
    %115 = tpu.matmul %112, %114, %cst_108 {dimension_numbers = #tpu.dot_dimension_numbers<[1], [0], [0], [1], [0, 0, 1, 1], [], []>} : vector<286x128xbf16>, vector<128x128xbf16>, vector<286x128xf32> -> vector<286x128xf32>
    %116 = arith.addf %111, %115 : vector<286x128xf32>
    %c37_109 = arith.constant 37 : index
    %c0_110 = arith.constant 0 : index
    %117 = vector.load %arg17[%c37_109, %c0_110] : memref<324x128xbf16, #tpu.memory_space<vmem>>, vector<286x128xbf16>
    %c0_111 = arith.constant 0 : index
    %c7_112 = arith.constant 7 : index
    %c0_113 = arith.constant 0 : index
    %c0_114 = arith.constant 0 : index
    %118 = vector.load %arg5[%c0_111, %c7_112, %c0_113, %c0_114] : memref<1x9x128x128xbf16, #tpu.memory_space<vmem>>, vector<1x1x128x128xbf16>
    %119 = vector.shape_cast %118 : vector<1x1x128x128xbf16> to vector<128x128xbf16>
    %cst_115 = arith.constant dense<0.000000e+00> : vector<286x128xf32>
    %120 = tpu.matmul %117, %119, %cst_115 {dimension_numbers = #tpu.dot_dimension_numbers<[1], [0], [0], [1], [0, 0, 1, 1], [], []>} : vector<286x128xbf16>, vector<128x128xbf16>, vector<286x128xf32> -> vector<286x128xf32>
    %121 = arith.addf %116, %120 : vector<286x128xf32>
    %c38_116 = arith.constant 38 : index
    %c0_117 = arith.constant 0 : index
    %122 = vector.load %arg17[%c38_116, %c0_117] : memref<324x128xbf16, #tpu.memory_space<vmem>>, vector<286x128xbf16>
    %c0_118 = arith.constant 0 : index
    %c8_119 = arith.constant 8 : index
    %c0_120 = arith.constant 0 : index
    %c0_121 = arith.constant 0 : index
    %123 = vector.load %arg5[%c0_118, %c8_119, %c0_120, %c0_121] : memref<1x9x128x128xbf16, #tpu.memory_space<vmem>>, vector<1x1x128x128xbf16>
    %124 = vector.shape_cast %123 : vector<1x1x128x128xbf16> to vector<128x128xbf16>
    %cst_122 = arith.constant dense<0.000000e+00> : vector<286x128xf32>
    %125 = tpu.matmul %122, %124, %cst_122 {dimension_numbers = #tpu.dot_dimension_numbers<[1], [0], [0], [1], [0, 0, 1, 1], [], []>} : vector<286x128xbf16>, vector<128x128xbf16>, vector<286x128xf32> -> vector<286x128xf32>
    %126 = arith.addf %121, %125 : vector<286x128xf32>
    %c0_123 = arith.constant 0 : index
    %c0_124 = arith.constant 0 : index
    %c0_125 = arith.constant 0 : index
    %127 = vector.load %arg6[%c0_123, %c0_124, %c0_125] : memref<1x1x128xf32, #tpu.memory_space<vmem>>, vector<1x1x128xf32>
    %128 = vector.shape_cast %127 : vector<1x1x128xf32> to vector<1x128xf32>
    %129 = vector.broadcast %128 : vector<1x128xf32> to vector<286x128xf32>
    %130 = arith.addf %126, %129 : vector<286x128xf32>
    %c0_126 = arith.constant 0 : index
    %c0_127 = arith.constant 0 : index
    %131 = vector.load %arg16[%c0_126, %c0_127] : memref<286x128xf32, #tpu.memory_space<vmem>>, vector<286x128xf32>
    %cst_128 = arith.constant 0.000000e+00 : f32
    %132 = vector.shape_cast %23 : vector<286x1xi1> to vector<286x1xi1>
    %133 = vector.broadcast %132 : vector<286x1xi1> to vector<286x128xi1>
    %134 = vector.broadcast %cst_128 : f32 to vector<286x128xf32>
    %135 = arith.select %133, %130, %134 : vector<286x128xi1>, vector<286x128xf32>
    %136 = arith.addf %131, %135 : vector<286x128xf32>
    %c0_129 = arith.constant 0 : index
    %c0_130 = arith.constant 0 : index
    %137 = vector.load %arg16[%c0_129, %c0_130] : memref<286x128xf32, #tpu.memory_space<vmem>>, vector<286x128xf32>
    tpu.vector_store %arg16[%c0_129, %c0_130], %136 {strides = array<i32>} : memref<286x128xf32, #tpu.memory_space<vmem>>, vector<286x128xf32>,
    %138 = arith.truncf %136 : vector<286x128xf32> to vector<286x128xbf16>
    %c0_131 = arith.constant 0 : index
    %c0_132 = arith.constant 0 : index
    %c0_133 = arith.constant 0 : index
    %139 = vector.load %arg7[%c0_131, %c0_132, %c0_133] : memref<1x128x128xbf16, #tpu.memory_space<vmem>>, vector<1x128x128xbf16>
    %140 = vector.shape_cast %139 : vector<1x128x128xbf16> to vector<128x128xbf16>
    %cst_134 = arith.constant dense<0.000000e+00> : vector<286x128xf32>
    %141 = tpu.matmul %138, %140, %cst_134 {dimension_numbers = #tpu.dot_dimension_numbers<[1], [0], [0], [1], [0, 0, 1, 1], [], []>} : vector<286x128xbf16>, vector<128x128xbf16>, vector<286x128xf32> -> vector<286x128xf32>
    %c0_135 = arith.constant 0 : index
    %c0_136 = arith.constant 0 : index
    %c0_137 = arith.constant 0 : index
    %142 = vector.load %arg8[%c0_135, %c0_136, %c0_137] : memref<1x1x128xf32, #tpu.memory_space<vmem>>, vector<1x1x128xf32>
    %143 = vector.shape_cast %142 : vector<1x1x128xf32> to vector<1x128xf32>
    %144 = vector.broadcast %143 : vector<1x128xf32> to vector<286x128xf32>
    %145 = arith.addf %141, %144 : vector<286x128xf32>
    %cst_138 = arith.constant 0.000000e+00 : f32
    %146 = vector.broadcast %cst_138 : f32 to vector<286x128xf32>
    %147 = arith.maximumf %145, %146 : vector<286x128xf32>
    %148 = arith.truncf %147 : vector<286x128xf32> to vector<286x128xbf16>
    %c0_139 = arith.constant 0 : index
    %c0_140 = arith.constant 0 : index
    %c0_141 = arith.constant 0 : index
    %149 = vector.load %arg9[%c0_139, %c0_140, %c0_141] : memref<1x128x128xbf16, #tpu.memory_space<vmem>>, vector<1x128x128xbf16>
    %150 = vector.shape_cast %149 : vector<1x128x128xbf16> to vector<128x128xbf16>
    %cst_142 = arith.constant dense<0.000000e+00> : vector<286x128xf32>
    %151 = tpu.matmul %148, %150, %cst_142 {dimension_numbers = #tpu.dot_dimension_numbers<[1], [0], [0], [1], [0, 0, 1, 1], [], []>} : vector<286x128xbf16>, vector<128x128xbf16>, vector<286x128xf32> -> vector<286x128xf32>
    %c0_143 = arith.constant 0 : index
    %c0_144 = arith.constant 0 : index
    %c0_145 = arith.constant 0 : index
    %152 = vector.load %arg10[%c0_143, %c0_144, %c0_145] : memref<1x1x128xf32, #tpu.memory_space<vmem>>, vector<1x1x128xf32>
    %153 = vector.shape_cast %152 : vector<1x1x128xf32> to vector<1x128xf32>
    %154 = vector.broadcast %153 : vector<1x128xf32> to vector<286x128xf32>
    %155 = arith.addf %151, %154 : vector<286x128xf32>
    %cst_146 = arith.constant 0.000000e+00 : f32
    %156 = vector.shape_cast %23 : vector<286x1xi1> to vector<286x1xi1>
    %157 = vector.broadcast %156 : vector<286x1xi1> to vector<286x128xi1>
    %158 = vector.broadcast %cst_146 : f32 to vector<286x128xf32>
    %159 = arith.select %157, %155, %158 : vector<286x128xi1>, vector<286x128xf32>
    %cst_147 = arith.constant dense<0.000000e+00> : vector<128xf32>
    %160 = vector.multi_reduction <add>, %159, %cst_147 [0] : vector<286x128xf32> to vector<128xf32>
    %161 = vector.shape_cast %160 : vector<128xf32> to vector<1x128xf32>
    %cst_148 = arith.constant 3.906250e-03 : f32
    %162 = vector.broadcast %cst_148 : f32 to vector<1x128xf32>
    %163 = arith.mulf %161, %162 : vector<1x128xf32>
    %164 = arith.truncf %163 : vector<1x128xf32> to vector<1x128xbf16>
    %c0_149 = arith.constant 0 : index
    %c0_150 = arith.constant 0 : index
    %c0_151 = arith.constant 0 : index
    %165 = vector.load %arg11[%c0_149, %c0_150, %c0_151] : memref<1x128x128xbf16, #tpu.memory_space<vmem>>, vector<1x128x128xbf16>
    %166 = vector.shape_cast %165 : vector<1x128x128xbf16> to vector<128x128xbf16>
    %cst_152 = arith.constant dense<0.000000e+00> : vector<1x128xf32>
    %167 = tpu.matmul %164, %166, %cst_152 {dimension_numbers = #tpu.dot_dimension_numbers<[1], [0], [0], [1], [0, 0, 1, 1], [], []>} : vector<1x128xbf16>, vector<128x128xbf16>, vector<1x128xf32> -> vector<1x128xf32>
    %c0_153 = arith.constant 0 : index
    %c0_154 = arith.constant 0 : index
    %c0_155 = arith.constant 0 : index
    %168 = vector.load %arg12[%c0_153, %c0_154, %c0_155] : memref<1x1x128xf32, #tpu.memory_space<vmem>>, vector<1x1x128xf32>
    %169 = vector.shape_cast %168 : vector<1x1x128xf32> to vector<1x128xf32>
    %170 = arith.addf %167, %169 : vector<1x128xf32>
    %cst_156 = arith.constant 0.000000e+00 : f32
    %171 = vector.broadcast %cst_156 : f32 to vector<1x128xf32>
    %172 = arith.maximumf %170, %171 : vector<1x128xf32>
    %173 = arith.truncf %172 : vector<1x128xf32> to vector<1x128xbf16>
    %c0_157 = arith.constant 0 : index
    %c0_158 = arith.constant 0 : index
    %c0_159 = arith.constant 0 : index
    %174 = vector.load %arg13[%c0_157, %c0_158, %c0_159] : memref<1x128x128xbf16, #tpu.memory_space<vmem>>, vector<1x128x128xbf16>
    %175 = vector.shape_cast %174 : vector<1x128x128xbf16> to vector<128x128xbf16>
    %cst_160 = arith.constant dense<0.000000e+00> : vector<1x128xf32>
    %176 = tpu.matmul %173, %175, %cst_160 {dimension_numbers = #tpu.dot_dimension_numbers<[1], [0], [0], [1], [0, 0, 1, 1], [], []>} : vector<1x128xbf16>, vector<128x128xbf16>, vector<1x128xf32> -> vector<1x128xf32>
    %c0_161 = arith.constant 0 : index
    %c0_162 = arith.constant 0 : index
    %c0_163 = arith.constant 0 : index
    %177 = vector.load %arg14[%c0_161, %c0_162, %c0_163] : memref<1x1x128xf32, #tpu.memory_space<vmem>>, vector<1x1x128xf32>
    %178 = vector.shape_cast %177 : vector<1x1x128xf32> to vector<1x128xf32>
    %179 = arith.addf %176, %178 : vector<1x128xf32>
    %180 = arith.negf %179 : vector<1x128xf32>
    %181 = math.exp %180 : vector<1x128xf32>
    %cst_164 = arith.constant 1.000000e+00 : f32
    %182 = vector.broadcast %cst_164 : f32 to vector<1x128xf32>
    %183 = arith.addf %182, %181 : vector<1x128xf32>
    %184 = arith.divf %182, %183 : vector<1x128xf32>
    %c0_165 = arith.constant 0 : index
    %c0_166 = arith.constant 0 : index
    %185 = vector.load %arg16[%c0_165, %c0_166] : memref<286x128xf32, #tpu.memory_space<vmem>>, vector<286x128xf32>
    %186 = vector.broadcast %184 : vector<1x128xf32> to vector<286x128xf32>
    %187 = arith.mulf %159, %186 : vector<286x128xf32>
    %cst_167 = arith.constant 1.000000e-01 : f32
    %188 = vector.broadcast %cst_167 : f32 to vector<286x128xf32>
    %189 = arith.mulf %188, %187 : vector<286x128xf32>
    %190 = arith.addf %185, %189 : vector<286x128xf32>
    %c0_168 = arith.constant 0 : index
    %c0_169 = arith.constant 0 : index
    %191 = vector.load %arg16[%c0_168, %c0_169] : memref<286x128xf32, #tpu.memory_space<vmem>>, vector<286x128xf32>
    tpu.vector_store %arg16[%c0_168, %c0_169], %190 {strides = array<i32>} : memref<286x128xf32, #tpu.memory_space<vmem>>, vector<286x128xf32>,
    %192 = arith.truncf %190 : vector<286x128xf32> to vector<286x128xbf16>
    %c19_170 = arith.constant 19 : index
    %c0_171 = arith.constant 0 : index
    %193 = vector.load %arg17[%c19_170, %c0_171] : memref<324x128xbf16, #tpu.memory_space<vmem>>, vector<286x128xbf16>
    tpu.vector_store %arg17[%c19_170, %c0_171], %192 {strides = array<i32>} : memref<324x128xbf16, #tpu.memory_space<vmem>>, vector<286x128xbf16>,
    %c1_i32_172 = arith.constant 1 : i32
    %194 = arith.cmpi eq, %arg1, %c1_i32_172 : i32
    %195 = arith.extui %194 : i1 to i32
    %c0_i32_173 = arith.constant 0 : i32
    %196 = arith.cmpi ne, %195, %c0_i32_173 : i32
    scf.if %196 {
      %c0_174 = arith.constant 0 : index
      %c0_175 = arith.constant 0 : index
      %197 = vector.load %arg16[%c0_174, %c0_175] : memref<286x128xf32, #tpu.memory_space<vmem>>, vector<16x128xf32>
      %c0_176 = arith.constant 0 : index
      %c0_177 = arith.constant 0 : index
      %c0_178 = arith.constant 0 : index
      %198 = vector.load %arg2[%c0_176, %c0_177, %c0_178] : memref<1x256x128xf32, #tpu.memory_space<vmem>>, vector<1x16x128xf32>
      %199 = vector.shape_cast %198 : vector<1x16x128xf32> to vector<16x128xf32>
      %200 = arith.addf %197, %199 : vector<16x128xf32>
      %c0_179 = arith.constant 0 : index
      %c0_180 = arith.constant 0 : index
      %c0_181 = arith.constant 0 : index
      %201 = vector.load %arg15[%c0_179, %c0_180, %c0_181] : memref<1x256x128xf32, #tpu.memory_space<vmem>>, vector<1x16x128xf32>
      %202 = vector.shape_cast %201 : vector<1x16x128xf32> to vector<16x128xf32>
      %203 = vector.shape_cast %200 : vector<16x128xf32> to vector<1x16x128xf32>
      tpu.vector_store %arg15[%c0_179, %c0_180, %c0_181], %203 {strides = array<i32>} : memref<1x256x128xf32, #tpu.memory_space<vmem>>, vector<1x16x128xf32>,
      %c18_182 = arith.constant 18 : index
      %c0_183 = arith.constant 0 : index
      %204 = vector.load %arg16[%c18_182, %c0_183] : memref<286x128xf32, #tpu.memory_space<vmem>>, vector<16x128xf32>
      %c0_184 = arith.constant 0 : index
      %c16 = arith.constant 16 : index
      %c0_185 = arith.constant 0 : index
      %205 = vector.load %arg2[%c0_184, %c16, %c0_185] : memref<1x256x128xf32, #tpu.memory_space<vmem>>, vector<1x16x128xf32>
      %206 = vector.shape_cast %205 : vector<1x16x128xf32> to vector<16x128xf32>
      %207 = arith.addf %204, %206 : vector<16x128xf32>
      %c0_186 = arith.constant 0 : index
      %c16_187 = arith.constant 16 : index
      %c0_188 = arith.constant 0 : index
      %208 = vector.load %arg15[%c0_186, %c16_187, %c0_188] : memref<1x256x128xf32, #tpu.memory_space<vmem>>, vector<1x16x128xf32>
      %209 = vector.shape_cast %208 : vector<1x16x128xf32> to vector<16x128xf32>
      %210 = vector.shape_cast %207 : vector<16x128xf32> to vector<1x16x128xf32>
      tpu.vector_store %arg15[%c0_186, %c16_187, %c0_188], %210 {strides = array<i32>} : memref<1x256x128xf32, #tpu.memory_space<vmem>>, vector<1x16x128xf32>,
      %c36_189 = arith.constant 36 : index
      %c0_190 = arith.constant 0 : index
      %211 = vector.load %arg16[%c36_189, %c0_190] : memref<286x128xf32, #tpu.memory_space<vmem>>, vector<16x128xf32>
      %c0_191 = arith.constant 0 : index
      %c32 = arith.constant 32 : index
      %c0_192 = arith.constant 0 : index
      %212 = vector.load %arg2[%c0_191, %c32, %c0_192] : memref<1x256x128xf32, #tpu.memory_space<vmem>>, vector<1x16x128xf32>
      %213 = vector.shape_cast %212 : vector<1x16x128xf32> to vector<16x128xf32>
      %214 = arith.addf %211, %213 : vector<16x128xf32>
      %c0_193 = arith.constant 0 : index
      %c32_194 = arith.constant 32 : index
      %c0_195 = arith.constant 0 : index
      %215 = vector.load %arg15[%c0_193, %c32_194, %c0_195] : memref<1x256x128xf32, #tpu.memory_space<vmem>>, vector<1x16x128xf32>
      %216 = vector.shape_cast %215 : vector<1x16x128xf32> to vector<16x128xf32>
      %217 = vector.shape_cast %214 : vector<16x128xf32> to vector<1x16x128xf32>
      tpu.vector_store %arg15[%c0_193, %c32_194, %c0_195], %217 {strides = array<i32>} : memref<1x256x128xf32, #tpu.memory_space<vmem>>, vector<1x16x128xf32>,
      %c54 = arith.constant 54 : index
      %c0_196 = arith.constant 0 : index
      %218 = vector.load %arg16[%c54, %c0_196] : memref<286x128xf32, #tpu.memory_space<vmem>>, vector<16x128xf32>
      %c0_197 = arith.constant 0 : index
      %c48 = arith.constant 48 : index
      %c0_198 = arith.constant 0 : index
      %219 = vector.load %arg2[%c0_197, %c48, %c0_198] : memref<1x256x128xf32, #tpu.memory_space<vmem>>, vector<1x16x128xf32>
      %220 = vector.shape_cast %219 : vector<1x16x128xf32> to vector<16x128xf32>
      %221 = arith.addf %218, %220 : vector<16x128xf32>
      %c0_199 = arith.constant 0 : index
      %c48_200 = arith.constant 48 : index
      %c0_201 = arith.constant 0 : index
      %222 = vector.load %arg15[%c0_199, %c48_200, %c0_201] : memref<1x256x128xf32, #tpu.memory_space<vmem>>, vector<1x16x128xf32>
      %223 = vector.shape_cast %222 : vector<1x16x128xf32> to vector<16x128xf32>
      %224 = vector.shape_cast %221 : vector<16x128xf32> to vector<1x16x128xf32>
      tpu.vector_store %arg15[%c0_199, %c48_200, %c0_201], %224 {strides = array<i32>} : memref<1x256x128xf32, #tpu.memory_space<vmem>>, vector<1x16x128xf32>,
      %c72 = arith.constant 72 : index
      %c0_202 = arith.constant 0 : index
      %225 = vector.load %arg16[%c72, %c0_202] : memref<286x128xf32, #tpu.memory_space<vmem>>, vector<16x128xf32>
      %c0_203 = arith.constant 0 : index
      %c64 = arith.constant 64 : index
      %c0_204 = arith.constant 0 : index
      %226 = vector.load %arg2[%c0_203, %c64, %c0_204] : memref<1x256x128xf32, #tpu.memory_space<vmem>>, vector<1x16x128xf32>
      %227 = vector.shape_cast %226 : vector<1x16x128xf32> to vector<16x128xf32>
      %228 = arith.addf %225, %227 : vector<16x128xf32>
      %c0_205 = arith.constant 0 : index
      %c64_206 = arith.constant 64 : index
      %c0_207 = arith.constant 0 : index
      %229 = vector.load %arg15[%c0_205, %c64_206, %c0_207] : memref<1x256x128xf32, #tpu.memory_space<vmem>>, vector<1x16x128xf32>
      %230 = vector.shape_cast %229 : vector<1x16x128xf32> to vector<16x128xf32>
      %231 = vector.shape_cast %228 : vector<16x128xf32> to vector<1x16x128xf32>
      tpu.vector_store %arg15[%c0_205, %c64_206, %c0_207], %231 {strides = array<i32>} : memref<1x256x128xf32, #tpu.memory_space<vmem>>, vector<1x16x128xf32>,
      %c90 = arith.constant 90 : index
      %c0_208 = arith.constant 0 : index
      %232 = vector.load %arg16[%c90, %c0_208] : memref<286x128xf32, #tpu.memory_space<vmem>>, vector<16x128xf32>
      %c0_209 = arith.constant 0 : index
      %c80 = arith.constant 80 : index
      %c0_210 = arith.constant 0 : index
      %233 = vector.load %arg2[%c0_209, %c80, %c0_210] : memref<1x256x128xf32, #tpu.memory_space<vmem>>, vector<1x16x128xf32>
      %234 = vector.shape_cast %233 : vector<1x16x128xf32> to vector<16x128xf32>
      %235 = arith.addf %232, %234 : vector<16x128xf32>
      %c0_211 = arith.constant 0 : index
      %c80_212 = arith.constant 80 : index
      %c0_213 = arith.constant 0 : index
      %236 = vector.load %arg15[%c0_211, %c80_212, %c0_213] : memref<1x256x128xf32, #tpu.memory_space<vmem>>, vector<1x16x128xf32>
      %237 = vector.shape_cast %236 : vector<1x16x128xf32> to vector<16x128xf32>
      %238 = vector.shape_cast %235 : vector<16x128xf32> to vector<1x16x128xf32>
      tpu.vector_store %arg15[%c0_211, %c80_212, %c0_213], %238 {strides = array<i32>} : memref<1x256x128xf32, #tpu.memory_space<vmem>>, vector<1x16x128xf32>,
      %c108 = arith.constant 108 : index
      %c0_214 = arith.constant 0 : index
      %239 = vector.load %arg16[%c108, %c0_214] : memref<286x128xf32, #tpu.memory_space<vmem>>, vector<16x128xf32>
      %c0_215 = arith.constant 0 : index
      %c96 = arith.constant 96 : index
      %c0_216 = arith.constant 0 : index
      %240 = vector.load %arg2[%c0_215, %c96, %c0_216] : memref<1x256x128xf32, #tpu.memory_space<vmem>>, vector<1x16x128xf32>
      %241 = vector.shape_cast %240 : vector<1x16x128xf32> to vector<16x128xf32>
      %242 = arith.addf %239, %241 : vector<16x128xf32>
      %c0_217 = arith.constant 0 : index
      %c96_218 = arith.constant 96 : index
      %c0_219 = arith.constant 0 : index
      %243 = vector.load %arg15[%c0_217, %c96_218, %c0_219] : memref<1x256x128xf32, #tpu.memory_space<vmem>>, vector<1x16x128xf32>
      %244 = vector.shape_cast %243 : vector<1x16x128xf32> to vector<16x128xf32>
      %245 = vector.shape_cast %242 : vector<16x128xf32> to vector<1x16x128xf32>
      tpu.vector_store %arg15[%c0_217, %c96_218, %c0_219], %245 {strides = array<i32>} : memref<1x256x128xf32, #tpu.memory_space<vmem>>, vector<1x16x128xf32>,
      %c126 = arith.constant 126 : index
      %c0_220 = arith.constant 0 : index
      %246 = vector.load %arg16[%c126, %c0_220] : memref<286x128xf32, #tpu.memory_space<vmem>>, vector<16x128xf32>
      %c0_221 = arith.constant 0 : index
      %c112 = arith.constant 112 : index
      %c0_222 = arith.constant 0 : index
      %247 = vector.load %arg2[%c0_221, %c112, %c0_222] : memref<1x256x128xf32, #tpu.memory_space<vmem>>, vector<1x16x128xf32>
      %248 = vector.shape_cast %247 : vector<1x16x128xf32> to vector<16x128xf32>
      %249 = arith.addf %246, %248 : vector<16x128xf32>
      %c0_223 = arith.constant 0 : index
      %c112_224 = arith.constant 112 : index
      %c0_225 = arith.constant 0 : index
      %250 = vector.load %arg15[%c0_223, %c112_224, %c0_225] : memref<1x256x128xf32, #tpu.memory_space<vmem>>, vector<1x16x128xf32>
      %251 = vector.shape_cast %250 : vector<1x16x128xf32> to vector<16x128xf32>
      %252 = vector.shape_cast %249 : vector<16x128xf32> to vector<1x16x128xf32>
      tpu.vector_store %arg15[%c0_223, %c112_224, %c0_225], %252 {strides = array<i32>} : memref<1x256x128xf32, #tpu.memory_space<vmem>>, vector<1x16x128xf32>,
      %c144 = arith.constant 144 : index
      %c0_226 = arith.constant 0 : index
      %253 = vector.load %arg16[%c144, %c0_226] : memref<286x128xf32, #tpu.memory_space<vmem>>, vector<16x128xf32>
      %c0_227 = arith.constant 0 : index
      %c128 = arith.constant 128 : index
      %c0_228 = arith.constant 0 : index
      %254 = vector.load %arg2[%c0_227, %c128, %c0_228] : memref<1x256x128xf32, #tpu.memory_space<vmem>>, vector<1x16x128xf32>
      %255 = vector.shape_cast %254 : vector<1x16x128xf32> to vector<16x128xf32>
      %256 = arith.addf %253, %255 : vector<16x128xf32>
      %c0_229 = arith.constant 0 : index
      %c128_230 = arith.constant 128 : index
      %c0_231 = arith.constant 0 : index
      %257 = vector.load %arg15[%c0_229, %c128_230, %c0_231] : memref<1x256x128xf32, #tpu.memory_space<vmem>>, vector<1x16x128xf32>
      %258 = vector.shape_cast %257 : vector<1x16x128xf32> to vector<16x128xf32>
      %259 = vector.shape_cast %256 : vector<16x128xf32> to vector<1x16x128xf32>
      tpu.vector_store %arg15[%c0_229, %c128_230, %c0_231], %259 {strides = array<i32>} : memref<1x256x128xf32, #tpu.memory_space<vmem>>, vector<1x16x128xf32>,
      %c162 = arith.constant 162 : index
      %c0_232 = arith.constant 0 : index
      %260 = vector.load %arg16[%c162, %c0_232] : memref<286x128xf32, #tpu.memory_space<vmem>>, vector<16x128xf32>
      %c0_233 = arith.constant 0 : index
      %c144_234 = arith.constant 144 : index
      %c0_235 = arith.constant 0 : index
      %261 = vector.load %arg2[%c0_233, %c144_234, %c0_235] : memref<1x256x128xf32, #tpu.memory_space<vmem>>, vector<1x16x128xf32>
      %262 = vector.shape_cast %261 : vector<1x16x128xf32> to vector<16x128xf32>
      %263 = arith.addf %260, %262 : vector<16x128xf32>
      %c0_236 = arith.constant 0 : index
      %c144_237 = arith.constant 144 : index
      %c0_238 = arith.constant 0 : index
      %264 = vector.load %arg15[%c0_236, %c144_237, %c0_238] : memref<1x256x128xf32, #tpu.memory_space<vmem>>, vector<1x16x128xf32>
      %265 = vector.shape_cast %264 : vector<1x16x128xf32> to vector<16x128xf32>
      %266 = vector.shape_cast %263 : vector<16x128xf32> to vector<1x16x128xf32>
      tpu.vector_store %arg15[%c0_236, %c144_237, %c0_238], %266 {strides = array<i32>} : memref<1x256x128xf32, #tpu.memory_space<vmem>>, vector<1x16x128xf32>,
      %c180 = arith.constant 180 : index
      %c0_239 = arith.constant 0 : index
      %267 = vector.load %arg16[%c180, %c0_239] : memref<286x128xf32, #tpu.memory_space<vmem>>, vector<16x128xf32>
      %c0_240 = arith.constant 0 : index
      %c160 = arith.constant 160 : index
      %c0_241 = arith.constant 0 : index
      %268 = vector.load %arg2[%c0_240, %c160, %c0_241] : memref<1x256x128xf32, #tpu.memory_space<vmem>>, vector<1x16x128xf32>
      %269 = vector.shape_cast %268 : vector<1x16x128xf32> to vector<16x128xf32>
      %270 = arith.addf %267, %269 : vector<16x128xf32>
      %c0_242 = arith.constant 0 : index
      %c160_243 = arith.constant 160 : index
      %c0_244 = arith.constant 0 : index
      %271 = vector.load %arg15[%c0_242, %c160_243, %c0_244] : memref<1x256x128xf32, #tpu.memory_space<vmem>>, vector<1x16x128xf32>
      %272 = vector.shape_cast %271 : vector<1x16x128xf32> to vector<16x128xf32>
      %273 = vector.shape_cast %270 : vector<16x128xf32> to vector<1x16x128xf32>
      tpu.vector_store %arg15[%c0_242, %c160_243, %c0_244], %273 {strides = array<i32>} : memref<1x256x128xf32, #tpu.memory_space<vmem>>, vector<1x16x128xf32>,
      %c198 = arith.constant 198 : index
      %c0_245 = arith.constant 0 : index
      %274 = vector.load %arg16[%c198, %c0_245] : memref<286x128xf32, #tpu.memory_space<vmem>>, vector<16x128xf32>
      %c0_246 = arith.constant 0 : index
      %c176 = arith.constant 176 : index
      %c0_247 = arith.constant 0 : index
      %275 = vector.load %arg2[%c0_246, %c176, %c0_247] : memref<1x256x128xf32, #tpu.memory_space<vmem>>, vector<1x16x128xf32>
      %276 = vector.shape_cast %275 : vector<1x16x128xf32> to vector<16x128xf32>
      %277 = arith.addf %274, %276 : vector<16x128xf32>
      %c0_248 = arith.constant 0 : index
      %c176_249 = arith.constant 176 : index
      %c0_250 = arith.constant 0 : index
      %278 = vector.load %arg15[%c0_248, %c176_249, %c0_250] : memref<1x256x128xf32, #tpu.memory_space<vmem>>, vector<1x16x128xf32>
      %279 = vector.shape_cast %278 : vector<1x16x128xf32> to vector<16x128xf32>
      %280 = vector.shape_cast %277 : vector<16x128xf32> to vector<1x16x128xf32>
      tpu.vector_store %arg15[%c0_248, %c176_249, %c0_250], %280 {strides = array<i32>} : memref<1x256x128xf32, #tpu.memory_space<vmem>>, vector<1x16x128xf32>,
      %c216 = arith.constant 216 : index
      %c0_251 = arith.constant 0 : index
      %281 = vector.load %arg16[%c216, %c0_251] : memref<286x128xf32, #tpu.memory_space<vmem>>, vector<16x128xf32>
      %c0_252 = arith.constant 0 : index
      %c192 = arith.constant 192 : index
      %c0_253 = arith.constant 0 : index
      %282 = vector.load %arg2[%c0_252, %c192, %c0_253] : memref<1x256x128xf32, #tpu.memory_space<vmem>>, vector<1x16x128xf32>
      %283 = vector.shape_cast %282 : vector<1x16x128xf32> to vector<16x128xf32>
      %284 = arith.addf %281, %283 : vector<16x128xf32>
      %c0_254 = arith.constant 0 : index
      %c192_255 = arith.constant 192 : index
      %c0_256 = arith.constant 0 : index
      %285 = vector.load %arg15[%c0_254, %c192_255, %c0_256] : memref<1x256x128xf32, #tpu.memory_space<vmem>>, vector<1x16x128xf32>
      %286 = vector.shape_cast %285 : vector<1x16x128xf32> to vector<16x128xf32>
      %287 = vector.shape_cast %284 : vector<16x128xf32> to vector<1x16x128xf32>
      tpu.vector_store %arg15[%c0_254, %c192_255, %c0_256], %287 {strides = array<i32>} : memref<1x256x128xf32, #tpu.memory_space<vmem>>, vector<1x16x128xf32>,
      %c234 = arith.constant 234 : index
      %c0_257 = arith.constant 0 : index
      %288 = vector.load %arg16[%c234, %c0_257] : memref<286x128xf32, #tpu.memory_space<vmem>>, vector<16x128xf32>
      %c0_258 = arith.constant 0 : index
      %c208 = arith.constant 208 : index
      %c0_259 = arith.constant 0 : index
      %289 = vector.load %arg2[%c0_258, %c208, %c0_259] : memref<1x256x128xf32, #tpu.memory_space<vmem>>, vector<1x16x128xf32>
      %290 = vector.shape_cast %289 : vector<1x16x128xf32> to vector<16x128xf32>
      %291 = arith.addf %288, %290 : vector<16x128xf32>
      %c0_260 = arith.constant 0 : index
      %c208_261 = arith.constant 208 : index
      %c0_262 = arith.constant 0 : index
      %292 = vector.load %arg15[%c0_260, %c208_261, %c0_262] : memref<1x256x128xf32, #tpu.memory_space<vmem>>, vector<1x16x128xf32>
      %293 = vector.shape_cast %292 : vector<1x16x128xf32> to vector<16x128xf32>
      %294 = vector.shape_cast %291 : vector<16x128xf32> to vector<1x16x128xf32>
      tpu.vector_store %arg15[%c0_260, %c208_261, %c0_262], %294 {strides = array<i32>} : memref<1x256x128xf32, #tpu.memory_space<vmem>>, vector<1x16x128xf32>,
      %c252 = arith.constant 252 : index
      %c0_263 = arith.constant 0 : index
      %295 = vector.load %arg16[%c252, %c0_263] : memref<286x128xf32, #tpu.memory_space<vmem>>, vector<16x128xf32>
      %c0_264 = arith.constant 0 : index
      %c224 = arith.constant 224 : index
      %c0_265 = arith.constant 0 : index
      %296 = vector.load %arg2[%c0_264, %c224, %c0_265] : memref<1x256x128xf32, #tpu.memory_space<vmem>>, vector<1x16x128xf32>
      %297 = vector.shape_cast %296 : vector<1x16x128xf32> to vector<16x128xf32>
      %298 = arith.addf %295, %297 : vector<16x128xf32>
      %c0_266 = arith.constant 0 : index
      %c224_267 = arith.constant 224 : index
      %c0_268 = arith.constant 0 : index
      %299 = vector.load %arg15[%c0_266, %c224_267, %c0_268] : memref<1x256x128xf32, #tpu.memory_space<vmem>>, vector<1x16x128xf32>
      %300 = vector.shape_cast %299 : vector<1x16x128xf32> to vector<16x128xf32>
      %301 = vector.shape_cast %298 : vector<16x128xf32> to vector<1x16x128xf32>
      tpu.vector_store %arg15[%c0_266, %c224_267, %c0_268], %301 {strides = array<i32>} : memref<1x256x128xf32, #tpu.memory_space<vmem>>, vector<1x16x128xf32>,
      %c270 = arith.constant 270 : index
      %c0_269 = arith.constant 0 : index
      %302 = vector.load %arg16[%c270, %c0_269] : memref<286x128xf32, #tpu.memory_space<vmem>>, vector<16x128xf32>
      %c0_270 = arith.constant 0 : index
      %c240 = arith.constant 240 : index
      %c0_271 = arith.constant 0 : index
      %303 = vector.load %arg2[%c0_270, %c240, %c0_271] : memref<1x256x128xf32, #tpu.memory_space<vmem>>, vector<1x16x128xf32>
      %304 = vector.shape_cast %303 : vector<1x16x128xf32> to vector<16x128xf32>
      %305 = arith.addf %302, %304 : vector<16x128xf32>
      %c0_272 = arith.constant 0 : index
      %c240_273 = arith.constant 240 : index
      %c0_274 = arith.constant 0 : index
      %306 = vector.load %arg15[%c0_272, %c240_273, %c0_274] : memref<1x256x128xf32, #tpu.memory_space<vmem>>, vector<1x16x128xf32>
      %307 = vector.shape_cast %306 : vector<1x16x128xf32> to vector<16x128xf32>
      %308 = vector.shape_cast %305 : vector<16x128xf32> to vector<1x16x128xf32>
      tpu.vector_store %arg15[%c0_272, %c240_273, %c0_274], %308 {strides = array<i32>} : memref<1x256x128xf32, #tpu.memory_space<vmem>>, vector<1x16x128xf32>,
    } else {
    }
    return
  }
  func.func @transform_0(%arg0: i32, %arg1: i32) -> (i32, i32, i32) {
    %c0_i32 = arith.constant 0 : i32
    %c0_i32_0 = arith.constant 0 : i32
    %c0_i32_1 = arith.constant 0 : i32
    return %arg0, %c0_i32, %c0_i32_0 : i32, i32, i32
  }
  func.func @transform_1(%arg0: i32, %arg1: i32) -> (i32, i32, i32, i32) {
    %c0_i32 = arith.constant 0 : i32
    %c0_i32_0 = arith.constant 0 : i32
    %c0_i32_1 = arith.constant 0 : i32
    %c0_i32_2 = arith.constant 0 : i32
    return %arg1, %c0_i32, %c0_i32_0, %c0_i32_1 : i32, i32, i32, i32
  }
  func.func @transform_2(%arg0: i32, %arg1: i32) -> (i32, i32, i32) {
    %c0_i32 = arith.constant 0 : i32
    %c0_i32_0 = arith.constant 0 : i32
    %c0_i32_1 = arith.constant 0 : i32
    return %arg1, %c0_i32, %c0_i32_0 : i32, i32, i32
  }
  func.func @transform_3(%arg0: i32, %arg1: i32) -> (i32, i32, i32, i32) {
    %c0_i32 = arith.constant 0 : i32
    %c0_i32_0 = arith.constant 0 : i32
    %c0_i32_1 = arith.constant 0 : i32
    %c0_i32_2 = arith.constant 0 : i32
    return %arg1, %c0_i32, %c0_i32_0, %c0_i32_1 : i32, i32, i32, i32
  }
  func.func @transform_4(%arg0: i32, %arg1: i32) -> (i32, i32, i32) {
    %c0_i32 = arith.constant 0 : i32
    %c0_i32_0 = arith.constant 0 : i32
    %c0_i32_1 = arith.constant 0 : i32
    return %arg1, %c0_i32, %c0_i32_0 : i32, i32, i32
  }
  func.func @transform_5(%arg0: i32, %arg1: i32) -> (i32, i32, i32) {
    %c0_i32 = arith.constant 0 : i32
    %c0_i32_0 = arith.constant 0 : i32
    %c0_i32_1 = arith.constant 0 : i32
    return %arg1, %c0_i32, %c0_i32_0 : i32, i32, i32
  }
  func.func @transform_6(%arg0: i32, %arg1: i32) -> (i32, i32, i32) {
    %c0_i32 = arith.constant 0 : i32
    %c0_i32_0 = arith.constant 0 : i32
    %c0_i32_1 = arith.constant 0 : i32
    return %arg1, %c0_i32, %c0_i32_0 : i32, i32, i32
  }
  func.func @transform_7(%arg0: i32, %arg1: i32) -> (i32, i32, i32) {
    %c0_i32 = arith.constant 0 : i32
    %c0_i32_0 = arith.constant 0 : i32
    %c0_i32_1 = arith.constant 0 : i32
    return %arg1, %c0_i32, %c0_i32_0 : i32, i32, i32
  }
  func.func @transform_8(%arg0: i32, %arg1: i32) -> (i32, i32, i32) {
    %c0_i32 = arith.constant 0 : i32
    %c0_i32_0 = arith.constant 0 : i32
    %c0_i32_1 = arith.constant 0 : i32
    return %arg1, %c0_i32, %c0_i32_0 : i32, i32, i32
  }
  func.func @transform_9(%arg0: i32, %arg1: i32) -> (i32, i32, i32) {
    %c0_i32 = arith.constant 0 : i32
    %c0_i32_0 = arith.constant 0 : i32
    %c0_i32_1 = arith.constant 0 : i32
    return %arg1, %c0_i32, %c0_i32_0 : i32, i32, i32
  }
  func.func @transform_10(%arg0: i32, %arg1: i32) -> (i32, i32, i32) {
    %c0_i32 = arith.constant 0 : i32
    %c0_i32_0 = arith.constant 0 : i32
    %c0_i32_1 = arith.constant 0 : i32
    return %arg1, %c0_i32, %c0_i32_0 : i32, i32, i32
  }
  func.func @transform_11(%arg0: i32, %arg1: i32) -> (i32, i32, i32) {
    %c0_i32 = arith.constant 0 : i32
    %c0_i32_0 = arith.constant 0 : i32
    %c0_i32_1 = arith.constant 0 : i32
    return %arg1, %c0_i32, %c0_i32_0 : i32, i32, i32
  }
  func.func @transform_12(%arg0: i32, %arg1: i32) -> (i32, i32, i32) {
    %c0_i32 = arith.constant 0 : i32
    %c0_i32_0 = arith.constant 0 : i32
    %c0_i32_1 = arith.constant 0 : i32
    return %arg1, %c0_i32, %c0_i32_0 : i32, i32, i32
  }
  func.func @transform_13(%arg0: i32, %arg1: i32) -> (i32, i32, i32) {
    %c0_i32 = arith.constant 0 : i32
    %c0_i32_0 = arith.constant 0 : i32
    %c0_i32_1 = arith.constant 0 : i32
    return %arg0, %c0_i32, %c0_i32_0 : i32, i32, i32
  }
}

</mosaic_0001>

<bundles_post_ra>
// kernel: tpu_custom_call.1
= control target key start
LH: loop header
LB: loop body
LE: loop exit
PB: predicated region body
PF: predicated region fallthrough
CT: control target
= control target key end

     0   :  { %s21251_s0 = inlined_call_operand.hbm [shape: f32[2,256,128], index: 0, kind: input, shape index: {}]   ;;  %s21252_s1 = inlined_call_operand.hbm [shape: bf16[2,9,128,128], index: 1, kind: input, shape index: {}]   ;;  %s21253_s2 = inlined_call_operand.vmem [shape: f32[2,1,128], index: 2, kind: input, shape index: {}]   ;;  %s21254_s3 = inlined_call_operand.hbm [shape: bf16[2,9,128,128], index: 3, kind: input, shape index: {}]   ;;  %s21255_s4 = inlined_call_operand.vmem [shape: f32[2,1,128], index: 4, kind: input, shape index: {}]   ;;  %s21256_s5 = inlined_call_operand.hbm [shape: bf16[2,128,128], index: 5, kind: input, shape index: {}]   ;;  %s21257_s6 = inlined_call_operand.vmem [shape: f32[2,1,128], index: 6, kind: input, shape index: {}]   ;;  %s21258_s7 = inlined_call_operand.hbm [shape: bf16[2,128,128], index: 7, kind: input, shape index: {}]   ;;  %s21259_s8 = inlined_call_operand.vmem [shape: f32[2,1,128], index: 8, kind: input, shape index: {}]   ;;  %s21260_s9 = inlined_call_operand.hbm [shape: bf16[2,128,128], index: 9, kind: input, shape index: {}]   ;;  %s21261_s10 = inlined_call_operand.vmem [shape: f32[2,1,128], index: 10, kind: input, shape index: {}]   ;;  %s21262_s11 = inlined_call_operand.hbm [shape: bf16[2,128,128], index: 11, kind: input, shape index: {}]   ;;  %s21263_s12 = inlined_call_operand.vmem [shape: f32[2,1,128], index: 12, kind: input, shape index: {}]   ;;  %s21264_s13 = inlined_call_operand.hbm [shape: f32[2,256,128], index: 13, kind: output, shape index: {}]  }
   0x1   :  { %21436 = sst [smem:[#allocation72_spill]] %s21251_s0 }
   0x2   :  { %21437 = sst [smem:[#allocation73_spill]] %s21252_s1 }
   0x3   :  { %21438 = sst [smem:[#allocation74_spill]] %s21253_s2 }
   0x4   :  { %21439 = sst [smem:[#allocation75_spill]] %s21254_s3 }
   0x5   :  { %21440 = sst [smem:[#allocation76_spill]] %s21255_s4 }
   0x6   :  { %21441 = sst [smem:[#allocation77_spill]] %s21256_s5 }
   0x7   :  { %21442 = sst [smem:[#allocation78_spill]] %s21257_s6 }
   0x8   :  { %21443 = sst [smem:[#allocation79_spill]] %s21258_s7 }
   0x9   :  { %21444 = sst [smem:[#allocation80_spill]] %s21259_s8 }
   0xa   :  { %21445 = sst [smem:[#allocation81_spill]] %s21260_s9 }
   0xb   :  { %21446 = sst [smem:[#allocation82_spill]] %s21261_s10 }
   0xc   :  { %21447 = sst [smem:[#allocation83_spill]] %s21262_s11 }
   0xd   :  { %21448 = sst [smem:[#allocation84_spill]] %s21263_s12 }
   0xe   :  { %21449 = sst [smem:[#allocation85_spill]] %s21264_s13 }
   0xf   :  { %18 = vsyncpa [#allocation5], 0 }
  0x10   :  { %20 = vsyncpa [#allocation5 + $0x1], 0 }
  0x11   :  { %21 = vsyncpa [#allocation8], 0 }
  0x12   :  { %23 = vsyncpa [#allocation8 + $0x1], 0 }
  0x13   :  { %24 = vsyncpa [#allocation11], 0 }
  0x14   :  { %26 = vsyncpa [#allocation11 + $0x1], 0 }
  0x15   :  { %27 = vsyncpa [#allocation14], 0 }
  0x16   :  { %29 = vsyncpa [#allocation14 + $0x1], 0 }
  0x17   :  { %30 = vsyncpa [#allocation6], 0 }
  0x18   :  { %32 = vsyncpa [#allocation6 + $0x1], 0  ;;  %s16868_s25 = smov 0   ;;  %s16870_s26 = smov 0  }
  0x19   :  { %s16872_s27 = smov 0   ;;  %s16874_s28 = smov 0  }
  0x1a   :  { %s16876_s29 = smov 0   ;;  %s16878_s30 = smov 0  }
  0x1b   :  { %s16880_s14 = smov 0   ;;  %s16882_s15 = smov 0  }
  0x1c   :  { %s16884_s16 = smov 0   ;;  %s16886_s17 = smov 0  }
  0x1d   :  { %s16888_s18 = smov 0  }
  0x1e LB: > { %21450 = sst [smem:[#allocation22_spill]] %s16742_s26  ;;  %s47_s19 = sadd.s32 1, %s16770_s16  ;;  %s16778_s18 = sphi %s16888_s18, %s38_s18   ;;  %s16774_s17 = sphi %s16886_s17, %s22175_s17   ;;  %s16770_s16 = sphi %s16884_s16, %s22174_s16   ;;  %s16766_s15 = sphi %s16882_s15, %s22173_s15   ;;  %s16762_s14 = sphi %s16880_s14, %s22172_s14   ;;  %s16758_s30 = sphi %s16878_s30, %s22171_s30   ;;  %s16754_s29 = sphi %s16876_s29, %s22170_s29   ;;  %s16750_s28 = sphi %s16874_s28, %s22169_s28   ;;  %s16746_s27 = sphi %s16872_s27, %s22168_s27   ;;  %s16742_s26 = sphi %s16870_s26, %s22167_s26   ;;  %s16738_s25 = sphi %s16868_s25, %s22166_s25  }
  0x1f   : > { %21451 = sst [smem:[#allocation23_spill]] %s16746_s27  ;;  %p21270_p0 = scmp.eq.s32.totalorder %s16778_s18, 0 }
  0x20   : > { %21452 = sst [smem:[#allocation24_spill]] %s16750_s28  ;;  %p16925_p1 = scmp.ge.s32.totalorder %s47_s19, 2 }
  0x21   : > { %21453 = sst [smem:[#allocation25_spill]] %s16754_s29  ;;  %s83_s21 = sadd.s32 1, %s16746_s27 }
  0x22   : > { %21454 = sst [smem:[#allocation26_spill]] %s16758_s30  ;;  %p90_p2 = scmp.ne.s32.totalorder %s16746_s27, %s16742_s26 }
  0x23   : > { %21455 = sst [smem:[#allocation27_spill]] %s16762_s14  ;;  %s22177_s19 = smov (%p16925_p1, %s47_s19), 0 }
  0x24   : > { %21456 = sst [smem:[#allocation28_spill]] %s16766_s15  ;;  %p92_p4 = por %p90_p2, %p21270_p0 }
  0x25   : > { %21457 = sst [smem:[#allocation29_spill]] %s16770_s16  ;;  %s80_s22 = ssub.s32 %s16770_s16, %s22177_s19 }
  0x26   : > { %21458 = sst [smem:[#allocation30_spill]] %s16774_s17  ;;  %p21269_p5 = scmp.lt.s32.totalorder %s16778_s18, 4 }
  0x27   : > { %21459 = sst [smem:[#allocation31_spill]] %s16778_s18  ;;  %p81_p6 = scmp.eq.s32.totalorder %s80_s22, 0 }
  0x28   : > { %s21460_s20 = scalar_select %p16925_p1, 1, 0 }
  0x29   : > { %21461 = sst [smem:[#allocation32_spill]] %s22177_s19  ;;  %s16944_s23 = sand.u32 1, %s16778_s18  }
  0x2a   : > { %s21267_s24 = sand.u32 1, %s16746_s27   ;;  %p16956_p7 = pnand %p21269_p5, %p92_p4 }
  0x2b   : > { %s16948_s13 = scalar_select %p81_p6, %s16746_s27, %s83_s21  }
  0x2c   : > { %s16952_s15 = smul.u32 576, %s21267_s24  ;;  %s21464_s1 = sld [smem:[#allocation73_spill]] }
  0x2d   : > { %21462 = sst [smem:[#allocation33_spill]] %s16948_s13  ;;  %s21268_s10 = smul.u32 9216, %s16770_s16 }
  0x2e   : > { %s21463_s12 = scalar_select %p16956_p7, 1, 0 }
  0x2f   : > { %s457_s21 = scalar_lea.vmem [#allocation7], %s16952_s15  ;;  %p16976_p9 = pneg %p16956_p7 }
  0x30   : > { %s464_s24 = sshll.u32 %s457_s21, 4  ;;  %s16969_s24 = int_to_ptr.vmem [resolvable:$true] %s464_s24 }
  0x32   : > { %s16966_s8 = scalar_lea.hbm %s21464_s1, %s21268_s10  ;;  %s16439_s10 = scalar_lea.hbm %s21464_s1, 18432 }
  0x33   : > { %s16434_s6 = scalar_lea.hbm %s16966_s8, 9216  ;;  %p16440_p12 = scmp.lt.u32.totalorder %s16966_s8, %s21464_s1 }
  0x34   : > { %p16435_p8 = scmp.ne.s32.totalorder %s16966_s8, %s16434_s6  ;;  %p16441_p13 = scmp.lt.u32.totalorder %s16439_s10, %s16434_s6 }
  0x35   : > { %p16443_p4 = scmp.lt.u32.totalorder %s16434_s6, %s16966_s8 }
  0x36   : > { %p16437_p10 = pnand %p16976_p9, %p16435_p8  ;;  %p16442_p2 = por %p16441_p13, %p16440_p12 }
  0x38   : > { %p16438_p11 = pneg %p16437_p10  ;;  %p16444_p6 = por %p16443_p4, %p16442_p2 }
  0x3a   : > { %p16445_p5 = pnand %p16444_p6, %p16438_p11 }
  0x3c   : > { %16448 = shalt.err (!%p16445_p5)
}
  0x3d   : > { %s16449_s13 = scalar_lea.vmem %s16969_s24, 9216  ;;  %s16780_s19 = smov [#allocation7]  }
  0x3e   : > { %p16450_p8 = scmp.ne.s32.totalorder %s16969_s24, %s16449_s13  ;;  %s16454_s22 = sshll.u32 %s16780_s19, 4  ;;  %s16455_s22 = int_to_ptr.vmem [resolvable:$false] %s16454_s22 }
  0x3f   : > { %s16456_s2 = scalar_lea.vmem %s16455_s22, 18432  ;;  %p16457_p0 = scmp.lt.s32.totalorder %s16969_s24, %s16455_s22 }
  0x40   : > { %p16452_p10 = pnand %p16450_p8, %p16976_p9  ;;  %p16458_p1 = scmp.lt.s32.totalorder %s16456_s2, %s16449_s13 }
  0x42   : > { %p16453_p3 = pneg %p16452_p10  ;;  %p16459_p12 = por %p16458_p1, %p16457_p0 }
  0x44   : > { %p16460_p13 = pnand %p16459_p12, %p16453_p3 }
  0x46   : > { %16463 = shalt.err (!%p16460_p13)
}
  0x47   : > { %s21276_s6 = smov 64   ;;  %s21280_s10 = smov 4  }
  0x48   : > { %s21466_s13 = scalar_lea.sflag [#allocation8], %s16944_s23  ;;  %p12837_p0 = scmp.ge.s32.totalorder %s16778_s18, 1 }
  0x49   : > { %15953 = dma.hbm_to_vmem [thread:$0]  (!%p16956_p7), %s16966_s8, 9216, %s16969_s24, %s21466_s13, %s21276_s6, %s21276_s6, %s21280_s10  }
  0x4a   : > { %p613_p1 = scmp.lt.s32.totalorder %s16778_s18, 5  ;;  %s21467_s21 = sand.u32 1, %s16746_s27  }
  0x4b   : > { %s17008_s19 = sshll.u32 %s21467_s21, 6  ;;  %s17015_s2 = sshll.u32 %s16770_s16, 10 }
  0x4c   : > { %p17010_p3 = pnand %p12837_p0, %p613_p1  ;;  %s511_s1 = scalar_lea.vmem [#allocation10], %s17008_s19 }
  0x4d   : > { %s518_s14 = sshll.u32 %s511_s1, 4  ;;  %s21469_s5 = sld [smem:[#allocation77_spill]]  ;;  %s17024_s14 = int_to_ptr.vmem [resolvable:$true] %s518_s14 }
  0x4e   : > { %s21468_s22 = scalar_select %p17010_p3, 1, 0 }
  0x4f   : > { %s21278_s8 = scalar_lea.sflag [#allocation11], %s16944_s23 }
  0x53   : > { %s17022_s3 = scalar_lea.hbm %s21469_s5, %s17015_s2  ;;  %s16469_s1 = scalar_lea.hbm %s21469_s5, 2048 }
  0x54   : > { %s16464_s24 = scalar_lea.hbm %s17022_s3, 1024  ;;  %p16470_p4 = scmp.lt.u32.totalorder %s17022_s3, %s21469_s5 }
  0x55   : > { %p16465_p5 = scmp.ne.s32.totalorder %s17022_s3, %s16464_s24  ;;  %p16471_p6 = scmp.lt.u32.totalorder %s16469_s1, %s16464_s24 }
  0x56   : > { %p16473_p10 = scmp.lt.u32.totalorder %s16464_s24, %s17022_s3 }
  0x57   : > { %p16467_p11 = pnand %p16465_p5, %p16976_p9  ;;  %p16472_p8 = por %p16471_p6, %p16470_p4 }
  0x59   : > { %p16468_p2 = pneg %p16467_p11  ;;  %p16474_p12 = por %p16473_p10, %p16472_p8 }
  0x5b   : > { %p16475_p13 = pnand %p16474_p12, %p16468_p2 }
  0x5d   : > { %16478 = shalt.err (!%p16475_p13)
}
  0x5e   : > { %s16479_s11 = scalar_lea.vmem %s17024_s14, 1024  ;;  %s16783_s13 = smov [#allocation10]  }
  0x5f   : > { %p16480_p0 = scmp.ne.s32.totalorder %s17024_s14, %s16479_s11  ;;  %s16484_s21 = sshll.u32 %s16783_s13, 4  ;;  %s16485_s21 = int_to_ptr.vmem [resolvable:$false] %s16484_s21 }
  0x60   : > { %s16486_s6 = scalar_lea.vmem %s16485_s21, 2048  ;;  %p16487_p11 = scmp.lt.s32.totalorder %s17024_s14, %s16485_s21 }
  0x61   : > { %p16482_p1 = pnand %p16480_p0, %p16976_p9  ;;  %p16488_p3 = scmp.lt.s32.totalorder %s16486_s6, %s16479_s11 }
  0x63   : > { %p16483_p5 = pneg %p16482_p1  ;;  %p16489_p4 = por %p16488_p3, %p16487_p11 }
  0x65   : > { %p16490_p6 = pnand %p16489_p4, %p16483_p5 }
  0x67   : > { %16493 = shalt.err (!%p16490_p6)
}
  0x68   : > { %s21470_s24 = smov 64   ;;  %s21471_s9 = sld [smem:[#allocation81_spill]] }
  0x69   : > { %15959 = dma.hbm_to_vmem [thread:$0]  (!%p16956_p7), %s17022_s3, 1024, %s17024_s14, %s21278_s8, %s21470_s24, %s21470_s24, %s21280_s10  }
  0x6a   : > { %s565_s13 = scalar_lea.vmem [#allocation13], %s17008_s19  ;;  %s21279_s6 = scalar_lea.sflag [#allocation14], %s16944_s23 }
  0x6b   : > { %s572_s21 = sshll.u32 %s565_s13, 4  ;;  %s17060_s21 = int_to_ptr.vmem [resolvable:$true] %s572_s21 }
  0x6e   : > { %s17057_s11 = scalar_lea.hbm %s21471_s9, %s17015_s2  ;;  %s16499_s1 = scalar_lea.hbm %s21471_s9, 2048 }
  0x6f   : > { %s16494_s5 = scalar_lea.hbm %s17057_s11, 1024  ;;  %p16500_p10 = scmp.lt.u32.totalorder %s17057_s11, %s21471_s9 }
  0x70   : > { %p16495_p3 = scmp.ne.s32.totalorder %s17057_s11, %s16494_s5  ;;  %p16501_p12 = scmp.lt.u32.totalorder %s16499_s1, %s16494_s5 }
  0x71   : > { %p16503_p0 = scmp.lt.u32.totalorder %s16494_s5, %s17057_s11 }
  0x72   : > { %p16497_p2 = pnand %p16495_p3, %p16976_p9  ;;  %p16502_p13 = por %p16501_p12, %p16500_p10 }
  0x74   : > { %p16498_p8 = pneg %p16497_p2  ;;  %p16504_p1 = por %p16503_p0, %p16502_p13 }
  0x76   : > { %p16505_p5 = pnand %p16504_p1, %p16498_p8 }
  0x78   : > { %16508 = shalt.err (!%p16505_p5)
}
  0x79   : > { %s16509_s13 = scalar_lea.vmem %s17060_s21, 1024  ;;  %s16784_s3 = smov [#allocation13]  }
  0x7a   : > { %p16510_p11 = scmp.ne.s32.totalorder %s17060_s21, %s16509_s13  ;;  %s16514_s14 = sshll.u32 %s16784_s3, 4  ;;  %s16515_s14 = int_to_ptr.vmem [resolvable:$false] %s16514_s14 }
  0x7b   : > { %s16516_s8 = scalar_lea.vmem %s16515_s14, 2048  ;;  %p16517_p3 = scmp.lt.s32.totalorder %s17060_s21, %s16515_s14 }
  0x7c   : > { %p16512_p4 = pnand %p16510_p11, %p16976_p9  ;;  %p16518_p2 = scmp.lt.s32.totalorder %s16516_s8, %s16509_s13 }
  0x7e   : > { %p16513_p6 = pneg %p16512_p4  ;;  %p16519_p10 = por %p16518_p2, %p16517_p3 }
  0x80   : > { %p16520_p12 = pnand %p16519_p10, %p16513_p6 }
  0x82   : > { %16523 = shalt.err (!%p16520_p12)
}
  0x83   : > { %15965 = dma.hbm_to_vmem [thread:$0]  (!%p16956_p7), %s17057_s11, 1024, %s17060_s21, %s21279_s6, %s21470_s24, %s21470_s24, %s21280_s10  }
  0x84   : > { %s17090_s5 = sadd.s32 4294967295, %s16778_s18   ;;  %s12817_s1 = sadd.s32 4294967294, %s16778_s18  }
  0x85   : > { %21472 = sst [smem:[#allocation34_spill]] %s17090_s5  ;;  %s50_s7 = sadd.s32 1, %s16774_s17 }
  0x86   : > { %p21473_p8 = scmp.ne.s32.totalorder %s21460_s20, 0  ;;  %s57_s13 = sadd.s32 1, %s16758_s30 }
  0x87   : > { %p64_p13 = scmp.ne.s32.totalorder %s16758_s30, %s16754_s29  ;;  %p70_p1 = scmp.ne.s32.totalorder %s16754_s29, %s16750_s28 }
  0x88   : > { %s22179_s7 = smov (!%p21473_p8, %s50_s7), %s16774_s17  ;;  %p21474_p5 = scmp.eq.s32.totalorder %s16778_s18, 0 }
  0x89   : > { %p52_p0 = scmp.ge.s32.totalorder %s22179_s7, 2  ;;  %p71_p4 = scmp.eq.s32.totalorder %s17090_s5, 0 }
  0x8a   : > { %p17104_p11 = por %p21474_p5, %p64_p13  ;;  %p21478_p3 = scmp.ne.s32.totalorder %s16742_s26, %s16738_s25 }
  0x8b   : > { %s22181_s7 = smov (%p52_p0, %s22179_s7), 0  ;;  %p17114_p6 = por %p71_p4, %p70_p1 }
  0x8c   : > { %21476 = sst [smem:[#allocation35_spill]] %s22181_s7  ;;  %p17121_p2 = por %p21478_p3, %p71_p4 }
  0x8d   : > { %s21477_s20 = scalar_select %p17114_p6, 1, 0 }
  0x8e   : > { %s21479_s21 = scalar_select %p17121_p2, 1, 0 }
  0x8f   : > { %s54_s3 = ssub.s32 %s16774_s17, %s22181_s7  ;;  %p406_p10 = scmp.eq.s32.totalorder %s17090_s5, 3 }
  0x90   : > { %21480 = sst [smem:[#allocation36_spill]] %s21479_s21  ;;  %p55_p12 = scmp.eq.s32.totalorder %s54_s3, 0 }
  0x91   : > { %p412_p8 = scmp.eq.s32.totalorder %s12817_s1, 3  ;;  %p17128_p5 = por %p406_p10, %p64_p13 }
  0x92   : > { %s432_s8 = sand.u32 1, %s16758_s30   ;;  %s13550_s9 = sshll.u32 %s16774_s17, 12 }
  0x93   : > { %s21481_s14 = scalar_select %p17128_p5, 1, 0 }
  0x94   : > { %s17134_s6 = scalar_select %p55_p12, %s16758_s30, %s57_s13  }
  0x95   : > { %21482 = sst [smem:[#allocation37_spill]] %s21481_s14  ;;  %p17139_p0 = por %p412_p8, %p70_p1 }
  0x96   : > { %21483 = sst [smem:[#allocation38_spill]] %s17134_s6  ;;  %s12820_s25 = sshll.u32 %s432_s8, 8 }
  0x97   : > { %s21484_s10 = scalar_select %p17139_p0, 1, 0 }
  0x98   : > { %s21486_s0 = sld [smem:[#allocation72_spill]]  ;;  %s436_s1 = scalar_lea.vmem [#allocation4], %s12820_s25 }
  0x99   : > { %21485 = sst [smem:[#allocation39_spill]] %s21484_s10  ;;  %s443_s3 = sshll.u32 %s436_s1, 4  ;;  %s17157_s3 = int_to_ptr.vmem [resolvable:$true] %s443_s3 }
  0x9a   : > { %p21487_p13 = scmp.lt.s32.totalorder %s16778_s18, 4  ;;  %s17159_s17 = scalar_lea.sflag [#allocation5], %s432_s8 }
  0x9c   : > { %p17153_p4 = pnand %p21487_p13, %p17104_p11 }
  0x9e   : > { %s17147_s7 = scalar_lea.hbm %s21486_s0, %s13550_s9  ;;  %p16526_p3 = pneg %p17153_p4 }
  0x9f   : > { %s16524_s9 = scalar_lea.hbm %s17147_s7, 4096  ;;  %s16529_s21 = scalar_lea.hbm %s21486_s0, 8192 }
  0xa0   : > { %p16525_p1 = scmp.ne.s32.totalorder %s17147_s7, %s16524_s9  ;;  %p16530_p11 = scmp.lt.u32.totalorder %s17147_s7, %s21486_s0 }
  0xa1   : > { %p16531_p8 = scmp.lt.u32.totalorder %s16529_s21, %s16524_s9  ;;  %p16533_p0 = scmp.lt.u32.totalorder %s16524_s9, %s17147_s7 }
  0xa2   : > { %p16527_p10 = pnand %p16526_p3, %p16525_p1 }
  0xa3   : > { %p16532_p13 = por %p16531_p8, %p16530_p11 }
  0xa4   : > { %p16528_p12 = pneg %p16527_p10 }
  0xa5   : > { %p16534_p5 = por %p16533_p0, %p16532_p13 }
  0xa7   : > { %p16535_p2 = pnand %p16534_p5, %p16528_p12 }
  0xa9   : > { %16538 = shalt.err (!%p16535_p2)
}
  0xaa   : > { %s16539_s8 = scalar_lea.vmem %s17157_s3, 4096  ;;  %s16785_s27 = smov [#allocation4]  }
  0xab   : > { %p16540_p1 = scmp.ne.s32.totalorder %s17157_s3, %s16539_s8  ;;  %s16544_s11 = sshll.u32 %s16785_s27, 4  ;;  %s16545_s11 = int_to_ptr.vmem [resolvable:$false] %s16544_s11 }
  0xac   : > { %s16546_s25 = scalar_lea.vmem %s16545_s11, 8192  ;;  %p16547_p7 = scmp.lt.s32.totalorder %s17157_s3, %s16545_s11 }
  0xad   : > { %p16542_p10 = pnand %p16540_p1, %p16526_p3  ;;  %p16548_p11 = scmp.lt.s32.totalorder %s16546_s25, %s16539_s8 }
  0xaf   : > { %p16543_p6 = pneg %p16542_p10  ;;  %p16549_p8 = por %p16548_p11, %p16547_p7 }
  0xb1   : > { %p16550_p0 = pnand %p16549_p8, %p16543_p6 }
  0xb3   : > { %16553 = shalt.err (!%p16550_p0)
}
  0xb4   : > { %s16786_s9 = smov 128   ;;  %s16787_s21 = smov 8  }
  0xb5   : > { %15950 = dma.hbm_to_vmem [thread:$0]  (!%p17153_p4), %s17147_s7, 4096, %s17157_s3, %s17159_s17, %s16786_s9, %s16786_s9, %s16787_s21  }
  0xb6   : > { %s21489_s1 = smul.u32 9216, %s16770_s16  ;;  %s21490_s11 = sld [smem:[#allocation75_spill]] }
  0xb7   : > { %s484_s25 = scalar_lea.vmem [#allocation9], %s16952_s15  ;;  %s21491_s28 = sld [smem:[#allocation79_spill]] }
  0xb8   : > { %s491_s6 = sshll.u32 %s484_s25, 4  ;;  %s17195_s6 = int_to_ptr.vmem [resolvable:$true] %s491_s6 }
  0xbc   : > { %s17192_s8 = scalar_lea.hbm %s21490_s11, %s21489_s1  ;;  %s16559_s3 = scalar_lea.hbm %s21490_s11, 18432 }
  0xbd   : > { %s21492_s5 = smov %s21491_s28  ;;  %s17201_s18 = scalar_lea.hbm %s21491_s28, %s17015_s2 }
  0xbe   : > { %s16554_s17 = scalar_lea.hbm %s17192_s8, 9216  ;;  %p16560_p5 = scmp.lt.u32.totalorder %s17192_s8, %s21490_s11 }
  0xbf   : > { %p16555_p7 = scmp.ne.s32.totalorder %s17192_s8, %s16554_s17  ;;  %p16561_p4 = scmp.lt.u32.totalorder %s16559_s3, %s16554_s17 }
  0xc0   : > { %p16563_p12 = scmp.lt.u32.totalorder %s16554_s17, %s17192_s8 }
  0xc1   : > { %p16557_p6 = pnand %p16555_p7, %p16976_p9  ;;  %p16562_p3 = por %p16561_p4, %p16560_p5 }
  0xc3   : > { %p16558_p2 = pneg %p16557_p6  ;;  %p16564_p13 = por %p16563_p12, %p16562_p3 }
  0xc5   : > { %p16565_p1 = pnand %p16564_p13, %p16558_p2 }
  0xc7   : > { %16568 = shalt.err (!%p16565_p1)
}
  0xc8   : > { %s16569_s28 = scalar_lea.vmem %s17195_s6, 9216  ;;  %s16788_s30 = smov [#allocation9]  }
  0xc9   : > { %p16570_p10 = scmp.ne.s32.totalorder %s17195_s6, %s16569_s28  ;;  %s16574_s15 = sshll.u32 %s16788_s30, 4  ;;  %s16575_s15 = int_to_ptr.vmem [resolvable:$false] %s16574_s15 }
  0xca   : > { %s16576_s10 = scalar_lea.vmem %s16575_s15, 18432  ;;  %p16577_p0 = scmp.lt.s32.totalorder %s17195_s6, %s16575_s15 }
  0xcb   : > { %p16572_p11 = pnand %p16570_p10, %p16976_p9  ;;  %p16578_p7 = scmp.lt.s32.totalorder %s16576_s10, %s16569_s28 }
  0xcd   : > { %p16573_p8 = pneg %p16572_p11  ;;  %p16579_p6 = por %p16578_p7, %p16577_p0 }
  0xcf   : > { %p16580_p5 = pnand %p16579_p6, %p16573_p8 }
  0xd1   : > { %16583 = shalt.err (!%p16580_p5)
}
  0xd2   : > { %p21493_p2 = scmp.ne.s32.totalorder %s21463_s12, 0  ;;  %s21494_s21 = smov 4  }
  0xd3   : > { %s21495_s1 = scalar_lea.sflag [#allocation8], %s16944_s23  ;;  %s538_s27 = scalar_lea.vmem [#allocation12], %s17008_s19 }
  0xd4   : > { %15956 = dma.hbm_to_vmem [thread:$0]  (!%p21493_p2), %s17192_s8, 9216, %s17195_s6, %s21495_s1, %s21470_s24, %s21470_s24, %s21494_s21  }
  0xd5   : > { %s545_s25 = sshll.u32 %s538_s27, 4  ;;  %s21496_s7 = sld [smem:[#allocation83_spill]]  ;;  %s17230_s25 = int_to_ptr.vmem [resolvable:$true] %s545_s25 }
  0xd6   : > { %s16584_s13 = scalar_lea.hbm %s17201_s18, 1024  ;;  %s16589_s30 = scalar_lea.hbm %s21492_s5, 2048 }
  0xd7   : > { %p16585_p4 = scmp.ne.s32.totalorder %s17201_s18, %s16584_s13  ;;  %p16590_p13 = scmp.lt.u32.totalorder %s17201_s18, %s21492_s5 }
  0xd8   : > { %p16591_p1 = scmp.lt.u32.totalorder %s16589_s30, %s16584_s13  ;;  %p16593_p11 = scmp.lt.u32.totalorder %s16584_s13, %s17201_s18 }
  0xd9   : > { %p16587_p3 = pnand %p16585_p4, %p16976_p9 }
  0xda   : > { %p16592_p10 = por %p16591_p1, %p16590_p13 }
  0xdb   : > { %s17236_s3 = scalar_lea.hbm %s21496_s7, %s17015_s2  ;;  %p16588_p12 = pneg %p16587_p3 }
  0xdc   : > { %p16594_p8 = por %p16593_p11, %p16592_p10 }
  0xde   : > { %p16595_p0 = pnand %p16594_p8, %p16588_p12 }
  0xe0   : > { %16598 = shalt.err (!%p16595_p0)
}
  0xe1   : > { %s16599_s2 = scalar_lea.vmem %s17230_s25, 1024  ;;  %s16789_s8 = smov [#allocation12]  }
  0xe2   : > { %p16600_p7 = scmp.ne.s32.totalorder %s17230_s25, %s16599_s2  ;;  %s16604_s10 = sshll.u32 %s16789_s8, 4  ;;  %s16605_s10 = int_to_ptr.vmem [resolvable:$false] %s16604_s10 }
  0xe3   : > { %s16606_s1 = scalar_lea.vmem %s16605_s10, 2048  ;;  %p16607_p4 = scmp.lt.s32.totalorder %s17230_s25, %s16605_s10 }
  0xe4   : > { %p16602_p6 = pnand %p16600_p7, %p16976_p9  ;;  %p16608_p3 = scmp.lt.s32.totalorder %s16606_s1, %s16599_s2 }
  0xe6   : > { %p16603_p5 = pneg %p16602_p6  ;;  %p16609_p13 = por %p16608_p3, %p16607_p4 }
  0xe8   : > { %p16610_p1 = pnand %p16609_p13, %p16603_p5 }
  0xea   : > { %16613 = shalt.err (!%p16610_p1)
}
  0xeb   : > { %s21497_s27 = scalar_lea.sflag [#allocation11], %s16944_s23  ;;  %s592_s17 = scalar_lea.vmem [#allocation15], %s17008_s19 }
  0xec   : > { %15962 = dma.hbm_to_vmem [thread:$0]  (!%p21493_p2), %s17201_s18, 1024, %s17230_s25, %s21497_s27, %s21470_s24, %s21470_s24, %s21494_s21  }
  0xed   : > { %s599_s0 = sshll.u32 %s592_s17, 4  ;;  %s16614_s13 = scalar_lea.hbm %s17236_s3, 1024  ;;  %s17265_s0 = int_to_ptr.vmem [resolvable:$true] %s599_s0 }
  0xee   : > { %p16615_p12 = scmp.ne.s32.totalorder %s17236_s3, %s16614_s13  ;;  %s16619_s30 = scalar_lea.hbm %s21496_s7, 2048 }
  0xef   : > { %p16620_p8 = scmp.lt.u32.totalorder %s17236_s3, %s21496_s7  ;;  %p16621_p0 = scmp.lt.u32.totalorder %s16619_s30, %s16614_s13 }
  0xf0   : > { %p16617_p10 = pnand %p16615_p12, %p16976_p9  ;;  %p16623_p6 = scmp.lt.u32.totalorder %s16614_s13, %s17236_s3 }
  0xf1   : > { %p16622_p7 = por %p16621_p0, %p16620_p8 }
  0xf2   : > { %p16618_p11 = pneg %p16617_p10 }
  0xf3   : > { %p16624_p5 = por %p16623_p6, %p16622_p7 }
  0xf5   : > { %p16625_p4 = pnand %p16624_p5, %p16618_p11 }
  0xf7   : > { %16628 = shalt.err (!%p16625_p4)
}
  0xf8   : > { %s16629_s18 = scalar_lea.vmem %s17265_s0, 1024  ;;  %s16790_s19 = smov [#allocation15]  }
  0xf9   : > { %p16630_p3 = scmp.ne.s32.totalorder %s17265_s0, %s16629_s18  ;;  %s16634_s25 = sshll.u32 %s16790_s19, 4  ;;  %s16635_s25 = int_to_ptr.vmem [resolvable:$false] %s16634_s25 }
  0xfa   : > { %s16636_s2 = scalar_lea.vmem %s16635_s25, 2048  ;;  %p16637_p12 = scmp.lt.s32.totalorder %s17265_s0, %s16635_s25 }
  0xfb   : > { %p16632_p13 = pnand %p16630_p3, %p16976_p9  ;;  %p16638_p10 = scmp.lt.s32.totalorder %s16636_s2, %s16629_s18 }
  0xfd   : > { %p16633_p1 = pneg %p16632_p13  ;;  %p16639_p8 = por %p16638_p10, %p16637_p12 }
  0xff   : > { %p16640_p0 = pnand %p16639_p8, %p16633_p1 }
 0x101   : > { %16643 = shalt.err (!%p16640_p0)
}
 0x102   : > { %s21498_s8 = scalar_lea.sflag [#allocation14], %s16944_s23  ;;  %p21499_p9 = scmp.ne.s32.totalorder %s21468_s22, 0 }
 0x103   : > { %15968 = dma.hbm_to_vmem [thread:$0]  (!%p21493_p2), %s17236_s3, 1024, %s17265_s0, %s21498_s8, %s21470_s24, %s21470_s24, %s21494_s21  }
 0x104   : > { %617 = sbr.rel (%p21499_p9) target bundleno = 3398 (0xd46), region = 72 }
 0x10b   : > { %s17296_s4 = sand.u32 1, %s16754_s29   ;;  %p21500_p11 = scmp.ne.s32.totalorder %s21477_s20, 0 }
 0x10c   : > { %s21298_s10 = sshll.u32 %s17296_s4, 8  ;;  %s620_s12 = scalar_lea.sflag [#allocation5], %s17296_s4 }
 0x10d   : > { %s17302_s1 = scalar_lea.vmem [#allocation4], %s21298_s10 }
 0x10e   : > { %16717 = dma.done.wait (%p21500_p11), %s620_s12, 4096  }
 0x10f   : > { %16719 = vsyncadd (%p21500_p11), %s620_s12, 4294963200  ;;  %s21501_s23 = sld [smem:[#allocation34_spill]]  ;;  %s21502_s22 = sld [smem:[#allocation36_spill]] }
 0x110   : > { %s630_s21 = sand.u32 1, %s16742_s26  }
 0x111   : > { %s15858_s3 = smul.u32 576, %s630_s21 }
 0x113   : > { %s17310_s17 = scalar_lea.vmem [#allocation7], %s15858_s3 }
 0x115   : > { %s628_s24 = sand.u32 1, %s21501_s23   ;;  %p21503_p2 = scmp.ne.s32.totalorder %s21502_s22, 0 }
 0x116   : > { %s629_s27 = scalar_lea.sflag [#allocation8], %s628_s24 }
 0x117   : > { %16721 = dma.done.wait (%p21503_p2), %s629_s27, 18432  }
 0x118   : > { %16723 = vsyncadd (%p21503_p2), %s629_s27, 4294948864  ;;  %s17316_s0 = sshll.u32 %s630_s21, 6  ;;  %s17318_s20 = scalar_lea.vmem [#allocation9], %s15858_s3 }
 0x119   : > { %s647_s13 = scalar_lea.sflag [#allocation11], %s628_s24  ;;  %s17321_s9 = scalar_lea.vmem [#allocation10], %s17316_s0 }
 0x11a   : > { %16725 = dma.done.wait (%p21503_p2), %s647_s13, 2048  }
 0x11b   : > { %16727 = vsyncadd (%p21503_p2), %s647_s13, 4294965248  ;;  %s17328_s28 = scalar_lea.vmem [#allocation12], %s17316_s0  ;;  %s665_s30 = scalar_lea.sflag [#allocation14], %s628_s24 }
 0x11c   : > { %s17331_s15 = scalar_lea.vmem [#allocation13], %s17316_s0 }
 0x11d   : > { %16729 = dma.done.wait (%p21503_p2), %s665_s30, 2048  }
 0x11e   : > { %16731 = vsyncadd (%p21503_p2), %s665_s30, 4294965248  ;;  %s21504_s6 = sld [smem:[#allocation27_spill]]  ;;  %s21505_s2 = sld [smem:[#allocation74_spill]]  ;;  %v787_v0 = vlaneseq }
 0x11f   : > { %s21506_s22 = sld [smem:[#allocation76_spill]]  ;;  %s21507_s27 = sld [smem:[#allocation78_spill]] }
 0x120   : > { %s21508_s5 = sld [smem:[#allocation80_spill]]  ;;  %s21509_s11 = sld [smem:[#allocation82_spill]]  ;;  %v17367_v1 = vshrl.u32 %v787_v0, 7 }
 0x121   : > { %s18467_s26 = scalar_lea.vmem [#allocation15], %s17316_s0  ;;  %s21809_s29 = sshll.u32 %s17296_s4, 8 }
 0x122   : > { %21511 = vst [vmem:[#allocation40_spill] sm:$0xff] %v17367_v1  ;;  %v789_v2 = vadd.s32 8, %v17367_v1  ;;  %v790_v3 = vadd.s32 16, %v17367_v1  ;;  %v791_v4 = vadd.s32 24, %v17367_v1  ;;  %v792_v5 = vadd.s32 32, %v17367_v1 }
 0x123   : > { %v793_v6 = vadd.s32 40, %v17367_v1  ;;  %v794_v7 = vadd.s32 48, %v17367_v1  ;;  %v795_v8 = vadd.s32 56, %v17367_v1  ;;  %v796_v9 = vadd.s32 64, %v17367_v1 }
 0x124   : > { %p768_p7 = scmp.lt.s32.totalorder %s21504_s6, 1  ;;  %v797_v10 = vadd.s32 72, %v17367_v1  ;;  %v798_v11 = vadd.s32 80, %v17367_v1  ;;  %v799_v12 = vadd.s32 88, %v17367_v1  ;;  %v800_v13 = vadd.s32 96, %v17367_v1  ;;  %p12844_p6 = scmp.ne.s32.totalorder %s21504_s6, 0 }
 0x125   : > { %v801_v14 = vadd.s32 104, %v17367_v1  ;;  %v802_v15 = vadd.s32 112, %v17367_v1  ;;  %v803_v16 = vadd.s32 120, %v17367_v1  ;;  %v804_v17 = vadd.s32 128, %v17367_v1 }
 0x126   : > { %s17339_s18 = scalar_select %p768_p7, %s21504_s6, 1  ;;  %v805_v18 = vadd.s32 136, %v17367_v1  ;;  %v806_v19 = vadd.s32 144, %v17367_v1  ;;  %v807_v20 = vadd.s32 152, %v17367_v1  ;;  %v808_v21 = vadd.s32 160, %v17367_v1 }
 0x127   : > { %v809_v22 = vadd.s32 168, %v17367_v1  ;;  %v810_v23 = vadd.s32 176, %v17367_v1  ;;  %v811_v24 = vadd.s32 184, %v17367_v1  ;;  %v812_v25 = vadd.s32 192, %v17367_v1 }
 0x128   : > { %s17345_s8 = scalar_lea.vmem %s21505_s2, %s17339_s18  ;;  %s773_s24 = scalar_lea.vmem %s21506_s22, %s17339_s18  ;;  %v813_v26 = vadd.s32 200, %v17367_v1  ;;  %v814_v27 = vadd.s32 208, %v17367_v1  ;;  %v815_v28 = vadd.s32 216, %v17367_v1  ;;  %v816_v29 = vadd.s32 224, %v17367_v1 }
 0x129   : > { %s776_s13 = scalar_lea.vmem %s21507_s27, %s17339_s18  ;;  %s779_s7 = scalar_lea.vmem %s21508_s5, %s17339_s18  ;;  %v817_v30 = vadd.s32 232, %v17367_v1  ;;  %v17399_v31 = vadd.s32 19, %v17367_v1  ;;  %v818_v32 = vadd.s32 240, %v17367_v1  ;;  %v819_v33 = vadd.s32 248, %v17367_v1 }
 0x12a   : > { %s782_s16 = scalar_lea.vmem %s21509_s11, %s17339_s18  ;;  %s21510_s2 = sld [smem:[#allocation84_spill]]  ;;  %v820_v34 = vadd.s32 256, %v17367_v1  ;;  %v821_v35 = vadd.s32 264, %v17367_v1  ;;  %v822_v36 = vadd.s32 272, %v17367_v1  ;;  %v823_v37 = vadd.s32 280, %v17367_v1 }
 0x12b   : > { %v17407_v38 = vadd.s32 19, %v789_v2  ;;  %v17409_v39 = vadd.s32 19, %v790_v3  ;;  %v17411_v40 = vadd.s32 19, %v791_v4  ;;  %v17413_v41 = vadd.s32 19, %v792_v5  ;;  %s18471_s5 = scalar_lea.vmem [#allocation16], %s21809_s29 }
 0x12c   : > { %v17415_v42 = vadd.s32 19, %v793_v6  ;;  %v17417_v43 = vadd.s32 19, %v794_v7  ;;  %v17419_v44 = vadd.s32 19, %v795_v8  ;;  %v17421_v45 = vadd.s32 19, %v796_v9 }
 0x12d   : > { %v17424_v46 = vmul.u32.u64.low 3817748708, %v17399_v31  ;;  %v17425_v47 = vmul.u32.u64.high 3817748708, %v17399_v31, %v17424_v46  ;;  %v17427_v48 = vadd.s32 19, %v797_v10  ;;  %v17429_v49 = vadd.s32 19, %v798_v11 }
 0x12e   : > { %v17431_v50 = vadd.s32 19, %v799_v12  ;;  %v17433_v51 = vadd.s32 19, %v800_v13  ;;  %v17436_v52 = vmul.u32.u64.low 3817748708, %v17407_v38  ;;  %v17437_v53 = vmul.u32.u64.high 3817748708, %v17407_v38, %v17436_v52 }
 0x12f   : > { %v17440_v54 = vmul.u32.u64.low 3817748708, %v17409_v39  ;;  %v17441_v55 = vmul.u32.u64.high 3817748708, %v17409_v39, %v17440_v54  ;;  %v17443_v56 = vadd.s32 19, %v801_v14  ;;  %v17445_v57 = vadd.s32 19, %v802_v15 }
 0x130   : > { %s785_s14 = scalar_lea.vmem %s21510_s2, %s17339_s18  ;;  %v17448_v58 = vmul.u32.u64.low 3817748708, %v17411_v40  ;;  %v17449_v59 = vmul.u32.u64.high 3817748708, %v17411_v40, %v17448_v58  ;;  %v17451_v60 = vadd.s32 19, %v803_v16  ;;  %v17453_v61 = vadd.s32 19, %v804_v17 }
 0x131   : > { %v17455_v62 = vadd.s32 19, %v805_v18  ;;  %v17457_v63 = vadd.s32 19, %v806_v19  ;;  %v17459_v0 = vadd.s32 19, %v807_v20  ;;  %v17461_v2 = vadd.s32 19, %v808_v21 }
 0x132   : > { %v17463_v3 = vadd.s32 19, %v809_v22  ;;  %v17465_v4 = vadd.s32 19, %v810_v23  ;;  %v17468_v5 = vmul.u32.u64.low 3817748708, %v17413_v41  ;;  %v17469_v6 = vmul.u32.u64.high 3817748708, %v17413_v41, %v17468_v5 }
 0x133   : > { %21512 = vst [vmem:[#allocation41_spill] sm:$0xff] %v17457_v63  ;;  %21513 = vst [vmem:[#allocation42_spill] sm:$0xff] %v17461_v2  ;;  %v17472_v7 = vmul.u32.u64.low 3817748708, %v17415_v42  ;;  %v17473_v8 = vmul.u32.u64.high 3817748708, %v17415_v42, %v17472_v7  ;;  %v17475_v9 = vadd.s32 19, %v811_v24  ;;  %v17477_v10 = vadd.s32 19, %v812_v25 }
 0x134   : > { %v17480_v11 = vmul.u32.u64.low 3817748708, %v17417_v43  ;;  %v17481_v12 = vmul.u32.u64.high 3817748708, %v17417_v43, %v17480_v11  ;;  %v17483_v13 = vadd.s32 19, %v813_v26  ;;  %v866_v14 = vshrl.u32 %v17425_v47, 4 }
 0x135   : > { %v17487_v15 = vmul.u32.u64.low 3817748708, %v17419_v44  ;;  %v17488_v16 = vmul.u32.u64.high 3817748708, %v17419_v44, %v17487_v15  ;;  %v17490_v17 = vadd.s32 19, %v814_v27  ;;  %v17492_v18 = vadd.s32 19, %v815_v28 }
 0x136   : > { %v17494_v19 = vadd.s32 19, %v816_v29  ;;  %v17496_v20 = vadd.s32 19, %v817_v30  ;;  %v877_v21 = vshrl.u32 %v17437_v53, 4  ;;  %v888_v22 = vshrl.u32 %v17441_v55, 4 }
 0x137   : > { %v17501_v23 = vmul.u32.u64.low 3817748708, %v17421_v45  ;;  %v17502_v24 = vmul.u32.u64.high 3817748708, %v17421_v45, %v17501_v23  ;;  %v17504_v25 = vadd.s32 19, %v818_v32  ;;  %v899_v26 = vshrl.u32 %v17449_v59, 4 }
 0x138   : > { %v17508_v27 = vmul.u32.u64.low 3817748708, %v17427_v48  ;;  %v17509_v28 = vmul.u32.u64.high 3817748708, %v17427_v48, %v17508_v27  ;;  %v17511_v29 = vadd.s32 19, %v819_v33  ;;  %v867_v30 = vmul.u32 18, %v866_v14 }
 0x139   : > { %v17514_v46 = vmul.u32.u64.low 3817748708, %v17429_v49  ;;  %v17515_v47 = vmul.u32.u64.high 3817748708, %v17429_v49, %v17514_v46  ;;  %v17517_v52 = vadd.s32 19, %v820_v34  ;;  %v17519_v53 = vadd.s32 19, %v821_v35 }
 0x13a   : > { %v17521_v54 = vadd.s32 19, %v822_v36  ;;  %v17523_v32 = vadd.s32 19, %v823_v37  ;;  %v878_v55 = vmul.u32 18, %v877_v21  ;;  %v889_v58 = vmul.u32 18, %v888_v22 }
 0x13b   : > { %v910_v59 = vshrl.u32 %v17469_v6, 4  ;;  %v921_v33 = vshrl.u32 %v17473_v8, 4  ;;  %v900_v5 = vmul.u32 18, %v899_v26  ;;  %v932_v7 = vshrl.u32 %v17481_v12, 4 }
 0x13c   : > { %v17529_v11 = vmul.u32.u64.low 3817748708, %v17431_v50  ;;  %v17530_v14 = vmul.u32.u64.high 3817748708, %v17431_v50, %v17529_v11  ;;  %v17533_v34 = vsub.s32 %v17399_v31, %v867_v30  ;;  %v943_v35 = vshrl.u32 %v17488_v16, 4 }
 0x13d   : > { %v17537_v36 = vmul.u32.u64.low 3817748708, %v17433_v51  ;;  %v17538_v37 = vmul.u32.u64.high 3817748708, %v17433_v51, %v17537_v36  ;;  %v17541_v6 = vmul.u32.u64.low 3817748708, %v17443_v56  ;;  %v17542_v15 = vmul.u32.u64.high 3817748708, %v17443_v56, %v17541_v6 }
 0x13e   : > { %v17545_v8 = vmul.u32.u64.low 3817748708, %v17445_v57  ;;  %v17546_v12 = vmul.u32.u64.high 3817748708, %v17445_v57, %v17545_v8  ;;  %v17549_v21 = vmul.u32.u64.low 3817748708, %v17451_v60  ;;  %v17550_v22 = vmul.u32.u64.high 3817748708, %v17451_v60, %v17549_v21 }
 0x13f   : > { %v17553_v31 = vmul.u32.u64.low 3817748708, %v17453_v61  ;;  %v17554_v23 = vmul.u32.u64.high 3817748708, %v17453_v61, %v17553_v31  ;;  %v911_v16 = vmul.u32 18, %v910_v59  ;;  %v954_v26 = vshrl.u32 %v17502_v24, 4 }
 0x140   : > { %v17558_v27 = vmul.u32.u64.low 3817748708, %v17455_v62  ;;  %v17559_v30 = vmul.u32.u64.high 3817748708, %v17455_v62, %v17558_v27  ;;  %v965_v46 = vshrl.u32 %v17509_v28, 4  ;;  %v976_v11 = vshrl.u32 %v17515_v47, 4 }
 0x141   : > { %v17564_v36 = vmul.u32.u64.low 3817748708, %v17457_v63  ;;  %v17565_v6 = vmul.u32.u64.high 3817748708, %v17457_v63, %v17564_v36  ;;  %v17568_v8 = vsub.s32 %v17407_v38, %v878_v55  ;;  %v922_v21 = vmul.u32 18, %v921_v33 }
 0x142   : > { %v17571_v59 = vmul.u32.u64.low 3817748708, %v17459_v0  ;;  %v17572_v31 = vmul.u32.u64.high 3817748708, %v17459_v0, %v17571_v59  ;;  %v17575_v24 = vsub.s32 %v17409_v39, %v889_v58  ;;  %v933_v27 = vmul.u32 18, %v932_v7 }
 0x143   : > { %v17578_v28 = vmul.u32.u64.low 3817748708, %v17461_v2  ;;  %v17579_v1 = vmul.u32.u64.high 3817748708, %v17461_v2, %v17578_v28  ;;  %v17582_v47 = vsub.s32 %v17411_v40, %v900_v5  ;;  %v944_v36 = vmul.u32 18, %v943_v35 }
 0x144   : > { %v955_v63 = vmul.u32 18, %v954_v26  ;;  %v987_v38 = vshrl.u32 %v17530_v14, 4  ;;  %v17586_v55 = vsub.s32 %v17413_v41, %v911_v16  ;;  %v966_v33 = vmul.u32 18, %v965_v46 }
 0x145   : > { %v977_v59 = vmul.u32 18, %v976_v11  ;;  %v998_v39 = vshrl.u32 %v17538_v37, 4  ;;  %v1009_v58 = vshrl.u32 %v17542_v15, 4  ;;  %v1020_v7 = vshrl.u32 %v17546_v12, 4 }
 0x146   : > { %v17592_v28 = vmul.u32.u64.low 3817748708, %v17463_v3  ;;  %v17593_v2 = vmul.u32.u64.high 3817748708, %v17463_v3, %v17592_v28  ;;  %v1031_v40 = vshrl.u32 %v17550_v22, 4  ;;  %v1042_v5 = vshrl.u32 %v17554_v23, 4 }
 0x147   : > { %v17598_v14 = vmul.u32.u64.low 3817748708, %v17465_v4  ;;  %v17599_v41 = vmul.u32.u64.high 3817748708, %v17465_v4, %v17598_v14  ;;  %v17602_v35 = vsub.s32 %v17415_v42, %v922_v21  ;;  %v17605_v37 = vsub.s32 %v17417_v43, %v933_v27 }
 0x148   : > { %v988_v15 = vmul.u32 18, %v987_v38  ;;  %v1053_v12 = vshrl.u32 %v17559_v30, 4  ;;  %v17609_v16 = vsub.s32 %v17419_v44, %v944_v36  ;;  %v17612_v22 = vsub.s32 %v17421_v45, %v955_v63 }
 0x149   : > { %v999_v23 = vmul.u32 18, %v998_v39  ;;  %v1064_v26 = vshrl.u32 %v17565_v6, 4  ;;  %v17616_v46 = vsub.s32 %v17427_v48, %v966_v33  ;;  %v1010_v42 = vmul.u32 18, %v1009_v58 }
 0x14a   : > { %v1021_v11 = vmul.u32 18, %v1020_v7  ;;  %v1075_v43 = vshrl.u32 %v17572_v31, 4  ;;  %v17620_v21 = vsub.s32 %v17429_v49, %v977_v59  ;;  %v1032_v30 = vmul.u32 18, %v1031_v40 }
 0x14b   : > { %v1043_v27 = vmul.u32 18, %v1042_v5  ;;  %v1086_v44 = vshrl.u32 %v17579_v1, 4  ;;  %v17624_v45 = vsub.s32 %v17431_v50, %v988_v15  ;;  %v1054_v63 = vmul.u32 18, %v1053_v12 }
 0x14c   : > { %v17627_v6 = vmul.u32.u64.low 3817748708, %v17475_v9  ;;  %v17628_v36 = vmul.u32.u64.high 3817748708, %v17475_v9, %v17627_v6  ;;  %v17631_v48 = vsub.s32 %v17433_v51, %v999_v23  ;;  %v1065_v38 = vmul.u32 18, %v1064_v26 }
 0x14d   : > { %v17634_v31 = vmul.u32.u64.low 3817748708, %v17477_v10  ;;  %v17635_v49 = vmul.u32.u64.high 3817748708, %v17477_v10, %v17634_v31  ;;  %v1076_v33 = vmul.u32 18, %v1075_v43  ;;  %v1097_v59 = vshrl.u32 %v17593_v2, 4 }
 0x14e   : > { %v17639_v1 = vmul.u32.u64.low 3817748708, %v17483_v13  ;;  %v17640_v50 = vmul.u32.u64.high 3817748708, %v17483_v13, %v17639_v1  ;;  %v1087_v39 = vmul.u32 18, %v1086_v44  ;;  %v1108_v58 = vshrl.u32 %v17599_v41, 4 }
 0x14f   : > { %v17644_v7 = vmul.u32.u64.low 3817748708, %v17490_v17  ;;  %v17645_v28 = vmul.u32.u64.high 3817748708, %v17490_v17, %v17644_v7  ;;  %v17648_v51 = vmul.u32.u64.low 3817748708, %v17492_v18  ;;  %v17649_v40 = vmul.u32.u64.high 3817748708, %v17492_v18, %v17648_v51 }
 0x150   : > { %v17652_v5 = vmul.u32.u64.low 3817748708, %v17494_v19  ;;  %v17653_v14 = vmul.u32.u64.high 3817748708, %v17494_v19, %v17652_v5  ;;  %v17656_v2 = vmul.u32.u64.low 3817748708, %v17496_v20  ;;  %v17657_v15 = vmul.u32.u64.high 3817748708, %v17496_v20, %v17656_v2 }
 0x151   : > { %v17660_v12 = vmul.u32.u64.low 3817748708, %v17504_v25  ;;  %v17661_v23 = vmul.u32.u64.high 3817748708, %v17504_v25, %v17660_v12  ;;  %vm1256_vm0 = vcmp.ne.s32.totalorder %v17533_v34, 0  ;;  %vm1257_vm1 = vcmp.ne.s32.totalorder %v17568_v8, 0 }
 0x152   : > { %v17665_v41 = vmul.u32.u64.low 3817748708, %v17511_v29  ;;  %v17666_v26 = vmul.u32.u64.high 3817748708, %v17511_v29, %v17665_v41  ;;  %v17669_v43 = vmul.u32.u64.low 3817748708, %v17517_v52  ;;  %v17670_v44 = vmul.u32.u64.high 3817748708, %v17517_v52, %v17669_v43 }
 0x153   : > { %v17674_v6 = vmul.u32.u64.low 3817748708, %v17519_v53  ;;  %v17675_v31 = vmul.u32.u64.high 3817748708, %v17519_v53, %v17674_v6  ;;  %v17678_v1 = vmul.u32.u64.low 3817748708, %v17521_v54  ;;  %v17679_v7 = vmul.u32.u64.high 3817748708, %v17521_v54, %v17678_v1 }
 0x154   : > { %vm1258_vm2 = vcmp.ne.s32.totalorder %v17575_v24, 0  ;;  %v17683_v51 = vsub.s32 %v17443_v56, %v1010_v42  ;;  %v17686_v5 = vsub.s32 %v17445_v57, %v1021_v11  ;;  %v1098_v2 = vmul.u32 18, %v1097_v59  ;;  %v21514_v42 = vld [vmem:[#allocation41_spill] sm:$0xff] }
 0x155   : > { %v1119_v12 = vshrl.u32 %v17628_v36, 4  ;;  %vm1259_vm3 = vcmp.ne.s32.totalorder %v17582_v47, 0  ;;  %v17691_v41 = vsub.s32 %v17451_v60, %v1032_v30  ;;  %v1130_v43 = vshrl.u32 %v17635_v49, 4  ;;  %v21515_v36 = vld [vmem:[#allocation42_spill] sm:$0xff] }
 0x156   : > { %v17695_v6 = vmul.u32.u64.low 3817748708, %v17523_v32  ;;  %v17696_v1 = vmul.u32.u64.high 3817748708, %v17523_v32, %v17695_v6  ;;  %vm1260_vm4 = vcmp.ne.s32.totalorder %v17586_v55, 0  ;;  %v17700_v56 = vsub.s32 %v17453_v61, %v1043_v27 }
 0x157   : > { %v17703_v57 = vsub.s32 %v17455_v62, %v1054_v63  ;;  %v17706_v11 = vsub.s32 %v21514_v42, %v1065_v38  ;;  %v1141_v60 = vshrl.u32 %v17640_v50, 4  ;;  %vm1261_vm5 = vcmp.ne.s32.totalorder %v17602_v35, 0 }
 0x158   : > { %v17711_v30 = vsub.s32 %v17459_v0, %v1076_v33  ;;  %v17714_v49 = vsub.s32 %v21515_v36, %v1087_v39  ;;  %v1109_v59 = vmul.u32 18, %v1108_v58  ;;  %v1152_v61 = vshrl.u32 %v17645_v28, 4 }
 0x159   : > { %vm1262_vm6 = vcmp.ne.s32.totalorder %v17605_v37, 0  ;;  %v17719_v62 = vsub.s32 %v17463_v3, %v1098_v2  ;;  %v1120_v27 = vmul.u32 18, %v1119_v12  ;;  %v1163_v63 = vshrl.u32 %v17649_v40, 4 }
 0x15a   : > { %v1174_v38 = vshrl.u32 %v17653_v14, 4  ;;  %vm1263_vm7 = vcmp.ne.s32.totalorder %v17609_v16, 0  ;;  %v1131_v0 = vmul.u32 18, %v1130_v43  ;;  %v1185_v33 = vshrl.u32 %v17657_v15, 4 }
 0x15b   : > { %v1196_v50 = vshrl.u32 %v17661_v23, 4  ;;  %vm1292_vm9 = vcmp.lt.s32.totalorder %v17533_v34, 0  ;;  %v1142_v39 = vmul.u32 18, %v1141_v60  ;;  %v1207_v3 = vshrl.u32 %v17666_v26, 4 }
 0x15c   : > { %v1218_v58 = vshrl.u32 %v17670_v44, 4  ;;  %vm1293_vm11 = vcmp.lt.s32.totalorder %v17568_v8, 0  ;;  %v1153_v28 = vmul.u32 18, %v1152_v61  ;;  %v1229_v40 = vshrl.u32 %v17675_v31, 4  ;;  %vm17745_vm10 = vmand %vm1292_vm9, %vm1256_vm0 }
 0x15d   : > { %v1240_v14 = vshrl.u32 %v17679_v7, 4  ;;  %vm1294_vm13 = vcmp.lt.s32.totalorder %v17575_v24, 0  ;;  %v17737_v15 = vsub.s32 %v17465_v4, %v1109_v59  ;;  %v1164_v23 = vmul.u32 18, %v1163_v63  ;;  %vm17756_vm14 = vmand %vm1293_vm11, %vm1257_vm1 }
 0x15e   : > { %v1175_v26 = vmul.u32 18, %v1174_v38  ;;  %vm1295_vm15 = vcmp.lt.s32.totalorder %v17582_v47, 0  ;;  %v1186_v31 = vmul.u32 18, %v1185_v33  ;;  %v1251_v2 = vshrl.u32 %v17696_v1, 4  ;;  %vm17769_vm12 = vmand %vm1294_vm13, %vm1258_vm2 }
 0x15f   : > { %v1197_v7 = vmul.u32 18, %v1196_v50  ;;  %vm1296_vm8 = vcmp.lt.s32.totalorder %v17586_v55, 0  ;;  %v17761_v12 = vsub.s32 %v17475_v9, %v1120_v27  ;;  %v1208_v43 = vmul.u32 18, %v1207_v3  ;;  %vm17782_vm0 = vmand %vm1295_vm15, %vm1259_vm3 }
 0x160   : > { %v1219_v6 = vmul.u32 18, %v1218_v58  ;;  %vm1297_vm9 = vcmp.lt.s32.totalorder %v17602_v35, 0  ;;  %v17774_v42 = vsub.s32 %v17477_v10, %v1131_v0  ;;  %v1230_v60 = vmul.u32 18, %v1229_v40  ;;  %vm17801_vm3 = vmand %vm1296_vm8, %vm1260_vm4 }
 0x161   : > { %v1241_v9 = vmul.u32 18, %v1240_v14  ;;  %vm1298_vm11 = vcmp.lt.s32.totalorder %v17605_v37, 0  ;;  %v17787_v59 = vsub.s32 %v17483_v13, %v1142_v39  ;;  %v17790_v10 = vsub.s32 %v17490_v17, %v1153_v28  ;;  %vm17817_vm1 = vmand %vm1297_vm9, %vm1261_vm5 }
 0x162   : > { %v17793_v61 = vsub.s32 %v17492_v18, %v1164_v23  ;;  %vm1299_vm13 = vcmp.lt.s32.totalorder %v17609_v16, 0  ;;  %v17806_v13 = vsub.s32 %v17494_v19, %v1175_v26  ;;  %v17809_v17 = vsub.s32 %v17496_v20, %v1186_v31  ;;  %vm17836_vm5 = vmand %vm1298_vm11, %vm1262_vm6 }
 0x163   : > { %v1252_v18 = vmul.u32 18, %v1251_v2  ;;  %vm1300_vm2 = vcmp.lt.s32.totalorder %v17612_v22, 0  ;;  %v17822_v38 = vsub.s32 %v17504_v25, %v1197_v7  ;;  %v17825_v19 = vsub.s32 %v17511_v29, %v1208_v43  ;;  %vm17852_vm15 = vmand %vm1299_vm13, %vm1263_vm7 }
 0x164   : > { %v17828_v20 = vsub.s32 %v17517_v52, %v1219_v6  ;;  %v21528_v0 = vmov 0  ;;  %v17841_v25 = vsub.s32 %v17519_v53, %v1230_v60  ;;  %v17844_v29 = vsub.s32 %v17521_v54, %v1241_v9 }
 0x165   : > { %v21529_v0 = vsel %vm17836_vm5, 4294967295, %v21528_v0  ;;  %v21530_v52 = vmov 0  ;;  %v1364_v33 = vadd.s32 18, %v17533_v34  ;;  %vm21532_vm4 = vcmp.ne.s32.totalorder %v17612_v22, 0 }
 0x166   : > { %v21531_v52 = vsel %vm17852_vm15, 4294967295, %v21530_v52  ;;  %vm17865_vm5 = vmand %vm1300_vm2, %vm21532_vm4  ;;  %v21533_v53 = vmov 0  ;;  %v1365_v54 = vadd.s32 18, %v17568_v8  ;;  %v17871_v50 = vsub.s32 %v17523_v32, %v1252_v18 }
 0x167   : > { %v21534_v53 = vsel %vm17865_vm5, 4294967295, %v21533_v53  ;;  %vm21535_vm9 = vcmp.ne.s32.totalorder %v17616_v46, 0  ;;  %vm21536_vm8 = vcmp.lt.s32.totalorder %v17616_v46, 0  ;;  %v1366_v3 = vadd.s32 18, %v17575_v24 }
 0x168   : > { %vm17880_vm11 = vmand %vm21536_vm8, %vm21535_vm9  ;;  %vm21539_vm6 = vcmp.ne.s32.totalorder %v17620_v21, 0  ;;  %vm21540_vm5 = vcmp.lt.s32.totalorder %v17620_v21, 0  ;;  %v1367_v58 = vadd.s32 18, %v17582_v47  ;;  %vm21543_vm7 = vcmp.ne.s32.totalorder %v17624_v45, 0 }
 0x169   : > { %vm17893_vm15 = vmand %vm21540_vm5, %vm21539_vm6  ;;  %vm21544_vm13 = vcmp.lt.s32.totalorder %v17624_v45, 0  ;;  %v1368_v40 = vadd.s32 18, %v17586_v55  ;;  %v1400_v14 = vsel %vm17745_vm10, %v1364_v33, %v17533_v34  ;;  %vm21547_vm8 = vcmp.ne.s32.totalorder %v17631_v48, 0 }
 0x16a   : > { %vm17905_vm4 = vmand %vm21544_vm13, %vm21543_vm7  ;;  %vm21548_vm2 = vcmp.lt.s32.totalorder %v17631_v48, 0  ;;  %v21549_v23 = vmov 0  ;;  %v1369_v26 = vadd.s32 18, %v17602_v35  ;;  %v1370_v31 = vadd.s32 18, %v17605_v37 }
 0x16b   : > { %vm17919_vm9 = vmand %vm21548_vm2, %vm21547_vm8  ;;  %v1401_v34 = vsel %vm17756_vm14, %v1365_v54, %v17568_v8  ;;  %vm21551_vm2 = vcmp.ne.s32.totalorder %v17683_v51, 0  ;;  %vm21552_vm8 = vcmp.lt.s32.totalorder %v17683_v51, 0  ;;  %v21553_v44 = vmov 0 }
 0x16c   : > { %v21550_v23 = vsel %vm17919_vm9, 4294967295, %v21549_v23  ;;  %vm17936_vm6 = vmand %vm21552_vm8, %vm21551_vm2  ;;  %v1402_v8 = vsel %vm17769_vm12, %v1366_v3, %v17575_v24  ;;  %vm21555_vm13 = vcmp.ne.s32.totalorder %v17686_v5, 0  ;;  %vm21556_vm5 = vcmp.lt.s32.totalorder %v17686_v5, 0 }
 0x16d   : > { %v21554_v44 = vsel %vm17936_vm6, 4294967295, %v21553_v44  ;;  %vm17949_vm7 = vmand %vm21556_vm5, %vm21555_vm13  ;;  %v21557_v7 = vmov 0  ;;  %v1371_v2 = vadd.s32 18, %v17609_v16  ;;  %v1372_v4 = vadd.s32 18, %v17612_v22 }
 0x16e   : > { %v21558_v7 = vsel %vm17949_vm7, 4294967295, %v21557_v7  ;;  %v1403_v24 = vsel %vm17782_vm0, %v1367_v58, %v17582_v47  ;;  %vm21559_vm10 = vcmp.ne.s32.totalorder %v17691_v41, 0  ;;  %vm21560_vm5 = vcmp.lt.s32.totalorder %v17691_v41, 0 }
 0x16f   : > { %vm17964_vm13 = vmand %vm21560_vm5, %vm21559_vm10  ;;  %v21561_v43 = vmov 0  ;;  %v1373_v6 = vadd.s32 18, %v17616_v46  ;;  %v1374_v1 = vadd.s32 18, %v17620_v21  ;;  %v1404_v47 = vsel %vm17801_vm3, %v1368_v40, %v17586_v55 }
 0x170   : > { %v21562_v43 = vsel %vm17964_vm13, 4294967295, %v21561_v43  ;;  %vm21563_vm14 = vcmp.ne.s32.totalorder %v17700_v56, 0  ;;  %vm21564_vm10 = vcmp.lt.s32.totalorder %v17700_v56, 0  ;;  %v21565_v60 = vmov 0 }
 0x171   : > { %vm17979_vm5 = vmand %vm21564_vm10, %vm21563_vm14  ;;  %v1405_v9 = vsel %vm17817_vm1, %v1369_v26, %v17602_v35  ;;  %vm21567_vm3 = vnez %v21529_v0  ;;  %vm1472_vm2 = vcmp.le.s32.totalorder %v1400_v14, 16  ;;  %vm21568_vm13 = vcmp.ne.s32.totalorder %v17703_v57, 0 }
 0x172   : > { %v21566_v60 = vsel %vm17979_vm5, 4294967295, %v21565_v60  ;;  %v1406_v55 = vsel %vm21567_vm3, %v1370_v31, %v17605_v37  ;;  %vm21569_vm14 = vcmp.lt.s32.totalorder %v17703_v57, 0  ;;  %vm1473_vm1 = vcmp.le.s32.totalorder %v1401_v34, 16 }
 0x173   : > { %vm17995_vm10 = vmand %vm21569_vm14, %vm21568_vm13  ;;  %vm21572_vm9 = vcmp.ge.s32.totalorder %v1400_v14, 1  ;;  %v21573_v35 = vmov 0  ;;  %vm21575_vm0 = vcmp.ne.s32.totalorder %v17706_v11, 0  ;;  %vm21576_vm13 = vcmp.lt.s32.totalorder %v17706_v11, 0 }
 0x174   : > { %vm18000_vm3 = vmand %vm21572_vm9, %vm1472_vm2  ;;  %v1375_v27 = vadd.s32 18, %v17624_v45  ;;  %vm21579_vm9 = vnez %v21531_v52  ;;  %vm21580_vm6 = vcmp.ge.s32.totalorder %v1401_v34, 1  ;;  %v21581_v63 = vmov 0 }
 0x175   : > { %v21574_v35 = vsel %vm18000_vm3, 4294967295, %v21573_v35  ;;  %vm18010_vm14 = vmand %vm21576_vm13, %vm21575_vm0  ;;  %v1407_v18 = vsel %vm21579_vm9, %v1371_v2, %v17609_v16  ;;  %vm21583_vm13 = vcmp.ne.s32.totalorder %v17711_v30, 0  ;;  %vm21584_vm7 = vcmp.lt.s32.totalorder %v17711_v30, 0 }
 0x176   : > { %vm18019_vm8 = vmand %vm21580_vm6, %vm1473_vm1  ;;  %v21585_v0 = vmov 0  ;;  %v1376_v16 = vadd.s32 18, %v17631_v48  ;;  %vm21587_vm6 = vnez %v21534_v53  ;;  %vm21588_vm2 = vcmp.le.s32.totalorder %v1402_v8, 16 }
 0x177   : > { %v21582_v63 = vsel %vm18019_vm8, 4294967295, %v21581_v63  ;;  %vm18029_vm3 = vmand %vm21584_vm7, %vm21583_vm13  ;;  %v1408_v52 = vsel %vm21587_vm6, %v1372_v4, %v17612_v22  ;;  %vm21589_vm12 = vcmp.ge.s32.totalorder %v1402_v8, 1  ;;  %v21590_v33 = vmov 0 }
 0x178   : > { %v21586_v0 = vsel %vm18029_vm3, 4294967295, %v21585_v0  ;;  %vm18039_vm5 = vmand %vm21589_vm12, %vm21588_vm2  ;;  %vm21592_vm13 = vcmp.ne.s32.totalorder %v17714_v49, 0  ;;  %vm21593_vm8 = vcmp.lt.s32.totalorder %v17714_v49, 0  ;;  %v1377_v22 = vadd.s32 18, %v17683_v51 }
 0x179   : > { %v21591_v33 = vsel %vm18039_vm5, 4294967295, %v21590_v33  ;;  %vm18049_vm3 = vmand %vm21593_vm8, %vm21592_vm13  ;;  %v1409_v53 = vsel %vm17880_vm11, %v1373_v6, %v17616_v46  ;;  %vm21596_vm6 = vcmp.le.s32.totalorder %v1403_v24, 16  ;;  %vm21597_vm0 = vcmp.ge.s32.totalorder %v1403_v24, 1 }
 0x17a   : > { %vm18059_vm1 = vmand %vm21597_vm0, %vm21596_vm6  ;;  %v21598_v3 = vmov 0  ;;  %vm21600_vm13 = vcmp.ne.s32.totalorder %v17719_v62, 0  ;;  %vm21601_vm9 = vcmp.lt.s32.totalorder %v17719_v62, 0  ;;  %v1378_v46 = vadd.s32 18, %v17686_v5 }
 0x17b   : > { %v21599_v3 = vsel %vm18059_vm1, 4294967295, %v21598_v3  ;;  %vm18069_vm5 = vmand %vm21601_vm9, %vm21600_vm13  ;;  %v1410_v39 = vsel %vm17893_vm15, %v1374_v1, %v17620_v21  ;;  %vm21604_vm6 = vcmp.le.s32.totalorder %v1404_v47, 16  ;;  %vm21605_vm7 = vcmp.ge.s32.totalorder %v1404_v47, 1 }
 0x17c   : > { %vm18079_vm12 = vmand %vm21605_vm7, %vm21604_vm6  ;;  %v21606_v40 = vmov 0  ;;  %vm21608_vm13 = vcmp.ne.s32.totalorder %v17737_v15, 0  ;;  %vm21609_vm2 = vcmp.lt.s32.totalorder %v17737_v15, 0  ;;  %v1379_v21 = vadd.s32 18, %v17691_v41 }
 0x17d   : > { %v21607_v40 = vsel %vm18079_vm12, 4294967295, %v21606_v40  ;;  %vm18089_vm1 = vmand %vm21609_vm2, %vm21608_vm13  ;;  %v1411_v32 = vsel %vm17905_vm4, %v1375_v27, %v17624_v45  ;;  %vm21612_vm6 = vcmp.le.s32.totalorder %v1405_v9, 16  ;;  %vm21613_vm8 = vcmp.ge.s32.totalorder %v1405_v9, 1 }
 0x17e   : > { %vm18099_vm11 = vmand %vm21613_vm8, %vm21612_vm6  ;;  %v21614_v26 = vmov 0  ;;  %vm21616_vm13 = vcmp.ne.s32.totalorder %v17761_v12, 0  ;;  %vm21617_vm0 = vcmp.lt.s32.totalorder %v17761_v12, 0  ;;  %v21618_v31 = vmov 0 }
 0x17f   : > { %v21615_v26 = vsel %vm18099_vm11, 4294967295, %v21614_v26  ;;  %vm18109_vm12 = vmand %vm21617_vm0, %vm21616_vm13  ;;  %v1380_v45 = vadd.s32 18, %v17700_v56  ;;  %vm21620_vm4 = vnez %v21550_v23  ;;  %vm21621_vm15 = vcmp.le.s32.totalorder %v1406_v55, 16 }
 0x180   : > { %v21619_v31 = vsel %vm18109_vm12, 4294967295, %v21618_v31  ;;  %v1412_v28 = vsel %vm21620_vm4, %v1376_v16, %v17631_v48  ;;  %vm21622_vm9 = vcmp.ge.s32.totalorder %v1406_v55, 1  ;;  %v21623_v34 = vmov 0 }
 0x181   : > { %vm18119_vm7 = vmand %vm21622_vm9, %vm21621_vm15  ;;  %vm21625_vm13 = vcmp.ne.s32.totalorder %v17774_v42, 0  ;;  %vm21626_vm11 = vcmp.lt.s32.totalorder %v17774_v42, 0  ;;  %v1381_v48 = vadd.s32 18, %v17703_v57  ;;  %vm21629_vm9 = vnez %v21554_v44 }
 0x182   : > { %v21624_v34 = vsel %vm18119_vm7, 4294967295, %v21623_v34  ;;  %vm18129_vm12 = vmand %vm21626_vm11, %vm21625_vm13  ;;  %v1413_v23 = vsel %vm21629_vm9, %v1377_v22, %v17683_v51  ;;  %vm21630_vm8 = vcmp.le.s32.totalorder %v1407_v18, 16  ;;  %vm21631_vm2 = vcmp.ge.s32.totalorder %v1407_v18, 1 }
 0x183   : > { %vm18139_vm6 = vmand %vm21631_vm2, %vm21630_vm8  ;;  %v21632_v2 = vmov 0  ;;  %vm21634_vm0 = vcmp.ne.s32.totalorder %v17787_v59, 0  ;;  %vm21635_vm11 = vcmp.lt.s32.totalorder %v17787_v59, 0  ;;  %v21636_v4 = vmov 0 }
 0x184   : > { %v21633_v2 = vsel %vm18139_vm6, 4294967295, %v21632_v2  ;;  %vm18147_vm13 = vmand %vm21635_vm11, %vm21634_vm0  ;;  %v1382_v24 = vadd.s32 18, %v17706_v11  ;;  %vm21638_vm9 = vnez %v21558_v7  ;;  %vm21639_vm2 = vcmp.le.s32.totalorder %v1408_v52, 16 }
 0x185   : > { %v21637_v4 = vsel %vm18147_vm13, 4294967295, %v21636_v4  ;;  %v1414_v51 = vsel %vm21638_vm9, %v1378_v46, %v17686_v5  ;;  %vm21640_vm8 = vcmp.ge.s32.totalorder %v1408_v52, 1  ;;  %v21641_v44 = vmov 0 }
 0x186   : > { %vm18157_vm7 = vmand %vm21640_vm8, %vm21639_vm2  ;;  %vm21643_vm6 = vcmp.ne.s32.totalorder %v17790_v10, 0  ;;  %vm21644_vm0 = vcmp.lt.s32.totalorder %v17790_v10, 0  ;;  %v21645_v6 = vmov 0  ;;  %v1383_v1 = vadd.s32 18, %v17711_v30 }
 0x187   : > { %v21642_v44 = vsel %vm18157_vm7, 4294967295, %v21641_v44  ;;  %vm18165_vm11 = vmand %vm21644_vm0, %vm21643_vm6  ;;  %vm21647_vm9 = vnez %v21562_v43  ;;  %vm21648_vm2 = vcmp.le.s32.totalorder %v1409_v53, 16  ;;  %vm21649_vm8 = vcmp.ge.s32.totalorder %v1409_v53, 1 }
 0x188   : > { %v21646_v6 = vsel %vm18165_vm11, 4294967295, %v21645_v6  ;;  %v1415_v5 = vsel %vm21647_vm9, %v1379_v21, %v17691_v41  ;;  %vm18175_vm13 = vmand %vm21649_vm8, %vm21648_vm2  ;;  %v21650_v7 = vmov 0  ;;  %vm21652_vm7 = vcmp.ne.s32.totalorder %v17793_v61, 0 }
 0x189   : > { %v21651_v7 = vsel %vm18175_vm13, 4294967295, %v21650_v7  ;;  %vm21653_vm6 = vcmp.lt.s32.totalorder %v17793_v61, 0  ;;  %v1384_v9 = vadd.s32 18, %v17714_v49  ;;  %vm21656_vm9 = vnez %v21566_v60 }
 0x18a   : > { %vm18183_vm0 = vmand %vm21653_vm6, %vm21652_vm7  ;;  %v1416_v41 = vsel %vm21656_vm9, %v1380_v45, %v17700_v56  ;;  %vm21657_vm2 = vcmp.le.s32.totalorder %v1410_v39, 16  ;;  %vm21658_vm8 = vcmp.ge.s32.totalorder %v1410_v39, 1  ;;  %v21659_v43 = vmov 0 }
 0x18b   : > { %vm18193_vm11 = vmand %vm21658_vm8, %vm21657_vm2  ;;  %vm21661_vm13 = vcmp.ne.s32.totalorder %v17806_v13, 0  ;;  %vm21662_vm7 = vcmp.lt.s32.totalorder %v17806_v13, 0  ;;  %v1385_v27 = vadd.s32 18, %v17719_v62  ;;  %v1417_v56 = vsel %vm17995_vm10, %v1381_v48, %v17703_v57 }
 0x18c   : > { %v21660_v43 = vsel %vm18193_vm11, 4294967295, %v21659_v43  ;;  %vm18201_vm6 = vmand %vm21662_vm7, %vm21661_vm13  ;;  %vm21665_vm2 = vcmp.le.s32.totalorder %v1411_v32, 16  ;;  %vm21666_vm8 = vcmp.ge.s32.totalorder %v1411_v32, 1  ;;  %v21667_v60 = vmov 0 }
 0x18d   : > { %vm18211_vm4 = vmand %vm21666_vm8, %vm21665_vm2  ;;  %vm21669_vm11 = vcmp.ne.s32.totalorder %v17809_v17, 0  ;;  %vm21670_vm13 = vcmp.lt.s32.totalorder %v17809_v17, 0  ;;  %v21671_v18 = vmov 0  ;;  %v1386_v16 = vadd.s32 18, %v17737_v15 }
 0x18e   : > { %v21668_v60 = vsel %vm18211_vm4, 4294967295, %v21667_v60  ;;  %vm18219_vm7 = vmand %vm21670_vm13, %vm21669_vm11  ;;  %v1418_v57 = vsel %vm18010_vm14, %v1382_v24, %v17706_v11  ;;  %vm21673_vm2 = vcmp.le.s32.totalorder %v1412_v28, 16  ;;  %vm21674_vm8 = vcmp.ge.s32.totalorder %v1412_v28, 1 }
 0x18f   : > { %v21672_v18 = vsel %vm18219_vm7, 4294967295, %v21671_v18  ;;  %vm18229_vm15 = vmand %vm21674_vm8, %vm21673_vm2  ;;  %v21675_v36 = vmov 0  ;;  %vm21678_vm4 = vcmp.ne.s32.totalorder %v17822_v38, 0  ;;  %vm21679_vm11 = vcmp.lt.s32.totalorder %v17822_v38, 0 }
 0x190   : > { %v21676_v36 = vsel %vm18229_vm15, 4294967295, %v21675_v36  ;;  %vm18237_vm13 = vmand %vm21679_vm11, %vm21678_vm4  ;;  %v1387_v22 = vadd.s32 18, %v17761_v12  ;;  %vm21682_vm14 = vnez %v21586_v0  ;;  %vm21683_vm2 = vcmp.le.s32.totalorder %v1413_v23, 16 }
 0x191   : > { %21677 = vst [vmem:[#allocation41_spill] sm:$0xff] %v21676_v36  ;;  %v1419_v11 = vsel %vm21682_vm14, %v1383_v1, %v17711_v30  ;;  %vm21684_vm8 = vcmp.ge.s32.totalorder %v1413_v23, 1  ;;  %v21685_v37 = vmov 0  ;;  %vm21688_vm15 = vcmp.ne.s32.totalorder %v17825_v19, 0 }
 0x192   : > { %vm18247_vm7 = vmand %vm21684_vm8, %vm21683_vm2  ;;  %vm21689_vm4 = vcmp.lt.s32.totalorder %v17825_v19, 0  ;;  %v1388_v46 = vadd.s32 18, %v17774_v42  ;;  %v1420_v30 = vsel %vm18049_vm3, %v1384_v9, %v17714_v49  ;;  %vm21692_vm2 = vcmp.le.s32.totalorder %v1414_v51, 16 }
 0x193   : > { %v21686_v37 = vsel %vm18247_vm7, 4294967295, %v21685_v37  ;;  %vm18255_vm11 = vmand %vm21689_vm4, %vm21688_vm15  ;;  %vm21693_vm8 = vcmp.ge.s32.totalorder %v1414_v51, 1  ;;  %v21694_v0 = vmov 0  ;;  %vm21697_vm7 = vcmp.ne.s32.totalorder %v17828_v20, 0 }
 0x194   : > { %21687 = vst [vmem:[#allocation42_spill] sm:$0xff] %v21686_v37  ;;  %vm18265_vm9 = vmand %vm21693_vm8, %vm21692_vm2  ;;  %vm21698_vm15 = vcmp.lt.s32.totalorder %v17828_v20, 0  ;;  %v21699_v39 = vmov 0  ;;  %v1389_v21 = vadd.s32 18, %v17787_v59  ;;  %v1421_v49 = vsel %vm18069_vm5, %v1385_v27, %v17719_v62 }
 0x195   : > { %v21695_v0 = vsel %vm18265_vm9, 4294967295, %v21694_v0  ;;  %vm18273_vm4 = vmand %vm21698_vm15, %vm21697_vm7  ;;  %vm21701_vm2 = vcmp.le.s32.totalorder %v1415_v5, 16  ;;  %vm21702_vm8 = vcmp.ge.s32.totalorder %v1415_v5, 1  ;;  %v21703_v54 = vmov 0 }
 0x196   : > { %21696 = vst [vmem:[#allocation43_spill] sm:$0xff] %v21695_v0  ;;  %v21700_v39 = vsel %vm18273_vm4, 4294967295, %v21699_v39  ;;  %vm18283_vm10 = vmand %vm21702_vm8, %vm21701_vm2  ;;  %vm21706_vm9 = vcmp.ne.s32.totalorder %v17841_v25, 0  ;;  %vm21707_vm7 = vcmp.lt.s32.totalorder %v17841_v25, 0  ;;  %v21708_v32 = vmov 0 }
 0x197   : > { %v21704_v54 = vsel %vm18283_vm10, 4294967295, %v21703_v54  ;;  %vm18291_vm15 = vmand %vm21707_vm7, %vm21706_vm9  ;;  %v1390_v45 = vadd.s32 18, %v17790_v10  ;;  %v1422_v62 = vsel %vm18089_vm1, %v1386_v16, %v17737_v15  ;;  %vm21710_vm2 = vcmp.le.s32.totalorder %v1416_v41, 16 }
 0x198   : > { %21705 = vst [vmem:[#allocation44_spill] sm:$0xff] %v21704_v54  ;;  %v21709_v32 = vsel %vm18291_vm15, 4294967295, %v21708_v32  ;;  %vm21711_vm8 = vcmp.ge.s32.totalorder %v1416_v41, 1  ;;  %v21712_v58 = vmov 0  ;;  %vm21715_vm10 = vcmp.ne.s32.totalorder %v17844_v29, 0 }
 0x199   : > { %vm18301_vm14 = vmand %vm21711_vm8, %vm21710_vm2  ;;  %vm21716_vm9 = vcmp.lt.s32.totalorder %v17844_v29, 0  ;;  %v21717_v28 = vmov 0  ;;  %v1391_v48 = vadd.s32 18, %v17793_v61  ;;  %vm21719_vm1 = vnez %v21619_v31 }
 0x19a   : > { %v21713_v58 = vsel %vm18301_vm14, 4294967295, %v21712_v58  ;;  %vm18309_vm7 = vmand %vm21716_vm9, %vm21715_vm10  ;;  %v1423_v15 = vsel %vm21719_vm1, %v1387_v22, %v17761_v12  ;;  %vm21720_vm2 = vcmp.le.s32.totalorder %v1417_v56, 16  ;;  %vm21721_vm8 = vcmp.ge.s32.totalorder %v1417_v56, 1 }
 0x19b   : > { %21714 = vst [vmem:[#allocation45_spill] sm:$0xff] %v21713_v58  ;;  %v21718_v28 = vsel %vm18309_vm7, 4294967295, %v21717_v28  ;;  %vm18319_vm15 = vmand %vm21721_vm8, %vm21720_vm2  ;;  %v21722_v14 = vmov 0  ;;  %vm21725_vm14 = vcmp.ne.s32.totalorder %v17871_v50, 0  ;;  %vm21726_vm10 = vcmp.lt.s32.totalorder %v17871_v50, 0 }
 0x19c   : > { %v21723_v14 = vsel %vm18319_vm15, 4294967295, %v21722_v14  ;;  %vm18327_vm9 = vmand %vm21726_vm10, %vm21725_vm14  ;;  %v21727_v23 = vmov 0  ;;  %v1392_v24 = vadd.s32 18, %v17806_v13  ;;  %v1424_v12 = vsel %vm18129_vm12, %v1388_v46, %v17774_v42 }
 0x19d   : > { %21724 = vst [vmem:[#allocation46_spill] sm:$0xff] %v21723_v14  ;;  %v21728_v23 = vsel %vm18327_vm9, 4294967295, %v21727_v23  ;;  %vm21729_vm2 = vcmp.le.s32.totalorder %v1418_v57, 16  ;;  %vm21730_vm8 = vcmp.ge.s32.totalorder %v1418_v57, 1  ;;  %v21731_v31 = vmov 0 }
 0x19e   : > { %vm18337_vm3 = vmand %vm21730_vm8, %vm21729_vm2  ;;  %v1393_v51 = vadd.s32 18, %v17809_v17  ;;  %vm21734_vm14 = vnez %v21637_v4  ;;  %vm21735_vm9 = vcmp.le.s32.totalorder %v1419_v11, 16  ;;  %vm21736_vm7 = vcmp.ge.s32.totalorder %v1419_v11, 1 }
 0x19f   : > { %v21732_v31 = vsel %vm18337_vm3, 4294967295, %v21731_v31  ;;  %v1425_v1 = vsel %vm21734_vm14, %v1389_v21, %v17787_v59  ;;  %vm18347_vm4 = vmand %vm21736_vm7, %vm21735_vm9  ;;  %v21737_v42 = vmov 0  ;;  %v1394_v8 = vadd.s32 18, %v17822_v38 }
 0x1a0   : > { %21733 = vst [vmem:[#allocation47_spill] sm:$0xff] %v21732_v31  ;;  %v21738_v42 = vsel %vm18347_vm4, 4294967295, %v21737_v42  ;;  %vm21740_vm12 = vnez %v21646_v6  ;;  %vm21741_vm1 = vcmp.le.s32.totalorder %v1420_v30, 16  ;;  %vm21742_vm5 = vcmp.ge.s32.totalorder %v1420_v30, 1 }
 0x1a1   : > { %21739 = vst [vmem:[#allocation48_spill] sm:$0xff] %v21738_v42  ;;  %v1426_v5 = vsel %vm21740_vm12, %v1390_v45, %v17790_v10  ;;  %vm18357_vm3 = vmand %vm21742_vm5, %vm21741_vm1  ;;  %v21743_v59 = vmov 0  ;;  %v1395_v4 = vadd.s32 18, %v17825_v19  ;;  %v1427_v9 = vsel %vm18183_vm0, %v1391_v48, %v17793_v61 }
 0x1a2   : > { %v21744_v59 = vsel %vm18357_vm3, 4294967295, %v21743_v59  ;;  %vm21746_vm14 = vcmp.le.s32.totalorder %v1421_v49, 16  ;;  %vm21747_vm10 = vcmp.ge.s32.totalorder %v1421_v49, 1  ;;  %v21748_v10 = vmov 0  ;;  %v18475_v49 = vld [vmem:[%s17302_s1] sm:$0xff] (!%p12844_p6) }
 0x1a3   : > { %21745 = vst [vmem:[#allocation49_spill] sm:$0xff] %v21744_v59  ;;  %vm18367_vm15 = vmand %vm21747_vm10, %vm21746_vm14  ;;  %v1396_v6 = vadd.s32 18, %v17828_v20  ;;  %v1428_v41 = vsel %vm18201_vm6, %v1392_v24, %v17806_v13  ;;  %vm21751_vm12 = vcmp.le.s32.totalorder %v1422_v62, 16  ;;  %vm21752_vm2 = vcmp.ge.s32.totalorder %v1422_v62, 1 }
 0x1a4   : > { %v21749_v10 = vsel %vm18367_vm15, 4294967295, %v21748_v10  ;;  %vm18377_vm8 = vmand %vm21752_vm2, %vm21751_vm12  ;;  %v21753_v61 = vmov 0  ;;  %v1397_v47 = vadd.s32 18, %v17841_v25  ;;  %vm21756_vm0 = vnez %v21672_v18  ;;  %1627 = vst [vmem:[#allocation2] sm:$0xff] (!%p12844_p6), %v18475_v49 }
 0x1a5   : > { %21750 = vst [vmem:[#allocation50_spill] sm:$0xff] %v21749_v10  ;;  %v21754_v61 = vsel %vm18377_vm8, 4294967295, %v21753_v61  ;;  %v1429_v27 = vsel %vm21756_vm0, %v1393_v51, %v17809_v17  ;;  %vm21757_vm7 = vcmp.le.s32.totalorder %v1423_v15, 16  ;;  %vm21758_vm9 = vcmp.ge.s32.totalorder %v1423_v15, 1  ;;  %v1672_v15 = vld [vmem:[%s17302_s1 + $0x10] sm:$0xff] (!%p12844_p6)  ;;  %v1719_v51 = vld [vmem:[%s17302_s1 + $0x20] sm:$0xff] (!%p12844_p6) }
 0x1a6   : > { %21755 = vst [vmem:[#allocation51_spill] sm:$0xff] %v21754_v61  ;;  %vm18387_vm15 = vmand %vm21758_vm9, %vm21757_vm7  ;;  %v21759_v13 = vmov 0  ;;  %v1398_v55 = vadd.s32 18, %v17844_v29  ;;  %v1430_v56 = vsel %vm18237_vm13, %v1394_v8, %v17822_v38  ;;  %vm1499_vm2 = vcmp.le.s32.totalorder %v1427_v9, 16  ;;  %v18654_v10 = vld [vmem:[%s17302_s1 + $0xb0] sm:$0xff] (!%p12844_p6) }
 0x1a7   : > { %v21760_v13 = vsel %vm18387_vm15, 4294967295, %v21759_v13  ;;  %vm21762_vm12 = vcmp.le.s32.totalorder %v1424_v12, 16  ;;  %vm21763_vm5 = vcmp.ge.s32.totalorder %v1424_v12, 1  ;;  %v21764_v17 = vmov 0 }
 0x1a8   : > { %21761 = vst [vmem:[#allocation52_spill] sm:$0xff] %v21760_v13  ;;  %vm18397_vm1 = vmand %vm21763_vm5, %vm21762_vm12  ;;  %v1399_v18 = vadd.s32 18, %v17871_v50  ;;  %v1431_v16 = vsel %vm18255_vm11, %v1395_v4, %v17825_v19  ;;  %vm1464_vm7 = vcmp.ge.s32.totalorder %v1428_v41, 1  ;;  %vm1500_vm9 = vcmp.le.s32.totalorder %v1428_v41, 16  ;;  %v18497_v41 = vld [vmem:[%s17302_s1 + $0x38] sm:$0xff] (!%p12844_p6) }
 0x1a9   : > { %v21765_v17 = vsel %vm18397_vm1, 4294967295, %v21764_v17  ;;  %vm21767_vm0 = vcmp.le.s32.totalorder %v1425_v1, 16  ;;  %vm21768_vm10 = vcmp.ge.s32.totalorder %v1425_v1, 1  ;;  %v21769_v38 = vmov 0  ;;  %v18490_v1 = vld [vmem:[%s17302_s1 + $0x28] sm:$0xff] (!%p12844_p6) }
 0x1aa   : > { %21766 = vst [vmem:[#allocation53_spill] sm:$0xff] %v21765_v17  ;;  %vm18407_vm14 = vmand %vm21768_vm10, %vm21767_vm0  ;;  %vm21772_vm13 = vnez %v21700_v39  ;;  %vm1465_vm5 = vcmp.ge.s32.totalorder %v1429_v27, 1  ;;  %vm1501_vm12 = vcmp.le.s32.totalorder %v1429_v27, 16  ;;  %vm21773_vm6 = vcmp.le.s32.totalorder %v1426_v5, 16 }
 0x1ab   : > { %v21770_v38 = vsel %vm18407_vm14, 4294967295, %v21769_v38  ;;  %v1432_v57 = vsel %vm21772_vm13, %v1396_v6, %v17828_v20  ;;  %vm21774_vm1 = vcmp.ge.s32.totalorder %v1426_v5, 1  ;;  %v21775_v52 = vmov 0  ;;  %v18494_v6 = vld [vmem:[%s17302_s1 + $0x30] sm:$0xff] (!%p12844_p6) }
 0x1ac   : > { %21771 = vst [vmem:[#allocation54_spill] sm:$0xff] %v21770_v38  ;;  %vm18416_vm15 = vmand %vm21774_vm1, %vm21773_vm6  ;;  %vm21778_vm11 = vnez %v21709_v32  ;;  %vm1466_vm10 = vcmp.ge.s32.totalorder %v1430_v56, 1  ;;  %vm1502_vm0 = vcmp.le.s32.totalorder %v1430_v56, 16  ;;  %vm21779_vm3 = vcmp.ge.s32.totalorder %v1427_v9, 1  ;;  %v18478_v32 = vld [vmem:[%s17302_s1 + $0x8] sm:$0xff] (!%p12844_p6) }
 0x1ad   : > { %v21776_v52 = vsel %vm18416_vm15, 4294967295, %v21775_v52  ;;  %v1433_v19 = vsel %vm21778_vm11, %v1397_v47, %v17841_v25  ;;  %vm18424_vm14 = vmand %vm21779_vm3, %vm1499_vm2  ;;  %v21780_v22 = vmov 0  ;;  %vm21783_vm13 = vnez %v21718_v28  ;;  %1628 = vst [vmem:[#allocation2 + $0x8] sm:$0xff] (!%p12844_p6), %v18478_v32 }
 0x1ae   : > { %21777 = vst [vmem:[#allocation55_spill] sm:$0xff] %v21776_v52  ;;  %v21781_v22 = vsel %vm18424_vm14, 4294967295, %v21780_v22  ;;  %v1434_v20 = vsel %vm21783_vm13, %v1398_v55, %v17844_v29  ;;  %vm1467_vm8 = vcmp.ge.s32.totalorder %v1431_v16, 1  ;;  %vm1503_vm1 = vcmp.le.s32.totalorder %v1431_v16, 16  ;;  %vm18431_vm6 = vmand %vm1464_vm7, %vm1500_vm9  ;;  %v18505_v16 = vld [vmem:[%s17302_s1 + $0x48] sm:$0xff] (!%p12844_p6) }
 0x1af   : > { %21782 = vst [vmem:[#allocation56_spill] sm:$0xff] %v21781_v22  ;;  %v21784_v11 = vmov 0  ;;  %vm21787_vm11 = vnez %v21728_v23  ;;  %vm1468_vm15 = vcmp.ge.s32.totalorder %v1432_v57, 1  ;;  %vm1504_vm3 = vcmp.le.s32.totalorder %v1432_v57, 16  ;;  %vm18438_vm2 = vmand %vm1465_vm5, %vm1501_vm12  ;;  %v1673_v23 = vld [vmem:[%s17302_s1 + $0x18] sm:$0xff] (!%p12844_p6) }
 0x1b0   : > { %v21785_v11 = vsel %vm18431_vm6, 4294967295, %v21784_v11  ;;  %v1435_v25 = vsel %vm21787_vm11, %v1399_v18, %v17871_v50  ;;  %v21788_v53 = vmov 0  ;;  %vm1469_vm14 = vcmp.ge.s32.totalorder %v1433_v19, 1  ;;  %vm18442_vm4 = vmand %vm1466_vm10, %vm1502_vm0  ;;  %v18502_v18 = vld [vmem:[%s17302_s1 + $0x40] sm:$0xff] (!%p12844_p6)  ;;  %1813 = vst [vmem:[#allocation2 + $0x50] sm:$0xff] (!%p12844_p6), %v18505_v16 }
 0x1b1   : > { %21786 = vst [vmem:[#allocation57_spill] sm:$0xff] %v21785_v11  ;;  %v21789_v53 = vsel %vm18438_vm2, 4294967295, %v21788_v53  ;;  %vm1505_vm13 = vcmp.le.s32.totalorder %v1433_v19, 16  ;;  %v21791_v29 = vmov 0  ;;  %vm1470_vm7 = vcmp.ge.s32.totalorder %v1434_v20, 1  ;;  %vm18446_vm6 = vmand %vm1467_vm8, %vm1503_vm1  ;;  %v18585_v11 = vld [vmem:[%s17302_s1 + $0x90] sm:$0xff] (!%p12844_p6) }
 0x1b2   : > { %21790 = vst [vmem:[#allocation58_spill] sm:$0xff] %v21789_v53  ;;  %v21792_v29 = vsel %vm18442_vm4, 4294967295, %v21791_v29  ;;  %vm1506_vm9 = vcmp.le.s32.totalorder %v1434_v20, 16  ;;  %v21794_v46 = vmov 0  ;;  %vm1471_vm11 = vcmp.ge.s32.totalorder %v1435_v25, 1  ;;  %vm18450_vm12 = vmand %vm1468_vm15, %vm1504_vm3  ;;  %1547 = sbr.rel (%p12844_p6) target bundleno = 547 (0x223), region = 104 }
 0x1b3   : > { %21793 = vst [vmem:[#allocation59_spill] sm:$0xff] %v21792_v29  ;;  %v21795_v46 = vsel %vm18446_vm6, 4294967295, %v21794_v46  ;;  %vm1507_vm5 = vcmp.le.s32.totalorder %v1435_v25, 16  ;;  %v21797_v50 = vmov 0  ;;  %vm18454_vm2 = vmand %vm1469_vm14, %vm1505_vm13  ;;  %v21800_v30 = vmov 0  ;;  %v18575_v53 = vld [vmem:[%s17302_s1 + $0x88] sm:$0xff] (!%p12844_p6) }
 0x1b4   : > { %21796 = vst [vmem:[#allocation60_spill] sm:$0xff] %v21795_v46  ;;  %v21798_v50 = vsel %vm18450_vm12, 4294967295, %v21797_v50  ;;  %v21801_v30 = vsel %vm18454_vm2, 4294967295, %v21800_v30  ;;  %vm18458_vm10 = vmand %vm1470_vm7, %vm1506_vm9  ;;  %v21803_v39 = vmov 0  ;;  %v21806_v21 = vmov 0 }
 0x1b5   : > { %21799 = vst [vmem:[#allocation61_spill] sm:$0xff] %v21798_v50  ;;  %21802 = vst [vmem:[#allocation62_spill] sm:$0xff] %v21801_v30  ;;  %v21804_v39 = vsel %vm18458_vm10, 4294967295, %v21803_v39  ;;  %vm1660_vm15 = vcmask (!%p12844_p6), 1043457   ;;  %vm1667_vm8 = vcmask (!%p12844_p6), 1041408   ;;  %v16791_v45 = vmov (!%p12844_p6), 0  }
 0x1b6   : > { %21805 = vst [vmem:[#allocation63_spill] sm:$0xff] %v21804_v39  ;;  %vm18462_vm0 = vmand %vm1471_vm11, %vm1507_vm5  ;;  %v16792_v62 = vmov (!%p12844_p6), 0.0   ;;  %v13555_v28 = vpack.c.bf16 (!%p12844_p6), %v18475_v49, %v18475_v49  ;;  %v13556_v48 = vpack.c.bf16 (!%p12844_p6), %v18478_v32, %v18478_v32  ;;  %vm1661_vm14 = vsmask.f32 (!%p12844_p6), 7942  ;;  %v18516_v32 = vld [vmem:[%s17302_s1 + $0x50] sm:$0xff] (!%p12844_p6) }
 0x1b7   : > { %v21807_v21 = vsel %vm18462_vm0, 4294967295, %v21806_v21  ;;  %1586 = vst [vmem:[#allocation3 + $0x8] sm:$0xf] (!%p12844_p6), %v16791_v45  ;;  %1584 = vst [vmem:[#allocation3] sm:$0xf] (!%p12844_p6), %v16791_v45  ;;  %v13557_v24 = vpack.c.bf16 (!%p12844_p6), %v1672_v15, %v1672_v15  ;;  %v13558_v12 = vpack.c.bf16 (!%p12844_p6), %v1673_v23, %v1673_v23  ;;  %vm1707_vm13 = vcmask (!%p12844_p6), 1043458  }
 0x1b8   : > { %21808 = vst [vmem:[#allocation64_spill] sm:$0xff] %v21807_v21  ;;  %1585 = vst [vmem:[#allocation3 + $0x4] sm:$0xf] (!%p12844_p6), %v16791_v45  ;;  %vm1635_vm1 = vsmask.f32 (!%p12844_p6), 1280  ;;  %v1639_v8 = vshrl.u32 (!%p12844_p6), %v13555_v28, 16 }
 0x1b9   : > { %1587 = vst [vmem:[#allocation3 + $0xc] sm:$0xf] %v16791_v45  ;;  %1588 = vst [vmem:[#allocation3 + $0x10] sm:$0xf] %v16791_v45  ;;  %vm1636_vm3 = vsmask.f32 5392 }
 0x1ba   : > { %1589 = vst [vmem:[#allocation3 + $0x14] sm:$0xf] %v16791_v45  ;;  %1590 = vst [vmem:[#allocation3 + $0x18] sm:$0xf] %v16791_v45  ;;  %v1642_v5 = vshll.u32 %v13555_v28, 16  ;;  %v1648_v4 = vshrl.u32 %v13556_v48, 16 }
 0x1bb   : > { %1591 = vst [vmem:[#allocation3 + $0x1c] sm:$0xf] %v16791_v45  ;;  %1592 = vst [vmem:[#allocation3 + $0x20] sm:$0xf] %v16791_v45  ;;  %v1651_v9 = vshll.u32 %v13556_v48, 16  ;;  %v1686_v47 = vshrl.u32 %v13557_v24, 16 }
 0x1bc   : > { %1593 = vst [vmem:[#allocation3 + $0x24] sm:$0xf] %v16791_v45  ;;  %1594 = vst [vmem:[#allocation3 + $0x28] sm:$0xf] %v16791_v45  ;;  %v1689_v27 = vshll.u32 %v13557_v24, 16  ;;  %v1695_v55 = vshrl.u32 %v13558_v12, 16 }
 0x1bd   : > { %1595 = vst [vmem:[#allocation3 + $0x2c] sm:$0xf] %v16791_v45  ;;  %1596 = vst [vmem:[#allocation3 + $0x30] sm:$0xf] %v16791_v45  ;;  %v1698_v56 = vshll.u32 %v13558_v12, 16  ;;  %v1641_v57 = vrot.slane %v1639_v8, 6 }
 0x1be   : > { %1597 = vst [vmem:[#allocation3 + $0x34] sm:$0xf] %v16791_v45  ;;  %1598 = vst [vmem:[#allocation3 + $0x38] sm:$0xf] %v16791_v45  ;;  %v1644_v19 = vrot.slane %v1642_v5, 7  ;;  %v1650_v20 = vrot.slane %v1648_v4, 6 }
 0x1bf   : > { %1599 = vst [vmem:[#allocation3 + $0x3c] sm:$0xf] %v16791_v45  ;;  %1600 = vst [vmem:[#allocation3 + $0x40] sm:$0xf] %v16791_v45  ;;  %v1653_v25 = vrot.slane %v1651_v9, 7  ;;  %v1688_v28 = vrot.slane %v1686_v47, 5 }
 0x1c0   : > { %1601 = vst [vmem:[#allocation3 + $0x44] sm:$0xf] %v16791_v45  ;;  %1602 = vst [vmem:[#allocation3 + $0x48] sm:$0xf] %v16791_v45  ;;  %v1691_v48 = vrot.slane %v1689_v27, 6  ;;  %v18530_v24 = vld [vmem:[%s17302_s1 + $0x60] sm:$0xff]  ;;  %v1645_v8 = vor.u32 %v1644_v19, %v1641_v57 }
 0x1c1   : > { %1603 = vst [vmem:[#allocation3 + $0x4c] sm:$0xf] %v16791_v45  ;;  %1604 = vst [vmem:[#allocation3 + $0x50] sm:$0xf] %v16791_v45  ;;  %v18533_v12 = vld [vmem:[%s17302_s1 + $0x68] sm:$0xff]  ;;  %v1654_v5 = vor.u32 %v1653_v25, %v1650_v20  ;;  %v18544_v9 = vld [vmem:[%s17302_s1 + $0x70] sm:$0xff]  ;;  %v13559_v20 = vpack.c.bf16 %v1719_v51, %v1719_v51 }
 0x1c2   : > { %1605 = vst [vmem:[#allocation3 + $0x54] sm:$0xf] %v16791_v45  ;;  %1606 = vst [vmem:[#allocation3 + $0x58] sm:$0xf] %v16791_v45  ;;  %vm1708_vm5 = vsmask.f32 7946 }
 0x1c3   : > { %1607 = vst [vmem:[#allocation3 + $0x5c] sm:$0xf] %v16791_v45  ;;  %1608 = vst [vmem:[#allocation3 + $0x60] sm:$0xf] %v16791_v45  ;;  %v18547_v47 = vld [vmem:[%s17302_s1 + $0x78] sm:$0xff]  ;;  %v1646_v30 = vrot.slane %v1645_v8, 4 }
 0x1c4   : > { %1609 = vst [vmem:[#allocation3 + $0x64] sm:$0xf] %v16791_v45  ;;  %1610 = vst [vmem:[#allocation3 + $0x68] sm:$0xf] %v16791_v45  ;;  %v1663_v27 = vld [vmem:[#allocation3 + $0x8] sm:$0xe] }
 0x1c5   : > { %1611 = vst [vmem:[#allocation3 + $0x6c] sm:$0xf] %v16791_v45  ;;  %1612 = vst [vmem:[#allocation3 + $0x70] sm:$0xf] %v16791_v45  ;;  %v1656_v21 = vrot.slane %v1654_v5, 4  ;;  %v1733_v39 = vshll.u32 %v13559_v20, 16 }
 0x1c6   : > { %1613 = vst [vmem:[#allocation3 + $0x74] sm:$0xf] %v16791_v45  ;;  %1614 = vst [vmem:[#allocation3 + $0x78] sm:$0xf] %v16791_v45  ;;  %v1710_v50 = vld [vmem:[#allocation3 + $0x10] sm:$0xc] }
 0x1c7   : > { %1615 = vst [vmem:[#allocation3 + $0x7c] sm:$0xf] %v16791_v45  ;;  %1616 = vst [vmem:[#allocation3 + $0x80] sm:$0xf] %v16791_v45  ;;  %vm1730_vm2 = vsmask.f32 7440 }
 0x1c8   : > { %1617 = vst [vmem:[#allocation3 + $0x84] sm:$0xf] %v16791_v45  ;;  %1618 = vst [vmem:[#allocation3 + $0x88] sm:$0xf] %v16791_v45  ;;  %vm21826_vm10 = vcmask 1043456  }
 0x1c9   : > { %1619 = vst [vmem:[#allocation3 + $0x8c] sm:$0xf] %v16791_v45  ;;  %1620 = vst [vmem:[#allocation3 + $0x90] sm:$0xf] %v16791_v45  ;;  %v1801_v38 = vld [vmem:[#allocation3 + $0x24] sm:$0xf] }
 0x1ca   : > { %1621 = vst [vmem:[#allocation3 + $0x94] sm:$0xf] %v16791_v45  ;;  %1622 = vst [vmem:[#allocation3 + $0x98] sm:$0xf] %v16791_v45  ;;  %v1957_v36 = vld [vmem:[#allocation3 + $0x48] sm:$0xf] }
 0x1cb   : > { %1623 = vst [vmem:[#allocation3 + $0x9c] sm:$0xf] %v16791_v45  ;;  %1624 = vst [vmem:[#allocation3 + $0xa0] sm:$0x3] %v16791_v45  ;;  %v18519_v45 = vld [vmem:[%s17302_s1 + $0x58] sm:$0xff] }
 0x1cc   : > { %1550 = vst [vmem:[#allocation2 + $0x10] sm:$0xff] %v16792_v62  ;;  %1551 = vst [vmem:[#allocation2 + $0x18] sm:$0xff] %v16792_v62 }
 0x1cd   : > { %1552 = vst [vmem:[#allocation2 + $0x20] sm:$0xff] %v16792_v62  ;;  %1553 = vst [vmem:[#allocation2 + $0x28] sm:$0xff] %v16792_v62 }
 0x1ce   : > { %1554 = vst [vmem:[#allocation2 + $0x30] sm:$0xff] %v16792_v62  ;;  %1555 = vst [vmem:[#allocation2 + $0x38] sm:$0xff] %v16792_v62 }
 0x1cf   : > { %1556 = vst [vmem:[#allocation2 + $0x40] sm:$0xff] %v16792_v62  ;;  %1559 = vst [vmem:[#allocation2 + $0x58] sm:$0xff] %v16792_v62 }
 0x1d0   : > { %1560 = vst [vmem:[#allocation2 + $0x60] sm:$0xff] %v16792_v62  ;;  %1561 = vst [vmem:[#allocation2 + $0x68] sm:$0xff] %v16792_v62 }
 0x1d1   : > { %1562 = vst [vmem:[#allocation2 + $0x70] sm:$0xff] %v16792_v62  ;;  %1563 = vst [vmem:[#allocation2 + $0x78] sm:$0xff] %v16792_v62 }
 0x1d2   : > { %1564 = vst [vmem:[#allocation2 + $0x80] sm:$0xff] %v16792_v62  ;;  %1565 = vst [vmem:[#allocation2 + $0x88] sm:$0xff] %v16792_v62 }
 0x1d3   : > { %1568 = vst [vmem:[#allocation2 + $0xa0] sm:$0xff] %v16792_v62  ;;  %1569 = vst [vmem:[#allocation2 + $0xa8] sm:$0xff] %v16792_v62 }
 0x1d4   : > { %1570 = vst [vmem:[#allocation2 + $0xb0] sm:$0xff] %v16792_v62  ;;  %1571 = vst [vmem:[#allocation2 + $0xb8] sm:$0xff] %v16792_v62 }
 0x1d5   : > { %1572 = vst [vmem:[#allocation2 + $0xc0] sm:$0xff] %v16792_v62  ;;  %1573 = vst [vmem:[#allocation2 + $0xc8] sm:$0xff] %v16792_v62 }
 0x1d6   : > { %1574 = vst [vmem:[#allocation2 + $0xd0] sm:$0xff] %v16792_v62  ;;  %1577 = vst [vmem:[#allocation2 + $0xe8] sm:$0xff] %v16792_v62 }
 0x1d7   : > { %1578 = vst [vmem:[#allocation2 + $0xf0] sm:$0xff] %v16792_v62  ;;  %1579 = vst [vmem:[#allocation2 + $0xf8] sm:$0xff] %v16792_v62 }
 0x1d8   : > { %1580 = vst [vmem:[#allocation2 + $0x100] sm:$0xff] %v16792_v62  ;;  %1581 = vst [vmem:[#allocation2 + $0x108] sm:$0xff] %v16792_v62 }
 0x1d9   : > { %1582 = vst [vmem:[#allocation2 + $0x110] sm:$0xff] %v16792_v62  ;;  %1583 = vst [vmem:[#allocation2 + $0x118] sm:$0x3f] %v16792_v62 }
 0x1da   : > { %1674 = vst [vmem:[#allocation2 + $0x12] sm:$0xff] %v1672_v15  ;;  %1675 = vst [vmem:[#allocation2 + $0x1a] sm:$0xff] %v1673_v23  ;;  %v1697_v15 = vrot.slane %v1695_v55, 5  ;;  %v1700_v23 = vrot.slane %v1698_v56, 6  ;;  %v1669_v55 = vld [vmem:[#allocation3 + $0x10] sm:$0x3]  ;;  %v1692_v56 = vor.u32 %v1691_v48, %v1688_v28 }
 0x1db   : > { %1721 = vst [vmem:[#allocation2 + $0x24] sm:$0xff] %v1719_v51  ;;  %1722 = vst [vmem:[#allocation2 + $0x2c] sm:$0xff] %v18490_v1  ;;  %v18564_v48 = vld [vmem:[%s17302_s1 + $0x80] sm:$0xff] }
 0x1dc   : > { %1768 = vst [vmem:[#allocation2 + $0x36] sm:$0xff] %v18494_v6  ;;  %1769 = vst [vmem:[#allocation2 + $0x3e] sm:$0xff] %v18497_v41  ;;  %v1701_v19 = vor.u32 %v1700_v23, %v1697_v15  ;;  %v1693_v15 = vrot.slane %v1692_v56, 4  ;;  %v13571_v37 = vpack.c.bf16 %v18564_v48, %v18564_v48 }
 0x1dd   : > { %vm18509_vm7 = vmand %vm1660_vm15, %vm1661_vm14  ;;  %1812 = vst [vmem:[#allocation2 + $0x48] sm:$0xff] %v18502_v18  ;;  %vm1682_vm15 = vsmask.f32 2304 }
 0x1de   : > { %vm18523_vm9 = vmor %vm1635_vm1, %vm1636_vm3  ;;  %1851 = vst [vmem:[#allocation2 + $0x5a] sm:$0xff] %v18516_v32  ;;  %v1664_v25 = vsel %vm18509_vm7, %v1645_v8, %v1663_v27  ;;  %vm1714_vm3 = vcmask 1042432   ;;  %v1703_v23 = vrot.slane %v1701_v19, 4  ;;  %v1716_v27 = vld [vmem:[#allocation3 + $0x18] sm:$0x7] }
 0x1df   : > { %1852 = vst [vmem:[#allocation2 + $0x62] sm:$0xff] %v18519_v45  ;;  %vm18537_vm11 = vmand %vm1667_vm8, %vm1635_vm1  ;;  %vm1683_vm8 = vsmask.f32 6416  ;;  %v1655_v46 = vsel %vm18523_vm9, %v1646_v30, %v1654_v5  ;;  %v1735_v5 = vrot.slane %v1733_v39, 5  ;;  %v13561_v39 = vpack.c.bf16 %v18494_v6, %v18494_v6 }
 0x1e0   : > { %1890 = vst [vmem:[#allocation2 + $0x6c] sm:$0xff] %v18530_v24  ;;  %1891 = vst [vmem:[#allocation2 + $0x74] sm:$0xff] %v18533_v12 }
 0x1e1   : > { %vm18550_vm14 = vmand %vm1707_vm13, %vm1708_vm5  ;;  %1929 = vst [vmem:[#allocation2 + $0x7e] sm:$0xff] %v18544_v9  ;;  %vm1754_vm5 = vcmask 1043459   ;;  %v1780_v6 = vshrl.u32 %v13561_v39, 16 }
 0x1e2   : > { %1930 = vst [vmem:[#allocation2 + $0x86] sm:$0xff] %v18547_v47  ;;  %vm18559_vm1 = vmor %vm1682_vm15, %vm1683_vm8  ;;  %v1711_v51 = vsel %vm18550_vm14, %v1692_v56, %v1710_v50  ;;  %v1736_v50 = vshrl.u32 %v13559_v20, 16  ;;  %v13560_v56 = vpack.c.bf16 %v18490_v1, %v18490_v1 }
 0x1e3   : > { %1665 = vst [vmem:[#allocation3 + $0x8] sm:$0xe] %v1664_v25  ;;  %vm18569_vm13 = vmand %vm1714_vm3, %vm1682_vm15  ;;  %v1670_v25 = vsel %vm18537_vm11, %v1656_v21, %v1669_v55  ;;  %v1702_v29 = vsel %vm18559_vm1, %v1693_v15, %v1701_v19  ;;  %v1757_v21 = vld [vmem:[#allocation3 + $0x18] sm:$0x8]  ;;  %vm1755_vm15 = vsmask.f32 7950 }
 0x1e4   : > { %1966 = vst [vmem:[#allocation2 + $0x90] sm:$0xff] %v18564_v48  ;;  %1712 = vst [vmem:[#allocation3 + $0x10] sm:$0xc] %v1711_v51  ;;  %v1717_v30 = vsel %vm18569_vm13, %v1703_v23, %v1716_v27  ;;  %v1738_v1 = vrot.slane %v1736_v50, 4  ;;  %v1742_v55 = vshll.u32 %v13560_v56, 16  ;;  %v1746_v20 = vshrl.u32 %v13560_v56, 16 }
 0x1e5   : > { %1967 = vst [vmem:[#allocation2 + $0x98] sm:$0xff] %v18575_v53  ;;  %1666 = vst [vmem:[#allocation3 + $0xc] sm:$0xf] %v1655_v46  ;;  %v18593_v46 = vld [vmem:[%s17302_s1 + $0x98] sm:$0xff]  ;;  %vm1729_vm3 = vsmask.f32 3328  ;;  %v13562_v56 = vpack.c.bf16 %v18497_v41, %v18497_v41 }
 0x1e6   : > { %1671 = vst [vmem:[#allocation3 + $0x10] sm:$0x3] %v1670_v25  ;;  %2005 = vst [vmem:[#allocation2 + $0xa2] sm:$0xff] %v18585_v11  ;;  %v1748_v19 = vrot.slane %v1746_v20, 4  ;;  %v1739_v23 = vor.u32 %v1738_v1, %v1735_v5  ;;  %v1744_v27 = vrot.slane %v1742_v55, 5  ;;  %v1783_v50 = vshll.u32 %v13561_v39, 16 }
 0x1e7   : > { %1713 = vst [vmem:[#allocation3 + $0x14] sm:$0xf] %v1702_v29  ;;  %1718 = vst [vmem:[#allocation3 + $0x18] sm:$0x7] %v1717_v30  ;;  %v18603_v29 = vld [vmem:[%s17302_s1 + $0xa0] sm:$0xff]  ;;  %v1782_v55 = vrot.slane %v1780_v6, 7  ;;  %v13563_v6 = vpack.c.bf16 %v18502_v18, %v18502_v18 }
 0x1e8   : > { %vm18595_vm8 = vmand %vm1754_vm5, %vm1755_vm15  ;;  %2006 = vst [vmem:[#allocation2 + $0xaa] sm:$0xff] %v18593_v46  ;;  %vm1799_vm15 = vsmask.f32 7938  ;;  %v1740_v30 = vrot.slane %v1739_v23, 4  ;;  %v1749_v20 = vor.u32 %v1748_v19, %v1744_v27  ;;  %v1763_v1 = vld [vmem:[#allocation3 + $0x20] sm:$0xf] }
 0x1e9   : > { %v1758_v15 = vsel %vm18595_vm8, %v1735_v5, %v1757_v21  ;;  %2044 = vst [vmem:[#allocation2 + $0xb4] sm:$0xff] %v18603_v29  ;;  %vm18609_vm5 = vmor %vm1729_vm3, %vm1730_vm2  ;;  %v18616_v5 = vld [vmem:[%s17302_s1 + $0xa8] sm:$0xff]  ;;  %v1791_v39 = vshll.u32 %v13562_v56, 16  ;;  %v1785_v17 = vor.u32 %v1783_v50, %v1782_v55  ;;  %v1821_v50 = vshrl.u32 %v13563_v6, 16 }
 0x1ea   : > { %1759 = vst [vmem:[#allocation3 + $0x18] sm:$0x8] %v1758_v15  ;;  %vm18620_vm6 = vmand %vm21826_vm10, %vm1729_vm3  ;;  %v1788_v15 = vshrl.u32 %v13562_v56, 16  ;;  %v1745_v41 = vsel %vm18609_vm5, %v1740_v30, %v1744_v27  ;;  %v1750_v19 = vrot.slane %v1749_v20, 4  ;;  %v13564_v56 = vpack.c.bf16 %v18505_v16, %v18505_v16  ;;  %v1807_v16 = vld [vmem:[#allocation3 + $0x2c] sm:$0x1] }
 0x1eb   : > { %2045 = vst [vmem:[#allocation2 + $0xbc] sm:$0xff] %v18616_v5  ;;  %vm21829_vm0 = vmmov %vm21826_vm10  ;;  %vm21832_vm10 = vsmask.f32 4368  ;;  %vm21833_vm3 = vsmask.f32 256  ;;  %v1786_v30 = vrot.slane %v1782_v55, 4  ;;  %v13565_v20 = vpack.c.bf16 %v18516_v32, %v18516_v32 }
 0x1ec   : > { %vm18629_vm12 = vmand %vm21829_vm0, %vm1799_vm15  ;;  %1760 = vst [vmem:[#allocation3 + $0x1c] sm:$0xf] %v1745_v41  ;;  %v1790_v22 = vrot.slane %v1788_v15, 7  ;;  %v1764_v52 = vsel %vm18620_vm6, %v1750_v19, %v1763_v1  ;;  %vm21837_vm15 = vcmask 1040384   ;;  %v1824_v15 = vshll.u32 %v13563_v6, 16 }
 0x1ed   : > { %vm18639_vm2 = vmor %vm21833_vm3, %vm21832_vm10  ;;  %v1830_v41 = vshrl.u32 %v13564_v56, 16  ;;  %1765 = vst [vmem:[#allocation3 + $0x20] sm:$0xf] %v1764_v52  ;;  %v1802_v55 = vsel %vm18629_vm12, %v1785_v17, %v1801_v38  ;;  %v1833_v59 = vshll.u32 %v13564_v56, 16  ;;  %v1823_v1 = vrot.slane %v1821_v50, 6 }
 0x1ee   : > { %vm21836_vm0 = vmmov %vm21833_vm3  ;;  %v1793_v32 = vor.u32 %v1791_v39, %v1790_v22  ;;  %v1795_v13 = vrot.slane %v1790_v22, 4  ;;  %2083 = vst [vmem:[#allocation2 + $0xc6] sm:$0xff] %v18654_v10  ;;  %v1826_v19 = vrot.slane %v1824_v15, 7  ;;  %v1860_v14 = vshrl.u32 %v13565_v20, 16  ;;  %v1842_v17 = vld [vmem:[#allocation3 + $0x2c] sm:$0xe] }
 0x1ef   : > { %vm18649_vm4 = vmand %vm21837_vm15, %vm21836_vm0  ;;  %1803 = vst [vmem:[#allocation3 + $0x24] sm:$0xf] %v1802_v55  ;;  %v1832_v61 = vrot.slane %v1830_v41, 6  ;;  %v1835_v42 = vrot.slane %v1833_v59, 7  ;;  %v1863_v38 = vshll.u32 %v13565_v20, 16  ;;  %v13566_v56 = vpack.c.bf16 %v18519_v45, %v18519_v45  ;;  %v18668_v15 = vld [vmem:[%s17302_s1 + $0xb8] sm:$0xff] }
 0x1f0   : > { %v1794_v6 = vsel %vm18639_vm2, %v1786_v30, %v1793_v32  ;;  %v1808_v52 = vsel %vm18649_vm4, %v1795_v13, %v1807_v16  ;;  %v1827_v22 = vor.u32 %v1826_v19, %v1823_v1  ;;  %v1862_v39 = vrot.slane %v1860_v14, 5  ;;  %v1846_v13 = vld [vmem:[#allocation3 + $0x34] sm:$0x3]  ;;  %2084 = vst [vmem:[#allocation2 + $0xce] sm:$0xff] %v18668_v15  ;;  %v18678_v14 = vld [vmem:[%s17302_s1 + $0xc0] sm:$0xff]  ;;  %v18681_v45 = vld [vmem:[%s17302_s1 + $0xc8] sm:$0xff] }
 0x1f1   : > { %1804 = vst [vmem:[#allocation3 + $0x28] sm:$0xf] %v1794_v6  ;;  %1809 = vst [vmem:[#allocation3 + $0x2c] sm:$0x1] %v1808_v52  ;;  %v13567_v50 = vpack.c.bf16 %v18530_v24, %v18530_v24  ;;  %v1836_v30 = vor.u32 %v1835_v42, %v1832_v61  ;;  %v1865_v59 = vrot.slane %v1863_v38, 6  ;;  %v13568_v16 = vpack.c.bf16 %v18533_v12, %v18533_v12  ;;  %v18688_v12 = vld [vmem:[%s17302_s1 + $0xd0] sm:$0xff] }
 0x1f2   : > { %v18674_v20 = vpack.c.bf16 %v18544_v9, %v18544_v9  ;;  %v1843_v24 = vsel %vm18509_vm7, %v1827_v22, %v1842_v17  ;;  %v1828_v42 = vrot.slane %v1827_v22, 4  ;;  %v1869_v61 = vshrl.u32 %v13566_v56, 16  ;;  %v1881_v55 = vld [vmem:[#allocation3 + $0x34] sm:$0xc]  ;;  %2120 = vst [vmem:[#allocation2 + $0xd8] sm:$0xff] %v18678_v14  ;;  %2121 = vst [vmem:[#allocation2 + $0xe0] sm:$0xff] %v18681_v45 }
 0x1f3   : > { %v1872_v41 = vshll.u32 %v13566_v56, 16  ;;  %1844 = vst [vmem:[#allocation3 + $0x2c] sm:$0xe] %v1843_v24  ;;  %v1838_v9 = vrot.slane %v1836_v30, 4  ;;  %v1866_v32 = vor.u32 %v1865_v59, %v1862_v39  ;;  %v1899_v1 = vshll.u32 %v13567_v50, 16  ;;  %2159 = vst [vmem:[#allocation2 + $0xea] sm:$0xff] %v18688_v12 }
 0x1f4   : > { %v1902_v19 = vshrl.u32 %v13567_v50, 16  ;;  %v18692_v6 = vld [vmem:[%s17302_s1 + $0xd8] sm:$0xff]  ;;  %v1837_v52 = vsel %vm18523_vm9, %v1828_v42, %v1836_v30  ;;  %v1871_v17 = vrot.slane %v1869_v61, 5  ;;  %v1908_v22 = vshll.u32 %v13568_v16, 16  ;;  %v18698_v24 = vld [vmem:[%s17302_s1 + $0xe0] sm:$0xff]  ;;  %v18706_v30 = vld [vmem:[%s17302_s1 + $0xe8] sm:$0xff] }
 0x1f5   : > { %v1874_v38 = vrot.slane %v1872_v41, 6  ;;  %v1920_v56 = vld [vmem:[#allocation3 + $0x3c] sm:$0x8]  ;;  %2160 = vst [vmem:[#allocation2 + $0xf2] sm:$0xff] %v18692_v6  ;;  %1845 = vst [vmem:[#allocation3 + $0x30] sm:$0xf] %v1837_v52  ;;  %v1847_v39 = vsel %vm18537_vm11, %v1838_v9, %v1846_v13  ;;  %v1882_v50 = vsel %vm18550_vm14, %v1866_v32, %v1881_v55 }
 0x1f6   : > { %v1867_v59 = vrot.slane %v1866_v32, 4  ;;  %v1901_v58 = vrot.slane %v1899_v1, 5  ;;  %2198 = vst [vmem:[#allocation2 + $0xfc] sm:$0xff] %v18698_v24  ;;  %v18709_v42 = vld [vmem:[%s17302_s1 + $0xf0] sm:$0xff]  ;;  %1848 = vst [vmem:[#allocation3 + $0x34] sm:$0x3] %v1847_v39 }
 0x1f7   : > { %1883 = vst [vmem:[#allocation3 + $0x34] sm:$0xc] %v1882_v50  ;;  %v1875_v61 = vor.u32 %v1874_v38, %v1871_v17  ;;  %v1904_v41 = vrot.slane %v1902_v19, 4  ;;  %v1912_v52 = vshrl.u32 %v13568_v16, 16  ;;  %v1910_v31 = vrot.slane %v1908_v22, 5  ;;  %2199 = vst [vmem:[#allocation2 + $0x104] sm:$0xff] %v18706_v30 }
 0x1f8   : > { %2237 = vst [vmem:[#allocation2 + $0x10e] sm:$0xff] %v18709_v42  ;;  %v18714_v13 = vld [vmem:[%s17302_s1 + $0xf8] sm:$0xff]  ;;  %v1921_v9 = vsel %vm18595_vm8, %v1901_v58, %v1920_v56  ;;  %v1938_v32 = vshrl.u32 %v18674_v20, 16  ;;  %v1941_v1 = vshll.u32 %v18674_v20, 16  ;;  %v13570_v17 = vpack.c.bf16 %v18547_v47, %v18547_v47  ;;  %v1961_v48 = vld [vmem:[#allocation3 + $0x50] sm:$0x1] }
 0x1f9   : > { %v1885_v55 = vld [vmem:[#allocation3 + $0x3c] sm:$0x7]  ;;  %2238 = vst [vmem:[#allocation2 + $0x116] sm:$0xff] %v18714_v13  ;;  %v1876_v16 = vsel %vm18559_vm1, %v1867_v59, %v1875_v61  ;;  %v1877_v19 = vrot.slane %v1875_v61, 4  ;;  %v1914_v38 = vrot.slane %v1912_v52, 4  ;;  %v1905_v22 = vor.u32 %v1904_v41, %v1901_v58 }
 0x1fa   : > { %1922 = vst [vmem:[#allocation3 + $0x3c] sm:$0x8] %v1921_v9  ;;  %1884 = vst [vmem:[#allocation3 + $0x38] sm:$0xf] %v1876_v16  ;;  %v1940_v39 = vrot.slane %v1938_v32, 7  ;;  %v1946_v50 = vshrl.u32 %v13570_v17, 16  ;;  %v13572_v59 = vpack.c.bf16 %v18575_v53, %v18575_v53  ;;  %v13585_v49 = vpack.c.bf16 %v18709_v42, %v18709_v42 }
 0x1fb   : > { %v1949_v56 = vshll.u32 %v13570_v17, 16  ;;  %v1886_v20 = vsel %vm18569_vm13, %v1877_v19, %v1885_v55  ;;  %v1906_v47 = vrot.slane %v1905_v22, 4  ;;  %v1915_v54 = vor.u32 %v1914_v38, %v1910_v31  ;;  %v1924_v61 = vld [vmem:[#allocation3 + $0x44] sm:$0xf] }
 0x1fc   : > { %1887 = vst [vmem:[#allocation3 + $0x3c] sm:$0x7] %v1886_v20  ;;  %v1948_v52 = vrot.slane %v1946_v50, 7  ;;  %v1943_v58 = vor.u32 %v1941_v1, %v1940_v39  ;;  %v1944_v41 = vrot.slane %v1940_v39, 4  ;;  %v1975_v9 = vshrl.u32 %v13571_v37, 16 }
 0x1fd   : > { %v1911_v32 = vsel %vm18609_vm5, %v1906_v47, %v1910_v31  ;;  %v1916_v17 = vrot.slane %v1915_v54, 4  ;;  %v1978_v16 = vshll.u32 %v13571_v37, 16  ;;  %v1984_v0 = vshrl.u32 %v13572_v59, 16  ;;  %v1996_v31 = vld [vmem:[#allocation3 + $0x50] sm:$0xe] }
 0x1fe   : > { %1923 = vst [vmem:[#allocation3 + $0x40] sm:$0xf] %v1911_v32  ;;  %v1958_v55 = vsel %vm18629_vm12, %v1943_v58, %v1957_v36  ;;  %v1951_v19 = vor.u32 %v1949_v56, %v1948_v52  ;;  %v1953_v38 = vrot.slane %v1948_v52, 4  ;;  %v1977_v53 = vrot.slane %v1975_v9, 6  ;;  %v2228_v42 = vld [vmem:[#allocation3 + $0x84] sm:$0x8] }
 0x1ff   : > { %v1925_v22 = vsel %vm18620_vm6, %v1916_v17, %v1924_v61  ;;  %1959 = vst [vmem:[#allocation3 + $0x48] sm:$0xf] %v1958_v55  ;;  %v1980_v1 = vrot.slane %v1978_v16, 7  ;;  %v1986_v39 = vrot.slane %v1984_v0, 6  ;;  %v1987_v50 = vshll.u32 %v13572_v59, 16 }
 0x200   : > { %1926 = vst [vmem:[#allocation3 + $0x44] sm:$0xf] %v1925_v22  ;;  %v1952_v54 = vsel %vm18639_vm2, %v1944_v41, %v1951_v19  ;;  %v1962_v37 = vsel %vm18649_vm4, %v1953_v38, %v1961_v48  ;;  %v13573_v36 = vpack.c.bf16 %v18585_v11, %v18585_v11  ;;  %v13574_v56 = vpack.c.bf16 %v18593_v46, %v18593_v46  ;;  %v2000_v46 = vld [vmem:[#allocation3 + $0x58] sm:$0x3] }
 0x201   : > { %1960 = vst [vmem:[#allocation3 + $0x4c] sm:$0xf] %v1952_v54  ;;  %1963 = vst [vmem:[#allocation3 + $0x50] sm:$0x1] %v1962_v37  ;;  %v1981_v20 = vor.u32 %v1980_v1, %v1977_v53  ;;  %v1989_v47 = vrot.slane %v1987_v50, 7  ;;  %v13575_v0 = vpack.c.bf16 %v18603_v29, %v18603_v29  ;;  %v13576_v59 = vpack.c.bf16 %v18616_v5, %v18616_v5 }
 0x202   : > { %v2014_v61 = vshrl.u32 %v13573_v36, 16  ;;  %v2017_v52 = vshll.u32 %v13573_v36, 16  ;;  %v2023_v58 = vshrl.u32 %v13574_v56, 16  ;;  %v2026_v41 = vshll.u32 %v13574_v56, 16  ;;  %v2074_v29 = vld [vmem:[#allocation3 + $0x60] sm:$0x8] }
 0x203   : > { %v1997_v11 = vsel %vm18509_vm7, %v1981_v20, %v1996_v31  ;;  %v1982_v9 = vrot.slane %v1981_v20, 4  ;;  %v1990_v32 = vor.u32 %v1989_v47, %v1986_v39  ;;  %v2053_v17 = vshll.u32 %v13575_v0, 16  ;;  %v2035_v53 = vld [vmem:[#allocation3 + $0x58] sm:$0xc]  ;;  %v2039_v36 = vld [vmem:[#allocation3 + $0x60] sm:$0x7] }
 0x204   : > { %1998 = vst [vmem:[#allocation3 + $0x50] sm:$0xe] %v1997_v11  ;;  %v2016_v48 = vrot.slane %v2014_v61, 5  ;;  %v2019_v16 = vrot.slane %v2017_v52, 6  ;;  %v2025_v55 = vrot.slane %v2023_v58, 5  ;;  %v2028_v19 = vrot.slane %v2026_v41, 6 }
 0x205   : > { %v1991_v5 = vsel %vm18523_vm9, %v1982_v9, %v1990_v32  ;;  %v1992_v38 = vrot.slane %v1990_v32, 4  ;;  %v2055_v22 = vrot.slane %v2053_v17, 5  ;;  %v2056_v1 = vshrl.u32 %v13575_v0, 16 }
 0x206   : > { %1999 = vst [vmem:[#allocation3 + $0x54] sm:$0xf] %v1991_v5  ;;  %v2020_v50 = vor.u32 %v2019_v16, %v2016_v48  ;;  %v2029_v54 = vor.u32 %v2028_v19, %v2025_v55  ;;  %v2062_v37 = vshll.u32 %v13576_v59, 16  ;;  %v2066_v39 = vshrl.u32 %v13576_v59, 16  ;;  %v2078_v55 = vld [vmem:[#allocation3 + $0x68] sm:$0xf] }
 0x207   : > { %v2001_v31 = vsel %vm18537_vm11, %v1992_v38, %v2000_v46  ;;  %v2058_v56 = vrot.slane %v2056_v1, 4  ;;  %v2075_v20 = vsel %vm18595_vm8, %v2055_v22, %v2074_v29  ;;  %v13577_v47 = vpack.c.bf16 %v18654_v10, %v18654_v10 }
 0x208   : > { %2002 = vst [vmem:[#allocation3 + $0x58] sm:$0x3] %v2001_v31  ;;  %v2036_v0 = vsel %vm18550_vm14, %v2020_v50, %v2035_v53  ;;  %v2021_v61 = vrot.slane %v2020_v50, 4  ;;  %v2031_v52 = vrot.slane %v2029_v54, 4  ;;  %v2068_v58 = vrot.slane %v2066_v39, 4 }
 0x209   : > { %2076 = vst [vmem:[#allocation3 + $0x60] sm:$0x8] %v2075_v20  ;;  %2037 = vst [vmem:[#allocation3 + $0x58] sm:$0xc] %v2036_v0  ;;  %v2059_v59 = vor.u32 %v2058_v56, %v2055_v22  ;;  %v2064_v41 = vrot.slane %v2062_v37, 5  ;;  %v2092_v11 = vshrl.u32 %v13577_v47, 16  ;;  %v13578_v10 = vpack.c.bf16 %v18668_v15, %v18668_v15 }
 0x20a   : > { %v2095_v9 = vshll.u32 %v13577_v47, 16  ;;  %v2030_v32 = vsel %vm18559_vm1, %v2021_v61, %v2029_v54  ;;  %v2040_v46 = vsel %vm18569_vm13, %v2031_v52, %v2039_v36  ;;  %v13579_v17 = vpack.c.bf16 %v18678_v14, %v18678_v14  ;;  %v2111_v53 = vld [vmem:[#allocation3 + $0x6c] sm:$0xf]  ;;  %v2115_v20 = vld [vmem:[#allocation3 + $0x74] sm:$0x1] }
 0x20b   : > { %2038 = vst [vmem:[#allocation3 + $0x5c] sm:$0xf] %v2030_v32  ;;  %2041 = vst [vmem:[#allocation3 + $0x60] sm:$0x7] %v2040_v46  ;;  %v2060_v48 = vrot.slane %v2059_v59, 4  ;;  %v2069_v16 = vor.u32 %v2068_v58, %v2064_v41  ;;  %v2094_v19 = vrot.slane %v2092_v11, 7  ;;  %v13580_v29 = vpack.c.bf16 %v18681_v45, %v18681_v45 }
 0x20c   : > { %v2100_v5 = vshrl.u32 %v13578_v10, 16  ;;  %v2103_v38 = vshll.u32 %v13578_v10, 16  ;;  %v2129_v22 = vshrl.u32 %v13579_v17, 16  ;;  %v2132_v1 = vshll.u32 %v13579_v17, 16  ;;  %v2150_v0 = vld [vmem:[#allocation3 + $0x74] sm:$0xe] }
 0x20d   : > { %v2065_v15 = vsel %vm18609_vm5, %v2060_v48, %v2064_v41  ;;  %v2070_v50 = vrot.slane %v2069_v16, 4  ;;  %v2097_v54 = vor.u32 %v2095_v9, %v2094_v19  ;;  %v2098_v14 = vrot.slane %v2094_v19, 4 }
 0x20e   : > { %2077 = vst [vmem:[#allocation3 + $0x64] sm:$0xf] %v2065_v15  ;;  %v2102_v37 = vrot.slane %v2100_v5, 7  ;;  %v2131_v39 = vrot.slane %v2129_v22, 6  ;;  %v2134_v31 = vrot.slane %v2132_v1, 7  ;;  %v2138_v36 = vshrl.u32 %v13580_v29, 16 }
 0x20f   : > { %v2079_v56 = vsel %vm18620_vm6, %v2070_v50, %v2078_v55  ;;  %v2112_v45 = vsel %vm18629_vm12, %v2097_v54, %v2111_v53  ;;  %v2141_v47 = vshll.u32 %v13580_v29, 16  ;;  %v13581_v61 = vpack.c.bf16 %v18688_v12, %v18688_v12  ;;  %v2154_v5 = vld [vmem:[#allocation3 + $0x7c] sm:$0x3] }
 0x210   : > { %2080 = vst [vmem:[#allocation3 + $0x68] sm:$0xf] %v2079_v56  ;;  %2113 = vst [vmem:[#allocation3 + $0x6c] sm:$0xf] %v2112_v45  ;;  %v2105_v52 = vor.u32 %v2103_v38, %v2102_v37  ;;  %v2107_v58 = vrot.slane %v2102_v37, 4  ;;  %v2135_v59 = vor.u32 %v2134_v31, %v2131_v39  ;;  %v2140_v41 = vrot.slane %v2138_v36, 6 }
 0x211   : > { %v2143_v11 = vrot.slane %v2141_v47, 7  ;;  %v2168_v9 = vshrl.u32 %v13581_v61, 16  ;;  %v2171_v32 = vshll.u32 %v13581_v61, 16  ;;  %v13582_v46 = vpack.c.bf16 %v18692_v6, %v18692_v6  ;;  %v2189_v6 = vld [vmem:[#allocation3 + $0x7c] sm:$0xc] }
 0x212   : > { %v2106_v10 = vsel %vm18639_vm2, %v2098_v14, %v2105_v52  ;;  %v2116_v17 = vsel %vm18649_vm4, %v2107_v58, %v2115_v20  ;;  %v2151_v12 = vsel %vm18509_vm7, %v2135_v59, %v2150_v0  ;;  %v2136_v48 = vrot.slane %v2135_v59, 4  ;;  %v2193_v0 = vld [vmem:[#allocation3 + $0x84] sm:$0x7] }
 0x213   : > { %2114 = vst [vmem:[#allocation3 + $0x70] sm:$0xf] %v2106_v10  ;;  %2117 = vst [vmem:[#allocation3 + $0x74] sm:$0x1] %v2116_v17  ;;  %v2144_v16 = vor.u32 %v2143_v11, %v2140_v41  ;;  %v2170_v55 = vrot.slane %v2168_v9, 5  ;;  %v2173_v19 = vrot.slane %v2171_v32, 6  ;;  %v13583_v53 = vpack.c.bf16 %v18698_v24, %v18698_v24 }
 0x214   : > { %2152 = vst [vmem:[#allocation3 + $0x74] sm:$0xe] %v2151_v12  ;;  %v2177_v29 = vshrl.u32 %v13582_v46, 16  ;;  %v2180_v38 = vshll.u32 %v13582_v46, 16  ;;  %v13584_v22 = vpack.c.bf16 %v18706_v30, %v18706_v30  ;;  %v2246_v52 = vshrl.u32 %v13585_v49, 16 }
 0x215   : > { %v2145_v1 = vsel %vm18523_vm9, %v2136_v48, %v2144_v16  ;;  %v2146_v15 = vrot.slane %v2144_v16, 4  ;;  %v2174_v54 = vor.u32 %v2173_v19, %v2170_v55  ;;  %v2207_v37 = vshll.u32 %v13583_v53, 16  ;;  %v2232_v48 = vld [vmem:[#allocation3 + $0x8c] sm:$0xf] }
 0x216   : > { %v2179_v50 = vrot.slane %v2177_v29, 5  ;;  %2153 = vst [vmem:[#allocation3 + $0x78] sm:$0xf] %v2145_v1  ;;  %v2182_v14 = vrot.slane %v2180_v38, 6  ;;  %v2210_v39 = vshrl.u32 %v13583_v53, 16  ;;  %v2216_v31 = vshll.u32 %v13584_v22, 16 }
 0x217   : > { %v2155_v24 = vsel %vm18537_vm11, %v2146_v15, %v2154_v5  ;;  %v2190_v30 = vsel %vm18550_vm14, %v2174_v54, %v2189_v6  ;;  %v2175_v36 = vrot.slane %v2174_v54, 4  ;;  %v2220_v56 = vshrl.u32 %v13584_v22, 16  ;;  %v2269_v29 = vld [vmem:[#allocation3 + $0x98] sm:$0x1] }
 0x218   : > { %2156 = vst [vmem:[#allocation3 + $0x7c] sm:$0x3] %v2155_v24  ;;  %2191 = vst [vmem:[#allocation3 + $0x7c] sm:$0xc] %v2190_v30  ;;  %v2183_v62 = vor.u32 %v2182_v14, %v2179_v50  ;;  %v2209_v45 = vrot.slane %v2207_v37, 5  ;;  %v2212_v20 = vrot.slane %v2210_v39, 4  ;;  %v13586_v4 = vpack.c.bf16 %v18714_v13, %v18714_v13 }
 0x219   : > { %v2218_v47 = vrot.slane %v2216_v31, 5  ;;  %v2222_v61 = vrot.slane %v2220_v56, 4  ;;  %v2249_v58 = vshll.u32 %v13585_v49, 16  ;;  %v2248_v32 = vrot.slane %v2246_v52, 7  ;;  %v2265_v13 = vld [vmem:[#allocation3 + $0x90] sm:$0xf] }
 0x21a   : > { %v2184_v57 = vsel %vm18559_vm1, %v2175_v36, %v2183_v62  ;;  %v2185_v59 = vrot.slane %v2183_v62, 4  ;;  %v2229_v41 = vsel %vm18595_vm8, %v2209_v45, %v2228_v42  ;;  %v2213_v11 = vor.u32 %v2212_v20, %v2209_v45 }
 0x21b   : > { %2192 = vst [vmem:[#allocation3 + $0x80] sm:$0xf] %v2184_v57  ;;  %2230 = vst [vmem:[#allocation3 + $0x84] sm:$0x8] %v2229_v41  ;;  %v2223_v9 = vor.u32 %v2222_v61, %v2218_v47  ;;  %v2254_v46 = vshrl.u32 %v13586_v4, 16  ;;  %v2257_v10 = vshll.u32 %v13586_v4, 16  ;;  %v2251_v55 = vor.u32 %v2249_v58, %v2248_v32 }
 0x21c   : > { %v2194_v17 = vsel %vm18569_vm13, %v2185_v59, %v2193_v0  ;;  %v2214_v12 = vrot.slane %v2213_v11, 4  ;;  %v2252_v19 = vrot.slane %v2248_v32, 4 }
 0x21d   : > { %2195 = vst [vmem:[#allocation3 + $0x84] sm:$0x7] %v2194_v17  ;;  %v2224_v28 = vrot.slane %v2223_v9, 4  ;;  %v2256_v16 = vrot.slane %v2254_v46, 7  ;;  %v2266_v8 = vsel %vm18629_vm12, %v2251_v55, %v2265_v13 }
 0x21e   : > { %v2219_v51 = vsel %vm18609_vm5, %v2214_v12, %v2218_v47  ;;  %2267 = vst [vmem:[#allocation3 + $0x90] sm:$0xf] %v2266_v8 }
 0x21f   : > { %2231 = vst [vmem:[#allocation3 + $0x88] sm:$0xf] %v2219_v51  ;;  %v2233_v5 = vsel %vm18620_vm6, %v2224_v28, %v2232_v48  ;;  %v2259_v38 = vor.u32 %v2257_v10, %v2256_v16  ;;  %v2261_v6 = vrot.slane %v2256_v16, 4 }
 0x220   : > { %2234 = vst [vmem:[#allocation3 + $0x8c] sm:$0xf] %v2233_v5 }
 0x221   : > { %v2260_v53 = vsel %vm18639_vm2, %v2252_v19, %v2259_v38  ;;  %v2270_v22 = vsel %vm18649_vm4, %v2261_v6, %v2269_v29 }
 0x222   : > { %2268 = vst [vmem:[#allocation3 + $0x94] sm:$0xf] %v2260_v53  ;;  %2271 = vst [vmem:[#allocation3 + $0x98] sm:$0x1] %v2270_v22 }
 0x223 PF: > { %v16073_v25 = vld [vmem:[%s17310_s17 + $0x40] sm:$0xff]   ;;  %v16074_v21 = vld [vmem:[%s17310_s17 + $0x48] sm:$0xff]   ;;  %v16075_v23 = vld [vmem:[%s17310_s17 + $0x50] sm:$0xff]   ;;  %vm21399_vm4 = vsmask.f32 7424  ;;  %vm21398_vm6 = vcmask 1046528   ;;  %vm21840_vm1 = vnez %v21591_v33  ;;  %vm21841_vm2 = vnez %v21574_v35 }
 0x224   : > { %14198 = vmatprep.subr.bf16.mxu0 %v16073_v25  ;;  %v16076_v27 = vld [vmem:[%s17310_s17 + $0x58] sm:$0xff]   ;;  %v16077_v37 = vld [vmem:[%s17310_s17 + $0x60] sm:$0xff]   ;;  %v16078_v30 = vld [vmem:[%s17310_s17 + $0x68] sm:$0xff]   ;;  %vm21397_vm12 = vsmask.f32 6400  ;;  %vm21396_vm7 = vcmask 1045504  }
 0x225   : > { %14199 = vmatpush3.bf16.msra.mxu0 %v16073_v25  ;;  %v16079_v42 = vld [vmem:[%s17310_s17 + $0x70] sm:$0xff]   ;;  %v16080_v20 = vld [vmem:[%s17310_s17 + $0x78] sm:$0xff]   ;;  %v16084_v57 = vld [vmem:[%s17310_s17] sm:$0xff]   ;;  %vm21395_vm9 = vsmask.f32 5376  ;;  %vm21394_vm11 = vcmask 1044480  }
 0x226   : > { %14200 = vmatprep.subr.bf16.mxu0 %v16074_v21  ;;  %v18834_v62 = vld [vmem:[#allocation3 + $0x18] sm:$0xff]   ;;  %v18841_v58 = vld [vmem:[#allocation3 + $0x20] sm:$0xff]   ;;  %v18844_v11 = vld [vmem:[#allocation3 + $0x28] sm:$0xff]   ;;  %vm6791_vm5 = vcmask 1043457   ;;  %vm6792_vm3 = vsmask.f32 7942 }
 0x227   : > { %v2457_v61 = vshll.u32 %v18834_v62, 16  ;;  %v18846_v9 = vld [vmem:[#allocation3 + $0x30] sm:$0xff]   ;;  %v18848_v32 = vld [vmem:[#allocation3 + $0x38] sm:$0xff]   ;;  %v2461_v46 = vshrl.u32 %v18834_v62, 16  ;;  %v2465_v10 = vshll.u32 %v18841_v58, 16  ;;  %v18853_v12 = vld [vmem:[#allocation3 + $0x40] sm:$0xff]  }
 0x228   : > { %v2272_v49 = vld [vmem:[#allocation3] sm:$0xf]  ;;  %v16087_v13 = vld [vmem:[%s17310_s17 + $0x8] sm:$0xff]   ;;  %v2469_v28 = vshrl.u32 %v18841_v58, 16  ;;  %v2473_v16 = vshll.u32 %v18844_v11, 16  ;;  %v2481_v55 = vshll.u32 %v18846_v9, 16 }
 0x229   : > { %14201 = vmatpush3.bf16.msra.mxu0 %v16074_v21  ;;  %v2273_v18 = vld [vmem:[#allocation3 + $0x4] sm:$0xf]  ;;  %v2459_v41 = vrot.slane %v2457_v61, 1  ;;  %v2489_v19 = vshll.u32 %v18848_v32, 16  ;;  %v2467_v29 = vrot.slane %v2465_v10, 1  ;;  %v2477_v5 = vshrl.u32 %v18844_v11, 16 }
 0x22a   : > { %14202 = vmatprep.subr.bf16.mxu0 %v16075_v23  ;;  %v18821_v1 = vcombine.low %v2272_v49, %v2273_v18  ;;  %v18823_v15 = vld [vmem:[#allocation3 + $0x8] sm:$0xff]   ;;  %v18831_v56 = vld [vmem:[#allocation3 + $0x10] sm:$0xff]   ;;  %v2497_v8 = vshll.u32 %v18853_v12, 16  ;;  %v2475_v53 = vrot.slane %v2473_v16, 1  ;;  %v2485_v25 = vshrl.u32 %v18846_v9, 16  ;;  %v18870_v18 = vld [vmem:[#allocation3 + $0x58] sm:$0xff]  }
 0x22b   : > { %v2441_v14 = vshll.u32 %v18823_v15, 16  ;;  %v2449_v45 = vshll.u32 %v18831_v56, 16  ;;  %v2445_v47 = vshrl.u32 %v18823_v15, 16  ;;  %v2453_v0 = vshrl.u32 %v18831_v56, 16  ;;  %v18863_v38 = vld [vmem:[#allocation3 + $0x48] sm:$0xff]   ;;  %v16090_v22 = vld [vmem:[%s17310_s17 + $0x10] sm:$0xff]  }
 0x22c   : > { %v2434_v50 = vshrl.u32 %v18821_v1, 16  ;;  %v2436_v54 = vshll.u32 %v18821_v1, 16  ;;  %v2463_v51 = vor.u32 %v2461_v46, %v2459_v41  ;;  %v2471_v6 = vor.u32 %v2469_v28, %v2467_v29  ;;  %v18868_v49 = vld [vmem:[#allocation3 + $0x50] sm:$0xff]  }
 0x22d   : > { %14203 = vmatpush3.bf16.msra.mxu0 %v16075_v23  ;;  %v2443_v31 = vrot.slane %v2441_v14, 1  ;;  %v2451_v52 = vrot.slane %v2449_v45, 1  ;;  %v2493_v21 = vshrl.u32 %v18848_v32, 16  ;;  %v2483_v23 = vrot.slane %v2481_v55, 1  ;;  %v18882_v45 = vld [vmem:[#allocation3 + $0x68] sm:$0xff]  }
 0x22e   : > { %14204 = vmatprep.subr.bf16.mxu0 %v16076_v27  ;;  %v2438_v39 = vrot.slane %v2436_v54, 1  ;;  %v16093_v54 = vld [vmem:[%s17310_s17 + $0x18] sm:$0xff]   ;;  %v2499_v14 = vrot.slane %v2497_v8, 1  ;;  %v16099_v46 = vld [vmem:[%s17310_s17 + $0x28] sm:$0xff]   ;;  %v2541_v55 = vshrl.u32 %v18882_v45, 16 }
 0x22f   : > { %v2447_v4 = vor.u32 %v2445_v47, %v2443_v31  ;;  %v2455_v59 = vor.u32 %v2453_v0, %v2451_v52  ;;  %v16096_v0 = vld [vmem:[%s17310_s17 + $0x20] sm:$0xff]   ;;  %v2487_v61 = vor.u32 %v2485_v25, %v2483_v23  ;;  %vm6392_vm15 = vsmask.f32 1280 }
 0x230   : > { %v2439_v24 = vor.u32 %v2438_v39, %v2434_v50  ;;  %v2468_v50 = vsel %vm21399_vm4, %v2463_v51, %v2467_v29  ;;  %v2505_v39 = vshll.u32 %v18863_v38, 16  ;;  %v16102_v51 = vld [vmem:[%s17310_s17 + $0x30] sm:$0xff]  }
 0x231   : > { %14205 = vmatpush3.bf16.msra.mxu0 %v16076_v27  ;;  %v2452_v17 = vsel %vm21399_vm4, %v2447_v4, %v2451_v52  ;;  %v2460_v48 = vsel %vm21399_vm4, %v2455_v59, %v2459_v41  ;;  %v2491_v27 = vrot.slane %v2489_v19, 1  ;;  %v2517_v52 = vshrl.u32 %v18868_v49, 16 }
 0x232   : > { %14206 = vmatprep.subr.bf16.mxu0 %v16077_v37  ;;  %v2444_v36 = vsel %vm21399_vm4, %v2439_v24, %v2443_v31  ;;  %v2509_v31 = vshrl.u32 %v18863_v38, 16  ;;  %v2476_v24 = vsel %vm21399_vm4, %v2471_v6, %v2475_v53  ;;  %v2507_v47 = vrot.slane %v2505_v39, 1 }
 0x233   : > { %14214 = vmatprep.mubr.bf16.mxu0 %v2444_v36  ;;  %v18879_v36 = vld [vmem:[#allocation3 + $0x60] sm:$0xff]   ;;  %v2525_v4 = vshrl.u32 %v18870_v18, 16  ;;  %v2492_v28 = vsel %vm21399_vm4, %v2487_v61, %v2491_v27  ;;  %v2495_v29 = vor.u32 %v2493_v21, %v2491_v27 }
 0x234   : > { %v2529_v59 = vshll.u32 %v18879_v36, 16  ;;  %v2533_v10 = vshrl.u32 %v18879_v36, 16  ;;  %v18911_v61 = vld [vmem:[#allocation3 + $0x80] sm:$0xff]  }
 0x235   : > { %14207 = vmatpush3.bf16.msra.mxu0 %v16077_v37  ;;  %v2501_v37 = vshrl.u32 %v18853_v12, 16  ;;  %v2500_v25 = vsel %vm21399_vm4, %v2495_v29, %v2499_v14 }
 0x236   : > { %14208 = vmatprep.subr.bf16.mxu0 %v16078_v30  ;;  %v2531_v16 = vrot.slane %v2529_v59, 1  ;;  %v2561_v59 = vshll.u32 %v18911_v61, 16 }
 0x237   : > { %v2503_v6 = vor.u32 %v2501_v37, %v2499_v14  ;;  %v16107_v37 = vld [vmem:[%s17310_s17 + $0x80] sm:$0xff]  }
 0x239   : > { %14209 = vmatpush3.bf16.msra.mxu0 %v16078_v30  ;;  %v2513_v30 = vshll.u32 %v18868_v49, 16 }
 0x23a   : > { %14210 = vmatprep.subr.bf16.mxu0 %v16079_v42 }
 0x23d   : > { %14211 = vmatpush3.bf16.msra.mxu0 %v16079_v42  ;;  %v2521_v42 = vshll.u32 %v18870_v18, 16 }
 0x23e   : > { %14212 = vmatprep.subr.bf16.mxu0 %v16080_v20 }
 0x23f   : > { %v2523_v41 = vrot.slane %v2521_v42, 1 }
 0x241   : > { %14213 = vmatpush3.bf16.msra.mxu0 %v16080_v20  ;;  %v2479_v20 = vor.u32 %v2477_v5, %v2475_v53  ;;  %v18899_v53 = vld [vmem:[#allocation3 + $0x78] sm:$0xff]   ;;  %v2527_v42 = vor.u32 %v2525_v4, %v2523_v41 }
 0x242   : > { %14250 = vmatprep.subr.bf16.mxu0 %v16084_v57  ;;  %v2553_v21 = vshll.u32 %v18899_v53, 16  ;;  %v2557_v27 = vshrl.u32 %v18899_v53, 16 }
 0x244   : > { %14215 = vmatmul.mubr.bf16.vlgmr.msra.gmra.mrb[0].mxu0 %v2452_v17  ;;  %v2537_v17 = vshll.u32 %v18882_v45, 16 }
 0x245   : > { %14251 = vmatpush3.bf16.msra.mxu0 %v16084_v57  ;;  %14218 = vmatprep.mubr.bf16.mxu0 %v2460_v48  ;;  %v2515_v57 = vrot.slane %v2513_v30, 1  ;;  %v18891_v48 = vld [vmem:[#allocation3 + $0x70] sm:$0xff]   ;;  %v18909_v30 = vld [vmem:[#allocation3 + $0x88] sm:$0xf] }
 0x246   : > { %14252 = vmatprep.subr.bf16.mxu0 %v16087_v13  ;;  %v2539_v19 = vrot.slane %v2537_v17, 1  ;;  %v2545_v5 = vshll.u32 %v18891_v48, 16  ;;  %v2549_v8 = vshrl.u32 %v18891_v48, 16  ;;  %v2565_v17 = vshrl.u32 %v18911_v61, 16 }
 0x247   : > { %v2519_v39 = vor.u32 %v2517_v52, %v2515_v57 }
 0x249   : > { %14253 = vmatpush3.bf16.msra.mxu0 %v16087_v13  ;;  %v2484_v13 = vsel %vm21399_vm4, %v2479_v20, %v2483_v23  ;;  %v2508_v23 = vsel %vm21399_vm4, %v2503_v6, %v2507_v47  ;;  %v2524_v14 = vsel %vm21399_vm4, %v2519_v39, %v2523_v41  ;;  %v2324_v20 = vld [vmem:[#allocation3 + $0x8c] sm:$0xf] }
 0x24a   : > { %14254 = vmatprep.subr.bf16.mxu0 %v16090_v22  ;;  %v16108_v6 = vld [vmem:[%s17310_s17 + $0x88] sm:$0xff]  }
 0x24c   : > { %14219 = vmatmul.mubr.bf16.gmra.mrb[4].mxu0 %v2468_v50  ;;  %v2511_v50 = vor.u32 %v2509_v31, %v2507_v47  ;;  %v2532_v31 = vsel %vm21399_vm4, %v2527_v42, %v2531_v16  ;;  %v18915_v47 = vcombine.low %v18909_v30, %v2324_v20 }
 0x24d   : > { %14222 = vmatprep.mubr.bf16.mxu0 %v2476_v24  ;;  %14255 = vmatpush3.bf16.msra.mxu0 %v16090_v22  ;;  %v16106_v22 = vld [vmem:[%s17310_s17 + $0x38] sm:$0xff]  }
 0x24e   : > { %14256 = vmatprep.subr.bf16.mxu0 %v16093_v54  ;;  %v2516_v24 = vsel %vm21399_vm4, %v2511_v50, %v2515_v57  ;;  %v2555_v57 = vrot.slane %v2553_v21, 1  ;;  %v2569_v4 = vshll.u32 %v18915_v47, 16  ;;  %v16414_v21 = vld [vmem:[#allocation3 + $0x18] sm:$0xff]   ;;  %v16118_v50 = vld [vmem:[%s17310_s17 + $0xc8] sm:$0xff]  }
 0x251   : > { %14257 = vmatpush3.bf16.msra.mxu0 %v16093_v54  ;;  %v2547_v54 = vrot.slane %v2545_v5, 1  ;;  %v2573_v5 = vshrl.u32 %v18915_v47, 16 }
 0x252   : > { %14258 = vmatprep.subr.bf16.mxu0 %v16096_v0 }
 0x253   : > { %v2551_v41 = vor.u32 %v2549_v8, %v2547_v54 }
 0x254   : > { %14223 = vmatmul.mubr.bf16.gmra.mrb[8].mxu0 %v2484_v13 }
 0x255   : > { %14226 = vmatprep.mubr.bf16.mxu0 %v2492_v28  ;;  %14259 = vmatpush3.bf16.msra.mxu0 %v16096_v0  ;;  %v2535_v0 = vor.u32 %v2533_v10, %v2531_v16  ;;  %v2556_v13 = vsel %vm21399_vm4, %v2551_v41, %v2555_v57  ;;  %v2563_v28 = vrot.slane %v2561_v59, 1  ;;  %v2559_v16 = vor.u32 %v2557_v27, %v2555_v57  ;;  %v16418_v57 = vld [vmem:[#allocation3 + $0x38] sm:$0xff]   ;;  %v16122_v41 = vld [vmem:[%s17310_s17 + $0xe8] sm:$0xff]  }
 0x256   : > { %14260 = vmatprep.subr.bf16.mxu0 %v16099_v46  ;;  %v3092_v27 = vrot.slane %v16414_v21, 1  ;;  %v3100_v59 = vrot.slane %v16418_v57, 1 }
 0x257   : > { %v2540_v52 = vsel %vm21399_vm4, %v2535_v0, %v2539_v19  ;;  %v2567_v29 = vor.u32 %v2565_v17, %v2563_v28  ;;  %v16120_v0 = vld [vmem:[%s17310_s17 + $0xd8] sm:$0xff]  }
 0x259   : > { %14261 = vmatpush3.bf16.msra.mxu0 %v16099_v46  ;;  %v2543_v46 = vor.u32 %v2541_v55, %v2539_v19  ;;  %v2564_v55 = vsel %vm21399_vm4, %v2559_v16, %v2563_v28  ;;  %v16420_v28 = vld [vmem:[#allocation3 + $0x48] sm:$0xff]  }
 0x25a   : > { %14262 = vmatprep.subr.bf16.mxu0 %v16102_v51  ;;  %v3104_v16 = vrot.slane %v16420_v28, 1 }
 0x25b   : > { %v2548_v10 = vsel %vm21399_vm4, %v2543_v46, %v2547_v54  ;;  %v16121_v46 = vld [vmem:[%s17310_s17 + $0xe0] sm:$0xff]  }
 0x25c   : > { %14227 = vmatmul.mubr.bf16.gmra.mrb[12].mxu0 %v2500_v25  ;;  %v16110_v25 = vld [vmem:[%s17310_s17 + $0x98] sm:$0xff]  }
 0x25d   : > { %14230 = vmatprep.mubr.bf16.mxu0 %v2508_v23  ;;  %14263 = vmatpush3.bf16.msra.mxu0 %v16102_v51  ;;  %v2571_v51 = vrot.slane %v2569_v4, 1  ;;  %v16112_v23 = vld [vmem:[%s17310_s17 + $0xa8] sm:$0xff]  }
 0x25e   : > { %14264 = vmatprep.subr.bf16.mxu0 %v16106_v22 }
 0x25f   : > { %v2572_v19 = vsel %vm21399_vm4, %v2567_v29, %v2571_v51  ;;  %v2575_v8 = vor.u32 %v2573_v5, %v2571_v51  ;;  %v16123_v51 = vld [vmem:[%s17310_s17 + $0xf0] sm:$0xff]   ;;  %vm21854_vm4 = vnez %v21660_v43 }
 0x260   : > { %v16421_v5 = vld [vmem:[#allocation3 + $0x50] sm:$0xff]  }
 0x261   : > { %14265 = vmatpush3.bf16.msra.mxu0 %v16106_v22  ;;  %v16109_v22 = vld [vmem:[%s17310_s17 + $0x90] sm:$0xff]  }
 0x262   : > { %14302 = vmatprep.subr.bf16.mxu0 %v16107_v37 }
 0x264   : > { %14231 = vmatmul.mubr.bf16.gmra.mrb[16].mxu0 %v2516_v24  ;;  %v16416_v24 = vld [vmem:[#allocation3 + $0x28] sm:$0xff]  }
 0x265   : > { %14234 = vmatprep.mubr.bf16.mxu0 %v2524_v14  ;;  %v3096_v14 = vrot.slane %v16416_v24, 1 }
 0x26c   : > { %14235 = vmatmul.mubr.bf16.gmra.mrb[20].mxu0 %v2532_v31  ;;  %v16417_v31 = vld [vmem:[#allocation3 + $0x30] sm:$0xff]  }
 0x26d   : > { %14238 = vmatprep.mubr.bf16.mxu0 %v2540_v52  ;;  %v3098_v52 = vrot.slane %v16417_v31, 1  ;;  %v16132_v31 = vld [vmem:[#allocation3 + $0x30] sm:$0xff]  }
 0x26e   : > { %v3553_v57 = vrot.slane %v16132_v31, 1 }
 0x26f   : > { %v3099_v17 = vsel %vm21398_vm6, %v3096_v14, %v3098_v52  ;;  %v3101_v4 = vsel %vm21398_vm6, %v3098_v52, %v3100_v59 }
 0x274   : > { %14239 = vmatmul.mubr.bf16.gmra.mrb[24].mxu0 %v2548_v10  ;;  %v16419_v10 = vld [vmem:[#allocation3 + $0x40] sm:$0xff]  }
 0x275   : > { %14242 = vmatprep.mubr.bf16.mxu0 %v2556_v13  ;;  %v3102_v13 = vrot.slane %v16419_v10, 1  ;;  %v16137_v10 = vld [vmem:[%s17310_s17 + $0x118] sm:$0xff]  }
 0x277   : > { %v3103_v29 = vsel %vm21398_vm6, %v3100_v59, %v3102_v13  ;;  %v16134_v59 = vld [vmem:[%s17310_s17 + $0x110] sm:$0xff]  }
 0x27c   : > { %14243 = vmatmul.mubr.bf16.gmra.mrb[28].mxu0 %v2564_v55  ;;  %v3105_v55 = vsel %vm21398_vm6, %v3102_v13, %v3104_v16 }
 0x27d   : > { %14246 = vmatprep.mubr.bf16.mxu0 %v2572_v19  ;;  %v16124_v19 = vld [vmem:[%s17310_s17 + $0xf8] sm:$0xff]  }
 0x284   : > { %14247 = vmatmul.mubr.bf16.gmra.mrb[32].mxu0 %v2575_v8  ;;  %v3106_v8 = vrot.slane %v16421_v5, 1  ;;  %v16143_v5 = vld [vmem:[%s17310_s17 + $0x128] sm:$0xff]  }
 0x285   : > { %14266 = vmatprep.mubr.bf16.mxu0 %v18821_v1  ;;  %v16111_v1 = vld [vmem:[%s17310_s17 + $0xa0] sm:$0xff]  }
 0x28c   : > { %14267 = vmatmul.mubr.bf16.vlgmr.msra.gmra.mrb[0].mxu0 %v18823_v15  ;;  %v16113_v15 = vld [vmem:[%s17310_s17 + $0xb0] sm:$0xff]  }
 0x28d   : > { %14303 = vmatpush3.bf16.msra.mxu0 %v16107_v37  ;;  %14270 = vmatprep.mubr.bf16.mxu0 %v18831_v56  ;;  %v16114_v56 = vld [vmem:[%s17310_s17 + $0xb8] sm:$0xff]  }
 0x28e   : > { %14304 = vmatprep.subr.bf16.mxu0 %v16108_v6  ;;  %v16415_v37 = vld [vmem:[#allocation3 + $0x20] sm:$0xff]  }
 0x28f   : > { %v3094_v39 = vrot.slane %v16415_v37, 1 }
 0x291   : > { %14305 = vmatpush3.bf16.msra.mxu0 %v16108_v6  ;;  %v3095_v42 = vsel %vm21398_vm6, %v3092_v27, %v3094_v39  ;;  %v3097_v20 = vsel %vm21398_vm6, %v3094_v39, %v3096_v14  ;;  %v16422_v6 = vld [vmem:[#allocation3 + $0x58] sm:$0xff]   ;;  %v16129_v14 = vld [vmem:[#allocation3 + $0x20] sm:$0xff]  }
 0x292   : > { %14306 = vmatprep.subr.bf16.mxu0 %v16109_v22  ;;  %v16127_v39 = vld [vmem:[#allocation3 + $0x18] sm:$0xff]  }
 0x294   : > { %14271 = vmatmul.mubr.bf16.gmra.mrb[4].mxu0 %v18834_v62  ;;  %v16117_v62 = vld [vmem:[%s17310_s17 + $0xc0] sm:$0xff]  }
 0x295   : > { %14274 = vmatprep.mubr.bf16.mxu0 %v18841_v58  ;;  %14307 = vmatpush3.bf16.msra.mxu0 %v16109_v22  ;;  %v3065_v58 = vld [vmem:[#allocation3] sm:$0xe]  ;;  %v3108_v22 = vrot.slane %v16422_v6, 1 }
 0x296   : > { %14308 = vmatprep.subr.bf16.mxu0 %v16110_v25 }
 0x299   : > { %14309 = vmatpush3.bf16.msra.mxu0 %v16110_v25  ;;  %v16128_v25 = vld [vmem:[%s17310_s17 + $0x100] sm:$0xff]  }
 0x29a   : > { %14310 = vmatprep.subr.bf16.mxu0 %v16111_v1 }
 0x29c   : > { %14275 = vmatmul.mubr.bf16.gmra.mrb[8].mxu0 %v18844_v11  ;;  %v16411_v11 = vld [vmem:[#allocation3 + $0x4] sm:$0xf] }
 0x29d   : > { %14278 = vmatprep.mubr.bf16.mxu0 %v18846_v9  ;;  %14311 = vmatpush3.bf16.msra.mxu0 %v16111_v1  ;;  %v12944_v9 = vcombine.low %v3065_v58, %v16411_v11  ;;  %v3107_v1 = vsel %vm21398_vm6, %v3104_v16, %v3106_v8  ;;  %v16140_v16 = vld [vmem:[%s17310_s17 + $0x120] sm:$0xff]  }
 0x29e   : > { %14312 = vmatprep.subr.bf16.mxu0 %v16112_v23 }
 0x2a1   : > { %14313 = vmatpush3.bf16.msra.mxu0 %v16112_v23  ;;  %v3109_v23 = vsel %vm21398_vm6, %v3106_v8, %v3108_v22 }
 0x2a2   : > { %14314 = vmatprep.subr.bf16.mxu0 %v16113_v15 }
 0x2a4   : > { %14279 = vmatmul.mubr.bf16.gmra.mrb[12].mxu0 %v18848_v32  ;;  %v2307_v32 = vld [vmem:[#allocation3 + $0x8c] sm:$0x7] }
 0x2a5   : > { %14282 = vmatprep.mubr.bf16.mxu0 %v18853_v12  ;;  %14315 = vmatpush3.bf16.msra.mxu0 %v16113_v15  ;;  %v3087_v12 = vrot.slane %v12944_v9, 1  ;;  %v16423_v15 = vld [vmem:[#allocation3 + $0x60] sm:$0xff]  }
 0x2a6   : > { %14316 = vmatprep.subr.bf16.mxu0 %v16114_v56 }
 0x2a9   : > { %14317 = vmatpush3.bf16.msra.mxu0 %v16114_v56  ;;  %v3110_v56 = vrot.slane %v16423_v15, 1  ;;  %v16141_v15 = vld [vmem:[#allocation3 + $0x60] sm:$0xff]  }
 0x2aa   : > { %14354 = vmatprep.subr.bf16.mxu0 %v16117_v62 }
 0x2ab   : > { %v3111_v11 = vsel %vm21398_vm6, %v3108_v22, %v3110_v56  ;;  %v16146_v22 = vld [vmem:[%s17310_s17 + $0x130] sm:$0xff]  }
 0x2ac   : > { %14283 = vmatmul.mubr.bf16.gmra.mrb[16].mxu0 %v18863_v38  ;;  %v16412_v38 = vld [vmem:[#allocation3 + $0x8] sm:$0xff]  }
 0x2ad   : > { %14286 = vmatprep.mubr.bf16.mxu0 %v18868_v49  ;;  %v3088_v49 = vrot.slane %v16412_v38, 1  ;;  %v16426_v38 = vld [vmem:[#allocation3 + $0x78] sm:$0xff]  }
 0x2b4   : > { %14287 = vmatmul.mubr.bf16.gmra.mrb[20].mxu0 %v18870_v18  ;;  %v12919_v18 = vcombine.low %v18909_v30, %v2307_v32  ;;  %v16119_v30 = vld [vmem:[%s17310_s17 + $0xd0] sm:$0xff]  }
 0x2b5   : > { %14290 = vmatprep.mubr.bf16.mxu0 %v18879_v36  ;;  %v3089_v36 = vsel %vm21398_vm6, %v3087_v12, %v3088_v49  ;;  %v16425_v32 = vld [vmem:[#allocation3 + $0x70] sm:$0xff]  }
 0x2b6   : > { %v3114_v12 = vrot.slane %v16425_v32, 1  ;;  %v16142_v32 = vld [vmem:[#allocation3 + $0x68] sm:$0xff]  }
 0x2bc   : > { %14291 = vmatmul.mubr.bf16.gmra.mrb[24].mxu0 %v18882_v45  ;;  %v16413_v45 = vld [vmem:[#allocation3 + $0x10] sm:$0xff]  }
 0x2bd   : > { %14294 = vmatprep.mubr.bf16.mxu0 %v18891_v48  ;;  %v3090_v48 = vrot.slane %v16413_v45, 1  ;;  %v3118_v45 = vrot.slane %v18911_v61, 1 }
 0x2bf   : > { %v3093_v54 = vsel %vm21398_vm6, %v3090_v48, %v3092_v27 }
 0x2c4   : > { %14295 = vmatmul.mubr.bf16.gmra.mrb[28].mxu0 %v18899_v53  ;;  %v3091_v53 = vsel %vm21398_vm6, %v3088_v49, %v3090_v48  ;;  %v3116_v49 = vrot.slane %v16426_v38, 1  ;;  %v3120_v48 = vrot.slane %v18915_v47, 1  ;;  %v3549_v47 = vrot.slane %v16129_v14, 1  ;;  %v16144_v38 = vld [vmem:[#allocation3 + $0x70] sm:$0xff]  }
 0x2c5   : > { %14298 = vmatprep.mubr.bf16.mxu0 %v18911_v61  ;;  %v3547_v61 = vrot.slane %v16127_v39, 1  ;;  %v16148_v39 = vld [vmem:[#allocation3 + $0x88] sm:$0xff]  }
 0x2c6   : > { %v3119_v21 = vsel %vm21398_vm6, %v3116_v49, %v3118_v45  ;;  %v3121_v27 = vsel %vm21398_vm6, %v3118_v45, %v3120_v48  ;;  %v16145_v45 = vld [vmem:[#allocation3 + $0x78] sm:$0xff]  }
 0x2cc   : > { %14299 = vmatmul.mubr.bf16.gmra.mrb[32].mxu0 %v12919_v18 }
 0x2cd   : > { %14318 = vmatprep.mubr.bf16.mxu0 %v3089_v36  ;;  %v3117_v36 = vsel %vm21398_vm6, %v3114_v12, %v3116_v49  ;;  %v3567_v49 = vrot.slane %v16142_v32, 1 }
 0x2d4   : > { %14319 = vmatmul.mubr.bf16.vlgmr.msra.gmra.mrb[0].mxu0 %v3091_v53  ;;  %v16126_v53 = vld [vmem:[#allocation3 + $0x10] sm:$0xff]  }
 0x2d5   : > { %14355 = vmatpush3.bf16.msra.mxu0 %v16117_v62  ;;  %14322 = vmatprep.mubr.bf16.mxu0 %v3093_v54  ;;  %v16424_v62 = vld [vmem:[#allocation3 + $0x68] sm:$0xff]   ;;  %v3545_v37 = vrot.slane %v16126_v53, 1 }
 0x2d6   : > { %14356 = vmatprep.subr.bf16.mxu0 %v16118_v50  ;;  %v3112_v58 = vrot.slane %v16424_v62, 1  ;;  %v3858_v53 = vld [vmem:[#allocation3 + $0x8] sm:$0xe] }
 0x2d8   : > { %v3113_v9 = vsel %vm21398_vm6, %v3110_v56, %v3112_v58  ;;  %v3115_v18 = vsel %vm21398_vm6, %v3112_v58, %v3114_v12  ;;  %v16150_v56 = vld [vmem:[%s17310_s17 + $0x138] sm:$0xff]   ;;  %v3565_v58 = vrot.slane %v16141_v15, 1 }
 0x2d9   : > { %14357 = vmatpush3.bf16.msra.mxu0 %v16118_v50  ;;  %v16125_v50 = vld [vmem:[#allocation3 + $0x8] sm:$0xfe]  }
 0x2da   : > { %14358 = vmatprep.subr.bf16.mxu0 %v16119_v30  ;;  %v3544_v54 = vrot.slane %v16125_v50, 1 }
 0x2dc   : > { %14323 = vmatmul.mubr.bf16.gmra.mrb[4].mxu0 %v3095_v42  ;;  %v3546_v24 = vsel %vm21398_vm6, %v3544_v54, %v3545_v37  ;;  %v16130_v42 = vld [vmem:[#allocation3 + $0x28] sm:$0xff]  }
 0x2dd   : > { %14326 = vmatprep.mubr.bf16.mxu0 %v3097_v20  ;;  %14359 = vmatpush3.bf16.msra.mxu0 %v16119_v30  ;;  %v3548_v30 = vsel %vm21398_vm6, %v3545_v37, %v3547_v61  ;;  %v3550_v20 = vsel %vm21398_vm6, %v3547_v61, %v3549_v47  ;;  %v3551_v52 = vrot.slane %v16130_v42, 1  ;;  %v19003_v54 = vld [vmem:[#allocation3 + $0xc] sm:$0xf] }
 0x2de   : > { %14360 = vmatprep.subr.bf16.mxu0 %v16120_v0  ;;  %v13011_v61 = vcombine.low %v3858_v53, %v19003_v54 }
 0x2e1   : > { %14361 = vmatpush3.bf16.msra.mxu0 %v16120_v0  ;;  %v16131_v0 = vld [vmem:[%s17310_s17 + $0x108] sm:$0xff]  }
 0x2e2   : > { %14362 = vmatprep.subr.bf16.mxu0 %v16121_v46 }
 0x2e4   : > { %14327 = vmatmul.mubr.bf16.gmra.mrb[8].mxu0 %v3099_v17  ;;  %v16133_v17 = vld [vmem:[#allocation3 + $0x38] sm:$0xff]  }
 0x2e5   : > { %14330 = vmatprep.mubr.bf16.mxu0 %v3101_v4  ;;  %14363 = vmatpush3.bf16.msra.mxu0 %v16121_v46  ;;  %v3552_v46 = vsel %vm21398_vm6, %v3549_v47, %v3551_v52  ;;  %v3554_v4 = vsel %vm21398_vm6, %v3551_v52, %v3553_v57  ;;  %v3555_v13 = vrot.slane %v16133_v17, 1  ;;  %v19008_v47 = vld [vmem:[#allocation3 + $0x10] sm:$0xff]  }
 0x2e6   : > { %14364 = vmatprep.subr.bf16.mxu0 %v16122_v41  ;;  %v4015_v31 = vshrl.u32 %v19008_v47, 16  ;;  %v4018_v52 = vshll.u32 %v19008_v47, 16 }
 0x2e9   : > { %14365 = vmatpush3.bf16.msra.mxu0 %v16122_v41  ;;  %v16135_v41 = vld [vmem:[#allocation3 + $0x40] sm:$0xff]  }
 0x2ea   : > { %14366 = vmatprep.subr.bf16.mxu0 %v16123_v51  ;;  %v3557_v28 = vrot.slane %v16135_v41, 1  ;;  %v4017_v41 = vrot.slane %v4015_v31, 1 }
 0x2ec   : > { %14331 = vmatmul.mubr.bf16.gmra.mrb[12].mxu0 %v3103_v29  ;;  %v16136_v29 = vld [vmem:[#allocation3 + $0x48] sm:$0xff]  }
 0x2ed   : > { %14334 = vmatprep.mubr.bf16.mxu0 %v3105_v55  ;;  %14367 = vmatpush3.bf16.msra.mxu0 %v16123_v51  ;;  %v3556_v51 = vsel %vm21398_vm6, %v3553_v57, %v3555_v13  ;;  %v3558_v55 = vsel %vm21398_vm6, %v3555_v13, %v3557_v28  ;;  %v3559_v8 = vrot.slane %v16136_v29, 1  ;;  %v19016_v13 = vld [vmem:[#allocation3 + $0x20] sm:$0xff]  }
 0x2ee   : > { %14368 = vmatprep.subr.bf16.mxu0 %v16124_v19 }
 0x2f1   : > { %14369 = vmatpush3.bf16.msra.mxu0 %v16124_v19  ;;  %v16138_v19 = vld [vmem:[#allocation3 + $0x50] sm:$0xff]  }
 0x2f2   : > { %14406 = vmatprep.subr.bf16.mxu0 %v16128_v25  ;;  %v3561_v6 = vrot.slane %v16138_v19, 1  ;;  %v4036_v19 = vshll.u32 %v19016_v13, 16 }
 0x2f4   : > { %14335 = vmatmul.mubr.bf16.gmra.mrb[16].mxu0 %v3107_v1  ;;  %v16139_v1 = vld [vmem:[#allocation3 + $0x58] sm:$0xff]  }
 0x2f5   : > { %14338 = vmatprep.mubr.bf16.mxu0 %v3109_v23  ;;  %v3562_v23 = vsel %vm21398_vm6, %v3559_v8, %v3561_v6  ;;  %v3563_v62 = vrot.slane %v16139_v1, 1  ;;  %v4038_v1 = vrot.slane %v4036_v19, 2 }
 0x2f7   : > { %v3566_v12 = vsel %vm21398_vm6, %v3563_v62, %v3565_v58 }
 0x2fc   : > { %14339 = vmatmul.mubr.bf16.gmra.mrb[20].mxu0 %v3111_v11  ;;  %v18996_v11 = vld [vmem:[%s17310_s17 + $0x140] sm:$0xff]  }
 0x2fd   : > { %14342 = vmatprep.mubr.bf16.mxu0 %v3113_v9  ;;  %v3564_v9 = vsel %vm21398_vm6, %v3561_v6, %v3563_v62  ;;  %v19022_v6 = vld [vmem:[#allocation3 + $0x28] sm:$0xff]  }
 0x2fe   : > { %v4045_v62 = vshll.u32 %v19022_v6, 16 }
 0x304   : > { %14343 = vmatmul.mubr.bf16.gmra.mrb[24].mxu0 %v3115_v18  ;;  %v3569_v18 = vrot.slane %v16144_v38, 1 }
 0x305   : > { %14346 = vmatprep.mubr.bf16.mxu0 %v3117_v36  ;;  %v3568_v36 = vsel %vm21398_vm6, %v3565_v58, %v3567_v49 }
 0x30c   : > { %14347 = vmatmul.mubr.bf16.gmra.mrb[28].mxu0 %v3119_v21  ;;  %v16147_v21 = vld [vmem:[#allocation3 + $0x80] sm:$0xff]  }
 0x30d   : > { %14350 = vmatprep.mubr.bf16.mxu0 %v3121_v27  ;;  %v3571_v27 = vrot.slane %v16145_v45, 1  ;;  %v3573_v50 = vrot.slane %v16147_v21, 1  ;;  %v16157_v45 = vld [vmem:[%s17310_s17 + $0x148] sm:$0xff]  }
 0x30f   : > { %v3572_v37 = vsel %vm21398_vm6, %v3569_v18, %v3571_v27  ;;  %v3574_v14 = vsel %vm21398_vm6, %v3571_v27, %v3573_v50  ;;  %v19036_v27 = vld [vmem:[#allocation3 + $0x40] sm:$0xff]  }
 0x314   : > { %14351 = vmatmul.mubr.bf16.gmra.mrb[32].mxu0 %v3120_v48  ;;  %v3570_v48 = vsel %vm21398_vm6, %v3567_v49, %v3569_v18  ;;  %v4047_v49 = vrot.slane %v4045_v62, 2  ;;  %v19032_v18 = vld [vmem:[#allocation3 + $0x38] sm:$0xff]  }
 0x315   : > { %14370 = vmatprep.mubr.bf16.mxu0 %v3546_v24  ;;  %v16149_v24 = vld [vmem:[#allocation3 + $0x90] sm:$0xff]   ;;  %v4060_v53 = vshrl.u32 %v19032_v18, 16 }
 0x316   : > { %v3577_v42 = vrot.slane %v16149_v24, 1  ;;  %v16160_v24 = vld [vmem:[%s17310_s17 + $0x150] sm:$0xff]  }
 0x31c   : > { %14371 = vmatmul.mubr.bf16.vlgmr.msra.gmra.mrb[0].mxu0 %v3548_v30  ;;  %v3575_v30 = vrot.slane %v16148_v39, 1 }
 0x31d   : > { %14407 = vmatpush3.bf16.msra.mxu0 %v16128_v25  ;;  %14374 = vmatprep.mubr.bf16.mxu0 %v3550_v20  ;;  %v3560_v25 = vsel %vm21398_vm6, %v3557_v28, %v3559_v8  ;;  %v4007_v20 = vshrl.u32 %v13011_v61, 16 }
 0x31e   : > { %14408 = vmatprep.subr.bf16.mxu0 %v16131_v0  ;;  %v3576_v57 = vsel %vm21398_vm6, %v3573_v50, %v3575_v30 }
 0x31f   : > { %v4009_v17 = vrot.slane %v4007_v20, 1 }
 0x321   : > { %14409 = vmatpush3.bf16.msra.mxu0 %v16131_v0  ;;  %v4010_v0 = vshll.u32 %v13011_v61, 16  ;;  %v4072_v61 = vshll.u32 %v19036_v27, 16 }
 0x322   : > { %14410 = vmatprep.subr.bf16.mxu0 %v16134_v59 }
 0x324   : > { %14375 = vmatmul.mubr.bf16.gmra.mrb[4].mxu0 %v3552_v46  ;;  %v19014_v46 = vld [vmem:[#allocation3 + $0x18] sm:$0xff]  }
 0x325   : > { %14378 = vmatprep.mubr.bf16.mxu0 %v3554_v4  ;;  %14411 = vmatpush3.bf16.msra.mxu0 %v16134_v59  ;;  %v3578_v59 = vsel %vm21398_vm6, %v3575_v30, %v3577_v42  ;;  %v4012_v4 = vrot.slane %v4010_v0, 2  ;;  %v4024_v28 = vshrl.u32 %v19014_v46, 16 }
 0x326   : > { %14412 = vmatprep.subr.bf16.mxu0 %v16137_v10 }
 0x329   : > { %14413 = vmatpush3.bf16.msra.mxu0 %v16137_v10  ;;  %v4020_v10 = vrot.slane %v4018_v52, 2  ;;  %v4074_v52 = vrot.slane %v4072_v61, 2 }
 0x32a   : > { %14414 = vmatprep.subr.bf16.mxu0 %v16140_v16 }
 0x32b   : > { %v4021_v29 = vor.u32 %v4020_v10, %v4017_v41 }
 0x32c   : > { %14379 = vmatmul.mubr.bf16.gmra.mrb[8].mxu0 %v3556_v51  ;;  %v4013_v51 = vor.u32 %v4012_v4, %v4009_v17 }
 0x32d   : > { %14382 = vmatprep.mubr.bf16.mxu0 %v3558_v55  ;;  %14415 = vmatpush3.bf16.msra.mxu0 %v16140_v16  ;;  %v4027_v16 = vshll.u32 %v19014_v46, 16  ;;  %v4033_v55 = vshrl.u32 %v19016_v13, 16 }
 0x32e   : > { %14416 = vmatprep.subr.bf16.mxu0 %v16143_v5 }
 0x32f   : > { %v4029_v8 = vrot.slane %v4027_v16, 2 }
 0x331   : > { %14417 = vmatpush3.bf16.msra.mxu0 %v16143_v5  ;;  %v4026_v5 = vrot.slane %v4024_v28, 1 }
 0x332   : > { %14418 = vmatprep.subr.bf16.mxu0 %v16146_v22 }
 0x333   : > { %v4030_v15 = vor.u32 %v4029_v8, %v4026_v5  ;;  %v19057_v5 = vld [vmem:[#allocation3 + $0x58] sm:$0xff]  }
 0x334   : > { %14383 = vmatmul.mubr.bf16.gmra.mrb[12].mxu0 %v3560_v25  ;;  %v4035_v25 = vrot.slane %v4033_v55, 1  ;;  %v4096_v62 = vshrl.u32 %v19057_v5, 16 }
 0x335   : > { %14386 = vmatprep.mubr.bf16.mxu0 %v3562_v23  ;;  %14419 = vmatpush3.bf16.msra.mxu0 %v16146_v22  ;;  %v4022_v22 = vsel %vm21397_vm12, %v4013_v51, %v4021_v29  ;;  %v19025_v23 = vld [vmem:[#allocation3 + $0x30] sm:$0xff]   ;;  %v16166_v51 = vld [vmem:[%s17310_s17 + $0x160] sm:$0xff]  }
 0x336   : > { %14420 = vmatprep.subr.bf16.mxu0 %v16150_v56  ;;  %v4039_v58 = vor.u32 %v4038_v1, %v4035_v25  ;;  %v4054_v32 = vshll.u32 %v19025_v23, 16  ;;  %v19060_v1 = vld [vmem:[#allocation3 + $0x60] sm:$0xff]  }
 0x338   : > { %v4056_v21 = vrot.slane %v4054_v32, 2  ;;  %v4105_v32 = vshrl.u32 %v19060_v1, 16 }
 0x339   : > { %14421 = vmatpush3.bf16.msra.mxu0 %v16150_v56  ;;  %v4042_v56 = vshrl.u32 %v19022_v6, 16 }
 0x33a   : > { %14458 = vmatprep.subr.bf16.mxu0 %v18996_v11 }
 0x33b   : > { %v4044_v38 = vrot.slane %v4042_v56, 1 }
 0x33c   : > { %14387 = vmatmul.mubr.bf16.gmra.mrb[16].mxu0 %v3564_v9  ;;  %v4051_v9 = vshrl.u32 %v19025_v23, 16 }
 0x33d   : > { %14390 = vmatprep.mubr.bf16.mxu0 %v3566_v12  ;;  %v4031_v12 = vsel %vm21397_vm12, %v4021_v29, %v4030_v15  ;;  %v4048_v50 = vor.u32 %v4047_v49, %v4044_v38  ;;  %v16172_v38 = vld [vmem:[%s17310_s17 + $0x170] sm:$0xff]  }
 0x33f   : > { %v4049_v30 = vsel %vm21397_vm12, %v4039_v58, %v4048_v50 }
 0x344   : > { %14391 = vmatmul.mubr.bf16.gmra.mrb[20].mxu0 %v3568_v36  ;;  %v4040_v36 = vsel %vm21397_vm12, %v4030_v15, %v4039_v58  ;;  %v16169_v15 = vld [vmem:[%s17310_s17 + $0x168] sm:$0xff]   ;;  %v4099_v58 = vshll.u32 %v19057_v5, 16 }
 0x345   : > { %14394 = vmatprep.mubr.bf16.mxu0 %v3570_v48  ;;  %v4053_v48 = vrot.slane %v4051_v9, 1 }
 0x347   : > { %v4057_v39 = vor.u32 %v4056_v21, %v4053_v48  ;;  %v19069_v48 = vld [vmem:[#allocation3 + $0x68] sm:$0xff]  }
 0x348   : > { %v4117_v61 = vshll.u32 %v19069_v48, 16 }
 0x349   : > { %v4058_v0 = vsel %vm21397_vm12, %v4048_v50, %v4057_v39  ;;  %v4107_v50 = vrot.slane %v4105_v32, 1  ;;  %v19097_v32 = vld [vmem:[#allocation3 + $0x90] sm:$0xff]  }
 0x34c   : > { %14395 = vmatmul.mubr.bf16.gmra.mrb[24].mxu0 %v3572_v37  ;;  %v4063_v37 = vshll.u32 %v19032_v18, 16 }
 0x34d   : > { %14398 = vmatprep.mubr.bf16.mxu0 %v3574_v14  ;;  %v4069_v14 = vshrl.u32 %v19036_v27, 16 }
 0x34e   : > { %v4065_v20 = vrot.slane %v4063_v37, 2  ;;  %v19072_v37 = vld [vmem:[#allocation3 + $0x70] sm:$0xff]  }
 0x34f   : > { %v4071_v31 = vrot.slane %v4069_v14, 1  ;;  %v4114_v14 = vshrl.u32 %v19069_v48, 16 }
 0x351   : > { %v4075_v10 = vor.u32 %v4074_v52, %v4071_v31  ;;  %v4116_v52 = vrot.slane %v4114_v14, 1 }
 0x354   : > { %14399 = vmatmul.mubr.bf16.gmra.mrb[28].mxu0 %v3576_v57  ;;  %v16163_v57 = vld [vmem:[%s17310_s17 + $0x158] sm:$0xff]  }
 0x355   : > { %14402 = vmatprep.mubr.bf16.mxu0 %v3578_v59  ;;  %v19049_v59 = vld [vmem:[#allocation3 + $0x50] sm:$0xff]  }
 0x356   : > { %v4087_v28 = vshrl.u32 %v19049_v59, 16  ;;  %v4090_v16 = vshll.u32 %v19049_v59, 16 }
 0x358   : > { %v4092_v25 = vrot.slane %v4090_v16, 2 }
 0x35c   : > { %14403 = vmatmul.mubr.bf16.gmra.mrb[32].mxu0 %v3577_v42  ;;  %v4062_v42 = vrot.slane %v4060_v53, 1 }
 0x35d   : > { %14422 = vmatprep.mubr.bf16.mxu0 %v4022_v22  ;;  %v4089_v22 = vrot.slane %v4087_v28, 1  ;;  %v19086_v28 = vld [vmem:[#allocation3 + $0x80] sm:$0xff]  }
 0x35e   : > { %v4066_v17 = vor.u32 %v4065_v20, %v4062_v42  ;;  %v4123_v42 = vshrl.u32 %v19072_v37, 16  ;;  %v4126_v20 = vshll.u32 %v19072_v37, 16 }
 0x35f   : > { %v4093_v9 = vor.u32 %v4092_v25, %v4089_v22 }
 0x360   : > { %v4067_v29 = vsel %vm21397_vm12, %v4057_v39, %v4066_v17  ;;  %v4076_v8 = vsel %vm21397_vm12, %v4066_v17, %v4075_v10  ;;  %v16176_v39 = vld [vmem:[%s17310_s17 + $0x178] sm:$0xff]  }
 0x361   : > { %v19083_v17 = vld [vmem:[#allocation3 + $0x78] sm:$0xff]  }
 0x364   : > { %14423 = vmatmul.mubr.bf16.vlgmr.msra.gmra.mrb[0].mxu0 %v4031_v12  ;;  %v4108_v12 = vshll.u32 %v19060_v1, 16 }
 0x365   : > { %14459 = vmatpush3.bf16.msra.mxu0 %v18996_v11  ;;  %14426 = vmatprep.mubr.bf16.mxu0 %v4040_v36  ;;  %v19045_v11 = vld [vmem:[#allocation3 + $0x48] sm:$0xff]   ;;  %v4098_v36 = vrot.slane %v4096_v62, 1 }
 0x366   : > { %14460 = vmatprep.subr.bf16.mxu0 %v16157_v45  ;;  %v4078_v4 = vshrl.u32 %v19045_v11, 16  ;;  %v4081_v41 = vshll.u32 %v19045_v11, 16  ;;  %v4110_v53 = vrot.slane %v4108_v12, 2 }
 0x368   : > { %v4080_v55 = vrot.slane %v4078_v4, 1  ;;  %v4083_v19 = vrot.slane %v4081_v41, 2  ;;  %v4125_v41 = vrot.slane %v4123_v42, 1  ;;  %v19105_v42 = vld [vmem:[#allocation3 + $0x98] ss:$0 sps:$4 sm:$0x11]  }
 0x369   : > { %14461 = vmatpush3.bf16.msra.mxu0 %v16157_v45  ;;  %v4101_v45 = vrot.slane %v4099_v58, 2 }
 0x36a   : > { %14462 = vmatprep.subr.bf16.mxu0 %v16160_v24  ;;  %v4084_v56 = vor.u32 %v4083_v19, %v4080_v55  ;;  %v4141_v19 = vshrl.u32 %v19086_v28, 16 }
 0x36c   : > { %14427 = vmatmul.mubr.bf16.gmra.mrb[4].mxu0 %v4049_v30  ;;  %v4085_v49 = vsel %vm21397_vm12, %v4075_v10, %v4084_v56  ;;  %v4094_v21 = vsel %vm21397_vm12, %v4084_v56, %v4093_v9  ;;  %v4111_v30 = vor.u32 %v4110_v53, %v4107_v50  ;;  %v4128_v10 = vrot.slane %v4126_v20, 2  ;;  %v19094_v56 = vld [vmem:[#allocation3 + $0x88] sm:$0xff]  }
 0x36d   : > { %14430 = vmatprep.mubr.bf16.mxu0 %v4058_v0  ;;  %14463 = vmatpush3.bf16.msra.mxu0 %v16160_v24  ;;  %v4102_v24 = vor.u32 %v4101_v45, %v4098_v36  ;;  %v19080_v0 = vld [vmem:[%s17310_s17 + $0x180] sm:$0xff]   ;;  %v4143_v58 = vrot.slane %v4141_v19, 1  ;;  %v4159_v45 = vshrl.u32 %v19097_v32, 16  ;;  %v4476_v19 = vrot.slane %v19014_v46, 2 }
 0x36e   : > { %14464 = vmatprep.subr.bf16.mxu0 %v16163_v57  ;;  %v4129_v55 = vor.u32 %v4128_v10, %v4125_v41 }
 0x36f   : > { %v4103_v31 = vsel %vm21397_vm12, %v4093_v9, %v4102_v24  ;;  %v4112_v4 = vsel %vm21397_vm12, %v4102_v24, %v4111_v30  ;;  %v4161_v14 = vrot.slane %v4159_v45, 1 }
 0x371   : > { %14465 = vmatpush3.bf16.msra.mxu0 %v16163_v57  ;;  %v4119_v57 = vrot.slane %v4117_v61, 2 }
 0x372   : > { %14466 = vmatprep.subr.bf16.mxu0 %v16166_v51 }
 0x373   : > { %v4120_v16 = vor.u32 %v4119_v57, %v4116_v52  ;;  %v4168_v57 = vshll.u32 %v19105_v42, 16 }
 0x374   : > { %14431 = vmatmul.mubr.bf16.gmra.mrb[8].mxu0 %v4067_v29  ;;  %v4135_v29 = vshll.u32 %v19083_v17, 16 }
 0x375   : > { %14434 = vmatprep.mubr.bf16.mxu0 %v4076_v8  ;;  %14467 = vmatpush3.bf16.msra.mxu0 %v16166_v51  ;;  %v4132_v51 = vshrl.u32 %v19083_v17, 16  ;;  %v4144_v8 = vshll.u32 %v19086_v28, 16  ;;  %v4121_v22 = vsel %vm21397_vm12, %v4111_v30, %v4120_v16  ;;  %v4130_v62 = vsel %vm21397_vm12, %v4120_v16, %v4129_v55 }
 0x376   : > { %14468 = vmatprep.subr.bf16.mxu0 %v16169_v15  ;;  %v4170_v10 = vrot.slane %v4168_v57, 2  ;;  %v19153_v57 = vld [vmem:[#allocation3 + $0x14] sm:$0xf] }
 0x377   : > { %v4134_v25 = vrot.slane %v4132_v51, 1  ;;  %v4146_v9 = vrot.slane %v4144_v8, 2  ;;  %v4474_v51 = vrot.slane %v19008_v47, 2  ;;  %v4478_v8 = vrot.slane %v19016_v13, 2 }
 0x378   : > { %v4480_v47 = vrot.slane %v19022_v6, 2  ;;  %v4486_v6 = vrot.slane %v19036_v27, 2  ;;  %v16185_v27 = vld [vmem:[%s17310_s17 + $0x1b0] sm:$0xff]  }
 0x379   : > { %14469 = vmatpush3.bf16.msra.mxu0 %v16169_v15  ;;  %v4137_v15 = vrot.slane %v4135_v29, 2  ;;  %v4147_v36 = vor.u32 %v4146_v9, %v4143_v58  ;;  %v16182_v58 = vld [vmem:[%s17310_s17 + $0x198] sm:$0xff]   ;;  %v16183_v9 = vld [vmem:[%s17310_s17 + $0x1a0] sm:$0xff]  }
 0x37a   : > { %14470 = vmatprep.subr.bf16.mxu0 %v16172_v38  ;;  %v4481_v46 = vsel %vm21396_vm7, %v4478_v8, %v4480_v47 }
 0x37b   : > { %v4138_v12 = vor.u32 %v4137_v15, %v4134_v25  ;;  %v16180_v25 = vld [vmem:[%s17310_s17 + $0x188] sm:$0xff]   ;;  %v4482_v15 = vrot.slane %v19025_v23, 2 }
 0x37c   : > { %14435 = vmatmul.mubr.bf16.gmra.mrb[12].mxu0 %v4085_v49  ;;  %v4153_v49 = vshll.u32 %v19094_v56, 16 }
 0x37d   : > { %14438 = vmatprep.mubr.bf16.mxu0 %v4094_v21  ;;  %14471 = vmatpush3.bf16.msra.mxu0 %v16172_v38  ;;  %v4150_v38 = vshrl.u32 %v19094_v56, 16  ;;  %v4162_v21 = vshll.u32 %v19097_v32, 16  ;;  %v4139_v50 = vsel %vm21397_vm12, %v4129_v55, %v4138_v12  ;;  %v4148_v24 = vsel %vm21397_vm12, %v4138_v12, %v4147_v36 }
 0x37e   : > { %14472 = vmatprep.subr.bf16.mxu0 %v16176_v39  ;;  %v4483_v13 = vsel %vm21396_vm7, %v4480_v47, %v4482_v15  ;;  %v19178_v47 = vld [vmem:[#allocation3 + $0x38] sm:$0xff]  }
 0x37f   : > { %v4152_v53 = vrot.slane %v4150_v38, 1  ;;  %v4164_v61 = vrot.slane %v4162_v21, 2  ;;  %v16184_v38 = vld [vmem:[%s17310_s17 + $0x1a8] sm:$0xff]   ;;  %v16186_v21 = vld [vmem:[%s17310_s17 + $0x1b8] sm:$0xff]  }
 0x381   : > { %14473 = vmatpush3.bf16.msra.mxu0 %v16176_v39  ;;  %v4155_v39 = vrot.slane %v4153_v49, 2  ;;  %v4165_v20 = vor.u32 %v4164_v61, %v4161_v14  ;;  %v4488_v49 = vrot.slane %v19045_v11, 2  ;;  %v4494_v11 = vrot.slane %v19060_v1, 2 }
 0x382   : > { %14510 = vmatprep.subr.bf16.mxu0 %v19080_v0  ;;  %v4498_v14 = vrot.slane %v19072_v37, 2  ;;  %v4500_v1 = vrot.slane %v19083_v17, 2  ;;  %v4506_v37 = vrot.slane %v19097_v32, 2 }
 0x383   : > { %v4156_v30 = vor.u32 %v4155_v39, %v4152_v53  ;;  %v4171_v29 = vsel %vm21397_vm12, %v4165_v20, %v4170_v10  ;;  %v16190_v53 = vld [vmem:[%s17310_s17 + $0x1c0] sm:$0xff]   ;;  %v4508_v10 = vrot.slane %v19105_v42, 2 }
 0x384   : > { %14439 = vmatmul.mubr.bf16.gmra.mrb[16].mxu0 %v4103_v31  ;;  %v4451_v31 = vld [vmem:[#allocation3 + $0x8] sm:$0xc] }
 0x385   : > { %14442 = vmatprep.mubr.bf16.mxu0 %v4112_v4  ;;  %v4157_v52 = vsel %vm21397_vm12, %v4147_v36, %v4156_v30  ;;  %v4166_v4 = vsel %vm21397_vm12, %v4156_v30, %v4165_v20  ;;  %v13054_v41 = vcombine.low %v4451_v31, %v19003_v54  ;;  %v4477_v54 = vsel %vm21396_vm7, %v4474_v51, %v4476_v19 }
 0x386   : > { %v4489_v36 = vsel %vm21396_vm7, %v4486_v6, %v4488_v49  ;;  %v4502_v30 = vrot.slane %v19086_v28, 2  ;;  %v4501_v20 = vsel %vm21396_vm7, %v4498_v14, %v4500_v1  ;;  %v19160_v28 = vld [vmem:[#allocation3 + $0x18] sm:$0xff]  }
 0x387   : > { %v4473_v16 = vrot.slane %v13054_v41, 2  ;;  %v4937_v32 = vrot.slane %v19160_v28, 2 }
 0x388   : > { %v4503_v31 = vsel %vm21396_vm7, %v4500_v1, %v4502_v30  ;;  %v19213_v1 = vld [vmem:[%s17310_s17 + $0x200] sm:$0xff]  }
 0x389   : > { %v4475_v55 = vsel %vm21396_vm7, %v4473_v16, %v4474_v51  ;;  %v4509_v16 = vsel %vm21396_vm7, %v4506_v37, %v4508_v10  ;;  %v19166_v51 = vld [vmem:[#allocation3 + $0x20] sm:$0xff]  }
 0x38c   : > { %14443 = vmatmul.mubr.bf16.gmra.mrb[20].mxu0 %v4121_v22  ;;  %v4479_v22 = vsel %vm21396_vm7, %v4476_v19, %v4478_v8  ;;  %v4939_v19 = vrot.slane %v19166_v51, 2 }
 0x38d   : > { %14446 = vmatprep.mubr.bf16.mxu0 %v4130_v62  ;;  %v16181_v62 = vld [vmem:[%s17310_s17 + $0x190] sm:$0xff]  }
 0x38e   : > { %v4940_v42 = vsel %vm21396_vm7, %v4937_v32, %v4939_v19 }
 0x394   : > { %14447 = vmatmul.mubr.bf16.gmra.mrb[24].mxu0 %v4139_v50  ;;  %v4492_v50 = vrot.slane %v19057_v5, 2 }
 0x395   : > { %14450 = vmatprep.mubr.bf16.mxu0 %v4148_v24  ;;  %v4496_v24 = vrot.slane %v19069_v48, 2  ;;  %v4504_v48 = vrot.slane %v19094_v56, 2 }
 0x396   : > { %v4495_v39 = vsel %vm21396_vm7, %v4492_v50, %v4494_v11 }
 0x397   : > { %v4497_v61 = vsel %vm21396_vm7, %v4494_v11, %v4496_v24  ;;  %v4499_v5 = vsel %vm21396_vm7, %v4496_v24, %v4498_v14  ;;  %v4507_v41 = vsel %vm21396_vm7, %v4504_v48, %v4506_v37  ;;  %v16208_v11 = vld [vmem:[%s17310_s17 + $0x1f0] sm:$0xff]   ;;  %v19207_v24 = vld [vmem:[#allocation3 + $0x68] sm:$0xff]   ;;  %v16212_v14 = vld [vmem:[%s17310_s17 + $0x1f8] sm:$0xff]  }
 0x39c   : > { %14451 = vmatmul.mubr.bf16.gmra.mrb[28].mxu0 %v4157_v52  ;;  %v4789_v52 = vld [vmem:[#allocation3 + $0x10] sm:$0xc] }
 0x39d   : > { %14454 = vmatprep.mubr.bf16.mxu0 %v4166_v4  ;;  %v4505_v4 = vsel %vm21396_vm7, %v4502_v30, %v4504_v48  ;;  %v19158_v17 = vcombine.low %v4789_v52, %v19153_v57  ;;  %v19219_v48 = vld [vmem:[#allocation3 + $0x78] sm:$0xff]  }
 0x39e   : > { %v4961_v52 = vrot.slane %v19219_v48, 2 }
 0x39f   : > { %v4936_v56 = vrot.slane %v19158_v17, 2 }
 0x3a4   : > { %14455 = vmatmul.mubr.bf16.gmra.mrb[32].mxu0 %v4171_v29  ;;  %v4938_v29 = vsel %vm21396_vm7, %v4936_v56, %v4937_v32  ;;  %v19228_v56 = vld [vmem:[#allocation3 + $0x88] sm:$0xff]  }
 0x3a5   : > { %14474 = vmatprep.mubr.bf16.mxu0 %v4475_v55  ;;  %v19169_v55 = vld [vmem:[#allocation3 + $0x28] sm:$0xff]  }
 0x3a6   : > { %v4941_v8 = vrot.slane %v19169_v55, 2 }
 0x3ac   : > { %14475 = vmatmul.mubr.bf16.vlgmr.msra.gmra.mrb[0].mxu0 %v4477_v54  ;;  %v19174_v54 = vld [vmem:[#allocation3 + $0x30] sm:$0xff]  }
 0x3ad   : > { %14511 = vmatpush3.bf16.msra.mxu0 %v19080_v0  ;;  %14478 = vmatprep.mubr.bf16.mxu0 %v4479_v22  ;;  %v4484_v0 = vrot.slane %v19032_v18, 2  ;;  %v4490_v18 = vrot.slane %v19049_v59, 2  ;;  %v4942_v22 = vsel %vm21396_vm7, %v4939_v19, %v4941_v8  ;;  %v19233_v19 = vld [vmem:[#allocation3 + $0x90] sm:$0xff]  }
 0x3ae   : > { %14512 = vmatprep.subr.bf16.mxu0 %v16180_v25 }
 0x3af   : > { %v4485_v23 = vsel %vm21396_vm7, %v4482_v15, %v4484_v0  ;;  %v4487_v12 = vsel %vm21396_vm7, %v4484_v0, %v4486_v6  ;;  %v4491_v45 = vsel %vm21396_vm7, %v4488_v49, %v4490_v18  ;;  %v4493_v59 = vsel %vm21396_vm7, %v4490_v18, %v4492_v50  ;;  %v19187_v6 = vld [vmem:[#allocation3 + $0x48] sm:$0xff]   ;;  %v19194_v18 = vld [vmem:[#allocation3 + $0x50] sm:$0xff]  }
 0x3b0   : > { %v4943_v15 = vrot.slane %v19174_v54, 2 }
 0x3b1   : > { %14513 = vmatpush3.bf16.msra.mxu0 %v16180_v25  ;;  %v16193_v25 = vld [vmem:[%s17310_s17 + $0x1c8] sm:$0xff]  }
 0x3b2   : > { %14514 = vmatprep.subr.bf16.mxu0 %v16181_v62 }
 0x3b4   : > { %14479 = vmatmul.mubr.bf16.gmra.mrb[4].mxu0 %v4481_v46  ;;  %v16196_v46 = vld [vmem:[%s17310_s17 + $0x1d0] sm:$0xff]  }
 0x3b5   : > { %14482 = vmatprep.mubr.bf16.mxu0 %v4483_v13  ;;  %14515 = vmatpush3.bf16.msra.mxu0 %v16181_v62  ;;  %v4945_v62 = vrot.slane %v19178_v47, 2  ;;  %v4944_v13 = vsel %vm21396_vm7, %v4941_v8, %v4943_v15  ;;  %v19235_v8 = vld [vmem:[#allocation3 + $0x98] sm:$0xff]  }
 0x3b6   : > { %14516 = vmatprep.subr.bf16.mxu0 %v16182_v58 }
 0x3b7   : > { %v4946_v0 = vsel %vm21396_vm7, %v4943_v15, %v4945_v62  ;;  %v5275_v15 = vshrl.u32 %v19158_v17, 16 }
 0x3b9   : > { %14517 = vmatpush3.bf16.msra.mxu0 %v16182_v58  ;;  %v19184_v58 = vld [vmem:[#allocation3 + $0x40] sm:$0xff]  }
 0x3ba   : > { %14518 = vmatprep.subr.bf16.mxu0 %v16183_v9 }
 0x3bc   : > { %14483 = vmatmul.mubr.bf16.gmra.mrb[8].mxu0 %v4485_v23  ;;  %v4947_v23 = vrot.slane %v19184_v58, 2 }
 0x3bd   : > { %14486 = vmatprep.mubr.bf16.mxu0 %v4487_v12  ;;  %14519 = vmatpush3.bf16.msra.mxu0 %v16183_v9  ;;  %v16199_v9 = vld [vmem:[%s17310_s17 + $0x1d8] sm:$0xff]   ;;  %v4949_v12 = vrot.slane %v19187_v6, 2 }
 0x3be   : > { %14520 = vmatprep.subr.bf16.mxu0 %v16184_v38  ;;  %v4948_v49 = vsel %vm21396_vm7, %v4945_v62, %v4947_v23  ;;  %v5278_v62 = vshll.u32 %v19158_v17, 16  ;;  %v5295_v17 = vshll.u32 %v19166_v51, 16 }
 0x3c1   : > { %14521 = vmatpush3.bf16.msra.mxu0 %v16184_v38  ;;  %v16202_v38 = vld [vmem:[%s17310_s17 + $0x1e0] sm:$0xff]  }
 0x3c2   : > { %14522 = vmatprep.subr.bf16.mxu0 %v16185_v27 }
 0x3c4   : > { %14487 = vmatmul.mubr.bf16.gmra.mrb[12].mxu0 %v4489_v36  ;;  %v19197_v36 = vld [vmem:[#allocation3 + $0x58] sm:$0xff]  }
 0x3c5   : > { %14490 = vmatprep.mubr.bf16.mxu0 %v4491_v45  ;;  %14523 = vmatpush3.bf16.msra.mxu0 %v16185_v27  ;;  %v4950_v27 = vsel %vm21396_vm7, %v4947_v23, %v4949_v12  ;;  %v16205_v45 = vld [vmem:[%s17310_s17 + $0x1e8] sm:$0xff]   ;;  %v4953_v50 = vrot.slane %v19197_v36, 2  ;;  %v16213_v23 = vld [vmem:[#allocation3 + $0xa0] ss:$0 sps:$4 sm:$0x11]  }
 0x3c6   : > { %14524 = vmatprep.subr.bf16.mxu0 %v16186_v21 }
 0x3c9   : > { %14525 = vmatpush3.bf16.msra.mxu0 %v16186_v21  ;;  %v4951_v21 = vrot.slane %v19194_v18, 2 }
 0x3ca   : > { %14562 = vmatprep.subr.bf16.mxu0 %v16190_v53 }
 0x3cc   : > { %14491 = vmatmul.mubr.bf16.gmra.mrb[16].mxu0 %v4493_v59  ;;  %v19204_v59 = vld [vmem:[#allocation3 + $0x60] sm:$0xff]  }
 0x3cd   : > { %14494 = vmatprep.mubr.bf16.mxu0 %v4495_v39  ;;  %v4954_v39 = vsel %vm21396_vm7, %v4951_v21, %v4953_v50 }
 0x3d4   : > { %14495 = vmatmul.mubr.bf16.gmra.mrb[20].mxu0 %v4497_v61  ;;  %v4955_v61 = vrot.slane %v19204_v59, 2 }
 0x3d5   : > { %14498 = vmatprep.mubr.bf16.mxu0 %v4499_v5  ;;  %v4957_v5 = vrot.slane %v19207_v24, 2 }
 0x3d6   : > { %v4956_v30 = vsel %vm21396_vm7, %v4953_v50, %v4955_v61 }
 0x3dc   : > { %14499 = vmatmul.mubr.bf16.gmra.mrb[24].mxu0 %v4501_v20  ;;  %v19216_v20 = vld [vmem:[#allocation3 + $0x70] sm:$0xff]  }
 0x3dd   : > { %14502 = vmatprep.mubr.bf16.mxu0 %v4503_v31  ;;  %v4958_v31 = vsel %vm21396_vm7, %v4955_v61, %v4957_v5  ;;  %v4959_v37 = vrot.slane %v19216_v20, 2 }
 0x3df   : > { %v4962_v10 = vsel %vm21396_vm7, %v4959_v37, %v4961_v52 }
 0x3e4   : > { %14503 = vmatmul.mubr.bf16.gmra.mrb[28].mxu0 %v4505_v4  ;;  %v4960_v4 = vsel %vm21396_vm7, %v4957_v5, %v4959_v37  ;;  %v5297_v5 = vrot.slane %v5295_v17, 3 }
 0x3e5   : > { %14506 = vmatprep.mubr.bf16.mxu0 %v4507_v41  ;;  %v19225_v41 = vld [vmem:[#allocation3 + $0x80] sm:$0xff]  }
 0x3e6   : > { %v4963_v32 = vrot.slane %v19225_v41, 2 }
 0x3ec   : > { %14507 = vmatmul.mubr.bf16.gmra.mrb[32].mxu0 %v4509_v16  ;;  %v4965_v16 = vrot.slane %v19228_v56, 2 }
 0x3ed   : > { %14526 = vmatprep.mubr.bf16.mxu0 %v4938_v29  ;;  %v4964_v29 = vsel %vm21396_vm7, %v4961_v52, %v4963_v32 }
 0x3f4   : > { %14527 = vmatmul.mubr.bf16.vlgmr.msra.gmra.mrb[0].mxu0 %v4940_v42  ;;  %v4966_v42 = vsel %vm21396_vm7, %v4963_v32, %v4965_v16 }
 0x3f5   : > { %14563 = vmatpush3.bf16.msra.mxu0 %v16190_v53  ;;  %14530 = vmatprep.mubr.bf16.mxu0 %v4942_v22  ;;  %v4952_v53 = vsel %vm21396_vm7, %v4949_v12, %v4951_v21  ;;  %v4967_v22 = vrot.slane %v19233_v19, 2  ;;  %v5277_v12 = vrot.slane %v5275_v15, 2  ;;  %v5292_v21 = vshrl.u32 %v19166_v51, 16 }
 0x3f6   : > { %14564 = vmatprep.subr.bf16.mxu0 %v16193_v25 }
 0x3f7   : > { %v5294_v61 = vrot.slane %v5292_v21, 2 }
 0x3f9   : > { %14565 = vmatpush3.bf16.msra.mxu0 %v16193_v25  ;;  %v4969_v25 = vrot.slane %v19235_v8, 2  ;;  %v5298_v52 = vor.u32 %v5297_v5, %v5294_v61  ;;  %v5349_v61 = vshll.u32 %v19194_v18, 16 }
 0x3fa   : > { %14566 = vmatprep.subr.bf16.mxu0 %v16196_v46 }
 0x3fc   : > { %14531 = vmatmul.mubr.bf16.gmra.mrb[4].mxu0 %v4944_v13  ;;  %v5286_v13 = vshll.u32 %v19160_v28, 16 }
 0x3fd   : > { %14534 = vmatprep.mubr.bf16.mxu0 %v4946_v0  ;;  %14567 = vmatpush3.bf16.msra.mxu0 %v16196_v46  ;;  %v5283_v46 = vshrl.u32 %v19160_v28, 16  ;;  %v4968_v0 = vsel %vm21396_vm7, %v4965_v16, %v4967_v22  ;;  %v5319_v16 = vshrl.u32 %v19178_v47, 16 }
 0x3fe   : > { %14568 = vmatprep.subr.bf16.mxu0 %v16199_v9 }
 0x401   : > { %14569 = vmatpush3.bf16.msra.mxu0 %v16199_v9  ;;  %v4970_v9 = vsel %vm21396_vm7, %v4967_v22, %v4969_v25 }
 0x402   : > { %14570 = vmatprep.subr.bf16.mxu0 %v16202_v38 }
 0x404   : > { %14535 = vmatmul.mubr.bf16.gmra.mrb[8].mxu0 %v4948_v49  ;;  %v5285_v49 = vrot.slane %v5283_v46, 2  ;;  %v5321_v46 = vrot.slane %v5319_v16, 2 }
 0x405   : > { %14538 = vmatprep.mubr.bf16.mxu0 %v4950_v27  ;;  %14571 = vmatpush3.bf16.msra.mxu0 %v16202_v38  ;;  %v5280_v38 = vrot.slane %v5278_v62, 3  ;;  %v5288_v27 = vrot.slane %v5286_v13, 3  ;;  %v16215_v62 = vld [vmem:[%s17310_s17 + $0x208] sm:$0xff]  }
 0x406   : > { %14572 = vmatprep.subr.bf16.mxu0 %v16205_v45 }
 0x407   : > { %v5281_v50 = vor.u32 %v5280_v38, %v5277_v12  ;;  %v16216_v38 = vld [vmem:[%s17310_s17 + $0x210] sm:$0xff]  }
 0x409   : > { %14573 = vmatpush3.bf16.msra.mxu0 %v16205_v45  ;;  %v4971_v45 = vrot.slane %v16213_v23, 2  ;;  %v5331_v23 = vshll.u32 %v19184_v58, 16 }
 0x40a   : > { %14574 = vmatprep.subr.bf16.mxu0 %v16208_v11 }
 0x40b   : > { %v5333_v17 = vrot.slane %v5331_v23, 3 }
 0x40c   : > { %14539 = vmatmul.mubr.bf16.gmra.mrb[12].mxu0 %v4952_v53  ;;  %v5301_v53 = vshrl.u32 %v19169_v55, 16 }
 0x40d   : > { %14542 = vmatprep.mubr.bf16.mxu0 %v4954_v39  ;;  %14575 = vmatpush3.bf16.msra.mxu0 %v16208_v11  ;;  %v5289_v11 = vor.u32 %v5288_v27, %v5285_v49  ;;  %v5304_v39 = vshll.u32 %v19169_v55, 16  ;;  %v5337_v49 = vshrl.u32 %v19187_v6, 16  ;;  %v5340_v27 = vshll.u32 %v19187_v6, 16 }
 0x40e   : > { %14576 = vmatprep.subr.bf16.mxu0 %v16212_v14 }
 0x40f   : > { %v5306_v37 = vrot.slane %v5304_v39, 3 }
 0x411   : > { %14577 = vmatpush3.bf16.msra.mxu0 %v16212_v14  ;;  %v4972_v14 = vsel %vm21396_vm7, %v4969_v25, %v4971_v45  ;;  %vm6393_vm7 = vsmask.f32 5392 }
 0x412   : > { %14614 = vmatprep.subr.bf16.mxu0 %v19213_v1 }
 0x414   : > { %14543 = vmatmul.mubr.bf16.gmra.mrb[16].mxu0 %v4956_v30  ;;  %v5290_v30 = vsel %vm21395_vm9, %v5281_v50, %v5289_v11  ;;  %v5339_v50 = vrot.slane %v5337_v49, 2 }
 0x415   : > { %14546 = vmatprep.mubr.bf16.mxu0 %v4958_v31  ;;  %v5303_v31 = vrot.slane %v5301_v53, 2  ;;  %v16217_v53 = vld [vmem:[%s17310_s17 + $0x218] sm:$0xff]  }
 0x417   : > { %v5307_v32 = vor.u32 %v5306_v37, %v5303_v31  ;;  %v5358_v31 = vshll.u32 %v19197_v36, 16  ;;  %v16218_v37 = vld [vmem:[%s17310_s17 + $0x220] sm:$0xff]  }
 0x419   : > { %v5308_v15 = vsel %vm21395_vm9, %v5298_v52, %v5307_v32 }
 0x41c   : > { %14547 = vmatmul.mubr.bf16.gmra.mrb[20].mxu0 %v4960_v4  ;;  %v5310_v4 = vshrl.u32 %v19174_v54, 16 }
 0x41d   : > { %14550 = vmatprep.mubr.bf16.mxu0 %v4962_v10  ;;  %v5313_v10 = vshll.u32 %v19174_v54, 16 }
 0x41e   : > { %v5312_v22 = vrot.slane %v5310_v4, 2 }
 0x41f   : > { %v5315_v25 = vrot.slane %v5313_v10, 3  ;;  %v5351_v10 = vrot.slane %v5349_v61, 3 }
 0x424   : > { %14551 = vmatmul.mubr.bf16.gmra.mrb[24].mxu0 %v4964_v29  ;;  %v5322_v29 = vshll.u32 %v19178_v47, 16 }
 0x425   : > { %14554 = vmatprep.mubr.bf16.mxu0 %v4966_v42  ;;  %v5299_v42 = vsel %vm21395_vm9, %v5289_v11, %v5298_v52  ;;  %v5342_v11 = vrot.slane %v5340_v27, 3 }
 0x426   : > { %v5324_v13 = vrot.slane %v5322_v29, 3  ;;  %v5360_v29 = vrot.slane %v5358_v31, 3 }
 0x427   : > { %v5343_v5 = vor.u32 %v5342_v11, %v5339_v50  ;;  %v5391_v11 = vshrl.u32 %v19219_v48, 16 }
 0x428   : > { %v5325_v12 = vor.u32 %v5324_v13, %v5321_v46  ;;  %v5373_v46 = vshrl.u32 %v19207_v24, 16  ;;  %v5376_v13 = vshll.u32 %v19207_v24, 16 }
 0x42a   : > { %v5375_v49 = vrot.slane %v5373_v46, 2  ;;  %v5378_v27 = vrot.slane %v5376_v13, 3  ;;  %v5418_v13 = vshrl.u32 %v19233_v19, 16 }
 0x42c   : > { %14555 = vmatmul.mubr.bf16.gmra.mrb[28].mxu0 %v4968_v0  ;;  %v5316_v0 = vor.u32 %v5315_v25, %v5312_v22  ;;  %v5364_v25 = vshrl.u32 %v19204_v59, 16  ;;  %v5379_v50 = vor.u32 %v5378_v27, %v5375_v49  ;;  %v5420_v49 = vrot.slane %v5418_v13, 2 }
 0x42d   : > { %14558 = vmatprep.mubr.bf16.mxu0 %v4970_v9  ;;  %v5328_v9 = vshrl.u32 %v19184_v58, 16 }
 0x42e   : > { %v5317_v45 = vsel %vm21395_vm9, %v5307_v32, %v5316_v0  ;;  %v5366_v23 = vrot.slane %v5364_v25, 2 }
 0x42f   : > { %v5330_v21 = vrot.slane %v5328_v9, 2 }
 0x431   : > { %v5334_v39 = vor.u32 %v5333_v17, %v5330_v21  ;;  %v5382_v17 = vshrl.u32 %v19216_v20, 16 }
 0x433   : > { %v5335_v52 = vsel %vm21395_vm9, %v5325_v12, %v5334_v39  ;;  %v5344_v32 = vsel %vm21395_vm9, %v5334_v39, %v5343_v5 }
 0x434   : > { %14559 = vmatmul.mubr.bf16.gmra.mrb[32].mxu0 %v4972_v14  ;;  %v5346_v14 = vshrl.u32 %v19194_v18, 16 }
 0x435   : > { %14578 = vmatprep.mubr.bf16.mxu0 %v5290_v30  ;;  %v5355_v30 = vshrl.u32 %v19197_v36, 16 }
 0x436   : > { %v5348_v4 = vrot.slane %v5346_v14, 2  ;;  %v5384_v14 = vrot.slane %v5382_v17, 2 }
 0x437   : > { %v5357_v16 = vrot.slane %v5355_v30, 2  ;;  %v5393_v30 = vrot.slane %v5391_v11, 2 }
 0x438   : > { %v5352_v22 = vor.u32 %v5351_v10, %v5348_v4  ;;  %v5403_v4 = vshll.u32 %v19225_v41, 16 }
 0x43a   : > { %v5353_v9 = vsel %vm21395_vm9, %v5343_v5, %v5352_v22 }
 0x43c   : > { %14579 = vmatmul.mubr.bf16.vlgmr.msra.gmra.mrb[0].mxu0 %v5299_v42  ;;  %v16219_v42 = vld [vmem:[%s17310_s17 + $0x228] sm:$0xff]  }
 0x43d   : > { %14615 = vmatpush3.bf16.msra.mxu0 %v19213_v1  ;;  %14582 = vmatprep.mubr.bf16.mxu0 %v5308_v15  ;;  %v5326_v1 = vsel %vm21395_vm9, %v5316_v0, %v5325_v12  ;;  %v5367_v15 = vshll.u32 %v19204_v59, 16  ;;  %v16220_v0 = vld [vmem:[%s17310_s17 + $0x230] sm:$0xff]  }
 0x43e   : > { %14616 = vmatprep.subr.bf16.mxu0 %v16215_v62 }
 0x43f   : > { %v5369_v12 = vrot.slane %v5367_v15, 3 }
 0x441   : > { %14617 = vmatpush3.bf16.msra.mxu0 %v16215_v62  ;;  %v5361_v62 = vor.u32 %v5360_v29, %v5357_v16  ;;  %v5370_v21 = vor.u32 %v5369_v12, %v5366_v23  ;;  %v5412_v16 = vshll.u32 %v19228_v56, 16  ;;  %v5427_v23 = vshrl.u32 %v19235_v8, 16 }
 0x442   : > { %14618 = vmatprep.subr.bf16.mxu0 %v16216_v38  ;;  %v5430_v12 = vshll.u32 %v19235_v8, 16 }
 0x443   : > { %v5371_v39 = vsel %vm21395_vm9, %v5361_v62, %v5370_v21  ;;  %v5380_v5 = vsel %vm21395_vm9, %v5370_v21, %v5379_v50  ;;  %v5429_v17 = vrot.slane %v5427_v23, 2 }
 0x444   : > { %14583 = vmatmul.mubr.bf16.gmra.mrb[4].mxu0 %v5317_v45  ;;  %v16221_v45 = vld [vmem:[%s17310_s17 + $0x238] sm:$0xff]  }
 0x445   : > { %14586 = vmatprep.mubr.bf16.mxu0 %v5326_v1  ;;  %14619 = vmatpush3.bf16.msra.mxu0 %v16216_v38  ;;  %v5362_v38 = vsel %vm21395_vm9, %v5352_v22, %v5361_v62  ;;  %v5385_v1 = vshll.u32 %v19216_v20, 16  ;;  %v5405_v22 = vrot.slane %v5403_v4, 3  ;;  %v5414_v62 = vrot.slane %v5412_v16, 3 }
 0x446   : > { %14620 = vmatprep.subr.bf16.mxu0 %v16217_v53 }
 0x447   : > { %v5387_v61 = vrot.slane %v5385_v1, 3  ;;  %v5432_v1 = vrot.slane %v5430_v12, 3 }
 0x449   : > { %14621 = vmatpush3.bf16.msra.mxu0 %v16217_v53  ;;  %v5394_v53 = vshll.u32 %v19219_v48, 16 }
 0x44a   : > { %14622 = vmatprep.subr.bf16.mxu0 %v16218_v37 }
 0x44b   : > { %v5396_v31 = vrot.slane %v5394_v53, 3 }
 0x44c   : > { %14587 = vmatmul.mubr.bf16.gmra.mrb[8].mxu0 %v5335_v52  ;;  %v5400_v52 = vshrl.u32 %v19225_v41, 16 }
 0x44d   : > { %14590 = vmatprep.mubr.bf16.mxu0 %v5344_v32  ;;  %14623 = vmatpush3.bf16.msra.mxu0 %v16218_v37  ;;  %v5388_v37 = vor.u32 %v5387_v61, %v5384_v14  ;;  %v5397_v10 = vor.u32 %v5396_v31, %v5393_v30  ;;  %v5409_v32 = vshrl.u32 %v19228_v56, 16  ;;  %v5723_v14 = vld [vmem:[#allocation3 + $0x10] sm:$0x8] }
 0x44e   : > { %14624 = vmatprep.subr.bf16.mxu0 %v16219_v42 }
 0x44f   : > { %v5389_v29 = vsel %vm21395_vm9, %v5379_v50, %v5388_v37  ;;  %v5398_v25 = vsel %vm21395_vm9, %v5388_v37, %v5397_v10  ;;  %v5411_v15 = vrot.slane %v5409_v32, 2  ;;  %v13147_v37 = vcombine.low %v5723_v14, %v19153_v57  ;;  %v16231_v14 = vld [vmem:[%s17318_s20 + $0x78] sm:$0xff]  }
 0x451   : > { %14625 = vmatpush3.bf16.msra.mxu0 %v16219_v42  ;;  %v5402_v42 = vrot.slane %v5400_v52, 2  ;;  %v5745_v4 = vrot.slane %v13147_v37, 3 }
 0x452   : > { %14626 = vmatprep.subr.bf16.mxu0 %v16220_v0 }
 0x453   : > { %v5406_v46 = vor.u32 %v5405_v22, %v5402_v42  ;;  %v5750_v42 = vrot.slane %v19169_v55, 3  ;;  %v5758_v55 = vrot.slane %v19187_v6, 3  ;;  %v5766_v6 = vrot.slane %v19207_v24, 3 }
 0x454   : > { %14591 = vmatmul.mubr.bf16.gmra.mrb[12].mxu0 %v5353_v9  ;;  %v5415_v9 = vor.u32 %v5414_v62, %v5411_v15  ;;  %v5774_v24 = vrot.slane %v19228_v56, 3 }
 0x455   : > { %14594 = vmatprep.mubr.bf16.mxu0 %v5362_v38  ;;  %14627 = vmatpush3.bf16.msra.mxu0 %v16220_v0  ;;  %v5421_v0 = vshll.u32 %v19233_v19, 16  ;;  %v5407_v38 = vsel %vm21395_vm9, %v5397_v10, %v5406_v46  ;;  %v5746_v10 = vrot.slane %v19160_v28, 3  ;;  %v5754_v28 = vrot.slane %v19178_v47, 3 }
 0x456   : > { %14628 = vmatprep.subr.bf16.mxu0 %v16221_v45  ;;  %v5416_v21 = vsel %vm21395_vm9, %v5406_v46, %v5415_v9  ;;  %v5762_v47 = vrot.slane %v19197_v36, 3  ;;  %v5770_v36 = vrot.slane %v19219_v48, 3  ;;  %v5778_v48 = vrot.slane %v19235_v8, 3  ;;  %v16226_v8 = vld [vmem:[%s17318_s20 + $0x50] sm:$0xff]  }
 0x457   : > { %v5423_v27 = vrot.slane %v5421_v0, 3  ;;  %v5747_v16 = vsel %vm21394_vm11, %v5745_v4, %v5746_v10 }
 0x459   : > { %14629 = vmatpush3.bf16.msra.mxu0 %v16221_v45  ;;  %v19301_v45 = vld [vmem:[#allocation3 + $0xa0] ss:$0 sps:$4 sm:$0x33]   ;;  %v5424_v50 = vor.u32 %v5423_v27, %v5420_v49 }
 0x45a   : > { %v5436_v11 = vshrl.u32 %v19301_v45, 16  ;;  %v5439_v53 = vshll.u32 %v19301_v45, 16 }
 0x45b   : > { %v5425_v61 = vsel %vm21395_vm9, %v5415_v9, %v5424_v50 }
 0x45c   : > { %14595 = vmatmul.mubr.bf16.gmra.mrb[16].mxu0 %v5371_v39  ;;  %v5433_v39 = vor.u32 %v5432_v1, %v5429_v17  ;;  %v5441_v30 = vrot.slane %v5439_v53, 3  ;;  %v16229_v53 = vld [vmem:[%s17318_s20 + $0x68] sm:$0xff]  }
 0x45d   : > { %14598 = vmatprep.mubr.bf16.mxu0 %v5380_v5  ;;  %v5438_v5 = vrot.slane %v5436_v11, 2  ;;  %v16227_v11 = vld [vmem:[%s17318_s20 + $0x58] sm:$0xff]  }
 0x45e   : > { %v5434_v31 = vsel %vm21395_vm9, %v5424_v50, %v5433_v39  ;;  %v16224_v50 = vld [vmem:[%s17318_s20 + $0x40] sm:$0xff]  }
 0x45f   : > { %v5442_v52 = vor.u32 %v5441_v30, %v5438_v5  ;;  %14666 = vmatprep.subr.bf16.mxu1 %v16224_v50  ;;  %v6837_v5 = vld [vmem:[#allocation3] sm:$0xf]  ;;  %v6838_v30 = vld [vmem:[#allocation3 + $0x4] sm:$0xf] }
 0x460   : > { %14667 = vmatpush3.bf16.msra.mxu1 %v16224_v50  ;;  %v19361_v37 = vcombine.low %v6837_v5, %v6838_v30 }
 0x461   : > { %v5443_v32 = vsel %vm21395_vm9, %v5433_v39, %v5442_v52  ;;  %v16230_v39 = vld [vmem:[%s17318_s20 + $0x70] sm:$0xff]  }
 0x464   : > { %14599 = vmatmul.mubr.bf16.gmra.mrb[20].mxu0 %v5389_v29  ;;  %v5748_v29 = vrot.slane %v19166_v51, 3  ;;  %v5756_v51 = vrot.slane %v19184_v58, 3  ;;  %v5764_v58 = vrot.slane %v19204_v59, 3  ;;  %v5772_v59 = vrot.slane %v19225_v41, 3 }
 0x465   : > { %14602 = vmatprep.mubr.bf16.mxu0 %v5398_v25  ;;  %v5752_v25 = vrot.slane %v19174_v54, 3  ;;  %v5760_v54 = vrot.slane %v19194_v18, 3  ;;  %v5768_v18 = vrot.slane %v19216_v20, 3  ;;  %v5776_v20 = vrot.slane %v19233_v19, 3  ;;  %v16225_v19 = vld [vmem:[%s17318_s20 + $0x48] sm:$0xff]  }
 0x466   : > { %v5749_v22 = vsel %vm21394_vm11, %v5746_v10, %v5748_v29  ;;  %v5751_v57 = vsel %vm21394_vm11, %v5748_v29, %v5750_v42  ;;  %v5757_v46 = vsel %vm21394_vm11, %v5754_v28, %v5756_v51  ;;  %v5759_v13 = vsel %vm21394_vm11, %v5756_v51, %v5758_v55  ;;  %14668 = vmatprep.subr.bf16.mxu1 %v16225_v19 }
 0x467   : > { %v5753_v15 = vsel %vm21394_vm11, %v5750_v42, %v5752_v25  ;;  %v5755_v62 = vsel %vm21394_vm11, %v5752_v25, %v5754_v28  ;;  %v5761_v0 = vsel %vm21394_vm11, %v5758_v55, %v5760_v54  ;;  %v5763_v9 = vsel %vm21394_vm11, %v5760_v54, %v5762_v47  ;;  %14669 = vmatpush3.bf16.msra.mxu1 %v16225_v19 }
 0x468   : > { %v5765_v23 = vsel %vm21394_vm11, %v5762_v47, %v5764_v58  ;;  %v5767_v12 = vsel %vm21394_vm11, %v5764_v58, %v5766_v6  ;;  %v5771_v49 = vsel %vm21394_vm11, %v5768_v18, %v5770_v36  ;;  %v5773_v27 = vsel %vm21394_vm11, %v5770_v36, %v5772_v59  ;;  %14670 = vmatprep.subr.bf16.mxu1 %v16226_v8 }
 0x469   : > { %v5777_v17 = vsel %vm21394_vm11, %v5774_v24, %v5776_v20  ;;  %v5779_v1 = vsel %vm21394_vm11, %v5776_v20, %v5778_v48  ;;  %v5780_v41 = vrot.slane %v19301_v45, 3  ;;  %v16228_v45 = vld [vmem:[%s17318_s20 + $0x60] sm:$0xff]   ;;  %v6998_v55 = vshrl.u32 %v19361_v37, 16 }
 0x46a   : > { %v21844_v20 = vmov 0 }
 0x46b   : > { %v5781_v56 = vsel %vm21394_vm11, %v5778_v48, %v5780_v41  ;;  %14671 = vmatpush3.bf16.msra.mxu1 %v16226_v8 }
 0x46c   : > { %14603 = vmatmul.mubr.bf16.gmra.mrb[24].mxu0 %v5407_v38  ;;  %v5769_v38 = vsel %vm21394_vm11, %v5766_v6, %v5768_v18  ;;  %14672 = vmatprep.subr.bf16.mxu1 %v16227_v11 }
 0x46d   : > { %14606 = vmatprep.mubr.bf16.mxu0 %v5416_v21  ;;  %v5775_v21 = vsel %vm21394_vm11, %v5772_v59, %v5774_v24  ;;  %vm21842_vm11 = vnez %v21599_v3 }
 0x46f   : > { %14673 = vmatpush3.bf16.msra.mxu1 %v16227_v11 }
 0x470   : > { %14674 = vmatprep.subr.bf16.mxu1 %v16228_v45 }
 0x473   : > { %14675 = vmatpush3.bf16.msra.mxu1 %v16228_v45 }
 0x474   : > { %14607 = vmatmul.mubr.bf16.gmra.mrb[28].mxu0 %v5425_v61  ;;  %14676 = vmatprep.subr.bf16.mxu1 %v16229_v53  ;;  %v19355_v61 = vld [vmem:[%s17318_s20] sm:$0xff]  }
 0x475   : > { %14610 = vmatprep.mubr.bf16.mxu0 %v5434_v31  ;;  %v19359_v31 = vld [vmem:[%s17345_s8] ss:$0 sm:$0xff] }
 0x477   : > { %14677 = vmatpush3.bf16.msra.mxu1 %v16229_v53 }
 0x478   : > { %14678 = vmatprep.subr.bf16.mxu1 %v16230_v39 }
 0x47b   : > { %14679 = vmatpush3.bf16.msra.mxu1 %v16230_v39 }
 0x47c   : > { %14611 = vmatmul.mubr.bf16.gmra.mrb[32].mxu0 %v5443_v32  ;;  %14680 = vmatprep.subr.bf16.mxu1 %v16231_v14 }
 0x47d   : > { %14630 = vmatprep.mubr.bf16.mxu0 %v5747_v16 }
 0x47f   : > { %14681 = vmatpush3.bf16.msra.mxu1 %v16231_v14 }
 0x480   : > { %14718 = vmatprep.subr.bf16.mxu1 %v19355_v61 }
 0x484   : > { %14631 = vmatmul.mubr.bf16.vlgmr.msra.gmra.mrb[0].mxu0 %v5749_v22  ;;  %v7000_v22 = vshll.u32 %v19361_v37, 16 }
 0x485   : > { %14634 = vmatprep.mubr.bf16.mxu0 %v5751_v57 }
 0x48c   : > { %14635 = vmatmul.mubr.bf16.gmra.mrb[4].mxu0 %v5753_v15 }
 0x48d   : > { %14638 = vmatprep.mubr.bf16.mxu0 %v5755_v62 }
 0x494   : > { %14639 = vmatmul.mubr.bf16.gmra.mrb[8].mxu0 %v5757_v46  ;;  %v7002_v46 = vrot.slane %v7000_v22, 1 }
 0x495   : > { %14642 = vmatprep.mubr.bf16.mxu0 %v5759_v13 }
 0x496   : > { %v19401_v22 = vor.u32 %v7002_v46, %v6998_v55 }
 0x49c   : > { %14643 = vmatmul.mubr.bf16.gmra.mrb[12].mxu0 %v5761_v0 }
 0x49d   : > { %14646 = vmatprep.mubr.bf16.mxu0 %v5763_v9 }
 0x4a4   : > { %14647 = vmatmul.mubr.bf16.gmra.mrb[16].mxu0 %v5765_v23 }
 0x4a5   : > { %14650 = vmatprep.mubr.bf16.mxu0 %v5767_v12 }
 0x4ac   : > { %14651 = vmatmul.mubr.bf16.gmra.mrb[20].mxu0 %v5769_v38 }
 0x4ad   : > { %14654 = vmatprep.mubr.bf16.mxu0 %v5771_v49 }
 0x4b4   : > { %14655 = vmatmul.mubr.bf16.gmra.mrb[24].mxu0 %v5773_v27 }
 0x4b5   : > { %14658 = vmatprep.mubr.bf16.mxu0 %v5775_v21 }
 0x4bc   : > { %14659 = vmatmul.mubr.bf16.gmra.mrb[28].mxu0 %v5777_v17 }
 0x4bd   : > { %14662 = vmatprep.mubr.bf16.mxu0 %v5779_v1 }
 0x4c4   : > { %14663 = vmatmul.mubr.bf16.gmra.mrb[32].mxu0 %v5781_v56  ;;  %v21847_v56 = vmov 0 }
 0x557   : > { %v14632_v52 = vpop.f32.mrb[0].mxu0 }
 0x558   : > { %v6070_v4 = vadd.f32 %v14632_v52, %v19359_v31  ;;  %v5882_v10 = vpop.f32.mrb[1].mxu0 }
 0x559   : > { %v6068_v32 = vadd.f32 %v19359_v31, %v5882_v10  ;;  %v14633_v16 = vpop.f32.mrb[2].mxu0 }
 0x55a   : > { %vm6106_vm14 = vcmp.gt.f32.partialorder %v6070_v4, 0.0  ;;  %v6071_v29 = vadd.f32 %v14633_v16, %v19359_v31  ;;  %v5885_v42 = vpop.f32.mrb[3].mxu0 }
 0x55b   : > { %vm6214_vm13 = vmand %vm21840_vm1, %vm6106_vm14  ;;  %vm6104_vm8 = vcmp.gt.f32.partialorder %v6068_v32, 0.0  ;;  %v6069_v57 = vadd.f32 %v19359_v31, %v5885_v42  ;;  %vm21843_vm14 = vnez %v21582_v63 }
 0x55c   : > { %v6250_v25 = vsel %vm6214_vm13, %v6070_v4, 0.0  ;;  %vm6212_vm10 = vmand %vm21841_vm2, %vm6104_vm8  ;;  %vm6107_vm0 = vcmp.gt.f32.partialorder %v6071_v29, 0.0  ;;  %vm21850_vm13 = vnez %v21624_v34  ;;  %v16427_v4 = vld [vmem:[#allocation3 + $0x8] sm:$0xe] }
 0x55d   : > { %v13589_v28 = vpack.c.bf16 %v6250_v25, %v6250_v25  ;;  %v6248_v15 = vsel %vm6212_vm10, %v6068_v32, 0.0  ;;  %vm6215_vm9 = vmand %vm21842_vm11, %vm6107_vm0  ;;  %vm6105_vm12 = vcmp.gt.f32.partialorder %v6069_v57, 0.0  ;;  %vm21851_vm10 = vnez %v21607_v40 }
 0x55e   : > { %v13587_v62 = vpack.c.bf16 %v6248_v15, %v6248_v15  ;;  %v6251_v51 = vsel %vm6215_vm9, %v6071_v29, 0.0  ;;  %vm6213_vm6 = vmand %vm21843_vm14, %vm6105_vm12  ;;  %vm21852_vm0 = vnez %v21633_v2 }
 0x55f   : > { %v6415_v13 = vshrl.u32 %v13589_v28, 16  ;;  %v6418_v54 = vshll.u32 %v13589_v28, 16  ;;  %v13590_v47 = vpack.c.bf16 %v6251_v51, %v6251_v51  ;;  %v6249_v0 = vsel %vm6213_vm6, %v6069_v57, 0.0  ;;  %v14636_v9 = vpop.f32.mrb[4].mxu0  ;;  %vm19380_vm12 = vmand %vm6791_vm5, %vm6792_vm3 }
 0x560   : > { %v6396_v58 = vshrl.u32 %v13587_v62, 16  ;;  %v6399_v6 = vshll.u32 %v13587_v62, 16  ;;  %v13588_v23 = vpack.c.bf16 %v6249_v0, %v6249_v0  ;;  %v6074_v12 = vadd.f32 %v14636_v9, %v19359_v31  ;;  %v5898_v18 = vpop.f32.mrb[5].mxu0  ;;  %vm19386_vm6 = vmor %vm6392_vm15, %vm6393_vm7 }
 0x561   : > { %v6417_v36 = vrot.slane %v6415_v13, 6  ;;  %v6420_v38 = vrot.slane %v6418_v54, 7  ;;  %v6425_v49 = vshrl.u32 %v13590_v47, 16  ;;  %v6428_v59 = vshll.u32 %v13590_v47, 16  ;;  %v14637_v24 = vpop.f32.mrb[6].mxu0 }
 0x562   : > { %v6398_v27 = vrot.slane %v6396_v58, 6  ;;  %v6401_v21 = vrot.slane %v6399_v6, 7  ;;  %v21845_v20 = vsel %vm19380_vm12, 4294967295, %v21844_v20  ;;  %v6405_v48 = vshrl.u32 %v13588_v23, 16  ;;  %v5901_v1 = vpop.f32.mrb[7].mxu0 }
 0x563   : > { %21846 = vst [vmem:[#allocation65_spill] sm:$0xff] %v21845_v20  ;;  %v6408_v17 = vshll.u32 %v13588_v23, 16  ;;  %v6421_v41 = vor.u32 %v6420_v38, %v6417_v36  ;;  %v21848_v56 = vsel %vm19386_vm6, 4294967295, %v21847_v56  ;;  %v6427_v50 = vrot.slane %v6425_v49, 6  ;;  %v16244_v20 = vld [vmem:[%s17318_s20 + $0x18] sm:$0xff]  }
 0x564   : > { %21849 = vst [vmem:[#allocation66_spill] sm:$0xff] %v21848_v56  ;;  %v6430_v19 = vrot.slane %v6428_v59, 7  ;;  %vm6110_vm9 = vcmp.gt.f32.partialorder %v6074_v12, 0.0  ;;  %v6402_v8 = vor.u32 %v6401_v21, %v6398_v27  ;;  %v6407_v11 = vrot.slane %v6405_v48, 6 }
 0x565   : > { %v6410_v45 = vrot.slane %v6408_v17, 7  ;;  %vm6218_vm8 = vmand %vm21850_vm13, %vm6110_vm9  ;;  %v6072_v53 = vadd.f32 %v19359_v31, %v5898_v18  ;;  %v6423_v39 = vrot.slane %v6421_v41, 4  ;;  %v6075_v30 = vadd.f32 %v14637_v24, %v19359_v31 }
 0x566   : > { %v19393_v14 = vor.u32 %v6430_v19, %v6427_v50  ;;  %v6254_v5 = vsel %vm6218_vm8, %v6074_v12, 0.0  ;;  %v6403_v52 = vrot.slane %v6402_v8, 4  ;;  %v6794_v10 = vsel %vm19380_vm12, %v6402_v8, %v16427_v4 }
 0x567   : > { %v6411_v32 = vor.u32 %v6410_v45, %v6407_v11  ;;  %v13593_v16 = vpack.c.bf16 %v6254_v5, %v6254_v5  ;;  %6795 = vst [vmem:[#allocation3 + $0x8] sm:$0xe] %v6794_v10  ;;  %vm6108_vm7 = vcmp.gt.f32.partialorder %v6072_v53, 0.0  ;;  %vm6111_vm5 = vcmp.gt.f32.partialorder %v6075_v30, 0.0  ;;  %v14640_v42 = vpop.f32.mrb[8].mxu0 }
 0x568   : > { %v6432_v29 = vsel %vm19386_vm6, %v6423_v39, %v19393_v14  ;;  %vm6216_vm3 = vmand %vm21851_vm10, %vm6108_vm7  ;;  %v5914_v62 = vpop.f32.mrb[9].mxu0  ;;  %v6073_v13 = vadd.f32 %v19359_v31, %v5901_v1  ;;  %v6078_v55 = vadd.f32 %v14640_v42, %v19359_v31  ;;  %v6433_v49 = vrot.slane %v19393_v14, 4 }
 0x569   : > { %6798 = vst [vmem:[#allocation3 + $0x14] sm:$0xf] %v6432_v29  ;;  %v6412_v57 = vsel %vm19386_vm6, %v6403_v52, %v6411_v32  ;;  %v6413_v25 = vrot.slane %v6411_v32, 4  ;;  %v6455_v28 = vshrl.u32 %v13593_v16, 16  ;;  %v6458_v15 = vshll.u32 %v13593_v16, 16  ;;  %vm6219_vm15 = vmand %vm21852_vm0, %vm6111_vm5  ;;  %v14641_v54 = vpop.f32.mrb[10].mxu0 }
 0x56a   : > { %6796 = vst [vmem:[#allocation3 + $0xc] sm:$0xf] %v6412_v57  ;;  %v6252_v51 = vsel %vm6216_vm3, %v6072_v53, 0.0  ;;  %v6076_v46 = vadd.f32 %v19359_v31, %v5914_v62  ;;  %v5917_v6 = vpop.f32.mrb[11].mxu0  ;;  %v6255_v23 = vsel %vm6219_vm15, %v6075_v30, 0.0  ;;  %vm6109_vm9 = vcmp.gt.f32.partialorder %v6073_v13, 0.0 }
 0x56b   : > { %v6422_v47 = vsel %vm19386_vm6, %v6413_v25, %v6421_v41  ;;  %v6457_v0 = vrot.slane %v6455_v28, 6  ;;  %v6460_v9 = vrot.slane %v6458_v15, 7  ;;  %v13591_v58 = vpack.c.bf16 %v6252_v51, %v6252_v51 }
 0x56c   : > { %6797 = vst [vmem:[#allocation3 + $0x10] sm:$0xf] %v6422_v47  ;;  %vm6114_vm8 = vcmp.gt.f32.partialorder %v6078_v55, 0.0  ;;  %vm6112_vm7 = vcmp.gt.f32.partialorder %v6076_v46, 0.0  ;;  %v13594_v38 = vpack.c.bf16 %v6255_v23, %v6255_v23  ;;  %vm21853_vm5 = vnez %v21615_v26 }
 0x56d   : > { %v19414_v12 = vor.u32 %v6460_v9, %v6457_v0  ;;  %v6435_v18 = vshrl.u32 %v13591_v58, 16  ;;  %v6438_v36 = vshll.u32 %v13591_v58, 16  ;;  %vm6217_vm3 = vmand %vm21853_vm5, %vm6109_vm9  ;;  %v6079_v24 = vadd.f32 %v14641_v54, %v19359_v31 }
 0x56e   : > { %v6253_v59 = vsel %vm6217_vm3, %v6073_v13, 0.0  ;;  %vm6222_vm12 = vmand %vm21854_vm4, %vm6114_vm8  ;;  %v6077_v27 = vadd.f32 %v19359_v31, %v5917_v6  ;;  %v6465_v1 = vshrl.u32 %v13594_v38, 16  ;;  %vm21855_vm15 = vnez %v21642_v44 }
 0x56f   : > { %v6463_v21 = vrot.slane %v19414_v12, 4  ;;  %v6437_v48 = vrot.slane %v6435_v18, 6  ;;  %v6440_v17 = vrot.slane %v6438_v36, 7  ;;  %vm6220_vm0 = vmand %vm21855_vm15, %vm6112_vm7  ;;  %v6468_v41 = vshll.u32 %v13594_v38, 16  ;;  %v14644_v11 = vpop.f32.mrb[12].mxu0 }
 0x570   : > { %v13592_v50 = vpack.c.bf16 %v6253_v59, %v6253_v59  ;;  %v6258_v19 = vsel %vm6222_vm12, %v6078_v55, 0.0  ;;  %v6256_v8 = vsel %vm6220_vm0, %v6076_v46, 0.0  ;;  %v6467_v53 = vrot.slane %v6465_v1, 6  ;;  %v5930_v5 = vpop.f32.mrb[13].mxu0 }
 0x571   : > { %v6441_v45 = vor.u32 %v6440_v17, %v6437_v48  ;;  %v13597_v39 = vpack.c.bf16 %v6258_v19, %v6258_v19  ;;  %v13595_v14 = vpack.c.bf16 %v6256_v8, %v6256_v8  ;;  %v6470_v30 = vrot.slane %v6468_v41, 7  ;;  %v14645_v10 = vpop.f32.mrb[14].mxu0 }
 0x572   : > { %v6445_v52 = vshrl.u32 %v13592_v50, 16  ;;  %v6448_v4 = vshll.u32 %v13592_v50, 16  ;;  %vm6115_vm9 = vcmp.gt.f32.partialorder %v6079_v24, 0.0  ;;  %vm21856_vm12 = vnez %v21668_v60  ;;  %v5933_v57 = vpop.f32.mrb[15].mxu0 }
 0x573   : > { %v6442_v32 = vsel %vm19386_vm6, %v6433_v49, %v6441_v45  ;;  %v6443_v16 = vrot.slane %v6441_v45, 4  ;;  %v6495_v29 = vshrl.u32 %v13597_v39, 16  ;;  %v6498_v42 = vshll.u32 %v13597_v39, 16  ;;  %vm6223_vm0 = vmand %vm21856_vm12, %vm6115_vm9  ;;  %v21858_v39 = vld [vmem:[#allocation43_spill] sm:$0xff] }
 0x574   : > { %6799 = vst [vmem:[#allocation3 + $0x18] sm:$0xf] %v6442_v32  ;;  %v6471_v25 = vor.u32 %v6470_v30, %v6467_v53  ;;  %v6447_v28 = vrot.slane %v6445_v52, 6  ;;  %v6450_v15 = vrot.slane %v6448_v4, 7  ;;  %v6475_v62 = vshrl.u32 %v13595_v14, 16 }
 0x575   : > { %v6497_v51 = vrot.slane %v6495_v29, 6  ;;  %v6500_v13 = vrot.slane %v6498_v42, 7  ;;  %v6478_v55 = vshll.u32 %v13595_v14, 16  ;;  %v6259_v46 = vsel %vm6223_vm0, %v6079_v24, 0.0 }
 0x576   : > { %v6472_v54 = vsel %vm19386_vm6, %v6463_v21, %v6471_v25  ;;  %v6473_v47 = vrot.slane %v6471_v25, 4  ;;  %v6451_v0 = vor.u32 %v6450_v15, %v6447_v28  ;;  %v6477_v9 = vrot.slane %v6475_v62, 6 }
 0x577   : > { %6802 = vst [vmem:[#allocation3 + $0x24] sm:$0xf] %v6472_v54  ;;  %v19433_v58 = vor.u32 %v6500_v13, %v6497_v51  ;;  %v6480_v6 = vrot.slane %v6478_v55, 7  ;;  %v13598_v23 = vpack.c.bf16 %v6259_v46, %v6259_v46  ;;  %vm6113_vm8 = vcmp.gt.f32.partialorder %v6077_v27, 0.0  ;;  %v14648_v59 = vpop.f32.mrb[16].mxu0  ;;  %v21862_v55 = vld [vmem:[#allocation44_spill] sm:$0xff] }
 0x578   : > { %v6452_v18 = vsel %vm19386_vm6, %v6443_v16, %v6451_v0  ;;  %v6453_v36 = vrot.slane %v6451_v0, 4  ;;  %vm21857_vm7 = vnez %v21651_v7  ;;  %v6082_v38 = vadd.f32 %v14644_v11, %v19359_v31  ;;  %v5946_v1 = vpop.f32.mrb[17].mxu0 }
 0x579   : > { %vm6221_vm3 = vmand %vm21857_vm7, %vm6113_vm8  ;;  %v6080_v49 = vadd.f32 %v19359_v31, %v5930_v5  ;;  %6800 = vst [vmem:[#allocation3 + $0x1c] sm:$0xf] %v6452_v18  ;;  %v6503_v24 = vrot.slane %v19433_v58, 4  ;;  %v6481_v21 = vor.u32 %v6480_v6, %v6477_v9  ;;  %v6505_v48 = vshrl.u32 %v13598_v23, 16  ;;  %v19445_v19 = vpop.f32.mrb[18].mxu0 }
 0x57a   : > { %v6508_v17 = vshll.u32 %v13598_v23, 16  ;;  %v6462_v41 = vsel %vm19386_vm6, %v6453_v36, %v19414_v12  ;;  %v6257_v50 = vsel %vm6221_vm3, %v6077_v27, 0.0  ;;  %vm6118_vm9 = vcmp.gt.f32.partialorder %v6082_v38, 0.0  ;;  %v19451_v14 = vpop.f32.mrb[19].mxu0  ;;  %v21860_v27 = vld [vmem:[#allocation41_spill] sm:$0xff] }
 0x57b   : > { %vm6116_vm0 = vcmp.gt.f32.partialorder %v6080_v49, 0.0  ;;  %6801 = vst [vmem:[#allocation3 + $0x20] sm:$0xf] %v6462_v41  ;;  %v6482_v8 = vsel %vm19386_vm6, %v6473_v47, %v6481_v21  ;;  %v6483_v11 = vrot.slane %v6481_v21, 4  ;;  %v6507_v45 = vrot.slane %v6505_v48, 6 }
 0x57c   : > { %v6510_v53 = vrot.slane %v6508_v17, 7  ;;  %vm21859_vm8 = vnez %v21858_v39  ;;  %6803 = vst [vmem:[#allocation3 + $0x28] sm:$0xf] %v6482_v8  ;;  %v13596_v5 = vpack.c.bf16 %v6257_v50, %v6257_v50  ;;  %vm21861_vm3 = vnez %v21860_v27 }
 0x57d   : > { %vm6226_vm7 = vmand %vm21859_vm8, %vm6118_vm9  ;;  %v6083_v30 = vadd.f32 %v14645_v10, %v19359_v31  ;;  %v6081_v52 = vadd.f32 %v19359_v31, %v5933_v57  ;;  %v6086_v29 = vadd.f32 %v14648_v59, %v19359_v31  ;;  %v21864_v59 = vld [vmem:[#allocation42_spill] sm:$0xff]  ;;  %v6084_v17 = vadd.f32 %v19359_v31, %v5946_v1 }
 0x57e   : > { %v6262_v12 = vsel %vm6226_vm7, %v6082_v38, 0.0  ;;  %vm6224_vm12 = vmand %vm21861_vm3, %vm6116_vm0  ;;  %v6511_v4 = vor.u32 %v6510_v53, %v6507_v45  ;;  %v6485_v42 = vshrl.u32 %v13596_v5, 16  ;;  %v6488_v25 = vshll.u32 %v13596_v5, 16  ;;  %v21866_v5 = vld [vmem:[#allocation47_spill] sm:$0xff] }
 0x57f   : > { %v13601_v32 = vpack.c.bf16 %v6262_v12, %v6262_v12  ;;  %v6260_v16 = vsel %vm6224_vm12, %v6080_v49, 0.0  ;;  %vm6119_vm9 = vcmp.gt.f32.partialorder %v6083_v30, 0.0  ;;  %vm21863_vm7 = vnez %v21862_v55  ;;  %v19462_v47 = vpop.f32.mrb[20].mxu0  ;;  %v19479_v12 = vld [vmem:[#allocation3 + $0x8] sm:$0xff]  }
 0x580   : > { %v13599_v28 = vpack.c.bf16 %v6260_v16, %v6260_v16  ;;  %v6512_v15 = vsel %vm19386_vm6, %v6503_v24, %v6511_v4  ;;  %v6513_v62 = vrot.slane %v6511_v4, 4  ;;  %vm6227_vm0 = vmand %vm21863_vm7, %vm6119_vm9  ;;  %v6487_v10 = vrot.slane %v6485_v42, 6  ;;  %v19464_v23 = vpop.f32.mrb[21].mxu0 }
 0x581   : > { %v6535_v51 = vshrl.u32 %v13601_v32, 16  ;;  %v6538_v13 = vshll.u32 %v13601_v32, 16  ;;  %6806 = vst [vmem:[#allocation3 + $0x34] sm:$0xf] %v6512_v15  ;;  %v6490_v57 = vrot.slane %v6488_v25, 7  ;;  %v6263_v6 = vsel %vm6227_vm0, %v6083_v30, 0.0 }
 0x582   : > { %v6515_v46 = vshrl.u32 %v13599_v28, 16  ;;  %v6518_v54 = vshll.u32 %v13599_v28, 16  ;;  %vm6117_vm12 = vcmp.gt.f32.partialorder %v6081_v52, 0.0  ;;  %v13602_v49 = vpack.c.bf16 %v6263_v6, %v6263_v6  ;;  %v19468_v24 = vpop.f32.mrb[22].mxu0 }
 0x583   : > { %v6537_v0 = vrot.slane %v6535_v51, 6  ;;  %v6540_v9 = vrot.slane %v6538_v13, 7  ;;  %v6491_v18 = vor.u32 %v6490_v57, %v6487_v10  ;;  %vm21865_vm8 = vnez %v21864_v59  ;;  %v19473_v41 = vpop.f32.mrb[23].mxu0 }
 0x584   : > { %v6517_v36 = vrot.slane %v6515_v46, 6  ;;  %v6520_v38 = vrot.slane %v6518_v54, 7  ;;  %vm6225_vm9 = vmand %vm21865_vm8, %vm6117_vm12  ;;  %vm6122_vm7 = vcmp.gt.f32.partialorder %v6086_v29, 0.0  ;;  %v6545_v53 = vshrl.u32 %v13602_v49, 16 }
 0x585   : > { %v19470_v21 = vor.u32 %v6540_v9, %v6537_v0  ;;  %v6261_v48 = vsel %vm6225_vm9, %v6081_v52, 0.0  ;;  %v6492_v50 = vsel %vm19386_vm6, %v6483_v11, %v6491_v18  ;;  %v6493_v8 = vrot.slane %v6491_v18, 4  ;;  %v21868_v0 = vld [vmem:[#allocation45_spill] sm:$0xff] }
 0x586   : > { %v6521_v45 = vor.u32 %v6520_v38, %v6517_v36  ;;  %vm21867_vm0 = vnez %v21866_v5  ;;  %6804 = vst [vmem:[#allocation3 + $0x2c] sm:$0xf] %v6492_v50  ;;  %v6548_v52 = vshll.u32 %v13602_v49, 16  ;;  %v13600_v4 = vpack.c.bf16 %v6261_v48, %v6261_v48  ;;  %v21870_v50 = vld [vmem:[#allocation48_spill] sm:$0xff] }
 0x587   : > { %vm6230_vm3 = vmand %vm21867_vm0, %vm6122_vm7  ;;  %v6543_v30 = vrot.slane %v19470_v21, 4  ;;  %v6502_v1 = vsel %vm19386_vm6, %v6493_v8, %v19433_v58  ;;  %v6547_v42 = vrot.slane %v6545_v53, 6  ;;  %vm6120_vm7 = vcmp.gt.f32.partialorder %v6084_v17, 0.0  ;;  %v19492_v10 = vpop.f32.mrb[24].mxu0 }
 0x588   : > { %v6266_v32 = vsel %vm6230_vm3, %v6086_v29, 0.0  ;;  %v6522_v11 = vsel %vm19386_vm6, %v6513_v62, %v6521_v45  ;;  %v6523_v16 = vrot.slane %v6521_v45, 4  ;;  %6805 = vst [vmem:[#allocation3 + $0x30] sm:$0xf] %v6502_v1  ;;  %v6550_v25 = vrot.slane %v6548_v52, 7  ;;  %v19496_v9 = vpop.f32.mrb[25].mxu0 }
 0x589   : > { %6807 = vst [vmem:[#allocation3 + $0x38] sm:$0xf] %v6522_v11  ;;  %v6525_v28 = vshrl.u32 %v13600_v4, 16  ;;  %v6528_v15 = vshll.u32 %v13600_v4, 16  ;;  %v13605_v51 = vpack.c.bf16 %v6266_v32, %v6266_v32  ;;  %v7005_v13 = vshll.u32 %v19479_v12, 16  ;;  %v19498_v38 = vpop.f32.mrb[26].mxu0 }
 0x58a   : > { %v6087_v29 = vadd.f32 %v19445_v19, %v19359_v31  ;;  %v6085_v58 = vadd.f32 %v19359_v31, %v19451_v14  ;;  %v6551_v62 = vor.u32 %v6550_v25, %v6547_v42  ;;  %vm21869_vm3 = vnez %v21868_v0  ;;  %v19504_v8 = vpop.f32.mrb[27].mxu0  ;;  %v19510_v1 = vld [vmem:[#allocation3 + $0x10] sm:$0xff]  }
 0x58b   : > { %v6527_v57 = vrot.slane %v6525_v28, 6  ;;  %v6530_v46 = vrot.slane %v6528_v15, 7  ;;  %v6575_v54 = vshrl.u32 %v13605_v51, 16  ;;  %vm6228_vm12 = vmand %vm21869_vm3, %vm6120_vm7  ;;  %v6578_v6 = vshll.u32 %v13605_v51, 16  ;;  %v21873_v28 = vld [vmem:[#allocation46_spill] sm:$0xff] }
 0x58c   : > { %v6264_v18 = vsel %vm6228_vm12, %v6084_v17, 0.0  ;;  %v7007_v36 = vrot.slane %v7005_v13, 1  ;;  %vm6123_vm9 = vcmp.gt.f32.partialorder %v6087_v29, 0.0  ;;  %v6552_v19 = vsel %vm19386_vm6, %v6543_v30, %v6551_v62 }
 0x58d   : > { %v6553_v14 = vrot.slane %v6551_v62, 4  ;;  %v6531_v49 = vor.u32 %v6530_v46, %v6527_v57  ;;  %v6577_v48 = vrot.slane %v6575_v54, 6  ;;  %vm21871_vm0 = vnez %v21870_v50  ;;  %6810 = vst [vmem:[#allocation3 + $0x44] sm:$0xf] %v6552_v19 }
 0x58e   : > { %vm6231_vm8 = vmand %vm21871_vm0, %vm6123_vm9  ;;  %v6580_v45 = vrot.slane %v6578_v6, 7  ;;  %v13603_v53 = vpack.c.bf16 %v6264_v18, %v6264_v18  ;;  %vm21872_vm7 = vsmask.f32 7424  ;;  %vm6121_vm12 = vcmp.gt.f32.partialorder %v6085_v58, 0.0 }
 0x58f   : > { %v7008_v17 = vsel %vm21872_vm7, %v19401_v22, %v7007_v36  ;;  %v6267_v52 = vsel %vm6231_vm8, %v6087_v29, 0.0  ;;  %v6532_v4 = vsel %vm19386_vm6, %v6523_v16, %v6531_v49  ;;  %v6533_v32 = vrot.slane %v6531_v49, 4  ;;  %v19521_v54 = vpop.f32.mrb[28].mxu0  ;;  %vm21875_vm8 = vmmov %vm21872_vm7 }
 0x590   : > { %14682 = vmatprep.mubr.bf16.mxu1 %v7008_v17  ;;  %v13606_v30 = vpack.c.bf16 %v6267_v52, %v6267_v52  ;;  %6808 = vst [vmem:[#allocation3 + $0x3c] sm:$0xf] %v6532_v4  ;;  %v19512_v11 = vor.u32 %v6580_v45, %v6577_v48  ;;  %v6555_v42 = vshrl.u32 %v13603_v53, 16  ;;  %v6558_v25 = vshll.u32 %v13603_v53, 16  ;;  %v19524_v49 = vpop.f32.mrb[29].mxu0  ;;  %v19528_v53 = vld [vmem:[#allocation3 + $0x18] sm:$0xff]  }
 0x591   : > { %vm21874_vm9 = vnez %v21873_v28  ;;  %v7009_v22 = vshrl.u32 %v19479_v12, 16  ;;  %v6542_v16 = vsel %vm19386_vm6, %v6533_v32, %v19470_v21  ;;  %v7013_v12 = vshll.u32 %v19510_v1, 16  ;;  %v19530_v17 = vpop.f32.mrb[30].mxu0  ;;  %v19581_v28 = vld [vmem:[#allocation3 + $0x28] sm:$0xff]  }
 0x592   : > { %vm6229_vm0 = vmand %vm21874_vm9, %vm6121_vm12  ;;  %v6585_v15 = vshrl.u32 %v13606_v30, 16  ;;  %v6588_v51 = vshll.u32 %v13606_v30, 16  ;;  %6809 = vst [vmem:[#allocation3 + $0x40] sm:$0xf] %v6542_v16  ;;  %v6583_v29 = vrot.slane %v19512_v11, 4  ;;  %v6557_v62 = vrot.slane %v6555_v42, 6 }
 0x593   : > { %v6265_v13 = vsel %vm6229_vm0, %v6085_v58, 0.0  ;;  %v6560_v57 = vrot.slane %v6558_v25, 7  ;;  %v7011_v19 = vor.u32 %v7009_v22, %v7007_v36  ;;  %v6090_v58 = vadd.f32 %v19462_v47, %v19359_v31  ;;  %v19537_v30 = vpop.f32.mrb[31].mxu0  ;;  %v16238_v16 = vld [vmem:[%s17318_s20 + $0x8] sm:$0xff]  }
 0x594   : > { %v13604_v46 = vpack.c.bf16 %v6265_v13, %v6265_v13  ;;  %v6587_v6 = vrot.slane %v6585_v15, 6  ;;  %v6590_v18 = vrot.slane %v6588_v51, 7  ;;  %v7015_v4 = vrot.slane %v7013_v12, 1  ;;  %v19547_v13 = vld [vmem:[#allocation3 + $0x20] sm:$0xff]  }
 0x595   : > { %v6561_v21 = vor.u32 %v6560_v57, %v6557_v62  ;;  %v6088_v36 = vadd.f32 %v19359_v31, %v19464_v23  ;;  %v7017_v32 = vshrl.u32 %v19510_v1, 16  ;;  %vm6126_vm0 = vcmp.gt.f32.partialorder %v6090_v58, 0.0 }
 0x596   : > { %v6565_v48 = vshrl.u32 %v13604_v46, 16  ;;  %v6568_v45 = vshll.u32 %v13604_v46, 16  ;;  %v19532_v52 = vor.u32 %v6590_v18, %v6587_v6  ;;  %v7016_v23 = vsel %vm21875_vm8, %v7011_v19, %v7015_v4  ;;  %v21878_v6 = vld [vmem:[#allocation49_spill] sm:$0xff] }
 0x597   : > { %v6562_v42 = vsel %vm19386_vm6, %v6553_v14, %v6561_v21  ;;  %v6563_v25 = vrot.slane %v6561_v21, 4  ;;  %14683 = vmatmul.mubr.bf16.vlgmr.msra.gmra.mrb[0].mxu1 %v7016_v23  ;;  %v21876_v14 = vld [vmem:[#allocation51_spill] sm:$0xff]  ;;  %vm6124_vm9 = vcmp.gt.f32.partialorder %v6088_v36, 0.0  ;;  %v7019_v57 = vor.u32 %v7017_v32, %v7015_v4 }
 0x598   : > { %v6567_v22 = vrot.slane %v6565_v48, 6  ;;  %v6570_v47 = vrot.slane %v6568_v45, 7  ;;  %6811 = vst [vmem:[#allocation3 + $0x48] sm:$0xf] %v6562_v42  ;;  %v6592_v15 = vsel %vm19386_vm6, %v6583_v29, %v19532_v52  ;;  %vm21877_vm7 = vnez %v21876_v14  ;;  %14719 = vmatpush3.bf16.msra.mxu1 %v19355_v61  ;;  %v16241_v61 = vld [vmem:[%s17318_s20 + $0x10] sm:$0xff]  }
 0x599   : > { %6814 = vst [vmem:[#allocation3 + $0x54] sm:$0xf] %v6592_v15  ;;  %vm6234_vm12 = vmand %vm21877_vm7, %vm6126_vm0  ;;  %v7021_v46 = vshll.u32 %v19528_v53, 16  ;;  %vm21879_vm3 = vnez %v21878_v6  ;;  %v6091_v18 = vadd.f32 %v19468_v24, %v19359_v31  ;;  %v6089_v19 = vadd.f32 %v19359_v31, %v19473_v41  ;;  %14720 = vmatprep.subr.bf16.mxu1 %v16238_v16 }
 0x59a   : > { %v6571_v62 = vor.u32 %v6570_v47, %v6567_v22  ;;  %v6270_v29 = vsel %vm6234_vm12, %v6090_v58, 0.0  ;;  %vm6232_vm8 = vmand %vm21879_vm3, %vm6124_vm9  ;;  %v7025_v12 = vshrl.u32 %v19528_v53, 16  ;;  %v19563_v58 = vpop.f32.mrb[32].mxu0  ;;  %v21880_v47 = vld [vmem:[#allocation52_spill] sm:$0xff]  ;;  %vm21882_vm7 = vsmask.f32 7424 }
 0x59b   : > { %v13609_v45 = vpack.c.bf16 %v6270_v29, %v6270_v29  ;;  %v6268_v4 = vsel %vm6232_vm8, %v6088_v36, 0.0  ;;  %v7023_v42 = vrot.slane %v7021_v46, 1  ;;  %vm6127_vm9 = vcmp.gt.f32.partialorder %v6091_v18, 0.0  ;;  %v19565_v24 = vpop.f32.mrb[33].mxu0 }
 0x59c   : > { %v6572_v21 = vsel %vm19386_vm6, %v6563_v25, %v6571_v62  ;;  %v6573_v48 = vrot.slane %v6571_v62, 4  ;;  %v13607_v32 = vpack.c.bf16 %v6268_v4, %v6268_v4  ;;  %vm6125_vm0 = vcmp.gt.f32.partialorder %v6089_v19, 0.0  ;;  %v19573_v15 = vpop.f32.mrb[34].mxu0  ;;  %14721 = vmatpush3.bf16.msra.mxu1 %v16238_v16 }
 0x59d   : > { %6812 = vst [vmem:[#allocation3 + $0x4c] sm:$0xf] %v6572_v21  ;;  %v6615_v22 = vshrl.u32 %v13609_v45, 16  ;;  %v6618_v25 = vshll.u32 %v13609_v45, 16  ;;  %vm21881_vm12 = vnez %v21880_v47  ;;  %v7029_v36 = vshll.u32 %v19547_v13, 16  ;;  %v21883_v21 = vld [vmem:[#allocation50_spill] sm:$0xff]  ;;  %14722 = vmatprep.subr.bf16.mxu1 %v16241_v61 }
 0x59e   : > { %v6582_v41 = vsel %vm19386_vm6, %v6573_v48, %v19512_v11  ;;  %vm6235_vm8 = vmand %vm21881_vm12, %vm6127_vm9  ;;  %v6595_v23 = vshrl.u32 %v13607_v32, 16  ;;  %v6598_v62 = vshll.u32 %v13607_v32, 16  ;;  %v7024_v46 = vsel %vm21882_vm7, %v7019_v57, %v7023_v42  ;;  %v19578_v11 = vpop.f32.mrb[35].mxu0 }
 0x59f   : > { %6813 = vst [vmem:[#allocation3 + $0x50] sm:$0xf] %v6582_v41  ;;  %v6271_v29 = vsel %vm6235_vm8, %v6091_v18, 0.0  ;;  %vm21884_vm3 = vnez %v21883_v21  ;;  %v6617_v48 = vrot.slane %v6615_v22, 6  ;;  %v6620_v45 = vrot.slane %v6618_v25, 7  ;;  %14686 = vmatprep.mubr.bf16.mxu1 %v7024_v46 }
 0x5a0   : > { %vm6233_vm4 = vmand %vm21884_vm3, %vm6125_vm0  ;;  %v13610_v4 = vpack.c.bf16 %v6271_v29, %v6271_v29  ;;  %v6597_v47 = vrot.slane %v6595_v23, 6  ;;  %v6600_v41 = vrot.slane %v6598_v62, 7  ;;  %v7027_v32 = vor.u32 %v7025_v12, %v7023_v42  ;;  %14723 = vmatpush3.bf16.msra.mxu1 %v16241_v61  ;;  %v16247_v12 = vld [vmem:[%s17318_s20 + $0x20] sm:$0xff]   ;;  %v16250_v29 = vld [vmem:[%s17318_s20 + $0x28] sm:$0xff]  }
 0x5a1   : > { %v6269_v51 = vsel %vm6233_vm4, %v6089_v19, 0.0  ;;  %v6621_v57 = vor.u32 %v6620_v45, %v6617_v48  ;;  %v7031_v21 = vrot.slane %v7029_v36, 1  ;;  %v6094_v25 = vadd.f32 %v19492_v10, %v19359_v31  ;;  %vm21885_vm4 = vmmov %vm21882_vm7  ;;  %14724 = vmatprep.subr.bf16.mxu1 %v16244_v20  ;;  %v21887_v45 = vld [vmem:[#allocation55_spill] sm:$0xff] }
 0x5a2   : > { %v13608_v14 = vpack.c.bf16 %v6269_v51, %v6269_v51  ;;  %v6625_v18 = vshrl.u32 %v13610_v4, 16  ;;  %v6628_v6 = vshll.u32 %v13610_v4, 16  ;;  %v6601_v16 = vor.u32 %v6600_v41, %v6597_v47 }
 0x5a3   : > { %v6623_v19 = vrot.slane %v6621_v57, 4  ;;  %v7032_v51 = vsel %vm21885_vm4, %v7027_v32, %v7031_v21  ;;  %v21886_v42 = vrot.slane %v19532_v52, 4  ;;  %vm6130_vm7 = vcmp.gt.f32.partialorder %v6094_v25, 0.0 }
 0x5a4   : > { %v6605_v50 = vshrl.u32 %v13608_v14, 16  ;;  %v6608_v22 = vshll.u32 %v13608_v14, 16  ;;  %v6627_v23 = vrot.slane %v6625_v18, 6  ;;  %v6630_v62 = vrot.slane %v6628_v6, 7  ;;  %14687 = vmatmul.mubr.bf16.gmra.mrb[4].mxu1 %v7032_v51  ;;  %v19608_v18 = vld [vmem:[#allocation3 + $0x30] sm:$0xff]  }
 0x5a5   : > { %v6602_v36 = vsel %vm19386_vm6, %v21886_v42, %v6601_v16  ;;  %v6603_v47 = vrot.slane %v6601_v16, 4  ;;  %v6092_v6 = vadd.f32 %v19359_v31, %v19496_v9  ;;  %v7033_v61 = vshrl.u32 %v19547_v13, 16  ;;  %14725 = vmatpush3.bf16.msra.mxu1 %v16244_v20 }
 0x5a6   : > { %v6607_v46 = vrot.slane %v6605_v50, 6  ;;  %v6610_v14 = vrot.slane %v6608_v22, 7  ;;  %6815 = vst [vmem:[#allocation3 + $0x58] sm:$0xf] %v6602_v36  ;;  %v19591_v10 = vor.u32 %v6630_v62, %v6627_v23  ;;  %vm21888_vm9 = vnez %v21887_v45  ;;  %14726 = vmatprep.subr.bf16.mxu1 %v16247_v12  ;;  %v21889_v23 = vld [vmem:[#allocation53_spill] sm:$0xff]  ;;  %v21891_v36 = vld [vmem:[#allocation56_spill] sm:$0xff] }
 0x5a7   : > { %vm6238_vm0 = vmand %vm21888_vm9, %vm6130_vm7  ;;  %v7037_v52 = vshll.u32 %v19581_v28, 16  ;;  %v6095_v50 = vadd.f32 %v19498_v38, %v19359_v31  ;;  %v6093_v4 = vadd.f32 %v19359_v31, %v19504_v8  ;;  %vm6128_vm8 = vcmp.gt.f32.partialorder %v6092_v6, 0.0 }
 0x5a8   : > { %v6611_v48 = vor.u32 %v6610_v14, %v6607_v46  ;;  %v6632_v9 = vsel %vm19386_vm6, %v6623_v19, %v19591_v10  ;;  %v6633_v41 = vrot.slane %v19591_v10, 4  ;;  %v6274_v32 = vsel %vm6238_vm0, %v6094_v25, 0.0  ;;  %v21894_v46 = vld [vmem:[#allocation54_spill] sm:$0xff] }
 0x5a9   : > { %6818 = vst [vmem:[#allocation3 + $0x64] sm:$0xf] %v6632_v9  ;;  %v13613_v22 = vpack.c.bf16 %v6274_v32, %v6274_v32  ;;  %vm21890_vm4 = vnez %v21889_v23  ;;  %v7035_v20 = vor.u32 %v7033_v61, %v7031_v21  ;;  %v7039_v19 = vrot.slane %v7037_v52, 1  ;;  %14727 = vmatpush3.bf16.msra.mxu1 %v16247_v12 }
 0x5aa   : > { %v6612_v16 = vsel %vm19386_vm6, %v6603_v47, %v6611_v48  ;;  %v6613_v38 = vrot.slane %v6611_v48, 4  ;;  %vm6236_vm7 = vmand %vm21890_vm4, %vm6128_vm8  ;;  %vm6131_vm9 = vcmp.gt.f32.partialorder %v6095_v50, 0.0  ;;  %vm6129_vm0 = vcmp.gt.f32.partialorder %v6093_v4, 0.0  ;;  %14728 = vmatprep.subr.bf16.mxu1 %v16250_v29 }
 0x5ab   : > { %6816 = vst [vmem:[#allocation3 + $0x5c] sm:$0xf] %v6612_v16  ;;  %v6272_v8 = vsel %vm6236_vm7, %v6092_v6, 0.0  ;;  %v6655_v62 = vshrl.u32 %v13613_v22, 16  ;;  %v6658_v51 = vshll.u32 %v13613_v22, 16  ;;  %vm21892_vm3 = vnez %v21891_v36 }
 0x5ac   : > { %v6622_v25 = vsel %vm19386_vm6, %v6613_v38, %v6621_v57  ;;  %v13611_v42 = vpack.c.bf16 %v6272_v8, %v6272_v8  ;;  %vm6239_vm12 = vmand %vm21892_vm3, %vm6131_vm9  ;;  %vm21893_vm15 = vsmask.f32 7424  ;;  %vm21895_vm8 = vnez %v21894_v46  ;;  %v16254_v57 = vld [vmem:[%s17318_s20 + $0x30] sm:$0xff]  }
 0x5ad   : > { %6817 = vst [vmem:[#allocation3 + $0x60] sm:$0xf] %v6622_v25  ;;  %v7040_v47 = vsel %vm21893_vm15, %v7035_v20, %v7039_v19  ;;  %v6275_v21 = vsel %vm6239_vm12, %v6095_v50, 0.0  ;;  %vm6237_vm7 = vmand %vm21895_vm8, %vm6129_vm0  ;;  %v7041_v14 = vshrl.u32 %v19581_v28, 16  ;;  %v7045_v10 = vshll.u32 %v19608_v18, 16  ;;  %14729 = vmatpush3.bf16.msra.mxu1 %v16250_v29 }
 0x5ae   : > { %v6657_v6 = vrot.slane %v6655_v62, 6  ;;  %v6660_v61 = vrot.slane %v6658_v51, 7  ;;  %v6635_v48 = vshrl.u32 %v13611_v42, 16  ;;  %v6638_v52 = vshll.u32 %v13611_v42, 16  ;;  %14690 = vmatprep.mubr.bf16.mxu1 %v7040_v47  ;;  %14730 = vmatprep.subr.bf16.mxu1 %v16254_v57  ;;  %v16257_v51 = vld [vmem:[%s17318_s20 + $0x38] sm:$0xff]  }
 0x5af   : > { %v13614_v12 = vpack.c.bf16 %v6275_v21, %v6275_v21  ;;  %v6273_v9 = vsel %vm6237_vm7, %v6093_v4, 0.0  ;;  %v7043_v32 = vor.u32 %v7041_v14, %v7039_v19  ;;  %v7047_v16 = vrot.slane %v7045_v10, 1  ;;  %v19628_v21 = vld [vmem:[#allocation3 + $0x38] sm:$0xff]   ;;  %v19631_v29 = vld [vmem:[%s17345_s8] ss:$0 sm:$0xff] }
 0x5b0   : > { %v6661_v50 = vor.u32 %v6660_v61, %v6657_v6  ;;  %v6637_v38 = vrot.slane %v6635_v48, 6  ;;  %v6640_v22 = vrot.slane %v6638_v52, 7  ;;  %v13612_v20 = vpack.c.bf16 %v6273_v9, %v6273_v9  ;;  %v21896_v52 = vld [vmem:[#allocation59_spill] sm:$0xff] }
 0x5b1   : > { %v6665_v8 = vshrl.u32 %v13614_v12, 16  ;;  %v6668_v25 = vshll.u32 %v13614_v12, 16  ;;  %v7048_v46 = vsel %vm21893_vm15, %v7043_v32, %v7047_v16  ;;  %v6098_v62 = vadd.f32 %v19521_v54, %v19359_v31  ;;  %14731 = vmatpush3.bf16.msra.mxu1 %v16254_v57  ;;  %v19643_v32 = vld [vmem:[%s17318_s20 + $0x80] sm:$0xff]  }
 0x5b2   : > { %v6663_v42 = vrot.slane %v6661_v50, 4  ;;  %v6641_v47 = vor.u32 %v6640_v22, %v6637_v38  ;;  %v6645_v4 = vshrl.u32 %v13612_v20, 16  ;;  %v6648_v19 = vshll.u32 %v13612_v20, 16  ;;  %14691 = vmatmul.mubr.bf16.gmra.mrb[8].mxu1 %v7048_v46  ;;  %14732 = vmatprep.subr.bf16.mxu1 %v16257_v51 }
 0x5b3   : > { %v6667_v14 = vrot.slane %v6665_v8, 6  ;;  %v6670_v10 = vrot.slane %v6668_v25, 7  ;;  %vm6134_vm12 = vcmp.gt.f32.partialorder %v6098_v62, 0.0  ;;  %v6096_v6 = vadd.f32 %v19631_v29, %v19524_v49 }
 0x5b4   : > { %v6642_v31 = vsel %vm19386_vm6, %v6633_v41, %v6641_v47  ;;  %v6643_v54 = vrot.slane %v6641_v47, 4  ;;  %v6647_v61 = vrot.slane %v6645_v4, 6  ;;  %v6650_v48 = vrot.slane %v6648_v19, 7  ;;  %v21898_v41 = vld [vmem:[#allocation57_spill] sm:$0xff] }
 0x5b5   : > { %vm21897_vm9 = vnez %v21896_v52  ;;  %6819 = vst [vmem:[#allocation3 + $0x68] sm:$0xf] %v6642_v31  ;;  %v19639_v46 = vor.u32 %v6670_v10, %v6667_v14  ;;  %vm6132_vm7 = vcmp.gt.f32.partialorder %v6096_v6, 0.0  ;;  %v7049_v9 = vshrl.u32 %v19608_v18, 16  ;;  %14733 = vmatpush3.bf16.msra.mxu1 %v16257_v51 }
 0x5b6   : > { %vm6242_vm0 = vmand %vm21897_vm9, %vm6134_vm12  ;;  %v6651_v49 = vor.u32 %v6650_v48, %v6647_v61  ;;  %vm21899_vm15 = vnez %v21898_v41  ;;  %v7053_v22 = vshll.u32 %v19628_v21, 16  ;;  %v6099_v57 = vadd.f32 %v19631_v29, %v19530_v17  ;;  %14770 = vmatprep.subr.bf16.mxu1 %v19643_v32  ;;  %v21900_v61 = vld [vmem:[#allocation60_spill] sm:$0xff] }
 0x5b7   : > { %v6278_v12 = vsel %vm6242_vm0, %v6098_v62, 0.0  ;;  %vm6240_vm8 = vmand %vm21899_vm15, %vm6132_vm7  ;;  %v6672_v20 = vsel %vm19386_vm6, %v6663_v42, %v19639_v46  ;;  %v6673_v8 = vrot.slane %v19639_v46, 4  ;;  %v7051_v62 = vor.u32 %v7049_v9, %v7047_v16  ;;  %v19658_v42 = vld [vmem:[#allocation3 + $0x40] sm:$0xff]  }
 0x5b8   : > { %v13617_v38 = vpack.c.bf16 %v6278_v12, %v6278_v12  ;;  %v6276_v25 = vsel %vm6240_vm8, %v6096_v6, 0.0  ;;  %6822 = vst [vmem:[#allocation3 + $0x74] sm:$0xf] %v6672_v20  ;;  %v6652_v47 = vsel %vm19386_vm6, %v6643_v54, %v6651_v49  ;;  %v6653_v4 = vrot.slane %v6651_v49, 4  ;;  %v21903_v20 = vld [vmem:[#allocation58_spill] sm:$0xff] }
 0x5b9   : > { %6820 = vst [vmem:[#allocation3 + $0x6c] sm:$0xf] %v6652_v47  ;;  %v13615_v10 = vpack.c.bf16 %v6276_v25, %v6276_v25  ;;  %v7055_v31 = vrot.slane %v7053_v22, 1  ;;  %vm6135_vm12 = vcmp.gt.f32.partialorder %v6099_v57, 0.0  ;;  %v6097_v17 = vadd.f32 %v19631_v29, %v19537_v30 }
 0x5ba   : > { %v6695_v19 = vshrl.u32 %v13617_v38, 16  ;;  %v6698_v14 = vshll.u32 %v13617_v38, 16  ;;  %v6662_v16 = vsel %vm19386_vm6, %v6653_v4, %v6661_v50  ;;  %vm21901_vm8 = vnez %v21900_v61 }
 0x5bb   : > { %vm6243_vm0 = vmand %vm21901_vm8, %vm6135_vm12  ;;  %v7057_v51 = vshrl.u32 %v19628_v21, 16  ;;  %6821 = vst [vmem:[#allocation3 + $0x70] sm:$0xf] %v6662_v16  ;;  %v6675_v48 = vshrl.u32 %v13615_v10, 16  ;;  %v6678_v46 = vshll.u32 %v13615_v10, 16  ;;  %vm6133_vm9 = vcmp.gt.f32.partialorder %v6097_v17, 0.0 }
 0x5bc   : > { %v6697_v6 = vrot.slane %v6695_v19, 6  ;;  %v6700_v54 = vrot.slane %v6698_v14, 7  ;;  %vm21902_vm7 = vsmask.f32 7424  ;;  %v6279_v30 = vsel %vm6243_vm0, %v6099_v57, 0.0 }
 0x5bd   : > { %v7056_v12 = vsel %vm21902_vm7, %v7051_v62, %v7055_v31  ;;  %v13618_v49 = vpack.c.bf16 %v6279_v30, %v6279_v30  ;;  %v7059_v38 = vor.u32 %v7057_v51, %v7055_v31  ;;  %v6677_v50 = vrot.slane %v6675_v48, 6  ;;  %v19679_v48 = vld [vmem:[#allocation3 + $0x48] sm:$0xff]  }
 0x5be   : > { %v19667_v9 = vor.u32 %v6700_v54, %v6697_v6  ;;  %14694 = vmatprep.mubr.bf16.mxu1 %v7056_v12  ;;  %v6680_v22 = vrot.slane %v6678_v46, 7  ;;  %vm21904_vm15 = vnez %v21903_v20  ;;  %v7061_v25 = vshll.u32 %v19658_v42, 16  ;;  %v21905_v54 = vld [vmem:[#allocation63_spill] sm:$0xff] }
 0x5bf   : > { %vm6241_vm3 = vmand %vm21904_vm15, %vm6133_vm9  ;;  %v6102_v47 = vadd.f32 %v19631_v29, %v19563_v58  ;;  %v6705_v62 = vshrl.u32 %v13618_v49, 16  ;;  %v6708_v57 = vshll.u32 %v13618_v49, 16  ;;  %vm21906_vm0 = vnez %v21905_v54 }
 0x5c0   : > { %v6703_v4 = vrot.slane %v19667_v9, 4  ;;  %v6277_v19 = vsel %vm6241_vm3, %v6097_v17, 0.0  ;;  %v6681_v14 = vor.u32 %v6680_v22, %v6677_v50  ;;  %v7063_v16 = vrot.slane %v7061_v25, 1 }
 0x5c1   : > { %v13616_v10 = vpack.c.bf16 %v6277_v19, %v6277_v19  ;;  %vm6138_vm12 = vcmp.gt.f32.partialorder %v6102_v47, 0.0  ;;  %v6707_v31 = vrot.slane %v6705_v62, 6  ;;  %v6710_v6 = vrot.slane %v6708_v57, 7  ;;  %v21908_v57 = vld [vmem:[#allocation61_spill] sm:$0xff] }
 0x5c2   : > { %vm6246_vm7 = vmand %vm21906_vm0, %vm6138_vm12  ;;  %v6100_v51 = vadd.f32 %v19631_v29, %v19565_v24  ;;  %v7065_v58 = vshrl.u32 %v19658_v42, 16  ;;  %v6682_v46 = vsel %vm19386_vm6, %v6673_v8, %v6681_v14  ;;  %v6683_v17 = vrot.slane %v6681_v14, 4 }
 0x5c3   : > { %v6685_v12 = vshrl.u32 %v13616_v10, 16  ;;  %v6688_v30 = vshll.u32 %v13616_v10, 16  ;;  %6823 = vst [vmem:[#allocation3 + $0x78] sm:$0xf] %v6682_v46  ;;  %v19684_v49 = vor.u32 %v6710_v6, %v6707_v31  ;;  %vm21907_vm3 = vsmask.f32 7424 }
 0x5c4   : > { %v7064_v50 = vsel %vm21907_vm3, %v7059_v38, %v7063_v16  ;;  %v6282_v22 = vsel %vm6246_vm7, %v6102_v47, 0.0  ;;  %vm6136_vm9 = vcmp.gt.f32.partialorder %v6100_v51, 0.0  ;;  %vm21909_vm12 = vnez %v21908_v57 }
 0x5c5   : > { %v6687_v25 = vrot.slane %v6685_v12, 6  ;;  %v6690_v62 = vrot.slane %v6688_v30, 7  ;;  %14695 = vmatmul.mubr.bf16.gmra.mrb[12].mxu1 %v7064_v50  ;;  %v13621_v24 = vpack.c.bf16 %v6282_v22, %v6282_v22  ;;  %vm6244_vm0 = vmand %vm21909_vm12, %vm6136_vm9  ;;  %v7067_v19 = vor.u32 %v7065_v58, %v7063_v16 }
 0x5c6   : > { %v6712_v8 = vsel %vm19386_vm6, %v6703_v4, %v19684_v49  ;;  %v6713_v14 = vrot.slane %v19684_v49, 4  ;;  %v6280_v10 = vsel %vm6244_vm0, %v6100_v51, 0.0  ;;  %v7069_v31 = vshll.u32 %v19679_v48, 16  ;;  %v19698_v4 = vld [vmem:[#allocation3 + $0x50] sm:$0xff]   ;;  %vm21910_vm0 = vmmov %vm21907_vm3 }
 0x5c7   : > { %6826 = vst [vmem:[#allocation3 + $0x84] sm:$0xf] %v6712_v8  ;;  %v6691_v38 = vor.u32 %v6690_v62, %v6687_v25  ;;  %v6735_v47 = vshrl.u32 %v13621_v24, 16  ;;  %v6738_v6 = vshll.u32 %v13621_v24, 16  ;;  %v13619_v46 = vpack.c.bf16 %v6280_v10, %v6280_v10  ;;  %v21911_v8 = vld [vmem:[#allocation64_spill] sm:$0xff] }
 0x5c8   : > { %v7071_v12 = vrot.slane %v7069_v31, 1  ;;  %v6103_v16 = vadd.f32 %v19631_v29, %v19573_v15  ;;  %v6101_v58 = vadd.f32 %v19631_v29, %v19578_v11  ;;  %v7073_v51 = vshrl.u32 %v19679_v48, 16  ;;  %v19704_v15 = vld [vmem:[#allocation3 + $0x58] sm:$0xff]   ;;  %v19713_v10 = vld [vmem:[#allocation3 + $0x60] sm:$0xff]  }
 0x5c9   : > { %v6692_v30 = vsel %vm19386_vm6, %v6683_v17, %v6691_v38  ;;  %v6693_v49 = vrot.slane %v6691_v38, 4  ;;  %v6737_v50 = vrot.slane %v6735_v47, 6  ;;  %v6740_v22 = vrot.slane %v6738_v6, 7  ;;  %v21913_v47 = vld [vmem:[#allocation62_spill] sm:$0xff] }
 0x5ca   : > { %6824 = vst [vmem:[#allocation3 + $0x7c] sm:$0xf] %v6692_v30  ;;  %v6715_v25 = vshrl.u32 %v13619_v46, 16  ;;  %v6718_v62 = vshll.u32 %v13619_v46, 16  ;;  %v7072_v24 = vsel %vm21910_vm0, %v7067_v19, %v7071_v12  ;;  %vm6139_vm9 = vcmp.gt.f32.partialorder %v6103_v16, 0.0 }
 0x5cb   : > { %v6702_v11 = vsel %vm19386_vm6, %v6693_v49, %v19667_v9  ;;  %v19709_v29 = vor.u32 %v6740_v22, %v6737_v50  ;;  %14698 = vmatprep.mubr.bf16.mxu1 %v7072_v24  ;;  %vm21912_vm7 = vnez %v21911_v8  ;;  %vm6137_vm12 = vcmp.gt.f32.partialorder %v6101_v58, 0.0  ;;  %v19720_v50 = vld [vmem:[#allocation3 + $0x68] sm:$0xff]  }
 0x5cc   : > { %vm6247_vm3 = vmand %vm21912_vm7, %vm6139_vm9  ;;  %v7075_v17 = vor.u32 %v7073_v51, %v7071_v12  ;;  %6825 = vst [vmem:[#allocation3 + $0x80] sm:$0xf] %v6702_v11  ;;  %v6717_v31 = vrot.slane %v6715_v25, 6  ;;  %v6720_v19 = vrot.slane %v6718_v62, 7  ;;  %vm21914_vm0 = vnez %v21913_v47 }
 0x5cd   : > { %v6283_v38 = vsel %vm6247_vm3, %v6103_v16, 0.0  ;;  %vm6245_vm15 = vmand %vm21914_vm0, %vm6137_vm12  ;;  %v7077_v6 = vshll.u32 %v19698_v4, 16  ;;  %v6743_v9 = vrot.slane %v19709_v29, 4  ;;  %v7081_v49 = vshrl.u32 %v19698_v4, 16 }
 0x5ce   : > { %v13622_v46 = vpack.c.bf16 %v6283_v38, %v6283_v38  ;;  %v6281_v30 = vsel %vm6245_vm15, %v6101_v58, 0.0  ;;  %v6721_v12 = vor.u32 %v6720_v19, %v6717_v31  ;;  %v7085_v25 = vshll.u32 %v19704_v15, 16  ;;  %v6834_v58 = vld [vmem:[#allocation3 + $0x98] sm:$0x1] }
 0x5cf   : > { %v13620_v51 = vpack.c.bf16 %v6281_v30, %v6281_v30  ;;  %v7079_v22 = vrot.slane %v7077_v6, 1  ;;  %v7089_v24 = vshrl.u32 %v19704_v15, 16  ;;  %v7093_v11 = vshll.u32 %v19713_v10, 16  ;;  %v19728_v30 = vld [vmem:[#allocation3 + $0x70] sm:$0xff]  }
 0x5d0   : > { %v6745_v62 = vshrl.u32 %v13622_v46, 16  ;;  %v6748_v16 = vshll.u32 %v13622_v46, 16  ;;  %v6722_v47 = vsel %vm19386_vm6, %v6713_v14, %v6721_v12  ;;  %v6723_v38 = vrot.slane %v6721_v12, 4 }
 0x5d1   : > { %v6725_v8 = vshrl.u32 %v13620_v51, 16  ;;  %v6728_v54 = vshll.u32 %v13620_v51, 16  ;;  %6827 = vst [vmem:[#allocation3 + $0x88] sm:$0xf] %v6722_v47  ;;  %vm21915_vm15 = vsmask.f32 7424  ;;  %v7083_v6 = vor.u32 %v7081_v49, %v7079_v22 }
 0x5d2   : > { %v6747_v57 = vrot.slane %v6745_v62, 6  ;;  %v6750_v31 = vrot.slane %v6748_v16, 7  ;;  %v7080_v19 = vsel %vm21915_vm15, %v7075_v17, %v7079_v22  ;;  %vm21916_vm12 = vsmask.f32 256  ;;  %v19739_v52 = vld [vmem:[#allocation3 + $0x78] sm:$0xff]  }
 0x5d3   : > { %vm21917_vm3 = vcmask 1040384   ;;  %v21918_v46 = vmov 0  ;;  %v6727_v20 = vrot.slane %v6725_v8, 6  ;;  %v6730_v14 = vrot.slane %v6728_v54, 7  ;;  %14699 = vmatmul.mubr.bf16.gmra.mrb[16].mxu1 %v7080_v19  ;;  %v19755_v19 = vld [vmem:[#allocation3 + $0x80] sm:$0xff]  }
 0x5d4   : > { %vm19732_vm9 = vmand %vm21917_vm3, %vm21916_vm12  ;;  %v7087_v12 = vrot.slane %v7085_v25, 1  ;;  %v7095_v61 = vrot.slane %v7093_v11, 1  ;;  %v6751_v51 = vor.u32 %v6750_v31, %v6747_v57  ;;  %v6753_v47 = vrot.slane %v6747_v57, 4 }
 0x5d5   : > { %v21919_v46 = vsel %vm19732_vm9, 4294967295, %v21918_v46  ;;  %v7101_v62 = vshll.u32 %v19720_v50, 16  ;;  %v6731_v16 = vor.u32 %v6730_v14, %v6727_v20  ;;  %v7097_v22 = vshrl.u32 %v19713_v10, 16  ;;  %vm21921_vm12 = vmmov %vm21915_vm15 }
 0x5d6   : > { %21920 = vst [vmem:[#allocation43_spill] sm:$0xff] %v21919_v46  ;;  %v7088_v17 = vsel %vm21915_vm15, %v7083_v6, %v7087_v12  ;;  %v7091_v49 = vor.u32 %v7089_v24, %v7087_v12  ;;  %v6752_v41 = vsel %vm19386_vm6, %v6743_v9, %v6751_v51  ;;  %v6835_v54 = vsel %vm19732_vm9, %v6753_v47, %v6834_v58  ;;  %vm21922_vm3 = vmmov %vm21921_vm12 }
 0x5d7   : > { %14702 = vmatprep.mubr.bf16.mxu1 %v7088_v17  ;;  %v7103_v8 = vrot.slane %v7101_v62, 1  ;;  %6830 = vst [vmem:[#allocation3 + $0x94] sm:$0xf] %v6752_v41  ;;  %6836 = vst [vmem:[#allocation3 + $0x98] sm:$0x1] %v6835_v54  ;;  %v6732_v20 = vsel %vm19386_vm6, %v6723_v38, %v6731_v16  ;;  %v6733_v57 = vrot.slane %v6731_v16, 4  ;;  %v7099_v25 = vor.u32 %v7097_v22, %v7095_v61 }
 0x5d8   : > { %v7109_v24 = vshll.u32 %v19728_v30, 16  ;;  %6828 = vst [vmem:[#allocation3 + $0x8c] sm:$0xf] %v6732_v20  ;;  %v7096_v11 = vsel %vm21921_vm12, %v7091_v49, %v7095_v61  ;;  %v7117_v31 = vshll.u32 %v19739_v52, 16  ;;  %v7105_v41 = vshrl.u32 %v19720_v50, 16  ;;  %vm21923_vm15 = vmmov %vm21922_vm3 }
 0x5d9   : > { %v6742_v9 = vsel %vm19386_vm6, %v6733_v57, %v19709_v29  ;;  %v7104_v58 = vsel %vm21922_vm3, %v7099_v25, %v7103_v8  ;;  %v7113_v14 = vshrl.u32 %v19728_v30, 16  ;;  %v7125_v51 = vshll.u32 %v19755_v19, 16  ;;  %v19759_v29 = vld [vmem:[#allocation3 + $0x88] sm:$0xf]  ;;  %vm21924_vm12 = vmmov %vm21922_vm3 }
 0x5da   : > { %6829 = vst [vmem:[#allocation3 + $0x90] sm:$0xf] %v6742_v9  ;;  %v7111_v38 = vrot.slane %v7109_v24, 1  ;;  %v7107_v6 = vor.u32 %v7105_v41, %v7103_v8  ;;  %v7119_v61 = vrot.slane %v7117_v31, 1  ;;  %v7121_v49 = vshrl.u32 %v19739_v52, 16  ;;  %v16259_v31 = vld [vmem:[%s17318_s20 + $0x88] sm:$0xff]  }
 0x5db   : > { %14703 = vmatmul.mubr.bf16.gmra.mrb[20].mxu1 %v7096_v11  ;;  %v7127_v54 = vrot.slane %v7125_v51, 1  ;;  %v7129_v20 = vshrl.u32 %v19755_v19, 16  ;;  %v16429_v41 = vld [vmem:[#allocation3 + $0x8] sm:$0xff]  }
 0x5dc   : > { %14706 = vmatprep.mubr.bf16.mxu1 %v7104_v58  ;;  %v7115_v12 = vor.u32 %v7113_v14, %v7111_v38  ;;  %v7112_v62 = vsel %vm21923_vm15, %v7107_v6, %v7111_v38  ;;  %v7123_v8 = vor.u32 %v7121_v49, %v7119_v61  ;;  %vm21925_vm15 = vmmov %vm21922_vm3  ;;  %v16260_v38 = vld [vmem:[%s17318_s20 + $0x90] sm:$0xff]   ;;  %v16261_v6 = vld [vmem:[%s17318_s20 + $0x98] sm:$0xff]  }
 0x5dd   : > { %v7131_v25 = vor.u32 %v7129_v20, %v7127_v54  ;;  %v16265_v14 = vld [vmem:[%s17318_s20 + $0xb8] sm:$0xff]  }
 0x5de   : > { %v7120_v17 = vsel %vm21924_vm12, %v7115_v12, %v7119_v61  ;;  %v7128_v24 = vsel %vm21922_vm3, %v7123_v8, %v7127_v54  ;;  %v16430_v61 = vld [vmem:[#allocation3 + $0x4] sm:$0xf]  ;;  %vm21926_vm12 = vcmask 1046528   ;;  %v16432_v8 = vld [vmem:[#allocation3 + $0x18] sm:$0xff]  }
 0x5df   : > { %v6889_v47 = vld [vmem:[#allocation3 + $0x8c] sm:$0xf]  ;;  %v7655_v20 = vrot.slane %v16432_v8, 1  ;;  %vm21927_vm3 = vmmov %vm21926_vm12 }
 0x5e0   : > { %v19763_v16 = vcombine.low %v19759_v29, %v6889_v47  ;;  %v6872_v51 = vld [vmem:[#allocation3 + $0x8c] sm:$0x7]  ;;  %vm21932_vm9 = vmmov %vm21927_vm3 }
 0x5e1   : > { %vm21936_vm6 = vmmov %vm21927_vm3 }
 0x5e2   : > { %v7133_v22 = vshll.u32 %v19763_v16, 16  ;;  %v7137_v9 = vshrl.u32 %v19763_v16, 16 }
 0x5e3   : > { %14707 = vmatmul.mubr.bf16.gmra.mrb[24].mxu1 %v7112_v62  ;;  %v7651_v62 = vrot.slane %v16429_v41, 1 }
 0x5e4   : > { %14710 = vmatprep.mubr.bf16.mxu1 %v7120_v17  ;;  %v7135_v57 = vrot.slane %v7133_v22, 1  ;;  %v13235_v17 = vcombine.low %v19759_v29, %v6872_v51  ;;  %v16431_v22 = vld [vmem:[#allocation3 + $0x10] sm:$0xff]   ;;  %v16279_v51 = vld [vmem:[%s17318_s20 + $0x100] sm:$0xff]  }
 0x5e5   : > { %v7653_v54 = vrot.slane %v16431_v22, 1  ;;  %v16270_v29 = vld [vmem:[%s17318_s20 + $0xd0] sm:$0xff]  }
 0x5e6   : > { %v7136_v11 = vsel %vm21925_vm15, %v7131_v25, %v7135_v57  ;;  %v7139_v58 = vor.u32 %v7137_v9, %v7135_v57  ;;  %v16269_v57 = vld [vmem:[%s17318_s20 + $0xc8] sm:$0xff]   ;;  %vm21928_vm15 = vmmov %vm21927_vm3 }
 0x5e7   : > { %v7654_v25 = vsel %vm21927_vm3, %v7651_v62, %v7653_v54 }
 0x5eb   : > { %14711 = vmatmul.mubr.bf16.gmra.mrb[28].mxu1 %v7128_v24  ;;  %v7656_v24 = vsel %vm21928_vm15, %v7653_v54, %v7655_v20  ;;  %vm21930_vm15 = vmmov %vm21927_vm3 }
 0x5ec   : > { %14714 = vmatprep.mubr.bf16.mxu1 %v7136_v11  ;;  %v16433_v11 = vld [vmem:[#allocation3 + $0x20] sm:$0xff]  }
 0x5ed   : > { %v7657_v9 = vrot.slane %v16433_v11, 1  ;;  %v16278_v11 = vld [vmem:[#allocation3 + $0x18] sm:$0xff]  }
 0x5f3   : > { %14715 = vmatmul.mubr.bf16.gmra.mrb[32].mxu1 %v7139_v58  ;;  %v7659_v58 = vrot.slane %v19581_v28, 1 }
 0x5f4   : > { %14734 = vmatprep.mubr.bf16.mxu1 %v19361_v37  ;;  %v16262_v37 = vld [vmem:[%s17318_s20 + $0xa0] sm:$0xff]  }
 0x5fb   : > { %14735 = vmatmul.mubr.bf16.vlgmr.msra.gmra.mrb[0].mxu1 %v16429_v41 }
 0x5fc   : > { %14738 = vmatprep.mubr.bf16.mxu1 %v19510_v1  ;;  %14771 = vmatpush3.bf16.msra.mxu1 %v19643_v32  ;;  %v16263_v1 = vld [vmem:[%s17318_s20 + $0xa8] sm:$0xff]   ;;  %v16264_v32 = vld [vmem:[%s17318_s20 + $0xb0] sm:$0xff]  }
 0x5fd   : > { %14772 = vmatprep.subr.bf16.mxu1 %v16259_v31 }
 0x600   : > { %14773 = vmatpush3.bf16.msra.mxu1 %v16259_v31  ;;  %v16271_v31 = vld [vmem:[%s17318_s20 + $0xd8] sm:$0xff]  }
 0x601   : > { %14774 = vmatprep.subr.bf16.mxu1 %v16260_v38 }
 0x603   : > { %14739 = vmatmul.mubr.bf16.gmra.mrb[4].mxu1 %v19528_v53  ;;  %v16268_v53 = vld [vmem:[%s17318_s20 + $0xc0] sm:$0xff]  }
 0x604   : > { %14742 = vmatprep.mubr.bf16.mxu1 %v19547_v13  ;;  %14775 = vmatpush3.bf16.msra.mxu1 %v16260_v38  ;;  %v7629_v13 = vld [vmem:[#allocation3] sm:$0xe]  ;;  %v7660_v38 = vsel %vm21927_vm3, %v7657_v9, %v7659_v58 }
 0x605   : > { %14776 = vmatprep.subr.bf16.mxu1 %v16261_v6  ;;  %v13260_v12 = vcombine.low %v7629_v13, %v16430_v61  ;;  %v7665_v13 = vrot.slane %v19658_v42, 1 }
 0x607   : > { %v7650_v47 = vrot.slane %v13260_v12, 1 }
 0x608   : > { %14777 = vmatpush3.bf16.msra.mxu1 %v16261_v6  ;;  %v16272_v6 = vld [vmem:[%s17318_s20 + $0xe0] sm:$0xff]  }
 0x609   : > { %14778 = vmatprep.subr.bf16.mxu1 %v16262_v37  ;;  %v7652_v49 = vsel %vm21926_vm12, %v7650_v47, %v7651_v62  ;;  %vm21929_vm12 = vmmov %vm21927_vm3  ;;  %v7669_v47 = vrot.slane %v19698_v4, 1  ;;  %v7671_v62 = vrot.slane %v19704_v15, 1 }
 0x60a   : > { %v7658_v41 = vsel %vm21929_vm12, %v7655_v20, %v7657_v9  ;;  %vm21931_vm12 = vmmov %vm21927_vm3 }
 0x60b   : > { %14743 = vmatmul.mubr.bf16.gmra.mrb[8].mxu1 %v19581_v28  ;;  %v16273_v28 = vld [vmem:[%s17318_s20 + $0xe8] sm:$0xff]  }
 0x60c   : > { %14746 = vmatprep.mubr.bf16.mxu1 %v19608_v18  ;;  %14779 = vmatpush3.bf16.msra.mxu1 %v16262_v37  ;;  %v7661_v37 = vrot.slane %v19608_v18, 1  ;;  %v7667_v18 = vrot.slane %v19679_v48, 1 }
 0x60d   : > { %14780 = vmatprep.subr.bf16.mxu1 %v16263_v1 }
 0x60e   : > { %v7668_v12 = vsel %vm21932_vm9, %v7665_v13, %v7667_v18  ;;  %vm21935_vm9 = vmmov %vm21927_vm3 }
 0x610   : > { %14781 = vmatpush3.bf16.msra.mxu1 %v16263_v1  ;;  %v7663_v1 = vrot.slane %v19628_v21, 1 }
 0x611   : > { %14782 = vmatprep.subr.bf16.mxu1 %v16264_v32 }
 0x612   : > { %v7666_v61 = vsel %vm21927_vm3, %v7663_v1, %v7665_v13  ;;  %v16284_v13 = vld [vmem:[#allocation3 + $0x38] sm:$0xff]  }
 0x613   : > { %14747 = vmatmul.mubr.bf16.gmra.mrb[12].mxu1 %v19628_v21  ;;  %v16275_v21 = vld [vmem:[%s17318_s20 + $0xf8] sm:$0xff]  }
 0x614   : > { %14750 = vmatprep.mubr.bf16.mxu1 %v19658_v42  ;;  %14783 = vmatpush3.bf16.msra.mxu1 %v16264_v32  ;;  %v7662_v32 = vsel %vm21930_vm15, %v7659_v58, %v7661_v37  ;;  %vm21933_vm15 = vmmov %vm21927_vm3  ;;  %v16280_v58 = vld [vmem:[#allocation3 + $0x20] sm:$0xff]  }
 0x615   : > { %14784 = vmatprep.subr.bf16.mxu1 %v16265_v14  ;;  %v7670_v42 = vsel %vm21933_vm15, %v7667_v18, %v7669_v47  ;;  %vm21937_vm15 = vmmov %vm21927_vm3 }
 0x618   : > { %14785 = vmatpush3.bf16.msra.mxu1 %v16265_v14  ;;  %v7664_v14 = vsel %vm21931_vm12, %v7661_v37, %v7663_v1  ;;  %vm21934_vm12 = vmmov %vm21927_vm3  ;;  %v16282_v37 = vld [vmem:[#allocation3 + $0x30] sm:$0xff]  }
 0x619   : > { %14822 = vmatprep.subr.bf16.mxu1 %v16268_v53  ;;  %v16286_v1 = vld [vmem:[%s17318_s20 + $0x110] sm:$0xff]  }
 0x61b   : > { %14751 = vmatmul.mubr.bf16.gmra.mrb[16].mxu1 %v19679_v48  ;;  %v7672_v48 = vsel %vm21934_vm12, %v7669_v47, %v7671_v62  ;;  %vm21938_vm12 = vmmov %vm21927_vm3  ;;  %v16295_v47 = vld [vmem:[%s17318_s20 + $0x128] sm:$0xff]  }
 0x61c   : > { %14754 = vmatprep.mubr.bf16.mxu1 %v19698_v4  ;;  %v7677_v4 = vrot.slane %v19728_v30, 1 }
 0x623   : > { %14755 = vmatmul.mubr.bf16.gmra.mrb[20].mxu1 %v19704_v15  ;;  %v7679_v15 = vrot.slane %v19739_v52, 1 }
 0x624   : > { %14758 = vmatprep.mubr.bf16.mxu1 %v19713_v10 }
 0x625   : > { %v7680_v20 = vsel %vm21937_vm15, %v7677_v4, %v7679_v15  ;;  %vm21941_vm15 = vmmov %vm21927_vm3 }
 0x62b   : > { %14759 = vmatmul.mubr.bf16.gmra.mrb[24].mxu1 %v19720_v50 }
 0x62c   : > { %14762 = vmatprep.mubr.bf16.mxu1 %v19728_v30  ;;  %v16276_v30 = vld [vmem:[#allocation3 + $0x8] sm:$0xfe]  }
 0x633   : > { %14763 = vmatmul.mubr.bf16.gmra.mrb[28].mxu1 %v19739_v52 }
 0x634   : > { %14766 = vmatprep.mubr.bf16.mxu1 %v19755_v19 }
 0x63b   : > { %14767 = vmatmul.mubr.bf16.gmra.mrb[32].mxu1 %v13235_v17  ;;  %v7673_v17 = vrot.slane %v19713_v10, 1  ;;  %v7681_v10 = vrot.slane %v19755_v19, 1  ;;  %v8110_v19 = vrot.slane %v16278_v11, 1 }
 0x63c   : > { %14786 = vmatprep.mubr.bf16.mxu1 %v7652_v49  ;;  %v7675_v49 = vrot.slane %v19720_v50, 1  ;;  %v7683_v50 = vrot.slane %v19763_v16, 1  ;;  %v8112_v16 = vrot.slane %v16280_v58, 1 }
 0x63d   : > { %v7674_v22 = vsel %vm21935_vm9, %v7671_v62, %v7673_v17  ;;  %vm21939_vm9 = vmmov %vm21927_vm3 }
 0x63e   : > { %v7676_v54 = vsel %vm21927_vm3, %v7673_v17, %v7675_v49  ;;  %v7678_v8 = vsel %vm21936_vm6, %v7675_v49, %v7677_v4  ;;  %vm21940_vm6 = vmmov %vm21927_vm3  ;;  %v16288_v17 = vld [vmem:[#allocation3 + $0x50] sm:$0xff]   ;;  %v16301_v4 = vld [vmem:[%s17318_s20 + $0x138] sm:$0xff]  }
 0x63f   : > { %v16298_v49 = vld [vmem:[%s17318_s20 + $0x130] sm:$0xff]  }
 0x643   : > { %14787 = vmatmul.mubr.bf16.vlgmr.msra.gmra.mrb[0].mxu1 %v7654_v25  ;;  %v7684_v25 = vsel %vm21939_vm9, %v7681_v10, %v7683_v50  ;;  %vm21943_vm9 = vmmov %vm21927_vm3 }
 0x644   : > { %14790 = vmatprep.mubr.bf16.mxu1 %v7656_v24  ;;  %14823 = vmatpush3.bf16.msra.mxu1 %v16268_v53  ;;  %v16274_v53 = vld [vmem:[%s17318_s20 + $0xf0] sm:$0xff]  }
 0x645   : > { %14824 = vmatprep.subr.bf16.mxu1 %v16269_v57  ;;  %v16277_v24 = vld [vmem:[#allocation3 + $0x10] sm:$0xff]  }
 0x646   : > { %v8108_v52 = vrot.slane %v16277_v24, 1 }
 0x648   : > { %14825 = vmatpush3.bf16.msra.mxu1 %v16269_v57  ;;  %v7682_v57 = vsel %vm21938_vm12, %v7679_v15, %v7681_v10  ;;  %vm21942_vm12 = vmmov %vm21927_vm3  ;;  %v16291_v10 = vld [vmem:[#allocation3 + $0x60] sm:$0xff]  }
 0x649   : > { %14826 = vmatprep.subr.bf16.mxu1 %v16270_v29 }
 0x64b   : > { %14791 = vmatmul.mubr.bf16.gmra.mrb[4].mxu1 %v7658_v41  ;;  %v8111_v41 = vsel %vm21927_vm3, %v8108_v52, %v8110_v19 }
 0x64c   : > { %14794 = vmatprep.mubr.bf16.mxu1 %v7660_v38  ;;  %14827 = vmatpush3.bf16.msra.mxu1 %v16270_v29  ;;  %v8107_v29 = vrot.slane %v16276_v30, 1  ;;  %v16281_v38 = vld [vmem:[#allocation3 + $0x28] sm:$0xff]  }
 0x64d   : > { %14828 = vmatprep.subr.bf16.mxu1 %v16271_v31  ;;  %v16293_v30 = vld [vmem:[#allocation3 + $0x68] sm:$0xff]  }
 0x64e   : > { %v8109_v9 = vsel %vm21940_vm6, %v8107_v29, %v8108_v52  ;;  %vm21944_vm6 = vmmov %vm21927_vm3  ;;  %v16294_v29 = vld [vmem:[#allocation3 + $0x70] sm:$0xff]   ;;  %v8130_v11 = vrot.slane %v16293_v30, 1 }
 0x650   : > { %14829 = vmatpush3.bf16.msra.mxu1 %v16271_v31  ;;  %v16283_v31 = vld [vmem:[%s17318_s20 + $0x108] sm:$0xff]  }
 0x651   : > { %14830 = vmatprep.subr.bf16.mxu1 %v16272_v6 }
 0x653   : > { %14795 = vmatmul.mubr.bf16.gmra.mrb[8].mxu1 %v7662_v32  ;;  %v8116_v32 = vrot.slane %v16282_v37, 1 }
 0x654   : > { %14798 = vmatprep.mubr.bf16.mxu1 %v7664_v14  ;;  %14831 = vmatpush3.bf16.msra.mxu1 %v16272_v6  ;;  %v8113_v6 = vsel %vm21941_vm15, %v8110_v19, %v8112_v16  ;;  %v16289_v14 = vld [vmem:[%s17318_s20 + $0x118] sm:$0xff]   ;;  %vm21945_vm15 = vmmov %vm21927_vm3 }
 0x655   : > { %14832 = vmatprep.subr.bf16.mxu1 %v16273_v28  ;;  %v16296_v19 = vld [vmem:[#allocation3 + $0x78] sm:$0xff]  }
 0x658   : > { %14833 = vmatpush3.bf16.msra.mxu1 %v16273_v28  ;;  %v8114_v28 = vrot.slane %v16281_v38, 1 }
 0x659   : > { %14834 = vmatprep.subr.bf16.mxu1 %v16274_v53 }
 0x65a   : > { %v8117_v18 = vsel %vm21943_vm9, %v8114_v28, %v8116_v32  ;;  %vm21947_vm9 = vmmov %vm21927_vm3 }
 0x65b   : > { %14799 = vmatmul.mubr.bf16.gmra.mrb[12].mxu1 %v7666_v61  ;;  %v16292_v61 = vld [vmem:[%s17318_s20 + $0x120] sm:$0xff]  }
 0x65c   : > { %14802 = vmatprep.mubr.bf16.mxu1 %v7668_v12  ;;  %14835 = vmatpush3.bf16.msra.mxu1 %v16274_v53  ;;  %v8115_v53 = vsel %vm21942_vm12, %v8112_v16, %v8114_v28  ;;  %v8118_v12 = vrot.slane %v16284_v13, 1  ;;  %vm21946_vm12 = vmmov %vm21927_vm3  ;;  %v16300_v28 = vld [vmem:[#allocation3 + $0x90] sm:$0xff]  }
 0x65d   : > { %14836 = vmatprep.subr.bf16.mxu1 %v16275_v21  ;;  %v19865_v13 = vld [vmem:[#allocation3 + $0x10] sm:$0xff]  }
 0x65e   : > { %v8119_v62 = vsel %vm21944_vm6, %v8116_v32, %v8118_v12  ;;  %vm21948_vm6 = vmmov %vm21927_vm3  ;;  %v8421_v32 = vld [vmem:[#allocation3 + $0x8] sm:$0xe] }
 0x660   : > { %14837 = vmatpush3.bf16.msra.mxu1 %v16275_v21  ;;  %v16285_v21 = vld [vmem:[#allocation3 + $0x40] sm:$0xff]  }
 0x661   : > { %14874 = vmatprep.subr.bf16.mxu1 %v16279_v51 }
 0x663   : > { %14803 = vmatmul.mubr.bf16.gmra.mrb[16].mxu1 %v7670_v42  ;;  %v16287_v42 = vld [vmem:[#allocation3 + $0x48] sm:$0xff]  }
 0x664   : > { %14806 = vmatprep.mubr.bf16.mxu1 %v7672_v48 }
 0x66b   : > { %14807 = vmatmul.mubr.bf16.gmra.mrb[20].mxu1 %v7674_v22  ;;  %v8122_v22 = vrot.slane %v16287_v42, 1 }
 0x66c   : > { %14810 = vmatprep.mubr.bf16.mxu1 %v7676_v54  ;;  %v8124_v54 = vrot.slane %v16288_v17, 1 }
 0x673   : > { %14811 = vmatmul.mubr.bf16.gmra.mrb[24].mxu1 %v7678_v8  ;;  %v16290_v8 = vld [vmem:[#allocation3 + $0x58] sm:$0xff]  }
 0x674   : > { %14814 = vmatprep.mubr.bf16.mxu1 %v7680_v20  ;;  %v8125_v20 = vsel %vm21946_vm12, %v8122_v22, %v8124_v54  ;;  %vm21950_vm12 = vmmov %vm21927_vm3 }
 0x67b   : > { %14815 = vmatmul.mubr.bf16.gmra.mrb[28].mxu1 %v7682_v57  ;;  %v8126_v57 = vrot.slane %v16290_v8, 1 }
 0x67c   : > { %14818 = vmatprep.mubr.bf16.mxu1 %v7684_v25  ;;  %v8128_v25 = vrot.slane %v16291_v10, 1 }
 0x67d   : > { %v8127_v24 = vsel %vm21947_vm9, %v8124_v54, %v8126_v57  ;;  %vm21951_vm9 = vmmov %vm21927_vm3 }
 0x67e   : > { %v8129_v52 = vsel %vm21948_vm6, %v8126_v57, %v8128_v25  ;;  %v8131_v58 = vsel %vm21927_vm3, %v8128_v25, %v8130_v11  ;;  %vm21952_vm6 = vmmov %vm21927_vm3 }
 0x683   : > { %14819 = vmatmul.mubr.bf16.gmra.mrb[32].mxu1 %v7683_v50  ;;  %v19853_v50 = vld [vmem:[%s17318_s20 + $0x140] sm:$0xff]  }
 0x684   : > { %14838 = vmatprep.mubr.bf16.mxu1 %v8109_v9  ;;  %v8132_v9 = vrot.slane %v16294_v29, 1 }
 0x68b   : > { %14839 = vmatmul.mubr.bf16.vlgmr.msra.gmra.mrb[0].mxu1 %v8111_v41  ;;  %v8134_v41 = vrot.slane %v16296_v19, 1 }
 0x68c   : > { %14842 = vmatprep.mubr.bf16.mxu1 %v8113_v6  ;;  %14875 = vmatpush3.bf16.msra.mxu1 %v16279_v51  ;;  %v8120_v51 = vrot.slane %v16285_v21, 1  ;;  %v19860_v6 = vld [vmem:[#allocation3 + $0xc] sm:$0xf]  ;;  %v8140_v21 = vrot.slane %v16300_v28, 1 }
 0x68d   : > { %14876 = vmatprep.subr.bf16.mxu1 %v16283_v31  ;;  %v8135_v37 = vsel %vm21950_vm12, %v8132_v9, %v8134_v41 }
 0x68e   : > { %v8121_v48 = vsel %vm21927_vm3, %v8118_v12, %v8120_v51  ;;  %v8123_v15 = vsel %vm21945_vm15, %v8120_v51, %v8122_v22  ;;  %vm21949_vm15 = vmmov %vm21927_vm3  ;;  %v8577_v51 = vshrl.u32 %v19865_v13, 16 }
 0x68f   : > { %v8133_v16 = vsel %vm21949_vm15, %v8130_v11, %v8132_v9  ;;  %vm21953_vm15 = vsmask.f32 6400 }
 0x690   : > { %14877 = vmatpush3.bf16.msra.mxu1 %v16283_v31  ;;  %v16297_v31 = vld [vmem:[#allocation3 + $0x80] sm:$0xff]   ;;  %v8579_v22 = vrot.slane %v8577_v51, 1  ;;  %vm21954_vm12 = vmmov %vm21953_vm15  ;;  %v16312_v51 = vld [vmem:[%s17318_s20 + $0x150] sm:$0xff]  }
 0x691   : > { %14878 = vmatprep.subr.bf16.mxu1 %v16286_v1  ;;  %v8136_v38 = vrot.slane %v16297_v31, 1 }
 0x693   : > { %14843 = vmatmul.mubr.bf16.gmra.mrb[4].mxu1 %v8115_v53  ;;  %v13327_v53 = vcombine.low %v8421_v32, %v19860_v6 }
 0x694   : > { %14846 = vmatprep.mubr.bf16.mxu1 %v8117_v18  ;;  %14879 = vmatpush3.bf16.msra.mxu1 %v16286_v1  ;;  %v16299_v1 = vld [vmem:[#allocation3 + $0x88] sm:$0xff]  }
 0x695   : > { %14880 = vmatprep.subr.bf16.mxu1 %v16289_v14  ;;  %v8138_v18 = vrot.slane %v16299_v1, 1  ;;  %v8572_v12 = vshll.u32 %v13327_v53, 16  ;;  %v16309_v1 = vld [vmem:[%s17318_s20 + $0x148] sm:$0xff]  }
 0x697   : > { %v8141_v42 = vsel %vm21927_vm3, %v8138_v18, %v8140_v21 }
 0x698   : > { %14881 = vmatpush3.bf16.msra.mxu1 %v16289_v14  ;;  %v8137_v14 = vsel %vm21951_vm9, %v8134_v41, %v8136_v38  ;;  %vm21955_vm9 = vmmov %vm21954_vm12 }
 0x699   : > { %14882 = vmatprep.subr.bf16.mxu1 %v16292_v61 }
 0x69b   : > { %14847 = vmatmul.mubr.bf16.gmra.mrb[8].mxu1 %v8119_v62  ;;  %v8139_v62 = vsel %vm21952_vm6, %v8136_v38, %v8138_v18  ;;  %vm21956_vm6 = vmmov %vm21955_vm9 }
 0x69c   : > { %14850 = vmatprep.mubr.bf16.mxu1 %v8121_v48  ;;  %14883 = vmatpush3.bf16.msra.mxu1 %v16292_v61  ;;  %v8569_v61 = vshrl.u32 %v13327_v53, 16  ;;  %v19871_v48 = vld [vmem:[#allocation3 + $0x18] sm:$0xff]   ;;  %vm21957_vm3 = vmmov %vm21956_vm6 }
 0x69d   : > { %14884 = vmatprep.subr.bf16.mxu1 %v16295_v47  ;;  %v8589_v8 = vshll.u32 %v19871_v48, 16  ;;  %v19890_v53 = vld [vmem:[#allocation3 + $0x38] sm:$0xff]  }
 0x69e   : > { %v8571_v17 = vrot.slane %v8569_v61, 1 }
 0x69f   : > { %v8591_v30 = vrot.slane %v8589_v8, 2 }
 0x6a0   : > { %14885 = vmatpush3.bf16.msra.mxu1 %v16295_v47  ;;  %v8580_v47 = vshll.u32 %v19865_v13, 16 }
 0x6a1   : > { %14886 = vmatprep.subr.bf16.mxu1 %v16298_v49 }
 0x6a2   : > { %v8582_v54 = vrot.slane %v8580_v47, 2 }
 0x6a3   : > { %14851 = vmatmul.mubr.bf16.gmra.mrb[12].mxu1 %v8123_v15  ;;  %v8586_v15 = vshrl.u32 %v19871_v48, 16 }
 0x6a4   : > { %14854 = vmatprep.mubr.bf16.mxu1 %v8125_v20  ;;  %14887 = vmatpush3.bf16.msra.mxu1 %v16298_v49  ;;  %v8574_v49 = vrot.slane %v8572_v12, 2  ;;  %v8583_v10 = vor.u32 %v8582_v54, %v8579_v22  ;;  %v19893_v12 = vld [vmem:[#allocation3 + $0x40] sm:$0xff]  }
 0x6a5   : > { %14888 = vmatprep.subr.bf16.mxu1 %v16301_v4  ;;  %v8634_v22 = vshll.u32 %v19893_v12, 16  ;;  %v16315_v54 = vld [vmem:[%s17318_s20 + $0x158] sm:$0xff]  }
 0x6a6   : > { %v8575_v20 = vor.u32 %v8574_v49, %v8571_v17  ;;  %v8631_v49 = vshrl.u32 %v19893_v12, 16 }
 0x6a8   : > { %14889 = vmatpush3.bf16.msra.mxu1 %v16301_v4  ;;  %v19873_v4 = vld [vmem:[#allocation3 + $0x20] sm:$0xff]   ;;  %v8584_v29 = vsel %vm21953_vm15, %v8575_v20, %v8583_v10  ;;  %v19903_v20 = vld [vmem:[#allocation3 + $0x48] sm:$0xff]   ;;  %vm21958_vm15 = vmmov %vm21957_vm3 }
 0x6a9   : > { %14926 = vmatprep.subr.bf16.mxu1 %v19853_v50  ;;  %v8595_v57 = vshrl.u32 %v19873_v4, 16  ;;  %v8598_v25 = vshll.u32 %v19873_v4, 16 }
 0x6ab   : > { %14855 = vmatmul.mubr.bf16.gmra.mrb[16].mxu1 %v8127_v24  ;;  %v8588_v24 = vrot.slane %v8586_v15, 1  ;;  %v8597_v11 = vrot.slane %v8595_v57, 1  ;;  %v8600_v9 = vrot.slane %v8598_v25, 2  ;;  %v8633_v57 = vrot.slane %v8631_v49, 1 }
 0x6ac   : > { %14858 = vmatprep.mubr.bf16.mxu1 %v8129_v52  ;;  %v19879_v52 = vld [vmem:[#allocation3 + $0x28] sm:$0xff]   ;;  %v8636_v25 = vrot.slane %v8634_v22, 2  ;;  %v16327_v22 = vld [vmem:[%s17318_s20 + $0x178] sm:$0xff]  }
 0x6ad   : > { %v8592_v19 = vor.u32 %v8591_v30, %v8588_v24  ;;  %v8607_v31 = vshll.u32 %v19879_v52, 16  ;;  %v8601_v41 = vor.u32 %v8600_v9, %v8597_v11  ;;  %v19906_v24 = vld [vmem:[#allocation3 + $0x50] sm:$0xff]   ;;  %v16318_v30 = vld [vmem:[%s17318_s20 + $0x160] sm:$0xff]   ;;  %v8640_v11 = vshrl.u32 %v19903_v20, 16 }
 0x6ae   : > { %v8643_v9 = vshll.u32 %v19903_v20, 16 }
 0x6af   : > { %v8593_v28 = vsel %vm21954_vm12, %v8583_v10, %v8592_v19  ;;  %v8602_v18 = vsel %vm21955_vm9, %v8592_v19, %v8601_v41  ;;  %v8637_v19 = vor.u32 %v8636_v25, %v8633_v57  ;;  %vm21959_vm12 = vmmov %vm21957_vm3 }
 0x6b0   : > { %vm21960_vm9 = vmmov %vm21957_vm3 }
 0x6b3   : > { %14859 = vmatmul.mubr.bf16.gmra.mrb[20].mxu1 %v8131_v58  ;;  %v19882_v58 = vld [vmem:[#allocation3 + $0x30] sm:$0xff]  }
 0x6b4   : > { %14862 = vmatprep.mubr.bf16.mxu1 %v8133_v16  ;;  %v8604_v16 = vshrl.u32 %v19879_v52, 16  ;;  %v8613_v38 = vshrl.u32 %v19882_v58, 16 }
 0x6b6   : > { %v8606_v32 = vrot.slane %v8604_v16, 1  ;;  %v8649_v16 = vshrl.u32 %v19906_v24, 16 }
 0x6bb   : > { %14863 = vmatmul.mubr.bf16.gmra.mrb[24].mxu1 %v8135_v37  ;;  %v8616_v37 = vshll.u32 %v19882_v58, 16 }
 0x6bc   : > { %14866 = vmatprep.mubr.bf16.mxu1 %v8137_v14  ;;  %v8609_v14 = vrot.slane %v8607_v31, 2  ;;  %v8652_v31 = vshll.u32 %v19906_v24, 16 }
 0x6bd   : > { %v8618_v61 = vrot.slane %v8616_v37, 2  ;;  %v8642_v37 = vrot.slane %v8640_v11, 1 }
 0x6be   : > { %v8610_v47 = vor.u32 %v8609_v14, %v8606_v32  ;;  %v8651_v14 = vrot.slane %v8649_v16, 1 }
 0x6c0   : > { %v8611_v15 = vsel %vm21956_vm6, %v8601_v41, %v8610_v47  ;;  %v16321_v41 = vld [vmem:[%s17318_s20 + $0x168] sm:$0xff]   ;;  %vm21961_vm6 = vmmov %vm21957_vm3 }
 0x6c3   : > { %14867 = vmatmul.mubr.bf16.gmra.mrb[28].mxu1 %v8139_v62  ;;  %v8622_v62 = vshrl.u32 %v19890_v53, 16 }
 0x6c4   : > { %14870 = vmatprep.mubr.bf16.mxu1 %v8141_v42  ;;  %v8625_v42 = vshll.u32 %v19890_v53, 16 }
 0x6c5   : > { %v8624_v8 = vrot.slane %v8622_v62, 1 }
 0x6cb   : > { %14871 = vmatmul.mubr.bf16.gmra.mrb[32].mxu1 %v8140_v21  ;;  %v8615_v21 = vrot.slane %v8613_v38, 1 }
 0x6cc   : > { %14890 = vmatprep.mubr.bf16.mxu1 %v8584_v29 }
 0x6cd   : > { %v8619_v17 = vor.u32 %v8618_v61, %v8615_v21  ;;  %v19918_v21 = vld [vmem:[#allocation3 + $0x60] sm:$0xff]   ;;  %v16324_v61 = vld [vmem:[%s17318_s20 + $0x170] sm:$0xff]  }
 0x6ce   : > { %v8670_v49 = vshll.u32 %v19918_v21, 16 }
 0x6cf   : > { %v8620_v10 = vsel %vm21957_vm3, %v8610_v47, %v8619_v17 }
 0x6d0   : > { %v8672_v25 = vrot.slane %v8670_v49, 2 }
 0x6d3   : > { %14891 = vmatmul.mubr.bf16.vlgmr.msra.gmra.mrb[0].mxu1 %v8593_v28  ;;  %v19915_v28 = vld [vmem:[#allocation3 + $0x58] sm:$0xff]  }
 0x6d4   : > { %14894 = vmatprep.mubr.bf16.mxu1 %v8602_v18  ;;  %14927 = vmatpush3.bf16.msra.mxu1 %v19853_v50  ;;  %v8627_v50 = vrot.slane %v8625_v42, 2  ;;  %v8654_v18 = vrot.slane %v8652_v31, 2  ;;  %v8658_v47 = vshrl.u32 %v19915_v28, 16  ;;  %v8661_v62 = vshll.u32 %v19915_v28, 16 }
 0x6d5   : > { %14928 = vmatprep.subr.bf16.mxu1 %v16309_v1 }
 0x6d6   : > { %v8628_v29 = vor.u32 %v8627_v50, %v8624_v8  ;;  %v8655_v42 = vor.u32 %v8654_v18, %v8651_v14  ;;  %v8663_v8 = vrot.slane %v8661_v62, 2  ;;  %v19927_v50 = vld [vmem:[#allocation3 + $0x68] sm:$0xff]  }
 0x6d8   : > { %14929 = vmatpush3.bf16.msra.mxu1 %v16309_v1  ;;  %v8629_v38 = vsel %vm21958_vm15, %v8619_v17, %v8628_v29  ;;  %v8645_v1 = vrot.slane %v8643_v9, 2  ;;  %v8638_v32 = vsel %vm21959_vm12, %v8628_v29, %v8637_v19  ;;  %v8667_v17 = vshrl.u32 %v19918_v21, 16  ;;  %v19933_v29 = vld [vmem:[%s17318_s20 + $0x180] sm:$0xff]   ;;  %vm21962_vm15 = vmmov %vm21957_vm3 }
 0x6d9   : > { %14930 = vmatprep.subr.bf16.mxu1 %v16312_v51  ;;  %v8676_v9 = vshrl.u32 %v19927_v50, 16  ;;  %vm21963_vm12 = vmmov %vm21957_vm3 }
 0x6da   : > { %v8669_v57 = vrot.slane %v8667_v17, 1 }
 0x6db   : > { %14895 = vmatmul.mubr.bf16.gmra.mrb[4].mxu1 %v8611_v15  ;;  %v8660_v15 = vrot.slane %v8658_v47, 1 }
 0x6dc   : > { %14898 = vmatprep.mubr.bf16.mxu1 %v8620_v10  ;;  %14931 = vmatpush3.bf16.msra.mxu1 %v16312_v51  ;;  %v8646_v51 = vor.u32 %v8645_v1, %v8642_v37  ;;  %v8673_v16 = vor.u32 %v8672_v25, %v8669_v57  ;;  %v8678_v37 = vrot.slane %v8676_v9, 1  ;;  %v19954_v9 = vld [vmem:[#allocation3 + $0x90] sm:$0xff]  }
 0x6dd   : > { %14932 = vmatprep.subr.bf16.mxu1 %v16315_v54  ;;  %v8664_v11 = vor.u32 %v8663_v8, %v8660_v15 }
 0x6de   : > { %v8656_v10 = vsel %vm21961_vm6, %v8646_v51, %v8655_v42  ;;  %vm21965_vm6 = vmmov %vm21957_vm3 }
 0x6df   : > { %v8674_v14 = vsel %vm21962_vm15, %v8664_v11, %v8673_v16  ;;  %vm21966_vm15 = vmmov %vm21957_vm3 }
 0x6e0   : > { %14933 = vmatpush3.bf16.msra.mxu1 %v16315_v54  ;;  %v8647_v54 = vsel %vm21960_vm9, %v8637_v19, %v8646_v51  ;;  %v8679_v19 = vshll.u32 %v19927_v50, 16  ;;  %v19944_v51 = vld [vmem:[#allocation3 + $0x80] sm:$0xff]   ;;  %vm21964_vm9 = vmmov %vm21957_vm3 }
 0x6e1   : > { %14934 = vmatprep.subr.bf16.mxu1 %v16318_v30 }
 0x6e2   : > { %v8681_v1 = vrot.slane %v8679_v19, 2 }
 0x6e3   : > { %14899 = vmatmul.mubr.bf16.gmra.mrb[8].mxu1 %v8629_v38  ;;  %v8665_v38 = vsel %vm21957_vm3, %v8655_v42, %v8664_v11  ;;  %v8703_v42 = vshrl.u32 %v19944_v51, 16 }
 0x6e4   : > { %14902 = vmatprep.mubr.bf16.mxu1 %v8638_v32  ;;  %14935 = vmatpush3.bf16.msra.mxu1 %v16318_v30  ;;  %v19930_v30 = vld [vmem:[#allocation3 + $0x70] sm:$0xff]   ;;  %v19941_v32 = vld [vmem:[#allocation3 + $0x78] sm:$0xff]   ;;  %v8682_v47 = vor.u32 %v8681_v1, %v8678_v37  ;;  %v8724_v37 = vshll.u32 %v19954_v9, 16 }
 0x6e5   : > { %14936 = vmatprep.subr.bf16.mxu1 %v16321_v41  ;;  %v8685_v31 = vshrl.u32 %v19930_v30, 16  ;;  %v8694_v62 = vshrl.u32 %v19941_v32, 16  ;;  %v8697_v17 = vshll.u32 %v19941_v32, 16  ;;  %v8705_v25 = vrot.slane %v8703_v42, 1 }
 0x6e7   : > { %v8687_v18 = vrot.slane %v8685_v31, 1  ;;  %v8696_v15 = vrot.slane %v8694_v62, 1  ;;  %v8699_v8 = vrot.slane %v8697_v17, 2  ;;  %v8726_v62 = vrot.slane %v8724_v37, 2 }
 0x6e8   : > { %14937 = vmatpush3.bf16.msra.mxu1 %v16321_v41  ;;  %v8688_v41 = vshll.u32 %v19930_v30, 16 }
 0x6e9   : > { %14938 = vmatprep.subr.bf16.mxu1 %v16324_v61  ;;  %v8700_v19 = vor.u32 %v8699_v8, %v8696_v15  ;;  %v9013_v15 = vld [vmem:[#allocation3 + $0x8] sm:$0xc] }
 0x6eb   : > { %14903 = vmatmul.mubr.bf16.gmra.mrb[12].mxu1 %v8647_v54  ;;  %v8683_v54 = vsel %vm21963_vm12, %v8673_v16, %v8682_v47  ;;  %v8721_v16 = vshrl.u32 %v19954_v9, 16  ;;  %vm21967_vm12 = vmmov %vm21957_vm3 }
 0x6ec   : > { %14906 = vmatprep.mubr.bf16.mxu1 %v8656_v10  ;;  %14939 = vmatpush3.bf16.msra.mxu1 %v16324_v61  ;;  %v8690_v61 = vrot.slane %v8688_v41, 2  ;;  %v19951_v10 = vld [vmem:[#allocation3 + $0x88] sm:$0xff]  }
 0x6ed   : > { %14940 = vmatprep.subr.bf16.mxu1 %v16327_v22  ;;  %v8712_v31 = vshrl.u32 %v19951_v10, 16  ;;  %v8715_v41 = vshll.u32 %v19951_v10, 16 }
 0x6ee   : > { %v8691_v49 = vor.u32 %v8690_v61, %v8687_v18 }
 0x6ef   : > { %v8717_v18 = vrot.slane %v8715_v41, 2 }
 0x6f0   : > { %14941 = vmatpush3.bf16.msra.mxu1 %v16327_v22  ;;  %v8706_v22 = vshll.u32 %v19944_v51, 16  ;;  %v8692_v57 = vsel %vm21964_vm9, %v8682_v47, %v8691_v49  ;;  %v8701_v1 = vsel %vm21965_vm6, %v8691_v49, %v8700_v19  ;;  %v8723_v47 = vrot.slane %v8721_v16, 1  ;;  %vm21968_vm9 = vmmov %vm21957_vm3 }
 0x6f1   : > { %14978 = vmatprep.subr.bf16.mxu1 %v19933_v29  ;;  %v13370_v49 = vcombine.low %v9013_v15, %v19860_v6  ;;  %vm21969_vm6 = vcmask 1045504   ;;  %v9039_v16 = vrot.slane %v19873_v4, 2  ;;  %v16331_v6 = vld [vmem:[%s17318_s20 + $0x188] sm:$0xff]  }
 0x6f2   : > { %v8708_v11 = vrot.slane %v8706_v22, 2  ;;  %v8727_v42 = vor.u32 %v8726_v62, %v8723_v47  ;;  %v19962_v22 = vld [vmem:[#allocation3 + $0x98] ss:$0 sps:$4 sm:$0x11]   ;;  %v9045_v47 = vrot.slane %v19890_v53, 2  ;;  %v9051_v53 = vrot.slane %v19906_v24, 2 }
 0x6f3   : > { %14907 = vmatmul.mubr.bf16.gmra.mrb[16].mxu1 %v8665_v38 }
 0x6f4   : > { %14910 = vmatprep.mubr.bf16.mxu1 %v8674_v14  ;;  %v8709_v38 = vor.u32 %v8708_v11, %v8705_v25  ;;  %v8714_v14 = vrot.slane %v8712_v31, 1  ;;  %v9034_v25 = vrot.slane %v13370_v49, 2  ;;  %v9035_v11 = vrot.slane %v19865_v13, 2  ;;  %v16332_v13 = vld [vmem:[%s17318_s20 + $0x190] sm:$0xff]   ;;  %v16341_v49 = vld [vmem:[%s17318_s20 + $0x1c0] sm:$0xff]  }
 0x6f6   : > { %v8710_v61 = vsel %vm21957_vm3, %v8700_v19, %v8709_v38  ;;  %v8718_v17 = vor.u32 %v8717_v18, %v8714_v14  ;;  %v9036_v41 = vsel %vm21969_vm6, %v9034_v25, %v9035_v11  ;;  %vm21970_vm3 = vmmov %vm21969_vm6  ;;  %v9041_v14 = vrot.slane %v19879_v52, 2 }
 0x6f7   : > { %v9043_v18 = vrot.slane %v19882_v58, 2  ;;  %v9047_v52 = vrot.slane %v19893_v12, 2  ;;  %v16335_v58 = vld [vmem:[%s17318_s20 + $0x1a8] sm:$0xff]   ;;  %vm21974_vm6 = vmmov %vm21970_vm3  ;;  %v16337_v12 = vld [vmem:[%s17318_s20 + $0x1b8] sm:$0xff]   ;;  %v9055_v25 = vrot.slane %v19918_v21, 2  ;;  %v9063_v21 = vrot.slane %v19944_v51, 2 }
 0x6f8   : > { %v8728_v8 = vsel %vm21967_vm12, %v8718_v17, %v8727_v42  ;;  %vm21972_vm12 = vmmov %vm21970_vm3  ;;  %v20014_v51 = vld [vmem:[#allocation3 + $0x14] sm:$0xf] }
 0x6f9   : > { %v9042_v4 = vsel %vm21972_vm12, %v9039_v16, %v9041_v14  ;;  %v9046_v62 = vsel %vm21974_vm6, %v9043_v18, %v9045_v47  ;;  %vm21976_vm12 = vmmov %vm21970_vm3 }
 0x6fa   : > { %vm21978_vm6 = vmmov %vm21970_vm3 }
 0x6fb   : > { %14911 = vmatmul.mubr.bf16.gmra.mrb[20].mxu1 %v8683_v54  ;;  %v8719_v54 = vsel %vm21966_vm15, %v8709_v38, %v8718_v17  ;;  %v9037_v38 = vrot.slane %v19871_v48, 2  ;;  %vm21971_vm15 = vmmov %vm21970_vm3  ;;  %v16333_v48 = vld [vmem:[%s17318_s20 + $0x198] sm:$0xff]   ;;  %v9048_v17 = vsel %vm21970_vm3, %v9045_v47, %v9047_v52 }
 0x6fc   : > { %14914 = vmatprep.mubr.bf16.mxu1 %v8692_v57  ;;  %v8730_v57 = vshll.u32 %v19962_v22, 16 }
 0x6fd   : > { %v9038_v37 = vsel %vm21970_vm3, %v9035_v11, %v9037_v38  ;;  %v9057_v11 = vrot.slane %v19927_v50, 2  ;;  %v9065_v50 = vrot.slane %v19951_v10, 2  ;;  %v9069_v10 = vrot.slane %v19962_v22, 2 }
 0x6fe   : > { %v8732_v19 = vrot.slane %v8730_v57, 2  ;;  %v9053_v57 = vrot.slane %v19915_v28, 2  ;;  %v9061_v28 = vrot.slane %v19941_v32, 2  ;;  %v20012_v32 = vld [vmem:[#allocation3 + $0x18] sm:$0xff]  }
 0x700   : > { %v8733_v31 = vsel %vm21968_vm9, %v8727_v42, %v8732_v19  ;;  %vm21973_vm9 = vmmov %vm21970_vm3  ;;  %v16336_v42 = vld [vmem:[%s17318_s20 + $0x1b0] sm:$0xff]   ;;  %v9056_v24 = vsel %vm21978_vm6, %v9053_v57, %v9055_v25  ;;  %v9059_v19 = vrot.slane %v19930_v30, 2  ;;  %v9067_v30 = vrot.slane %v19954_v9, 2 }
 0x701   : > { %vm21982_vm6 = vmmov %vm21970_vm3 }
 0x703   : > { %14915 = vmatmul.mubr.bf16.gmra.mrb[24].mxu1 %v8701_v1  ;;  %v9040_v1 = vsel %vm21971_vm15, %v9037_v38, %v9039_v16  ;;  %vm21975_vm15 = vmmov %vm21970_vm3 }
 0x704   : > { %14918 = vmatprep.mubr.bf16.mxu1 %v8710_v61  ;;  %v9044_v61 = vsel %vm21973_vm9, %v9041_v14, %v9043_v18  ;;  %vm21977_vm9 = vmmov %vm21970_vm3  ;;  %v9498_v14 = vrot.slane %v20012_v32, 2 }
 0x70b   : > { %14919 = vmatmul.mubr.bf16.gmra.mrb[28].mxu1 %v8719_v54  ;;  %v9049_v54 = vrot.slane %v19903_v20, 2  ;;  %v9054_v20 = vsel %vm21977_vm9, %v9051_v53, %v9053_v57  ;;  %vm21981_vm9 = vmmov %vm21970_vm3 }
 0x70c   : > { %14922 = vmatprep.mubr.bf16.mxu1 %v8728_v8  ;;  %v9064_v16 = vsel %vm21981_vm9, %v9061_v28, %v9063_v21  ;;  %vm21985_vm9 = vmmov %vm21970_vm3 }
 0x70d   : > { %v9050_v15 = vsel %vm21975_vm15, %v9047_v52, %v9049_v54  ;;  %v9052_v8 = vsel %vm21976_vm12, %v9049_v54, %v9051_v53  ;;  %vm21979_vm15 = vmmov %vm21970_vm3  ;;  %v16345_v52 = vld [vmem:[%s17318_s20 + $0x1c8] sm:$0xff]  }
 0x70e   : > { %vm21980_vm12 = vmmov %vm21970_vm3 }
 0x70f   : > { %v9062_v38 = vsel %vm21980_vm12, %v9059_v19, %v9061_v28  ;;  %vm21984_vm12 = vmmov %vm21970_vm3  ;;  %v20055_v28 = vld [vmem:[#allocation3 + $0x58] sm:$0xff]  }
 0x713   : > { %14923 = vmatmul.mubr.bf16.gmra.mrb[32].mxu1 %v8733_v31  ;;  %v9058_v31 = vsel %vm21970_vm3, %v9055_v25, %v9057_v11  ;;  %v20045_v25 = vld [vmem:[#allocation3 + $0x48] sm:$0xff]  }
 0x714   : > { %14942 = vmatprep.mubr.bf16.mxu1 %v9036_v41  ;;  %v9060_v41 = vsel %vm21979_vm15, %v9057_v11, %v9059_v19  ;;  %vm21983_vm15 = vmmov %vm21970_vm3  ;;  %v16357_v11 = vld [vmem:[%s17318_s20 + $0x1e8] sm:$0xff]  }
 0x715   : > { %v9070_v18 = vsel %vm21983_vm15, %v9067_v30, %v9069_v10  ;;  %vm21987_vm15 = vmmov %vm21970_vm3 }
 0x71b   : > { %14943 = vmatmul.mubr.bf16.vlgmr.msra.gmra.mrb[0].mxu1 %v9038_v37  ;;  %v9350_v37 = vld [vmem:[#allocation3 + $0x10] sm:$0xc] }
 0x71c   : > { %14946 = vmatprep.mubr.bf16.mxu1 %v9040_v1  ;;  %14979 = vmatpush3.bf16.msra.mxu1 %v19933_v29  ;;  %v16334_v29 = vld [vmem:[%s17318_s20 + $0x1a0] sm:$0xff]   ;;  %v9068_v1 = vsel %vm21970_vm3, %v9065_v50, %v9067_v30 }
 0x71d   : > { %14980 = vmatprep.subr.bf16.mxu1 %v16331_v6 }
 0x720   : > { %14981 = vmatpush3.bf16.msra.mxu1 %v16331_v6  ;;  %v9066_v6 = vsel %vm21982_vm6, %v9063_v21, %v9065_v50  ;;  %vm21986_vm6 = vmmov %vm21970_vm3  ;;  %v16360_v21 = vld [vmem:[%s17318_s20 + $0x1f0] sm:$0xff]   ;;  %v16363_v50 = vld [vmem:[%s17318_s20 + $0x1f8] sm:$0xff]  }
 0x721   : > { %14982 = vmatprep.subr.bf16.mxu1 %v16332_v13 }
 0x723   : > { %14947 = vmatmul.mubr.bf16.gmra.mrb[4].mxu1 %v9042_v4 }
 0x724   : > { %14950 = vmatprep.mubr.bf16.mxu1 %v9044_v61  ;;  %14983 = vmatpush3.bf16.msra.mxu1 %v16332_v13  ;;  %v20017_v13 = vcombine.low %v9350_v37, %v20014_v51  ;;  %v20026_v61 = vld [vmem:[#allocation3 + $0x28] sm:$0xff]  }
 0x725   : > { %14984 = vmatprep.subr.bf16.mxu1 %v16333_v48  ;;  %v9502_v47 = vrot.slane %v20026_v61, 2 }
 0x726   : > { %v9497_v9 = vrot.slane %v20017_v13, 2 }
 0x728   : > { %14985 = vmatpush3.bf16.msra.mxu1 %v16333_v48  ;;  %v20023_v48 = vld [vmem:[#allocation3 + $0x20] sm:$0xff]   ;;  %v9499_v4 = vsel %vm21984_vm12, %v9497_v9, %v9498_v14  ;;  %vm21988_vm12 = vmmov %vm21970_vm3 }
 0x729   : > { %14986 = vmatprep.subr.bf16.mxu1 %v16334_v29 }
 0x72b   : > { %14951 = vmatmul.mubr.bf16.gmra.mrb[8].mxu1 %v9046_v62 }
 0x72c   : > { %14954 = vmatprep.mubr.bf16.mxu1 %v9048_v17  ;;  %14987 = vmatpush3.bf16.msra.mxu1 %v16334_v29  ;;  %v9500_v29 = vrot.slane %v20023_v48, 2  ;;  %v20035_v17 = vld [vmem:[#allocation3 + $0x38] sm:$0xff]  }
 0x72d   : > { %14988 = vmatprep.subr.bf16.mxu1 %v16335_v58  ;;  %v9506_v53 = vrot.slane %v20035_v17, 2 }
 0x72e   : > { %v9501_v22 = vsel %vm21985_vm9, %v9498_v14, %v9500_v29  ;;  %v9503_v62 = vsel %vm21986_vm6, %v9500_v29, %v9502_v47  ;;  %vm21989_vm9 = vmmov %vm21970_vm3  ;;  %v20068_v14 = vld [vmem:[%s17318_s20 + $0x200] sm:$0xff]  }
 0x72f   : > { %vm21990_vm6 = vmmov %vm21970_vm3 }
 0x730   : > { %14989 = vmatpush3.bf16.msra.mxu1 %v16335_v58  ;;  %v20032_v58 = vld [vmem:[#allocation3 + $0x30] sm:$0xff]  }
 0x731   : > { %14990 = vmatprep.subr.bf16.mxu1 %v16336_v42  ;;  %v9504_v54 = vrot.slane %v20032_v58, 2 }
 0x733   : > { %14955 = vmatmul.mubr.bf16.gmra.mrb[12].mxu1 %v9050_v15  ;;  %v9505_v15 = vsel %vm21970_vm3, %v9502_v47, %v9504_v54  ;;  %v9507_v57 = vsel %vm21987_vm15, %v9504_v54, %v9506_v53  ;;  %vm21991_vm15 = vmmov %vm21970_vm3  ;;  %v20077_v47 = vld [vmem:[#allocation3 + $0x78] sm:$0xff]  }
 0x734   : > { %14958 = vmatprep.mubr.bf16.mxu1 %v9052_v8  ;;  %14991 = vmatpush3.bf16.msra.mxu1 %v16336_v42  ;;  %v16348_v42 = vld [vmem:[%s17318_s20 + $0x1d0] sm:$0xff]   ;;  %v20042_v8 = vld [vmem:[#allocation3 + $0x40] sm:$0xff]  }
 0x735   : > { %14992 = vmatprep.subr.bf16.mxu1 %v16337_v12 }
 0x738   : > { %14993 = vmatpush3.bf16.msra.mxu1 %v16337_v12  ;;  %v16351_v12 = vld [vmem:[%s17318_s20 + $0x1d8] sm:$0xff]  }
 0x739   : > { %15030 = vmatprep.subr.bf16.mxu1 %v16341_v49 }
 0x73b   : > { %14959 = vmatmul.mubr.bf16.gmra.mrb[16].mxu1 %v9054_v20  ;;  %v9508_v20 = vrot.slane %v20042_v8, 2 }
 0x73c   : > { %14962 = vmatprep.mubr.bf16.mxu1 %v9056_v24  ;;  %v9510_v24 = vrot.slane %v20045_v25, 2 }
 0x73d   : > { %v9509_v19 = vsel %vm21988_vm12, %v9506_v53, %v9508_v20  ;;  %vm21992_vm12 = vmmov %vm21970_vm3  ;;  %v20085_v53 = vld [vmem:[#allocation3 + $0x88] sm:$0xff]  }
 0x743   : > { %14963 = vmatmul.mubr.bf16.gmra.mrb[20].mxu1 %v9058_v31  ;;  %v20052_v31 = vld [vmem:[#allocation3 + $0x50] sm:$0xff]  }
 0x744   : > { %14966 = vmatprep.mubr.bf16.mxu1 %v9060_v41  ;;  %v9511_v41 = vsel %vm21989_vm9, %v9508_v20, %v9510_v24  ;;  %vm21993_vm9 = vmmov %vm21970_vm3 }
 0x74b   : > { %14967 = vmatmul.mubr.bf16.gmra.mrb[24].mxu1 %v9062_v38  ;;  %v9512_v38 = vrot.slane %v20052_v31, 2 }
 0x74c   : > { %14970 = vmatprep.mubr.bf16.mxu1 %v9064_v16  ;;  %v9514_v16 = vrot.slane %v20055_v28, 2 }
 0x74d   : > { %v9513_v30 = vsel %vm21990_vm6, %v9510_v24, %v9512_v38  ;;  %vm21994_vm6 = vmmov %vm21970_vm3  ;;  %v20093_v24 = vld [vmem:[#allocation3 + $0x98] sm:$0xff]  }
 0x74e   : > { %v9515_v37 = vsel %vm21970_vm3, %v9512_v38, %v9514_v16  ;;  %v9835_v38 = vshrl.u32 %v20017_v13, 16 }
 0x753   : > { %14971 = vmatmul.mubr.bf16.gmra.mrb[28].mxu1 %v9066_v6  ;;  %v20062_v6 = vld [vmem:[#allocation3 + $0x60] sm:$0xff]  }
 0x754   : > { %14974 = vmatprep.mubr.bf16.mxu1 %v9068_v1  ;;  %v20065_v1 = vld [vmem:[#allocation3 + $0x68] sm:$0xff]   ;;  %v9516_v10 = vrot.slane %v20062_v6, 2 }
 0x755   : > { %v9518_v9 = vrot.slane %v20065_v1, 2 }
 0x757   : > { %v9519_v29 = vsel %vm21992_vm12, %v9516_v10, %v9518_v9  ;;  %vm21996_vm12 = vmmov %vm21970_vm3 }
 0x75b   : > { %14975 = vmatmul.mubr.bf16.gmra.mrb[32].mxu1 %v9070_v18  ;;  %v9517_v18 = vsel %vm21991_vm15, %v9514_v16, %v9516_v10  ;;  %vm21995_vm15 = vmmov %vm21970_vm3  ;;  %v9838_v16 = vshll.u32 %v20017_v13, 16  ;;  %v9864_v13 = vshll.u32 %v20026_v61, 16 }
 0x75c   : > { %14994 = vmatprep.mubr.bf16.mxu1 %v9499_v4  ;;  %v20074_v4 = vld [vmem:[#allocation3 + $0x70] sm:$0xff]  }
 0x763   : > { %14995 = vmatmul.mubr.bf16.vlgmr.msra.gmra.mrb[0].mxu1 %v9501_v22  ;;  %v9522_v22 = vrot.slane %v20077_v47, 2 }
 0x764   : > { %14998 = vmatprep.mubr.bf16.mxu1 %v9503_v62  ;;  %15031 = vmatpush3.bf16.msra.mxu1 %v16341_v49  ;;  %v16354_v49 = vld [vmem:[%s17318_s20 + $0x1e0] sm:$0xff]  }
 0x765   : > { %15032 = vmatprep.subr.bf16.mxu1 %v16345_v52 }
 0x768   : > { %15033 = vmatpush3.bf16.msra.mxu1 %v16345_v52  ;;  %v9520_v52 = vrot.slane %v20074_v4, 2 }
 0x769   : > { %15034 = vmatprep.subr.bf16.mxu1 %v16348_v42 }
 0x76a   : > { %v9521_v62 = vsel %vm21993_vm9, %v9518_v9, %v9520_v52  ;;  %v9523_v54 = vsel %vm21994_vm6, %v9520_v52, %v9522_v22  ;;  %vm21997_vm9 = vmmov %vm21970_vm3 }
 0x76b   : > { %14999 = vmatmul.mubr.bf16.gmra.mrb[4].mxu1 %v9505_v15  ;;  %v9526_v15 = vrot.slane %v20085_v53, 2  ;;  %vm21998_vm6 = vmmov %vm21970_vm3 }
 0x76c   : > { %15002 = vmatprep.mubr.bf16.mxu1 %v9507_v57  ;;  %15035 = vmatpush3.bf16.msra.mxu1 %v16348_v42  ;;  %v20082_v42 = vld [vmem:[#allocation3 + $0x80] sm:$0xff]  }
 0x76d   : > { %15036 = vmatprep.subr.bf16.mxu1 %v16351_v12 }
 0x770   : > { %15037 = vmatpush3.bf16.msra.mxu1 %v16351_v12  ;;  %v9524_v12 = vrot.slane %v20082_v42, 2 }
 0x771   : > { %15038 = vmatprep.subr.bf16.mxu1 %v16354_v49 }
 0x772   : > { %v9525_v57 = vsel %vm21970_vm3, %v9522_v22, %v9524_v12  ;;  %v9527_v20 = vsel %vm21995_vm15, %v9524_v12, %v9526_v15  ;;  %v9852_v22 = vshrl.u32 %v20023_v48, 16  ;;  %v9861_v12 = vshrl.u32 %v20026_v61, 16 }
 0x773   : > { %15003 = vmatmul.mubr.bf16.gmra.mrb[8].mxu1 %v9509_v19  ;;  %v9843_v19 = vshrl.u32 %v20012_v32, 16  ;;  %vm21999_vm3 = vsmask.f32 5376 }
 0x774   : > { %15006 = vmatprep.mubr.bf16.mxu1 %v9511_v41  ;;  %15039 = vmatpush3.bf16.msra.mxu1 %v16354_v49  ;;  %v20090_v49 = vld [vmem:[#allocation3 + $0x90] sm:$0xff]   ;;  %v9846_v41 = vshll.u32 %v20012_v32, 16  ;;  %vm22000_vm15 = vmmov %vm21999_vm3 }
 0x775   : > { %15040 = vmatprep.subr.bf16.mxu1 %v16357_v11  ;;  %v9845_v10 = vrot.slane %v9843_v19, 2 }
 0x776   : > { %v9848_v9 = vrot.slane %v9846_v41, 3  ;;  %v9863_v41 = vrot.slane %v9861_v12, 2 }
 0x778   : > { %15041 = vmatpush3.bf16.msra.mxu1 %v16357_v11  ;;  %v9528_v11 = vrot.slane %v20090_v49, 2 }
 0x779   : > { %15042 = vmatprep.subr.bf16.mxu1 %v16360_v21 }
 0x77b   : > { %15007 = vmatmul.mubr.bf16.gmra.mrb[12].mxu1 %v9513_v30  ;;  %v16364_v30 = vld [vmem:[#allocation3 + $0xa0] ss:$0 sps:$4 sm:$0x11]  }
 0x77c   : > { %15010 = vmatprep.mubr.bf16.mxu1 %v9515_v37  ;;  %15043 = vmatpush3.bf16.msra.mxu1 %v16360_v21  ;;  %v9530_v21 = vrot.slane %v20093_v24, 2  ;;  %v9532_v52 = vrot.slane %v16364_v30, 2  ;;  %v9873_v30 = vshll.u32 %v20032_v58, 16 }
 0x77d   : > { %15044 = vmatprep.subr.bf16.mxu1 %v16363_v50 }
 0x77e   : > { %v9531_v37 = vsel %vm21997_vm9, %v9528_v11, %v9530_v21  ;;  %vm22002_vm9 = vmmov %vm21999_vm3 }
 0x780   : > { %15045 = vmatpush3.bf16.msra.mxu1 %v16363_v50  ;;  %v9529_v50 = vsel %vm21996_vm12, %v9526_v15, %v9528_v11  ;;  %vm22001_vm12 = vmmov %vm21999_vm3 }
 0x781   : > { %15082 = vmatprep.subr.bf16.mxu1 %v20068_v14 }
 0x783   : > { %15011 = vmatmul.mubr.bf16.gmra.mrb[16].mxu1 %v9517_v18  ;;  %v9837_v18 = vrot.slane %v9835_v38, 2  ;;  %v9866_v38 = vrot.slane %v9864_v13, 3  ;;  %v16367_v13 = vld [vmem:[%s17318_s20 + $0x210] sm:$0xff]  }
 0x784   : > { %15014 = vmatprep.mubr.bf16.mxu1 %v9519_v29  ;;  %v9840_v29 = vrot.slane %v9838_v16, 3 }
 0x786   : > { %v9841_v15 = vor.u32 %v9840_v29, %v9837_v18 }
 0x78b   : > { %15015 = vmatmul.mubr.bf16.gmra.mrb[20].mxu1 %v9521_v62  ;;  %v9855_v62 = vshll.u32 %v20023_v48, 16 }
 0x78c   : > { %15018 = vmatprep.mubr.bf16.mxu1 %v9523_v54  ;;  %v9849_v54 = vor.u32 %v9848_v9, %v9845_v10  ;;  %v9879_v10 = vshrl.u32 %v20035_v17, 16  ;;  %v9882_v9 = vshll.u32 %v20035_v17, 16 }
 0x78d   : > { %v9857_v11 = vrot.slane %v9855_v62, 3 }
 0x78e   : > { %v9850_v19 = vsel %vm21999_vm3, %v9841_v15, %v9849_v54  ;;  %v9881_v62 = vrot.slane %v9879_v10, 2  ;;  %v9884_v12 = vrot.slane %v9882_v9, 3  ;;  %v16375_v9 = vld [vmem:[%s17321_s9] sm:$0xff]  }
 0x78f   : > { %15134 = vmatprep.subr.bf16.mxu0 %v16375_v9 }
 0x790   : > { %15135 = vmatpush3.bf16.msra.mxu0 %v16375_v9  ;;  %v9933_v9 = vshrl.u32 %v20065_v1, 16 }
 0x793   : > { %15019 = vmatmul.mubr.bf16.gmra.mrb[24].mxu1 %v9525_v57  ;;  %v9533_v57 = vsel %vm21998_vm6, %v9530_v21, %v9532_v52  ;;  %v16366_v21 = vld [vmem:[%s17318_s20 + $0x208] sm:$0xff]   ;;  %v9875_v52 = vrot.slane %v9873_v30, 3  ;;  %vm22003_vm6 = vmmov %vm21999_vm3 }
 0x794   : > { %15022 = vmatprep.mubr.bf16.mxu1 %v9527_v20  ;;  %v9854_v20 = vrot.slane %v9852_v22, 2 }
 0x796   : > { %v9858_v16 = vor.u32 %v9857_v11, %v9854_v20  ;;  %v9885_v20 = vor.u32 %v9884_v12, %v9881_v62  ;;  %v9897_v11 = vshrl.u32 %v20045_v25, 16  ;;  %v9915_v62 = vshrl.u32 %v20055_v28, 16 }
 0x797   : > { %v9918_v12 = vshll.u32 %v20055_v28, 16 }
 0x798   : > { %v9859_v18 = vsel %vm22000_vm15, %v9849_v54, %v9858_v16  ;;  %v9891_v54 = vshll.u32 %v20042_v8, 16  ;;  %v9899_v30 = vrot.slane %v9897_v11, 2  ;;  %vm22004_vm15 = vmmov %vm21999_vm3 }
 0x79b   : > { %15023 = vmatmul.mubr.bf16.gmra.mrb[28].mxu1 %v9529_v50  ;;  %v9870_v50 = vshrl.u32 %v20032_v58, 16 }
 0x79c   : > { %15026 = vmatprep.mubr.bf16.mxu1 %v9531_v37  ;;  %v9867_v37 = vor.u32 %v9866_v38, %v9863_v41  ;;  %v16368_v41 = vld [vmem:[%s17318_s20 + $0x218] sm:$0xff]  }
 0x79d   : > { %v9872_v29 = vrot.slane %v9870_v50, 2 }
 0x79e   : > { %v9868_v22 = vsel %vm22001_vm12, %v9858_v16, %v9867_v37  ;;  %v9893_v16 = vrot.slane %v9891_v54, 3  ;;  %vm22005_vm12 = vmmov %vm21999_vm3 }
 0x79f   : > { %v9876_v15 = vor.u32 %v9875_v52, %v9872_v29  ;;  %v16369_v29 = vld [vmem:[%s17318_s20 + $0x220] sm:$0xff]   ;;  %v9906_v52 = vshrl.u32 %v20052_v31, 16 }
 0x7a1   : > { %v9886_v50 = vsel %vm22003_vm6, %v9876_v15, %v9885_v20  ;;  %v9908_v54 = vrot.slane %v9906_v52, 2  ;;  %v16372_v52 = vld [vmem:[%s17318_s20 + $0x238] sm:$0xff]   ;;  %vm22007_vm6 = vmmov %vm21999_vm3 }
 0x7a3   : > { %15027 = vmatmul.mubr.bf16.gmra.mrb[32].mxu1 %v9533_v57  ;;  %v9888_v57 = vshrl.u32 %v20042_v8, 16 }
 0x7a4   : > { %15046 = vmatprep.mubr.bf16.mxu1 %v9850_v19  ;;  %v9900_v19 = vshll.u32 %v20045_v25, 16 }
 0x7a5   : > { %v9890_v38 = vrot.slane %v9888_v57, 2 }
 0x7a6   : > { %v9902_v10 = vrot.slane %v9900_v19, 3 }
 0x7ab   : > { %15047 = vmatmul.mubr.bf16.vlgmr.msra.gmra.mrb[0].mxu1 %v9859_v18  ;;  %v16376_v18 = vld [vmem:[%s17321_s9 + $0x8] sm:$0xff]  }
 0x7ac   : > { %15050 = vmatprep.mubr.bf16.mxu1 %v9868_v22  ;;  %15083 = vmatpush3.bf16.msra.mxu1 %v20068_v14  ;;  %v9877_v14 = vsel %vm22002_vm9, %v9867_v37, %v9876_v15  ;;  %v9909_v37 = vshll.u32 %v20052_v31, 16  ;;  %v9903_v22 = vor.u32 %v9902_v10, %v9899_v30  ;;  %v16377_v15 = vld [vmem:[%s17321_s9 + $0x10] sm:$0xff]   ;;  %v9924_v30 = vshrl.u32 %v20062_v6, 16  ;;  %vm22006_vm9 = vmmov %vm21999_vm3 }
 0x7ad   : > { %15084 = vmatprep.subr.bf16.mxu1 %v16366_v21  ;;  %15136 = vmatprep.subr.bf16.mxu0 %v16376_v18 }
 0x7ae   : > { %v9911_v11 = vrot.slane %v9909_v37, 3  ;;  %15137 = vmatpush3.bf16.msra.mxu0 %v16376_v18  ;;  %v9936_v18 = vshll.u32 %v20065_v1, 16  ;;  %v9926_v37 = vrot.slane %v9924_v30, 2 }
 0x7af   : > { %15138 = vmatprep.subr.bf16.mxu0 %v16377_v15 }
 0x7b0   : > { %15085 = vmatpush3.bf16.msra.mxu1 %v16366_v21  ;;  %v9894_v21 = vor.u32 %v9893_v16, %v9890_v38  ;;  %v9920_v38 = vrot.slane %v9918_v12, 3  ;;  %v16378_v16 = vld [vmem:[%s17321_s9 + $0x18] sm:$0xff]  }
 0x7b1   : > { %15086 = vmatprep.subr.bf16.mxu1 %v16367_v13 }
 0x7b2   : > { %v9895_v57 = vsel %vm21999_vm3, %v9885_v20, %v9894_v21  ;;  %v9904_v19 = vsel %vm22004_vm15, %v9894_v21, %v9903_v22  ;;  %v9927_v20 = vshll.u32 %v20062_v6, 16  ;;  %15139 = vmatpush3.bf16.msra.mxu0 %v16377_v15  ;;  %v16379_v21 = vld [vmem:[%s17321_s9 + $0x20] sm:$0xff]   ;;  %v9935_v15 = vrot.slane %v9933_v9, 2  ;;  %vm22008_vm15 = vmmov %vm21999_vm3 }
 0x7b3   : > { %15051 = vmatmul.mubr.bf16.gmra.mrb[4].mxu1 %v9877_v14  ;;  %v9917_v14 = vrot.slane %v9915_v62, 2  ;;  %15140 = vmatprep.subr.bf16.mxu0 %v16378_v16 }
 0x7b4   : > { %15054 = vmatprep.mubr.bf16.mxu1 %v9886_v50  ;;  %15087 = vmatpush3.bf16.msra.mxu1 %v16367_v13  ;;  %v16370_v13 = vld [vmem:[%s17318_s20 + $0x228] sm:$0xff]   ;;  %v9912_v50 = vor.u32 %v9911_v11, %v9908_v54  ;;  %v9929_v62 = vrot.slane %v9927_v20, 3 }
 0x7b5   : > { %15088 = vmatprep.subr.bf16.mxu1 %v16368_v41  ;;  %v9921_v10 = vor.u32 %v9920_v38, %v9917_v14  ;;  %v16380_v54 = vld [vmem:[%s17321_s9 + $0x28] sm:$0xff]   ;;  %v9951_v14 = vshrl.u32 %v20077_v47, 16  ;;  %v9954_v38 = vshll.u32 %v20077_v47, 16 }
 0x7b6   : > { %15141 = vmatpush3.bf16.msra.mxu0 %v16378_v16  ;;  %v9930_v11 = vor.u32 %v9929_v62, %v9926_v37  ;;  %v16381_v16 = vld [vmem:[%s17321_s9 + $0x30] sm:$0xff]   ;;  %v9963_v37 = vshll.u32 %v20082_v42, 16 }
 0x7b7   : > { %v9922_v12 = vsel %vm22006_vm9, %v9912_v50, %v9921_v10  ;;  %15142 = vmatprep.subr.bf16.mxu0 %v16379_v21  ;;  %v9953_v9 = vrot.slane %v9951_v14, 2  ;;  %v9978_v14 = vshrl.u32 %v20090_v49, 16  ;;  %vm22010_vm9 = vmmov %vm21999_vm3 }
 0x7b8   : > { %15089 = vmatpush3.bf16.msra.mxu1 %v16368_v41  ;;  %v16371_v41 = vld [vmem:[%s17318_s20 + $0x230] sm:$0xff]  }
 0x7b9   : > { %15090 = vmatprep.subr.bf16.mxu1 %v16369_v29 }
 0x7ba   : > { %15143 = vmatpush3.bf16.msra.mxu0 %v16379_v21 }
 0x7bb   : > { %15055 = vmatmul.mubr.bf16.gmra.mrb[8].mxu1 %v9895_v57  ;;  %v9938_v57 = vrot.slane %v9936_v18, 3  ;;  %15144 = vmatprep.subr.bf16.mxu0 %v16380_v54  ;;  %v9956_v18 = vrot.slane %v9954_v38, 3  ;;  %v9981_v38 = vshll.u32 %v20090_v49, 16 }
 0x7bc   : > { %15058 = vmatprep.mubr.bf16.mxu1 %v9904_v19  ;;  %15091 = vmatpush3.bf16.msra.mxu1 %v16369_v29  ;;  %v9913_v29 = vsel %vm22005_vm12, %v9903_v22, %v9912_v50  ;;  %v9945_v19 = vshll.u32 %v20074_v4, 16  ;;  %v9931_v50 = vsel %vm22007_vm6, %v9921_v10, %v9930_v11  ;;  %v9972_v10 = vshll.u32 %v20085_v53, 16  ;;  %vm22009_vm12 = vmmov %vm21999_vm3 }
 0x7bd   : > { %15092 = vmatprep.subr.bf16.mxu1 %v16370_v13  ;;  %v9939_v22 = vor.u32 %v9938_v57, %v9935_v15  ;;  %v9957_v62 = vor.u32 %v9956_v18, %v9953_v9  ;;  %v9965_v57 = vrot.slane %v9963_v37, 3  ;;  %v20165_v9 = vld [vmem:[#allocation3 + $0xa0] ss:$0 sps:$4 sm:$0x33]   ;;  %vm22011_vm6 = vmmov %vm21999_vm3 }
 0x7be   : > { %v9947_v20 = vrot.slane %v9945_v19, 3  ;;  %15145 = vmatpush3.bf16.msra.mxu0 %v16380_v54 }
 0x7bf   : > { %15146 = vmatprep.subr.bf16.mxu0 %v16381_v16 }
 0x7c0   : > { %15093 = vmatpush3.bf16.msra.mxu1 %v16370_v13  ;;  %v9942_v13 = vshrl.u32 %v20074_v4, 16 }
 0x7c1   : > { %15094 = vmatprep.subr.bf16.mxu1 %v16371_v41 }
 0x7c2   : > { %v9944_v30 = vrot.slane %v9942_v13, 2  ;;  %15147 = vmatpush3.bf16.msra.mxu0 %v16381_v16  ;;  %v9974_v13 = vrot.slane %v9972_v10, 3  ;;  %v9999_v10 = vshll.u32 %v20165_v9, 16 }
 0x7c3   : > { %15059 = vmatmul.mubr.bf16.gmra.mrb[12].mxu1 %v9913_v29  ;;  %v9960_v29 = vshrl.u32 %v20082_v42, 16 }
 0x7c4   : > { %15062 = vmatprep.mubr.bf16.mxu1 %v9922_v12  ;;  %15095 = vmatpush3.bf16.msra.mxu1 %v16371_v41  ;;  %v9940_v41 = vsel %vm21999_vm3, %v9930_v11, %v9939_v22  ;;  %v9948_v21 = vor.u32 %v9947_v20, %v9944_v30  ;;  %v9990_v30 = vshll.u32 %v20093_v24, 16  ;;  %v9980_v20 = vrot.slane %v9978_v14, 2 }
 0x7c5   : > { %15096 = vmatprep.subr.bf16.mxu1 %v16372_v52  ;;  %v9962_v15 = vrot.slane %v9960_v29, 2  ;;  %v10305_v14 = vrot.slane %v20012_v32, 3  ;;  %v10313_v32 = vrot.slane %v20035_v17, 3  ;;  %v10321_v17 = vrot.slane %v20055_v28, 3 }
 0x7c6   : > { %v9949_v12 = vsel %vm22008_vm15, %v9939_v22, %v9948_v21  ;;  %v9958_v54 = vsel %vm22009_vm12, %v9948_v21, %v9957_v62  ;;  %v9992_v29 = vrot.slane %v9990_v30, 3  ;;  %vm22012_vm15 = vmmov %vm21999_vm3  ;;  %v10329_v28 = vrot.slane %v20077_v47, 3 }
 0x7c7   : > { %v9966_v19 = vor.u32 %v9965_v57, %v9962_v15  ;;  %vm22013_vm12 = vmmov %vm21999_vm3  ;;  %v10335_v47 = vrot.slane %v20090_v49, 3  ;;  %v16383_v49 = vld [vmem:[%s17328_s28] sm:$0xff]  }
 0x7c8   : > { %15097 = vmatpush3.bf16.msra.mxu1 %v16372_v52  ;;  %v9969_v52 = vshrl.u32 %v20085_v53, 16 }
 0x7c9   : > { %v9967_v22 = vsel %vm22010_vm9, %v9957_v62, %v9966_v19  ;;  %v10001_v62 = vrot.slane %v9999_v10, 3  ;;  %vm22014_vm9 = vcmask 1044480   ;;  %15186 = vmatprep.subr.bf16.mxu1 %v16383_v49 }
 0x7ca   : > { %v9971_v11 = vrot.slane %v9969_v52, 2  ;;  %v9996_v52 = vshrl.u32 %v20165_v9, 16 }
 0x7cb   : > { %15063 = vmatmul.mubr.bf16.gmra.mrb[16].mxu1 %v9931_v50  ;;  %v9987_v50 = vshrl.u32 %v20093_v24, 16 }
 0x7cc   : > { %15066 = vmatprep.mubr.bf16.mxu1 %v9940_v41  ;;  %v9975_v16 = vor.u32 %v9974_v13, %v9971_v11  ;;  %v9983_v41 = vrot.slane %v9981_v38, 3  ;;  %v9998_v57 = vrot.slane %v9996_v52, 2 }
 0x7cd   : > { %v9989_v21 = vrot.slane %v9987_v50, 2 }
 0x7ce   : > { %v9976_v18 = vsel %vm22011_vm6, %v9966_v19, %v9975_v16  ;;  %v9984_v37 = vor.u32 %v9983_v41, %v9980_v20  ;;  %v10002_v19 = vor.u32 %v10001_v62, %v9998_v57  ;;  %vm22015_vm6 = vmmov %vm22014_vm9 }
 0x7d0   : > { %v9985_v15 = vsel %vm21999_vm3, %v9975_v16, %v9984_v37  ;;  %v10307_v16 = vrot.slane %v20023_v48, 3  ;;  %vm22016_vm3 = vmmov %vm22015_vm6  ;;  %v10315_v48 = vrot.slane %v20042_v8, 3  ;;  %v10323_v8 = vrot.slane %v20062_v6, 3 }
 0x7d1   : > { %v10331_v6 = vrot.slane %v20082_v42, 3 }
 0x7d2   : > { %v10308_v20 = vsel %vm22015_vm6, %v10305_v14, %v10307_v16  ;;  %vm22020_vm6 = vmmov %vm22016_vm3 }
 0x7d3   : > { %15067 = vmatmul.mubr.bf16.gmra.mrb[20].mxu1 %v9949_v12  ;;  %v9993_v12 = vor.u32 %v9992_v29, %v9989_v21 }
 0x7d4   : > { %15070 = vmatprep.mubr.bf16.mxu1 %v9958_v54  ;;  %v10283_v54 = vld [vmem:[#allocation3 + $0x10] sm:$0x8] }
 0x7d5   : > { %v9994_v11 = vsel %vm22012_vm15, %v9984_v37, %v9993_v12  ;;  %v13463_v13 = vcombine.low %v10283_v54, %v20014_v51  ;;  %v10003_v50 = vsel %vm22013_vm12, %v9993_v12, %v10002_v19  ;;  %v10311_v51 = vrot.slane %v20032_v58, 3  ;;  %vm22017_vm15 = vmmov %vm22016_vm3 }
 0x7d6   : > { %vm22018_vm12 = vmmov %vm22016_vm3  ;;  %v10319_v58 = vrot.slane %v20052_v31, 3  ;;  %v10327_v31 = vrot.slane %v20074_v4, 3 }
 0x7d7   : > { %v10304_v38 = vrot.slane %v13463_v13, 3  ;;  %v10314_v21 = vsel %vm22018_vm12, %v10311_v51, %v10313_v32  ;;  %vm22022_vm12 = vmmov %vm22016_vm3 }
 0x7d8   : > { %v10324_v12 = vsel %vm22022_vm12, %v10321_v17, %v10323_v8  ;;  %v10330_v62 = vsel %vm22016_vm3, %v10327_v31, %v10329_v28  ;;  %vm22026_vm12 = vmmov %vm22016_vm3 }
 0x7d9   : > { %v10306_v30 = vsel %vm22014_vm9, %v10304_v38, %v10305_v14  ;;  %vm22019_vm9 = vmmov %vm22016_vm3  ;;  %v16382_v14 = vld [vmem:[%s17321_s9 + $0x38] sm:$0xff]   ;;  %v16385_v38 = vld [vmem:[%s17328_s28 + $0x10] sm:$0xff]  }
 0x7da   : > { %v10316_v29 = vsel %vm22019_vm9, %v10313_v32, %v10315_v48  ;;  %vm22023_vm9 = vmmov %vm22016_vm3  ;;  %15148 = vmatprep.subr.bf16.mxu0 %v16382_v14 }
 0x7db   : > { %15071 = vmatmul.mubr.bf16.gmra.mrb[24].mxu1 %v9967_v22  ;;  %v10309_v22 = vrot.slane %v20026_v61, 3  ;;  %v10317_v61 = vrot.slane %v20045_v25, 3  ;;  %v10325_v25 = vrot.slane %v20065_v1, 3  ;;  %v10333_v1 = vrot.slane %v20085_v53, 3  ;;  %15149 = vmatpush3.bf16.msra.mxu0 %v16382_v14 }
 0x7dc   : > { %15074 = vmatprep.mubr.bf16.mxu1 %v9976_v18  ;;  %v10339_v53 = vrot.slane %v20165_v9, 3  ;;  %v16387_v9 = vld [vmem:[%s17328_s28 + $0x20] sm:$0xff]  }
 0x7dd   : > { %v10310_v41 = vsel %vm22016_vm3, %v10307_v16, %v10309_v22  ;;  %v10312_v18 = vsel %vm22017_vm15, %v10309_v22, %v10311_v51  ;;  %v10318_v37 = vsel %vm22020_vm6, %v10315_v48, %v10317_v61  ;;  %v10320_v52 = vsel %vm22016_vm3, %v10317_v61, %v10319_v58  ;;  %vm22021_vm15 = vmmov %vm22016_vm3  ;;  %v16389_v16 = vld [vmem:[%s17328_s28 + $0x30] sm:$0xff]   ;;  %v20223_v22 = vld [vmem:[%s773_s24] ss:$0 sm:$0xff] }
 0x7de   : > { %v10322_v10 = vsel %vm22021_vm15, %v10319_v58, %v10321_v17  ;;  %vm22024_vm6 = vmmov %vm22016_vm3  ;;  %v10334_v4 = vsel %vm22026_vm12, %v10331_v6, %v10333_v1  ;;  %v10666_v48 = vld [vmem:[#allocation2 + $0x18] sm:$0xff]  ;;  %v10664_v17 = vld [vmem:[#allocation2 + $0x8] sm:$0xff]  ;;  %vm22031_vm12 = vnez %v21642_v44 }
 0x7df   : > { %v10328_v57 = vsel %vm22024_vm6, %v10325_v25, %v10327_v31  ;;  %vm22025_vm15 = vmmov %vm22016_vm3 }
 0x7e0   : > { %v10332_v54 = vsel %vm22025_vm15, %v10329_v28, %v10331_v6  ;;  %vm22028_vm6 = vmmov %vm22016_vm3  ;;  %vm22030_vm15 = vnez %v21633_v2 }
 0x7e3   : > { %15075 = vmatmul.mubr.bf16.gmra.mrb[28].mxu1 %v9985_v15  ;;  %v10326_v15 = vsel %vm22023_vm9, %v10323_v8, %v10325_v25  ;;  %vm22027_vm9 = vmmov %vm22016_vm3 }
 0x7e4   : > { %15078 = vmatprep.mubr.bf16.mxu1 %v9994_v11  ;;  %v10337_v11 = vrot.slane %v20093_v24, 3  ;;  %v10336_v13 = vsel %vm22027_vm9, %v10333_v1, %v10335_v47  ;;  %v16384_v24 = vld [vmem:[%s17328_s28 + $0x8] sm:$0xff]   ;;  %vm22032_vm9 = vnez %v21660_v43 }
 0x7e6   : > { %v10338_v42 = vsel %vm22028_vm6, %v10335_v47, %v10337_v11  ;;  %v10340_v19 = vsel %vm22016_vm3, %v10337_v11, %v10339_v53  ;;  %v10667_v53 = vld [vmem:[#allocation2 + $0x20] sm:$0xff]  ;;  %vm22033_vm6 = vnez %v21668_v60  ;;  %vm22035_vm3 = vnez %v21651_v7 }
 0x7eb   : > { %15079 = vmatmul.mubr.bf16.gmra.mrb[32].mxu1 %v10003_v50  ;;  %v16386_v50 = vld [vmem:[%s17328_s28 + $0x18] sm:$0xff]  }
 0x7ec   : > { %15098 = vmatprep.mubr.bf16.mxu1 %v10306_v30  ;;  %v16388_v30 = vld [vmem:[%s17328_s28 + $0x28] sm:$0xff]  }
 0x7f3   : > { %15099 = vmatmul.mubr.bf16.vlgmr.msra.gmra.mrb[0].mxu1 %v10308_v20 }
 0x7f4   : > { %15102 = vmatprep.mubr.bf16.mxu1 %v10310_v41  ;;  %15187 = vmatpush3.bf16.msra.mxu1 %v16383_v49  ;;  %v10668_v49 = vld [vmem:[#allocation2 + $0x28] sm:$0xff] }
 0x7f5   : > { %15188 = vmatprep.subr.bf16.mxu1 %v16384_v24 }
 0x7f8   : > { %15189 = vmatpush3.bf16.msra.mxu1 %v16384_v24  ;;  %v10669_v24 = vld [vmem:[#allocation2 + $0x30] sm:$0xff] }
 0x7f9   : > { %15190 = vmatprep.subr.bf16.mxu1 %v16385_v38 }
 0x7fb   : > { %15103 = vmatmul.mubr.bf16.gmra.mrb[4].mxu1 %v10312_v18 }
 0x7fc   : > { %15106 = vmatprep.mubr.bf16.mxu1 %v10314_v21  ;;  %15191 = vmatpush3.bf16.msra.mxu1 %v16385_v38 }
 0x7fd   : > { %15192 = vmatprep.subr.bf16.mxu1 %v16386_v50 }
 0x800   : > { %15193 = vmatpush3.bf16.msra.mxu1 %v16386_v50 }
 0x801   : > { %15194 = vmatprep.subr.bf16.mxu1 %v16387_v9 }
 0x803   : > { %15107 = vmatmul.mubr.bf16.gmra.mrb[8].mxu1 %v10316_v29  ;;  %v10663_v29 = vld [vmem:[#allocation2] sm:$0xff] }
 0x804   : > { %15110 = vmatprep.mubr.bf16.mxu1 %v10318_v37  ;;  %15195 = vmatpush3.bf16.msra.mxu1 %v16387_v9 }
 0x805   : > { %15196 = vmatprep.subr.bf16.mxu1 %v16388_v30 }
 0x808   : > { %15197 = vmatpush3.bf16.msra.mxu1 %v16388_v30 }
 0x809   : > { %15198 = vmatprep.subr.bf16.mxu1 %v16389_v16 }
 0x80b   : > { %15111 = vmatmul.mubr.bf16.gmra.mrb[12].mxu1 %v10320_v52  ;;  %v10665_v52 = vld [vmem:[#allocation2 + $0x10] sm:$0xff] }
 0x80c   : > { %15114 = vmatprep.mubr.bf16.mxu1 %v10322_v10  ;;  %15199 = vmatpush3.bf16.msra.mxu1 %v16389_v16 }
 0x813   : > { %15115 = vmatmul.mubr.bf16.gmra.mrb[16].mxu1 %v10324_v12 }
 0x814   : > { %15118 = vmatprep.mubr.bf16.mxu1 %v10326_v15 }
 0x81b   : > { %15119 = vmatmul.mubr.bf16.gmra.mrb[20].mxu1 %v10328_v57 }
 0x81c   : > { %15122 = vmatprep.mubr.bf16.mxu1 %v10330_v62 }
 0x823   : > { %15123 = vmatmul.mubr.bf16.gmra.mrb[24].mxu1 %v10332_v54 }
 0x824   : > { %15126 = vmatprep.mubr.bf16.mxu1 %v10334_v4 }
 0x82b   : > { %15127 = vmatmul.mubr.bf16.gmra.mrb[28].mxu1 %v10336_v13  ;;  %v10670_v13 = vld [vmem:[#allocation2 + $0x38] sm:$0xff] }
 0x82c   : > { %15130 = vmatprep.mubr.bf16.mxu1 %v10338_v42 }
 0x833   : > { %15131 = vmatmul.mubr.bf16.gmra.mrb[32].mxu1 %v10340_v19 }
 0x8c6   : > { %v15100_v20 = vpop.f32.mrb[0].mxu1 }
 0x8c7   : > { %v10629_v41 = vadd.f32 %v15100_v20, %v20223_v22  ;;  %v10441_v51 = vpop.f32.mrb[1].mxu1 }
 0x8c8   : > { %v10627_v32 = vadd.f32 %v20223_v22, %v10441_v51  ;;  %v15101_v18 = vpop.f32.mrb[2].mxu1 }
 0x8c9   : > { %v10630_v21 = vadd.f32 %v15101_v18, %v20223_v22  ;;  %v10444_v61 = vpop.f32.mrb[3].mxu1  ;;  %v10701_v10 = vsel %vm21840_vm1, %v10629_v41, 0.0 }
 0x8ca   : > { %v10699_v37 = vsel %vm21841_vm2, %v10627_v32, 0.0  ;;  %v10628_v58 = vadd.f32 %v20223_v22, %v10444_v61  ;;  %v20243_v28 = vadd.f32 %v10701_v10, %v10665_v52  ;;  %v10671_v52 = vld [vmem:[#allocation2 + $0x40] sm:$0xff] }
 0x8cb   : > { %v10702_v8 = vsel %vm21842_vm11, %v10630_v21, 0.0  ;;  %v20239_v15 = vadd.f32 %v10699_v37, %v10663_v29 }
 0x8cc   : > { %v20235_v25 = vadd.f32 %v10702_v8, %v10666_v48  ;;  %v10700_v12 = vsel %vm21843_vm14, %v10628_v58, 0.0  ;;  %v10674_v58 = vld [vmem:[#allocation2 + $0x58] sm:$0xff] }
 0x8cd   : > { %v20241_v31 = vadd.f32 %v10700_v12, %v10664_v17  ;;  %v10672_v12 = vld [vmem:[#allocation2 + $0x48] sm:$0xff] }
 0x8ce   : > { %v15104_v57 = vpop.f32.mrb[4].mxu1  ;;  %v10808_v54 = vpack.c.bf16 %v20235_v25, %v20243_v28 }
 0x8cf   : > { %v10633_v62 = vadd.f32 %v15104_v57, %v20223_v22  ;;  %v10457_v6 = vpop.f32.mrb[5].mxu1  ;;  %v10807_v1 = vpack.c.bf16 %v20241_v31, %v20239_v15  ;;  %v10673_v57 = vld [vmem:[#allocation2 + $0x50] sm:$0xff] }
 0x8d0   : > { %v10631_v4 = vadd.f32 %v20223_v22, %v10457_v6  ;;  %v15105_v47 = vpop.f32.mrb[6].mxu1 }
 0x8d1   : > { %v10634_v11 = vadd.f32 %v15105_v47, %v20223_v22  ;;  %v10460_v42 = vpop.f32.mrb[7].mxu1  ;;  %15150 = vmatprep.mubr.bf16.mxu0 %v10807_v1  ;;  %v10705_v38 = vsel %vm21850_vm13, %v10633_v62, 0.0 }
 0x8d2   : > { %v10703_v19 = vsel %vm21851_vm10, %v10631_v4, 0.0  ;;  %v10632_v14 = vadd.f32 %v20223_v22, %v10460_v42  ;;  %15151 = vmatmul.mubr.bf16.vlgmr.msra.gmra.mrb[36].mxu0 %v10808_v54  ;;  %v20267_v41 = vadd.f32 %v10705_v38, %v10669_v24 }
 0x8d3   : > { %v10706_v50 = vsel %vm22030_vm15, %v10634_v11, 0.0  ;;  %v20263_v16 = vadd.f32 %v10703_v19, %v10667_v53 }
 0x8d4   : > { %v20259_v9 = vadd.f32 %v10706_v50, %v10670_v13  ;;  %v10704_v30 = vsel %vm21853_vm5, %v10632_v14, 0.0  ;;  %v10678_v50 = vld [vmem:[#allocation2 + $0x78] sm:$0xff] }
 0x8d5   : > { %v20265_v20 = vadd.f32 %v10704_v30, %v10668_v49 }
 0x8d6   : > { %v15108_v51 = vpop.f32.mrb[8].mxu1  ;;  %v10810_v29 = vpack.c.bf16 %v20259_v9, %v20267_v41 }
 0x8d7   : > { %v10637_v32 = vadd.f32 %v15108_v51, %v20223_v22  ;;  %v10473_v18 = vpop.f32.mrb[9].mxu1  ;;  %v10809_v21 = vpack.c.bf16 %v20265_v20, %v20263_v16  ;;  %v10675_v51 = vld [vmem:[#allocation2 + $0x60] sm:$0xff] }
 0x8d8   : > { %v10635_v48 = vadd.f32 %v20223_v22, %v10473_v18  ;;  %v15109_v61 = vpop.f32.mrb[10].mxu1 }
 0x8d9   : > { %v10638_v37 = vadd.f32 %v15109_v61, %v20223_v22  ;;  %v10476_v17 = vpop.f32.mrb[11].mxu1  ;;  %15154 = vmatprep.mubr.bf16.mxu0 %v10809_v21  ;;  %v10709_v62 = vsel %vm22032_vm9, %v10637_v32, 0.0  ;;  %v10676_v21 = vld [vmem:[#allocation2 + $0x68] sm:$0xff]  ;;  %vm22040_vm9 = vnez %v21858_v39 }
 0x8da   : > { %v10707_v10 = vsel %vm22031_vm12, %v10635_v48, 0.0  ;;  %v10636_v8 = vadd.f32 %v20223_v22, %v10476_v17  ;;  %15155 = vmatmul.mubr.bf16.gmra.mrb[40].mxu0 %v10810_v29  ;;  %v20291_v11 = vadd.f32 %v10709_v62, %v10673_v57  ;;  %v10677_v48 = vld [vmem:[#allocation2 + $0x70] sm:$0xff]  ;;  %vm22043_vm12 = vnez %v21864_v59 }
 0x8db   : > { %v10710_v6 = vsel %vm22033_vm6, %v10638_v37, 0.0  ;;  %v20287_v4 = vadd.f32 %v10707_v10, %v10671_v52  ;;  %vm22039_vm6 = vnez %v21860_v27 }
 0x8dc   : > { %v20283_v1 = vadd.f32 %v10710_v6, %v10674_v58  ;;  %v10708_v54 = vsel %vm22035_vm3, %v10636_v8, 0.0  ;;  %22038 = vst [vmem:[#allocation47_spill] sm:$0xff] %v20291_v11  ;;  %vm22041_vm3 = vnez %v21862_v55 }
 0x8dd   : > { %22036 = vst [vmem:[#allocation44_spill] sm:$0xff] %v20287_v4  ;;  %v20289_v47 = vadd.f32 %v10708_v54, %v10672_v12 }
 0x8de   : > { %22034 = vst [vmem:[#allocation41_spill] sm:$0xff] %v20283_v1  ;;  %v15112_v13 = vpop.f32.mrb[12].mxu1  ;;  %v10812_v24 = vpack.c.bf16 %v20283_v1, %v20291_v11 }
 0x8df   : > { %22037 = vst [vmem:[#allocation42_spill] sm:$0xff] %v20289_v47  ;;  %v10641_v42 = vadd.f32 %v15112_v13, %v20223_v22  ;;  %v10489_v53 = vpop.f32.mrb[13].mxu1  ;;  %v10811_v19 = vpack.c.bf16 %v20289_v47, %v20287_v4 }
 0x8e0   : > { %v10639_v14 = vadd.f32 %v20223_v22, %v10489_v53  ;;  %v15113_v49 = vpop.f32.mrb[14].mxu1  ;;  %v10682_v53 = vld [vmem:[#allocation2 + $0x98] sm:$0xff] }
 0x8e1   : > { %v10642_v38 = vadd.f32 %v15113_v49, %v20223_v22  ;;  %v10492_v30 = vpop.f32.mrb[15].mxu1  ;;  %15158 = vmatprep.mubr.bf16.mxu0 %v10811_v19  ;;  %v10713_v61 = vsel %vm22040_vm9, %v10641_v42, 0.0  ;;  %vm22048_vm9 = vnez %v21866_v5 }
 0x8e2   : > { %v10711_v32 = vsel %vm22039_vm6, %v10639_v14, 0.0  ;;  %v10640_v18 = vadd.f32 %v20223_v22, %v10492_v30  ;;  %15159 = vmatmul.mubr.bf16.gmra.mrb[44].mxu0 %v10812_v24  ;;  %v20315_v10 = vadd.f32 %v10713_v61, %v10677_v48  ;;  %v10679_v14 = vld [vmem:[#allocation2 + $0x80] sm:$0xff] }
 0x8e3   : > { %v10714_v29 = vsel %vm22041_vm3, %v10642_v38, 0.0  ;;  %v20311_v17 = vadd.f32 %v10711_v32, %v10675_v51  ;;  %vm22047_vm3 = vnez %v21868_v0  ;;  %v10680_v38 = vld [vmem:[#allocation2 + $0x88] sm:$0xff] }
 0x8e4   : > { %v20307_v37 = vadd.f32 %v10714_v29, %v10678_v50  ;;  %v10712_v58 = vsel %vm22043_vm12, %v10640_v18, 0.0  ;;  %22046 = vst [vmem:[#allocation56_spill] sm:$0xff] %v20315_v10  ;;  %v10681_v50 = vld [vmem:[#allocation2 + $0x90] sm:$0xff]  ;;  %v22049_v51 = vld [vmem:[#allocation48_spill] sm:$0xff] }
 0x8e5   : > { %22044 = vst [vmem:[#allocation55_spill] sm:$0xff] %v20311_v17  ;;  %v20313_v52 = vadd.f32 %v10712_v58, %v10676_v21  ;;  %vm22050_vm12 = vnez %v22049_v51  ;;  %v22052_v21 = vld [vmem:[#allocation46_spill] sm:$0xff] }
 0x8e6   : > { %22042 = vst [vmem:[#allocation45_spill] sm:$0xff] %v20307_v37  ;;  %v15116_v8 = vpop.f32.mrb[16].mxu1  ;;  %v10814_v13 = vpack.c.bf16 %v20307_v37, %v20315_v10  ;;  %vm22053_vm6 = vnez %v22052_v21 }
 0x8e7   : > { %22045 = vst [vmem:[#allocation53_spill] sm:$0xff] %v20313_v52  ;;  %v10645_v12 = vadd.f32 %v15116_v8, %v20223_v22  ;;  %v10505_v57 = vpop.f32.mrb[17].mxu1  ;;  %v10813_v62 = vpack.c.bf16 %v20313_v52, %v20311_v17 }
 0x8e8   : > { %v10643_v6 = vadd.f32 %v20223_v22, %v10505_v57  ;;  %v15117_v54 = vpop.f32.mrb[18].mxu1 }
 0x8e9   : > { %v10646_v42 = vadd.f32 %v15117_v54, %v20223_v22  ;;  %v10508_v19 = vpop.f32.mrb[19].mxu1  ;;  %15162 = vmatprep.mubr.bf16.mxu0 %v10813_v62  ;;  %v10717_v30 = vsel %vm22048_vm9, %v10645_v12, 0.0 }
 0x8ea   : > { %v10715_v49 = vsel %vm22047_vm3, %v10643_v6, 0.0  ;;  %v10644_v24 = vadd.f32 %v20223_v22, %v10508_v19  ;;  %15163 = vmatmul.mubr.bf16.gmra.mrb[48].mxu0 %v10814_v13  ;;  %v20339_v58 = vadd.f32 %v10717_v30, %v10681_v50  ;;  %v10684_v50 = vld [vmem:[#allocation2 + $0xa8] sm:$0xff]  ;;  %v10685_v30 = vld [vmem:[#allocation2 + $0xb0] sm:$0xff] }
 0x8eb   : > { %v10718_v32 = vsel %vm22050_vm12, %v10646_v42, 0.0  ;;  %v20335_v61 = vadd.f32 %v10715_v49, %v10679_v14  ;;  %v10683_v14 = vld [vmem:[#allocation2 + $0xa0] sm:$0xff]  ;;  %v22057_v49 = vld [vmem:[#allocation49_spill] sm:$0xff] }
 0x8ec   : > { %v20331_v18 = vadd.f32 %v10718_v32, %v10682_v53  ;;  %v10716_v48 = vsel %vm22053_vm6, %v10644_v24, 0.0  ;;  %22056 = vst [vmem:[#allocation68_spill] sm:$0xff] %v20339_v58  ;;  %v10686_v53 = vld [vmem:[#allocation2 + $0xb8] sm:$0xff]  ;;  %vm22058_vm12 = vnez %v22057_v49 }
 0x8ed   : > { %22054 = vst [vmem:[#allocation46_spill] sm:$0xff] %v20335_v61  ;;  %v20337_v29 = vadd.f32 %v10716_v48, %v10680_v38  ;;  %v22059_v32 = vld [vmem:[#allocation51_spill] sm:$0xff] }
 0x8ee   : > { %22051 = vst [vmem:[#allocation48_spill] sm:$0xff] %v20331_v18  ;;  %v15120_v8 = vpop.f32.mrb[20].mxu1  ;;  %v10816_v13 = vpack.c.bf16 %v20331_v18, %v20339_v58  ;;  %vm22060_vm9 = vnez %v22059_v32 }
 0x8ef   : > { %22055 = vst [vmem:[#allocation67_spill] sm:$0xff] %v20337_v29  ;;  %v10649_v57 = vadd.f32 %v15120_v8, %v20223_v22  ;;  %v10521_v62 = vpop.f32.mrb[21].mxu1  ;;  %v10815_v12 = vpack.c.bf16 %v20337_v29, %v20335_v61  ;;  %v22061_v8 = vld [vmem:[#allocation52_spill] sm:$0xff] }
 0x8f0   : > { %v10647_v6 = vadd.f32 %v20223_v22, %v10521_v62  ;;  %v15121_v54 = vpop.f32.mrb[22].mxu1  ;;  %vm22062_vm6 = vnez %v22061_v8  ;;  %v22081_v61 = vld [vmem:[#allocation60_spill] sm:$0xff] }
 0x8f1   : > { %v10650_v42 = vadd.f32 %v15121_v54, %v20223_v22  ;;  %v10524_v19 = vpop.f32.mrb[23].mxu1  ;;  %15166 = vmatprep.mubr.bf16.mxu0 %v10815_v12  ;;  %v10721_v48 = vsel %vm22060_vm9, %v10649_v57, 0.0  ;;  %v22064_v54 = vld [vmem:[#allocation50_spill] sm:$0xff]  ;;  %vm22070_vm9 = vnez %v21891_v36 }
 0x8f2   : > { %v10719_v24 = vsel %vm22058_vm12, %v10647_v6, 0.0  ;;  %v10648_v38 = vadd.f32 %v20223_v22, %v10524_v19  ;;  %15167 = vmatmul.mubr.bf16.gmra.mrb[52].mxu0 %v10816_v13  ;;  %vm22065_vm3 = vnez %v22064_v54  ;;  %v20363_v6 = vadd.f32 %v10721_v48, %v10685_v30 }
 0x8f3   : > { %v10722_v62 = vsel %vm22062_vm6, %v10650_v42, 0.0  ;;  %v20359_v56 = vadd.f32 %v10719_v24, %v10683_v14  ;;  %v10690_v24 = vld [vmem:[#allocation2 + $0xd8] sm:$0xff]  ;;  %vm22069_vm6 = vnez %v21887_v45 }
 0x8f4   : > { %v20355_v46 = vadd.f32 %v10722_v62, %v10686_v53  ;;  %v10720_v12 = vsel %vm22065_vm3, %v10648_v38, 0.0  ;;  %22068 = vst [vmem:[#allocation50_spill] sm:$0xff] %v20363_v6 }
 0x8f5   : > { %22066 = vst [vmem:[#allocation51_spill] sm:$0xff] %v20359_v56  ;;  %v20361_v18 = vadd.f32 %v10720_v12, %v10684_v50  ;;  %v10687_v50 = vld [vmem:[#allocation2 + $0xc0] sm:$0xff]  ;;  %v10688_v12 = vld [vmem:[#allocation2 + $0xc8] sm:$0xff] }
 0x8f6   : > { %22063 = vst [vmem:[#allocation49_spill] sm:$0xff] %v20355_v46  ;;  %v15124_v19 = vpop.f32.mrb[24].mxu1  ;;  %v10818_v62 = vpack.c.bf16 %v20355_v46, %v20363_v6 }
 0x8f7   : > { %22067 = vst [vmem:[#allocation52_spill] sm:$0xff] %v20361_v18  ;;  %v10653_v13 = vadd.f32 %v15124_v19, %v20223_v22  ;;  %v10537_v58 = vpop.f32.mrb[25].mxu1  ;;  %v10817_v57 = vpack.c.bf16 %v20361_v18, %v20359_v56  ;;  %v10689_v19 = vld [vmem:[#allocation2 + $0xd0] sm:$0xff] }
 0x8f8   : > { %v10651_v42 = vadd.f32 %v20223_v22, %v10537_v58  ;;  %v15125_v53 = vpop.f32.mrb[26].mxu1 }
 0x8f9   : > { %v10654_v14 = vadd.f32 %v15125_v53, %v20223_v22  ;;  %v10540_v38 = vpop.f32.mrb[27].mxu1  ;;  %15170 = vmatprep.mubr.bf16.mxu0 %v10817_v57  ;;  %v10725_v58 = vsel %vm22069_vm6, %v10653_v13, 0.0  ;;  %v22072_v53 = vld [vmem:[#allocation54_spill] sm:$0xff] }
 0x8fa   : > { %v10723_v30 = vsel %vm21890_vm4, %v10651_v42, 0.0  ;;  %v10652_v48 = vadd.f32 %v20223_v22, %v10540_v38  ;;  %15171 = vmatmul.mubr.bf16.gmra.mrb[56].mxu0 %v10818_v62  ;;  %vm22073_vm3 = vnez %v22072_v53  ;;  %v20387_v42 = vadd.f32 %v10725_v58, %v10689_v19  ;;  %v22077_v19 = vld [vmem:[#allocation57_spill] sm:$0xff] }
 0x8fb   : > { %v10726_v46 = vsel %vm22070_vm9, %v10654_v14, 0.0  ;;  %v20383_v18 = vadd.f32 %v10723_v30, %v10687_v50  ;;  %v10694_v30 = vld [vmem:[#allocation2 + $0xf8] sm:$0xff]  ;;  %vm22078_vm9 = vnez %v22077_v19 }
 0x8fc   : > { %v20379_v6 = vadd.f32 %v10726_v46, %v10690_v24  ;;  %v10724_v57 = vsel %vm22073_vm3, %v10652_v48, 0.0  ;;  %22076 = vst [vmem:[#allocation71_spill] sm:$0xff] %v20387_v42 }
 0x8fd   : > { %22074 = vst [vmem:[#allocation54_spill] sm:$0xff] %v20383_v18  ;;  %v20385_v56 = vadd.f32 %v10724_v57, %v10688_v12  ;;  %v10691_v12 = vld [vmem:[#allocation2 + $0xe0] sm:$0xff] }
 0x8fe   : > { %22071 = vst [vmem:[#allocation69_spill] sm:$0xff] %v20379_v6  ;;  %v15128_v38 = vpop.f32.mrb[28].mxu1  ;;  %v10820_v24 = vpack.c.bf16 %v20379_v6, %v20387_v42 }
 0x8ff   : > { %22075 = vst [vmem:[#allocation70_spill] sm:$0xff] %v20385_v56  ;;  %v10657_v62 = vadd.f32 %v15128_v38, %v20223_v22  ;;  %v10553_v29 = vpop.f32.mrb[29].mxu1  ;;  %v10819_v13 = vpack.c.bf16 %v20385_v56, %v20383_v18  ;;  %v10692_v38 = vld [vmem:[#allocation2 + $0xe8] sm:$0xff]  ;;  %v10693_v56 = vld [vmem:[#allocation2 + $0xf0] sm:$0xff]  ;;  %v22079_v18 = vld [vmem:[#allocation59_spill] sm:$0xff] }
 0x900   : > { %v10655_v14 = vadd.f32 %v20223_v22, %v10553_v29  ;;  %v15129_v46 = vpop.f32.mrb[30].mxu1  ;;  %vm22080_vm6 = vnez %v22079_v18 }
 0x901   : > { %v10658_v50 = vadd.f32 %v15129_v46, %v20223_v22  ;;  %v10556_v48 = vpop.f32.mrb[31].mxu1  ;;  %15174 = vmatprep.mubr.bf16.mxu0 %v10819_v13  ;;  %v10729_v29 = vsel %vm22080_vm6, %v10657_v62, 0.0  ;;  %v22083_v46 = vld [vmem:[#allocation58_spill] sm:$0xff] }
 0x902   : > { %v10727_v58 = vsel %vm22078_vm9, %v10655_v14, 0.0  ;;  %v10656_v57 = vadd.f32 %v20223_v22, %v10556_v48  ;;  %15175 = vmatmul.mubr.bf16.gmra.mrb[60].mxu0 %v10820_v24  ;;  %vm22084_vm3 = vnez %v22083_v46  ;;  %v20411_v14 = vadd.f32 %v10729_v29, %v10693_v56  ;;  %v10695_v56 = vld [vmem:[#allocation2 + $0x100] sm:$0xff] }
 0x903   : > { %v10730_v6 = vsel %vm21901_vm8, %v10658_v50, 0.0  ;;  %v20407_v37 = vadd.f32 %v10727_v58, %v10691_v12  ;;  %v10698_v58 = vld [vmem:[#allocation2 + $0x118] sm:$0x3f] }
 0x904   : > { %v20403_v42 = vadd.f32 %v10730_v6, %v10694_v30  ;;  %v10728_v13 = vsel %vm22084_vm3, %v10656_v57, 0.0  ;;  %22087 = vst [vmem:[#allocation58_spill] sm:$0xff] %v20411_v14 }
 0x905   : > { %22085 = vst [vmem:[#allocation59_spill] sm:$0xff] %v20407_v37  ;;  %v20409_v10 = vadd.f32 %v10728_v13, %v10692_v38  ;;  %v22088_v38 = vld [vmem:[#allocation61_spill] sm:$0xff] }
 0x906   : > { %22082 = vst [vmem:[#allocation57_spill] sm:$0xff] %v20403_v42  ;;  %v15132_v48 = vpop.f32.mrb[32].mxu1  ;;  %v10822_v30 = vpack.c.bf16 %v20403_v42, %v20411_v14  ;;  %vm22089_vm8 = vnez %v22088_v38 }
 0x907   : > { %22086 = vst [vmem:[#allocation60_spill] sm:$0xff] %v20409_v10  ;;  %v10661_v24 = vadd.f32 %v15132_v48, %v20223_v22  ;;  %v10569_v52 = vpop.f32.mrb[33].mxu1  ;;  %v10821_v62 = vpack.c.bf16 %v20409_v10, %v20407_v37  ;;  %v10696_v48 = vld [vmem:[#allocation2 + $0x108] sm:$0xff]  ;;  %v10697_v10 = vld [vmem:[#allocation2 + $0x110] sm:$0xff] }
 0x908   : > { %v10659_v50 = vadd.f32 %v20223_v22, %v10569_v52  ;;  %v15133_v6 = vpop.f32.mrb[34].mxu1  ;;  %v22090_v52 = vld [vmem:[#allocation63_spill] sm:$0xff] }
 0x909   : > { %v10662_v12 = vadd.f32 %v15133_v6, %v20223_v22  ;;  %v10572_v57 = vpop.f32.mrb[35].mxu1  ;;  %15178 = vmatprep.mubr.bf16.mxu0 %v10821_v62  ;;  %vm22091_vm6 = vnez %v22090_v52 }
 0x90a   : > { %v10731_v29 = vsel %vm22089_vm8, %v10659_v50, 0.0  ;;  %v10660_v13 = vadd.f32 %v20223_v22, %v10572_v57  ;;  %15179 = vmatmul.mubr.bf16.gmra.mrb[64].mxu0 %v10822_v30  ;;  %v10733_v37 = vsel %vm22091_vm6, %v10661_v24, 0.0  ;;  %v16390_v24 = vld [vmem:[%s17328_s28 + $0x38] sm:$0xff]   ;;  %vm16794_vm6 = vmmov 0  }
 0x90b   : > { %v10734_v6 = vsel %vm21912_vm7, %v10662_v12, 0.0  ;;  %v20429_v1 = vadd.f32 %v10731_v29, %v10695_v56  ;;  %v20433_v22 = vadd.f32 %v10733_v37, %v10697_v10  ;;  %15200 = vmatprep.subr.bf16.mxu1 %v16390_v24  ;;  %v20444_v12 = vld [vmem:[%s776_s13] ss:$0 sm:$0xff] }
 0x90c   : > { %v10770_v14 = vadd.f32 %v10734_v6, %v10698_v58  ;;  %v10732_v62 = vsel %vm21914_vm0, %v10660_v13, 0.0  ;;  %15201 = vmatpush3.bf16.msra.mxu1 %v16390_v24 }
 0x90d   : > { %22094 = vst [vmem:[#allocation61_spill] sm:$0xff] %v20429_v1  ;;  %v20431_v50 = vadd.f32 %v10732_v62, %v10696_v48  ;;  %22096 = vst [vmem:[#allocation64_spill] sm:$0xff] %v20433_v22 }
 0x90e   : > { %10806 = vst [vmem:[#allocation2 + $0x118] sm:$0x3f] %v10770_v14  ;;  %v10824_v57 = vpack.c.bf16 %v10770_v14, %v20433_v22 }
 0x90f   : > { %22095 = vst [vmem:[#allocation63_spill] sm:$0xff] %v20431_v50  ;;  %v10823_v30 = vpack.c.bf16 %v20431_v50, %v20429_v1 }
 0x911   : > { %15182 = vmatprep.mubr.bf16.mxu0 %v10823_v30 }
 0x912   : > { %15183 = vmatmul.mubr.bf16.gmra.mrb[68].mxu0 %v10824_v57 }
 0x9a5   : > { %v15152_v58 = vpop.f32.mrb[36].mxu0 }
 0x9a6   : > { %v10939_v37 = vadd.f32 %v15152_v58, %v20444_v12  ;;  %v10930_v10 = vpop.f32.mrb[37].mxu0 }
 0x9a7   : > { %v10931_v56 = vadd.f32 %v20444_v12, %v10930_v10  ;;  %v15153_v29 = vpop.f32.mrb[38].mxu0 }
 0x9a8   : > { %v10942_v14 = vadd.f32 %v15153_v29, %v20444_v12  ;;  %v10933_v13 = vpop.f32.mrb[39].mxu0  ;;  %v11075_v6 = vmax.f32 %v10939_v37, 0.0 }
 0x9a9   : > { %v10934_v48 = vadd.f32 %v20444_v12, %v10933_v13  ;;  %v11073_v30 = vmax.f32 %v10931_v56, 0.0 }
 0x9aa   : > { %v11076_v62 = vmax.f32 %v10942_v14, 0.0 }
 0x9ab   : > { %v11074_v57 = vmax.f32 %v10934_v48, 0.0 }
 0x9ac   : > { %v11110_v24 = vpack.c.bf16 %v11076_v62, %v11075_v6 }
 0x9ad   : > { %v11109_v22 = vpack.c.bf16 %v11074_v57, %v11073_v30  ;;  %v15156_v50 = vpop.f32.mrb[40].mxu0 }
 0x9ae   : > { %v10955_v1 = vadd.f32 %v15156_v50, %v20444_v12  ;;  %v10946_v11 = vpop.f32.mrb[41].mxu0 }
 0x9af   : > { %v10947_v58 = vadd.f32 %v20444_v12, %v10946_v11  ;;  %v15157_v47 = vpop.f32.mrb[42].mxu0  ;;  %15202 = vmatprep.mubr.bf16.mxu1 %v11109_v22 }
 0x9b0   : > { %v10958_v10 = vadd.f32 %v15157_v47, %v20444_v12  ;;  %v10949_v29 = vpop.f32.mrb[43].mxu0  ;;  %15203 = vmatmul.mubr.bf16.vlgmr.msra.gmra.mrb[36].mxu1 %v11110_v24  ;;  %v11079_v37 = vmax.f32 %v10955_v1, 0.0 }
 0x9b1   : > { %v10950_v13 = vadd.f32 %v20444_v12, %v10949_v29  ;;  %v11077_v56 = vmax.f32 %v10947_v58, 0.0 }
 0x9b2   : > { %v11080_v14 = vmax.f32 %v10958_v10, 0.0 }
 0x9b3   : > { %v11078_v48 = vmax.f32 %v10950_v13, 0.0 }
 0x9b4   : > { %v11112_v6 = vpack.c.bf16 %v11080_v14, %v11079_v37 }
 0x9b5   : > { %v11111_v62 = vpack.c.bf16 %v11078_v48, %v11077_v56  ;;  %v15160_v30 = vpop.f32.mrb[44].mxu0 }
 0x9b6   : > { %v10971_v50 = vadd.f32 %v15160_v30, %v20444_v12  ;;  %v10962_v57 = vpop.f32.mrb[45].mxu0 }
 0x9b7   : > { %v10963_v11 = vadd.f32 %v20444_v12, %v10962_v57  ;;  %v15161_v4 = vpop.f32.mrb[46].mxu0  ;;  %15206 = vmatprep.mubr.bf16.mxu1 %v11111_v62 }
 0x9b8   : > { %v10974_v47 = vadd.f32 %v15161_v4, %v20444_v12  ;;  %v10965_v22 = vpop.f32.mrb[47].mxu0  ;;  %15207 = vmatmul.mubr.bf16.gmra.mrb[40].mxu1 %v11112_v6  ;;  %v11083_v1 = vmax.f32 %v10971_v50, 0.0 }
 0x9b9   : > { %v10966_v24 = vadd.f32 %v20444_v12, %v10965_v22  ;;  %v11081_v58 = vmax.f32 %v10963_v11, 0.0 }
 0x9ba   : > { %v11084_v10 = vmax.f32 %v10974_v47, 0.0 }
 0x9bb   : > { %v11082_v29 = vmax.f32 %v10966_v24, 0.0 }
 0x9bc   : > { %v11114_v13 = vpack.c.bf16 %v11084_v10, %v11083_v1 }
 0x9bd   : > { %v11113_v37 = vpack.c.bf16 %v11082_v29, %v11081_v58  ;;  %v15164_v14 = vpop.f32.mrb[48].mxu0 }
 0x9be   : > { %v10987_v56 = vadd.f32 %v15164_v14, %v20444_v12  ;;  %v10978_v48 = vpop.f32.mrb[49].mxu0 }
 0x9bf   : > { %v10979_v30 = vadd.f32 %v20444_v12, %v10978_v48  ;;  %v15165_v57 = vpop.f32.mrb[50].mxu0  ;;  %15210 = vmatprep.mubr.bf16.mxu1 %v11113_v37 }
 0x9c0   : > { %v10990_v4 = vadd.f32 %v15165_v57, %v20444_v12  ;;  %v10981_v62 = vpop.f32.mrb[51].mxu0  ;;  %15211 = vmatmul.mubr.bf16.gmra.mrb[44].mxu1 %v11114_v13  ;;  %v11087_v50 = vmax.f32 %v10987_v56, 0.0 }
 0x9c1   : > { %v10982_v6 = vadd.f32 %v20444_v12, %v10981_v62  ;;  %v11085_v11 = vmax.f32 %v10979_v30, 0.0 }
 0x9c2   : > { %v11088_v47 = vmax.f32 %v10990_v4, 0.0 }
 0x9c3   : > { %v11086_v22 = vmax.f32 %v10982_v6, 0.0 }
 0x9c4   : > { %v11116_v24 = vpack.c.bf16 %v11088_v47, %v11087_v50 }
 0x9c5   : > { %v11115_v1 = vpack.c.bf16 %v11086_v22, %v11085_v11  ;;  %v15168_v10 = vpop.f32.mrb[52].mxu0 }
 0x9c6   : > { %v11003_v58 = vadd.f32 %v15168_v10, %v20444_v12  ;;  %v10994_v29 = vpop.f32.mrb[53].mxu0 }
 0x9c7   : > { %v10995_v14 = vadd.f32 %v20444_v12, %v10994_v29  ;;  %v15169_v48 = vpop.f32.mrb[54].mxu0  ;;  %15214 = vmatprep.mubr.bf16.mxu1 %v11115_v1 }
 0x9c8   : > { %v11006_v37 = vadd.f32 %v15169_v48, %v20444_v12  ;;  %v10997_v57 = vpop.f32.mrb[55].mxu0  ;;  %15215 = vmatmul.mubr.bf16.gmra.mrb[48].mxu1 %v11116_v24  ;;  %v11091_v56 = vmax.f32 %v11003_v58, 0.0 }
 0x9c9   : > { %v10998_v13 = vadd.f32 %v20444_v12, %v10997_v57  ;;  %v11089_v30 = vmax.f32 %v10995_v14, 0.0 }
 0x9ca   : > { %v11092_v4 = vmax.f32 %v11006_v37, 0.0 }
 0x9cb   : > { %v11090_v62 = vmax.f32 %v10998_v13, 0.0 }
 0x9cc   : > { %v11118_v6 = vpack.c.bf16 %v11092_v4, %v11091_v56 }
 0x9cd   : > { %v11117_v50 = vpack.c.bf16 %v11090_v62, %v11089_v30  ;;  %v15172_v47 = vpop.f32.mrb[56].mxu0 }
 0x9ce   : > { %v11019_v11 = vadd.f32 %v15172_v47, %v20444_v12  ;;  %v11010_v22 = vpop.f32.mrb[57].mxu0 }
 0x9cf   : > { %v11011_v10 = vadd.f32 %v20444_v12, %v11010_v22  ;;  %v15173_v29 = vpop.f32.mrb[58].mxu0  ;;  %15218 = vmatprep.mubr.bf16.mxu1 %v11117_v50 }
 0x9d0   : > { %v11022_v1 = vadd.f32 %v15173_v29, %v20444_v12  ;;  %v11013_v48 = vpop.f32.mrb[59].mxu0  ;;  %15219 = vmatmul.mubr.bf16.gmra.mrb[52].mxu1 %v11118_v6  ;;  %v11095_v58 = vmax.f32 %v11019_v11, 0.0 }
 0x9d1   : > { %v11014_v24 = vadd.f32 %v20444_v12, %v11013_v48  ;;  %v11093_v14 = vmax.f32 %v11011_v10, 0.0 }
 0x9d2   : > { %v11096_v37 = vmax.f32 %v11022_v1, 0.0 }
 0x9d3   : > { %v11094_v57 = vmax.f32 %v11014_v24, 0.0 }
 0x9d4   : > { %v11120_v13 = vpack.c.bf16 %v11096_v37, %v11095_v58 }
 0x9d5   : > { %v11119_v56 = vpack.c.bf16 %v11094_v57, %v11093_v14  ;;  %v15176_v4 = vpop.f32.mrb[60].mxu0 }
 0x9d6   : > { %v11035_v30 = vadd.f32 %v15176_v4, %v20444_v12  ;;  %v11026_v62 = vpop.f32.mrb[61].mxu0 }
 0x9d7   : > { %v11027_v47 = vadd.f32 %v20444_v12, %v11026_v62  ;;  %v15177_v22 = vpop.f32.mrb[62].mxu0  ;;  %15222 = vmatprep.mubr.bf16.mxu1 %v11119_v56 }
 0x9d8   : > { %v11038_v50 = vadd.f32 %v15177_v22, %v20444_v12  ;;  %v11029_v29 = vpop.f32.mrb[63].mxu0  ;;  %15223 = vmatmul.mubr.bf16.gmra.mrb[56].mxu1 %v11120_v13  ;;  %v11099_v11 = vmax.f32 %v11035_v30, 0.0 }
 0x9d9   : > { %v11030_v6 = vadd.f32 %v20444_v12, %v11029_v29  ;;  %v11097_v10 = vmax.f32 %v11027_v47, 0.0 }
 0x9da   : > { %v11100_v1 = vmax.f32 %v11038_v50, 0.0 }
 0x9db   : > { %v11098_v48 = vmax.f32 %v11030_v6, 0.0 }
 0x9dc   : > { %v11122_v24 = vpack.c.bf16 %v11100_v1, %v11099_v11 }
 0x9dd   : > { %v11121_v58 = vpack.c.bf16 %v11098_v48, %v11097_v10  ;;  %v15180_v37 = vpop.f32.mrb[64].mxu0 }
 0x9de   : > { %v11051_v14 = vadd.f32 %v15180_v37, %v20444_v12  ;;  %v11042_v57 = vpop.f32.mrb[65].mxu0 }
 0x9df   : > { %v11043_v4 = vadd.f32 %v20444_v12, %v11042_v57  ;;  %v15181_v62 = vpop.f32.mrb[66].mxu0  ;;  %15226 = vmatprep.mubr.bf16.mxu1 %v11121_v58 }
 0x9e0   : > { %v11054_v56 = vadd.f32 %v15181_v62, %v20444_v12  ;;  %v11045_v22 = vpop.f32.mrb[67].mxu0  ;;  %15227 = vmatmul.mubr.bf16.gmra.mrb[60].mxu1 %v11122_v24  ;;  %v11103_v30 = vmax.f32 %v11051_v14, 0.0 }
 0x9e1   : > { %v11046_v13 = vadd.f32 %v20444_v12, %v11045_v22  ;;  %v11101_v47 = vmax.f32 %v11043_v4, 0.0 }
 0x9e2   : > { %v11104_v50 = vmax.f32 %v11054_v56, 0.0 }
 0x9e3   : > { %v11102_v29 = vmax.f32 %v11046_v13, 0.0 }
 0x9e4   : > { %v11124_v6 = vpack.c.bf16 %v11104_v50, %v11103_v30  ;;  %v16391_v50 = vld [vmem:[%s17331_s15] sm:$0xff]  }
 0x9e5   : > { %v11123_v11 = vpack.c.bf16 %v11102_v29, %v11101_v47  ;;  %v15184_v1 = vpop.f32.mrb[68].mxu0  ;;  %v16793_v47 = vmov 0.0   ;;  %v16392_v29 = vld [vmem:[%s17331_s15 + $0x8] sm:$0xff]  }
 0x9e6   : > { %v11067_v10 = vadd.f32 %v15184_v1, %v20444_v12  ;;  %v11058_v48 = vpop.f32.mrb[69].mxu0  ;;  %15238 = vmatprep.subr.bf16.mxu0 %v16793_v47  ;;  %15258 = vmatprep.subr.bf16.mxu1 %v16793_v47  ;;  %v16396_v1 = vld [vmem:[%s17331_s15 + $0x28] sm:$0xff]  }
 0x9e7   : > { %v11059_v37 = vadd.f32 %v20444_v12, %v11058_v48  ;;  %v15185_v58 = vpop.f32.mrb[70].mxu0  ;;  %15230 = vmatprep.mubr.bf16.mxu1 %v11123_v11  ;;  %15239 = vmatpush3.bf16.msra.mxu0 %v16391_v50  ;;  %v16395_v11 = vld [vmem:[%s17331_s15 + $0x20] sm:$0xff]   ;;  %v16398_v48 = vld [vmem:[%s17331_s15 + $0x38] sm:$0xff]  }
 0x9e8   : > { %v11070_v57 = vadd.f32 %v15185_v58, %v20444_v12  ;;  %v11061_v24 = vpop.f32.mrb[71].mxu0  ;;  %15231 = vmatmul.mubr.bf16.gmra.mrb[64].mxu1 %v11124_v6  ;;  %v11107_v4 = vmax.f32 %v11067_v10, 0.0  ;;  %15240 = vmatprep.subr.bf16.mxu0 %v16793_v47  ;;  %v16394_v6 = vld [vmem:[%s17331_s15 + $0x18] sm:$0xff]   ;;  %v16397_v10 = vld [vmem:[%s17331_s15 + $0x30] sm:$0xff]   ;;  %v16400_v58 = vld [vmem:[%s18467_s26 + $0x8] sm:$0xff]  }
 0x9e9   : > { %v11062_v14 = vadd.f32 %v20444_v12, %v11061_v24  ;;  %v11105_v56 = vmax.f32 %v11059_v37, 0.0  ;;  %v16393_v12 = vld [vmem:[%s17331_s15 + $0x10] sm:$0xff]   ;;  %15254 = vmatprep.mubr.msk.bf16.mxu0 %vm16794_vm6, %v16793_v47  ;;  %v16399_v37 = vld [vmem:[%s18467_s26] sm:$0xff]   ;;  %v16402_v24 = vld [vmem:[%s18467_s26 + $0x18] sm:$0xff]  }
 0x9ea   : > { %v11108_v62 = vmax.f32 %v11070_v57, 0.0  ;;  %15259 = vmatpush3.bf16.msra.mxu1 %v16399_v37  ;;  %v16401_v57 = vld [vmem:[%s18467_s26 + $0x10] sm:$0xff]  }
 0x9eb   : > { %v11106_v22 = vmax.f32 %v11062_v14, 0.0  ;;  %15241 = vmatpush3.bf16.msra.mxu0 %v16392_v29  ;;  %15260 = vmatprep.subr.bf16.mxu1 %v16793_v47  ;;  %v16403_v14 = vld [vmem:[%s18467_s26 + $0x20] sm:$0xff]  }
 0x9ec   : > { %v11126_v13 = vpack.c.bf16 %v11108_v62, %v11107_v4  ;;  %15242 = vmatprep.subr.bf16.mxu0 %v16793_v47  ;;  %v16404_v4 = vld [vmem:[%s18467_s26 + $0x28] sm:$0xff]   ;;  %v16405_v62 = vld [vmem:[%s18467_s26 + $0x30] sm:$0xff]  }
 0x9ed   : > { %v11125_v30 = vpack.c.bf16 %v11106_v22, %v11105_v56  ;;  %v16406_v56 = vld [vmem:[%s18467_s26 + $0x38] sm:$0xff]  }
 0x9ee   : > { %15261 = vmatpush3.bf16.msra.mxu1 %v16400_v58  ;;  %v20503_v22 = vld [vmem:[%s779_s7] ss:$0 sm:$0xff] }
 0x9ef   : > { %15234 = vmatprep.mubr.bf16.mxu1 %v11125_v30  ;;  %15243 = vmatpush3.bf16.msra.mxu0 %v16393_v12 }
 0x9f0   : > { %15235 = vmatmul.mubr.bf16.gmra.mrb[68].mxu1 %v11126_v13  ;;  %15244 = vmatprep.subr.bf16.mxu0 %v16793_v47 }
 0x9f1   : > { %15274 = vmatprep.mubr.msk.bf16.mxu1 %vm16794_vm6, %v16793_v47  ;;  %15262 = vmatprep.subr.bf16.mxu1 %v16793_v47  ;;  %vm22107_vm6 = vnez %v21868_v0 }
 0x9f2   : > { %15263 = vmatpush3.bf16.msra.mxu1 %v16401_v57 }
 0x9f3   : > { %15245 = vmatpush3.bf16.msra.mxu0 %v16394_v6  ;;  %15264 = vmatprep.subr.bf16.mxu1 %v16793_v47 }
 0x9f4   : > { %15246 = vmatprep.subr.bf16.mxu0 %v16793_v47 }
 0x9f6   : > { %15265 = vmatpush3.bf16.msra.mxu1 %v16402_v24 }
 0x9f7   : > { %15247 = vmatpush3.bf16.msra.mxu0 %v16395_v11  ;;  %15266 = vmatprep.subr.bf16.mxu1 %v16793_v47 }
 0x9f8   : > { %15248 = vmatprep.subr.bf16.mxu0 %v16793_v47 }
 0x9fa   : > { %15267 = vmatpush3.bf16.msra.mxu1 %v16403_v14 }
 0x9fb   : > { %15249 = vmatpush3.bf16.msra.mxu0 %v16396_v1  ;;  %15268 = vmatprep.subr.bf16.mxu1 %v16793_v47 }
 0x9fc   : > { %15250 = vmatprep.subr.bf16.mxu0 %v16793_v47 }
 0x9fe   : > { %15269 = vmatpush3.bf16.msra.mxu1 %v16404_v4 }
 0x9ff   : > { %15251 = vmatpush3.bf16.msra.mxu0 %v16397_v10  ;;  %15270 = vmatprep.subr.bf16.mxu1 %v16793_v47 }
 0xa00   : > { %15252 = vmatprep.subr.bf16.mxu0 %v16793_v47 }
 0xa02   : > { %15271 = vmatpush3.bf16.msra.mxu1 %v16405_v62 }
 0xa03   : > { %15253 = vmatpush3.bf16.msra.mxu0 %v16398_v48  ;;  %15272 = vmatprep.subr.bf16.mxu1 %v16793_v47 }
 0xa06   : > { %15273 = vmatpush3.bf16.msra.mxu1 %v16406_v56 }
 0xa83   : > { %v15204_v13 = vpop.f32.mrb[36].mxu1 }
 0xa84   : > { %v11232_v30 = vpop.f32.mrb[37].mxu1  ;;  %v11241_v6 = vadd.f32 %v15204_v13, %v20503_v22 }
 0xa85   : > { %v11233_v50 = vadd.f32 %v20503_v22, %v11232_v30  ;;  %v15205_v29 = vpop.f32.mrb[38].mxu1 }
 0xa86   : > { %v11235_v12 = vpop.f32.mrb[39].mxu1  ;;  %v11244_v1 = vadd.f32 %v15205_v29, %v20503_v22  ;;  %v20521_v37 = vsel %vm21840_vm1, %v11241_v6, 0.0  ;;  %vm22100_vm1 = vnez %v21651_v7 }
 0xa87   : > { %v11236_v11 = vadd.f32 %v20503_v22, %v11235_v12  ;;  %v20510_v47 = vsel %vm21841_vm2, %v11233_v50, 0.0  ;;  %vm22101_vm2 = vnez %v21660_v43 }
 0xa88   : > { %v20526_v35 = vsel %vm21842_vm11, %v11244_v1, 0.0  ;;  %vm22099_vm11 = vnez %v21642_v44 }
 0xa89   : > { %v20515_v10 = vsel %vm21843_vm14, %v11236_v11, 0.0  ;;  %vm22102_vm14 = vnez %v21668_v60 }
 0xa8a   : > { %v11411_v48 = vadd.f32 %v20515_v10, %v20510_v47 }
 0xa8b   : > { %v15208_v58 = vpop.f32.mrb[40].mxu1 }
 0xa8c   : > { %v11412_v57 = vadd.f32 %v11411_v48, %v20521_v37  ;;  %v11248_v24 = vpop.f32.mrb[41].mxu1  ;;  %v11257_v56 = vadd.f32 %v15208_v58, %v20503_v22 }
 0xa8d   : > { %v11249_v14 = vadd.f32 %v20503_v22, %v11248_v24  ;;  %v15209_v63 = vpop.f32.mrb[42].mxu1 }
 0xa8e   : > { %v11413_v4 = vadd.f32 %v11412_v57, %v20526_v35  ;;  %v11251_v62 = vpop.f32.mrb[43].mxu1  ;;  %v11260_v3 = vadd.f32 %v15209_v63, %v20503_v22  ;;  %v20545_v12 = vsel %vm21850_vm13, %v11257_v56, 0.0  ;;  %vm22103_vm13 = vnez %v21860_v27 }
 0xa8f   : > { %v20533_v33 = vsel %vm21851_vm10, %v11249_v14, 0.0  ;;  %v11252_v13 = vadd.f32 %v20503_v22, %v11251_v62  ;;  %vm22104_vm10 = vnez %v21864_v59 }
 0xa90   : > { %v11414_v30 = vadd.f32 %v11413_v4, %v20533_v33  ;;  %v20550_v1 = vsel %vm22030_vm15, %v11260_v3, 0.0  ;;  %vm22106_vm15 = vnez %v21862_v55 }
 0xa91   : > { %v20540_v50 = vsel %vm21853_vm5, %v11252_v13, 0.0  ;;  %vm22105_vm5 = vnez %v21858_v39 }
 0xa92   : > { %v11415_v29 = vadd.f32 %v11414_v30, %v20540_v50 }
 0xa93   : > { %v15212_v6 = vpop.f32.mrb[44].mxu1 }
 0xa94   : > { %v11416_v40 = vadd.f32 %v11415_v29, %v20545_v12  ;;  %v11264_v11 = vpop.f32.mrb[45].mxu1  ;;  %v11273_v24 = vadd.f32 %v15212_v6, %v20503_v22 }
 0xa95   : > { %v11265_v48 = vadd.f32 %v20503_v22, %v11264_v11  ;;  %v15213_v58 = vpop.f32.mrb[46].mxu1 }
 0xa96   : > { %v11417_v26 = vadd.f32 %v11416_v40, %v20550_v1  ;;  %v11267_v57 = vpop.f32.mrb[47].mxu1  ;;  %v11276_v2 = vadd.f32 %v15213_v58, %v20503_v22  ;;  %v20569_v56 = vsel %vm22101_vm2, %v11273_v24, 0.0  ;;  %vm22110_vm2 = vnez %v22049_v51 }
 0xa97   : > { %v20557_v34 = vsel %vm22099_vm11, %v11265_v48, 0.0  ;;  %v11268_v14 = vadd.f32 %v20503_v22, %v11267_v57  ;;  %vm22108_vm11 = vnez %v22052_v21 }
 0xa98   : > { %v11418_v63 = vadd.f32 %v11417_v26, %v20557_v34  ;;  %v20574_v3 = vsel %vm22102_vm14, %v11276_v2, 0.0  ;;  %vm22111_vm14 = vnez %v22064_v54 }
 0xa99   : > { %v20564_v4 = vsel %vm22100_vm1, %v11268_v14, 0.0  ;;  %vm22109_vm1 = vnez %v21866_v5 }
 0xa9a   : > { %v11419_v62 = vadd.f32 %v11418_v63, %v20564_v4 }
 0xa9b   : > { %v15216_v13 = vpop.f32.mrb[48].mxu1 }
 0xa9c   : > { %v11420_v44 = vadd.f32 %v11419_v62, %v20569_v56  ;;  %v11280_v30 = vpop.f32.mrb[49].mxu1  ;;  %v11289_v11 = vadd.f32 %v15216_v13, %v20503_v22 }
 0xa9d   : > { %v11281_v29 = vadd.f32 %v20503_v22, %v11280_v30  ;;  %v15217_v6 = vpop.f32.mrb[50].mxu1 }
 0xa9e   : > { %v11421_v7 = vadd.f32 %v11420_v44, %v20574_v3  ;;  %v11283_v40 = vpop.f32.mrb[51].mxu1  ;;  %v11292_v60 = vadd.f32 %v15217_v6, %v20503_v22  ;;  %v20593_v24 = vsel %vm22105_vm5, %v11289_v11, 0.0  ;;  %vm22115_vm5 = vnez %v21887_v45 }
 0xa9f   : > { %v20581_v43 = vsel %vm22103_vm13, %v11281_v29, 0.0  ;;  %v11284_v48 = vadd.f32 %v20503_v22, %v11283_v40  ;;  %vm22112_vm13 = vnez %v22059_v32 }
 0xaa0   : > { %v11422_v58 = vadd.f32 %v11421_v7, %v20581_v43  ;;  %v20598_v2 = vsel %vm22106_vm15, %v11292_v60, 0.0  ;;  %vm22117_vm15 = vnez %v22079_v18 }
 0xaa1   : > { %v20588_v26 = vsel %vm22104_vm10, %v11284_v48, 0.0  ;;  %vm22114_vm10 = vnez %v22072_v53 }
 0xaa2   : > { %v11423_v57 = vadd.f32 %v11422_v58, %v20588_v26 }
 0xaa3   : > { %v15220_v14 = vpop.f32.mrb[52].mxu1 }
 0xaa4   : > { %v11424_v27 = vadd.f32 %v11423_v57, %v20593_v24  ;;  %v11296_v63 = vpop.f32.mrb[53].mxu1  ;;  %v11305_v30 = vadd.f32 %v15220_v14, %v20503_v22 }
 0xaa5   : > { %v11297_v62 = vadd.f32 %v20503_v22, %v11296_v63  ;;  %v15221_v13 = vpop.f32.mrb[54].mxu1 }
 0xaa6   : > { %v11425_v59 = vadd.f32 %v11424_v27, %v20598_v2  ;;  %v11299_v44 = vpop.f32.mrb[55].mxu1  ;;  %v11308_v55 = vadd.f32 %v15221_v13, %v20503_v22  ;;  %v20617_v11 = vsel %vm22109_vm1, %v11305_v30, 0.0 }
 0xaa7   : > { %v20605_v39 = vsel %vm22107_vm6, %v11297_v62, 0.0  ;;  %v11300_v29 = vadd.f32 %v20503_v22, %v11299_v44 }
 0xaa8   : > { %v11426_v6 = vadd.f32 %v11425_v59, %v20605_v39  ;;  %v20622_v60 = vsel %vm22110_vm2, %v11308_v55, 0.0 }
 0xaa9   : > { %v20612_v7 = vsel %vm22108_vm11, %v11300_v29, 0.0 }
 0xaaa   : > { %v11427_v40 = vadd.f32 %v11426_v6, %v20612_v7 }
 0xaab   : > { %v15224_v48 = vpop.f32.mrb[56].mxu1 }
 0xaac   : > { %v11428_v0 = vadd.f32 %v11427_v40, %v20617_v11  ;;  %v11312_v58 = vpop.f32.mrb[57].mxu1  ;;  %v11321_v63 = vadd.f32 %v15224_v48, %v20503_v22 }
 0xaad   : > { %v11313_v57 = vadd.f32 %v20503_v22, %v11312_v58  ;;  %v15225_v14 = vpop.f32.mrb[58].mxu1 }
 0xaae   : > { %v11429_v21 = vadd.f32 %v11428_v0, %v20622_v60  ;;  %v11315_v27 = vpop.f32.mrb[59].mxu1  ;;  %v11324_v51 = vadd.f32 %v15225_v14, %v20503_v22  ;;  %v20641_v30 = vsel %vm22112_vm13, %v11321_v63, 0.0 }
 0xaaf   : > { %v20629_v5 = vsel %vm22058_vm12, %v11313_v57, 0.0  ;;  %v11316_v62 = vadd.f32 %v20503_v22, %v11315_v27  ;;  %vm22113_vm12 = vnez %v22061_v8 }
 0xab0   : > { %v11430_v13 = vadd.f32 %v11429_v21, %v20629_v5  ;;  %v20646_v55 = vsel %vm22113_vm12, %v11324_v51, 0.0 }
 0xab1   : > { %v20636_v59 = vsel %vm22111_vm14, %v11316_v62, 0.0 }
 0xab2   : > { %v11431_v44 = vadd.f32 %v11430_v13, %v20636_v59 }
 0xab3   : > { %v15228_v29 = vpop.f32.mrb[60].mxu1 }
 0xab4   : > { %v11432_v49 = vadd.f32 %v11431_v44, %v20641_v30  ;;  %v11328_v6 = vpop.f32.mrb[61].mxu1  ;;  %v11337_v58 = vadd.f32 %v15228_v29, %v20503_v22 }
 0xab5   : > { %v11329_v40 = vadd.f32 %v20503_v22, %v11328_v6  ;;  %v15229_v48 = vpop.f32.mrb[62].mxu1 }
 0xab6   : > { %v11433_v54 = vadd.f32 %v11432_v49, %v20646_v55  ;;  %v11331_v0 = vpop.f32.mrb[63].mxu1  ;;  %v11340_v8 = vadd.f32 %v15229_v48, %v20503_v22  ;;  %v20665_v63 = vsel %vm22115_vm5, %v11337_v58, 0.0 }
 0xab7   : > { %v20653_v32 = vsel %vm21890_vm4, %v11329_v40, 0.0  ;;  %v11332_v57 = vadd.f32 %v20503_v22, %v11331_v0  ;;  %vm22116_vm4 = vnez %v21891_v36 }
 0xab8   : > { %v11434_v14 = vadd.f32 %v11433_v54, %v20653_v32  ;;  %v20670_v51 = vsel %vm22116_vm4, %v11340_v8, 0.0 }
 0xab9   : > { %v20660_v21 = vsel %vm22114_vm10, %v11332_v57, 0.0 }
 0xaba   : > { %v11435_v27 = vadd.f32 %v11434_v14, %v20660_v21 }
 0xabb   : > { %v15232_v62 = vpop.f32.mrb[64].mxu1 }
 0xabc   : > { %v11436_v23 = vadd.f32 %v11435_v27, %v20665_v63  ;;  %v11344_v13 = vpop.f32.mrb[65].mxu1  ;;  %v11353_v6 = vadd.f32 %v15232_v62, %v20503_v22 }
 0xabd   : > { %v11345_v44 = vadd.f32 %v20503_v22, %v11344_v13  ;;  %v15233_v29 = vpop.f32.mrb[66].mxu1 }
 0xabe   : > { %v11437_v53 = vadd.f32 %v11436_v23, %v20670_v51  ;;  %v11347_v49 = vpop.f32.mrb[67].mxu1  ;;  %v11356_v36 = vadd.f32 %v15233_v29, %v20503_v22  ;;  %v20689_v58 = vsel %vm22117_vm15, %v11353_v6, 0.0 }
 0xabf   : > { %v20677_v45 = vsel %vm22078_vm9, %v11345_v44, 0.0  ;;  %v11348_v40 = vadd.f32 %v20503_v22, %v11347_v49  ;;  %vm22118_vm9 = vnez %v22081_v61 }
 0xac0   : > { %v11438_v48 = vadd.f32 %v11437_v53, %v20677_v45  ;;  %v20694_v8 = vsel %vm22118_vm9, %v11356_v36, 0.0 }
 0xac1   : > { %v20684_v54 = vsel %vm22084_vm3, %v11348_v40, 0.0  ;;  %vm22119_vm3 = vnez %v22090_v52  ;;  %v11472_v52 = vld [vmem:[%s782_s16] sm:$0x1]  ;;  %s22157_s16 = sld [smem:[#allocation27_spill]] }
 0xac2   : > { %v11439_v0 = vadd.f32 %v11438_v48, %v20684_v54 }
 0xac3   : > { %v15236_v57 = vpop.f32.mrb[68].mxu1 }
 0xac4   : > { %v11440_v19 = vadd.f32 %v11439_v0, %v20689_v58  ;;  %v11360_v14 = vpop.f32.mrb[69].mxu1  ;;  %v11369_v18 = vadd.f32 %v15236_v57, %v20503_v22 }
 0xac5   : > { %v11361_v27 = vadd.f32 %v20503_v22, %v11360_v14  ;;  %v15237_v62 = vpop.f32.mrb[70].mxu1 }
 0xac6   : > { %v11441_v46 = vadd.f32 %v11440_v19, %v20694_v8  ;;  %v11372_v23 = vadd.f32 %v15237_v62, %v20503_v22  ;;  %v11363_v13 = vpop.f32.mrb[71].mxu1  ;;  %v20717_v38 = vsel %vm22119_vm3, %v11369_v18, 0.0 }
 0xac7   : > { %v20702_v44 = vsel %vm22089_vm8, %v11361_v27, 0.0  ;;  %v11364_v29 = vadd.f32 %v20503_v22, %v11363_v13  ;;  %vm22120_vm8 = vcmask 1045504   ;;  %p13544_p5 = scmp.ne.s32.totalorder %s22157_s16, 1 }
 0xac8   : > { %v11442_v61 = vadd.f32 %v11441_v46, %v20702_v44  ;;  %v20712_v49 = vsel %vm21912_vm7, %v11372_v23, 0.0 }
 0xac9   : > { %v20708_v53 = vsel %vm21914_vm0, %v11364_v29, 0.0  ;;  %v11446_v22 = vsel %vm22120_vm8, %v20712_v49, 0.0 }
 0xaca   : > { %v11443_v6 = vadd.f32 %v11442_v61, %v20708_v53 }
 0xacc   : > { %v11444_v40 = vadd.f32 %v11443_v6, %v20717_v38  ;;  %v11579_v6 = vld [vmem:[%s785_s14] sm:$0x1] }
 0xace   : > { %v11447_v48 = vadd.f32 %v11446_v22, %v11444_v40 }
 0xad0   : > { %v11448_v17 = vrot.slane %v11447_v48, 4 }
 0xad2   : > { %v11449_v36 = vadd.f32 %v11448_v17, %v11447_v48 }
 0xad4   : > { %v11450_v0 = vrot.slane %v11449_v36, 2 }
 0xad6   : > { %v11451_v42 = vadd.f32 %v11450_v0, %v11449_v36 }
 0xad8   : > { %v11452_v57 = vrot.slane %v11451_v42, 1 }
 0xada   : > { %v11453_v19 = vadd.f32 %v11452_v57, %v11451_v42 }
 0xadc   : > { %v11454_v14 = vmul.f32 0.00390625, %v11453_v19  ;;  %v22123_v19 = vld [vmem:[#allocation40_spill] sm:$0xff] }
 0xade   : > { %v11455_v27 = vpack.c.bf16 %v11454_v14, %v11454_v14  ;;  %v11712_v14 = vsub.s32 0, %v22123_v19 }
 0xae0   : > { %15255 = vmatmul.mubr.bf16.vlgmr.msra.gmra.mrb[72].mxu0 %v11455_v27 }
 0xbb3   : > { %v11555_v62 = vpop.f32.mrb[72].mxu0 }
 0xbb4   : > { %v11556_v46 = vadd.f32 %v11555_v62, %v11472_v52  ;;  %v15256_v23 = vpop.f32.mrb[73].mxu0 }
 0xbb5   : > { %v11558_v13 = vpop.f32.mrb[74].mxu0 }
 0xbb6   : > { %v11561_v18 = vmax.f32 %v11556_v46, 0.0  ;;  %v15257_v29 = vpop.f32.mrb[75].mxu0 }
 0xbb8   : > { %v11562_v61 = vpack.c.bf16 %v11561_v18, %v11561_v18 }
 0xbba   : > { %15275 = vmatmul.mubr.bf16.vlgmr.msra.gmra.mrb[72].mxu1 %v11562_v61 }
 0xc8d   : > { %v11662_v40 = vpop.f32.mrb[72].mxu1 }
 0xc8e   : > { %v11663_v22 = vadd.f32 %v11662_v40, %v11579_v6  ;;  %v15276_v48 = vpop.f32.mrb[73].mxu1 }
 0xc8f   : > { %v11665_v17 = vpop.f32.mrb[74].mxu1 }
 0xc90   : > { %v13507_v36 = vmul.f32 -1.442695, %v11663_v22  ;;  %v15277_v0 = vpop.f32.mrb[75].mxu1 }
 0xc92   : > { %16407 = vpow2.f32 %v13507_v36 }
 0xc9c   : > { %v16408_v42 = vpop.eup %16407 }
 0xc9d   : > { %v11671_v57 = vadd.f32 1.0, %v16408_v42 }
 0xc9f   : > { %16409 = vrcp.f32 %v11671_v57 }
 0xca9   : > { %v16410_v27 = vpop.eup %16409 }
 0xcaa   : > { %v11713_v52 = vrot.slane %v16410_v27, %v11712_v14 }
 0xcac   : > { %v11714_v62 = vmul.f32 %v11713_v52, %v20510_v47  ;;  %v11715_v46 = vmul.f32 %v11713_v52, %v20515_v10  ;;  %v11716_v23 = vmul.f32 %v11713_v52, %v20521_v37  ;;  %v11717_v13 = vmul.f32 %v11713_v52, %v20526_v35 }
 0xcad   : > { %v11718_v18 = vmul.f32 %v11713_v52, %v20533_v33  ;;  %v11719_v29 = vmul.f32 %v11713_v52, %v20540_v50  ;;  %v11720_v61 = vmul.f32 %v11713_v52, %v20545_v12  ;;  %v11721_v6 = vmul.f32 %v11713_v52, %v20550_v1 }
 0xcae   : > { %v11722_v40 = vmul.f32 %v11713_v52, %v20557_v34  ;;  %v11723_v22 = vmul.f32 %v11713_v52, %v20564_v4  ;;  %v11724_v47 = vmul.f32 %v11713_v52, %v20569_v56  ;;  %v11725_v10 = vmul.f32 %v11713_v52, %v20574_v3 }
 0xcaf   : > { %v11726_v37 = vmul.f32 %v11713_v52, %v20581_v43  ;;  %v11727_v35 = vmul.f32 %v11713_v52, %v20588_v26  ;;  %v11728_v33 = vmul.f32 %v11713_v52, %v20593_v24  ;;  %v11729_v50 = vmul.f32 %v11713_v52, %v20598_v2 }
 0xcb0   : > { %v11730_v12 = vmul.f32 %v11713_v52, %v20605_v39  ;;  %v11731_v1 = vmul.f32 %v11713_v52, %v20612_v7  ;;  %v11732_v34 = vmul.f32 %v11713_v52, %v20617_v11  ;;  %v11733_v4 = vmul.f32 %v11713_v52, %v20622_v60 }
 0xcb1   : > { %v11734_v56 = vmul.f32 %v11713_v52, %v20629_v5  ;;  %v11735_v3 = vmul.f32 %v11713_v52, %v20636_v59  ;;  %v11736_v43 = vmul.f32 %v11713_v52, %v20641_v30  ;;  %v11737_v26 = vmul.f32 %v11713_v52, %v20646_v55 }
 0xcb2   : > { %v11738_v24 = vmul.f32 %v11713_v52, %v20653_v32  ;;  %v11739_v2 = vmul.f32 %v11713_v52, %v20660_v21  ;;  %v11740_v39 = vmul.f32 %v11713_v52, %v20665_v63  ;;  %v11741_v7 = vmul.f32 %v11713_v52, %v20670_v51 }
 0xcb3   : > { %v11742_v11 = vmul.f32 %v11713_v52, %v20677_v45  ;;  %v11743_v60 = vmul.f32 %v11713_v52, %v20684_v54  ;;  %v11744_v5 = vmul.f32 %v11713_v52, %v20689_v58  ;;  %v11745_v59 = vmul.f32 %v11713_v52, %v20694_v8 }
 0xcb4   : > { %v11746_v30 = vmul.f32 %v11713_v52, %v20702_v44  ;;  %v11747_v55 = vmul.f32 %v11713_v52, %v20708_v53  ;;  %v11748_v32 = vmul.f32 %v11713_v52, %v20717_v38  ;;  %v11750_v48 = vmul.f32 0.1, %v11714_v62 }
 0xcb5   : > { %v11751_v21 = vmul.f32 0.1, %v11715_v46  ;;  %v11752_v17 = vmul.f32 0.1, %v11716_v23  ;;  %v11749_v63 = vmul.f32 %v11713_v52, %v20712_v49  ;;  %v11753_v51 = vmul.f32 0.1, %v11717_v13 }
 0xcb6   : > { %v11754_v36 = vmul.f32 0.1, %v11718_v18  ;;  %v11755_v45 = vmul.f32 0.1, %v11719_v29  ;;  %v11756_v0 = vmul.f32 0.1, %v11720_v61  ;;  %v20770_v58 = vadd.f32 %v11750_v48, %v20239_v15 }
 0xcb7   : > { %v11757_v54 = vmul.f32 0.1, %v11721_v6  ;;  %v11758_v42 = vmul.f32 0.1, %v11722_v40  ;;  %v11759_v8 = vmul.f32 0.1, %v11723_v22  ;;  %v20773_v53 = vadd.f32 %v11751_v21, %v20241_v31 }
 0xcb8   : > { %v11760_v44 = vmul.f32 0.1, %v11724_v47  ;;  %v11761_v57 = vmul.f32 0.1, %v11725_v10  ;;  %v11762_v38 = vmul.f32 0.1, %v11726_v37  ;;  %v20776_v49 = vadd.f32 %v11752_v17, %v20243_v28 }
 0xcb9   : > { %v11763_v19 = vmul.f32 0.1, %v11727_v35  ;;  %v11764_v14 = vmul.f32 0.1, %v11728_v33  ;;  %11822 = vst [vmem:[#allocation2] sm:$0xff] %v20770_v58  ;;  %v20780_v15 = vadd.f32 %v11753_v51, %v20235_v25  ;;  %11823 = vst [vmem:[#allocation2 + $0x8] sm:$0xff] %v20773_v53  ;;  %v20784_v13 = vadd.f32 %v11754_v36, %v20263_v16 }
 0xcba   : > { %v11765_v27 = vmul.f32 0.1, %v11729_v50  ;;  %v11766_v52 = vmul.f32 0.1, %v11730_v12  ;;  %v11767_v62 = vmul.f32 0.1, %v11731_v1  ;;  %v20788_v61 = vadd.f32 %v11755_v45, %v20265_v20 }
 0xcbb   : > { %v11768_v46 = vmul.f32 0.1, %v11732_v34  ;;  %v11769_v23 = vmul.f32 0.1, %v11733_v4  ;;  %v11770_v31 = vmul.f32 0.1, %v11734_v56  ;;  %v20792_v22 = vadd.f32 %v11756_v0, %v20267_v41 }
 0xcbc   : > { %11824 = vst [vmem:[#allocation2 + $0x10] sm:$0xff] %v20776_v49  ;;  %v11771_v28 = vmul.f32 0.1, %v11735_v3  ;;  %v11772_v18 = vmul.f32 0.1, %v11736_v43  ;;  %11825 = vst [vmem:[#allocation2 + $0x18] sm:$0xff] %v20780_v15  ;;  %v20796_v37 = vadd.f32 %v11757_v54, %v20259_v9 }
 0xcbd   : > { %v11773_v29 = vmul.f32 0.1, %v11737_v26  ;;  %v11774_v25 = vmul.f32 0.1, %v11738_v24  ;;  %v11775_v6 = vmul.f32 0.1, %v11739_v2 }
 0xcbe   : > { %v11776_v40 = vmul.f32 0.1, %v11740_v39  ;;  %11826 = vst [vmem:[#allocation2 + $0x20] sm:$0xff] %v20784_v13  ;;  %v11777_v16 = vmul.f32 0.1, %v11741_v7  ;;  %11827 = vst [vmem:[#allocation2 + $0x28] sm:$0xff] %v20788_v61 }
 0xcbf   : > { %v11778_v47 = vmul.f32 0.1, %v11742_v11  ;;  %v11779_v10 = vmul.f32 0.1, %v11743_v60  ;;  %v11780_v20 = vmul.f32 0.1, %v11744_v5 }
 0xcc0   : > { %v11781_v35 = vmul.f32 0.1, %v11745_v59  ;;  %v11782_v33 = vmul.f32 0.1, %v11746_v30  ;;  %v22124_v50 = vld [vmem:[#allocation44_spill] sm:$0xff]  ;;  %11828 = vst [vmem:[#allocation2 + $0x30] sm:$0xff] %v20792_v22 }
 0xcc1   : > { %v20800_v12 = vadd.f32 %v11758_v42, %v22124_v50  ;;  %v11783_v41 = vmul.f32 0.1, %v11747_v55  ;;  %v11784_v1 = vmul.f32 0.1, %v11748_v32  ;;  %v11785_v34 = vmul.f32 0.1, %v11749_v63 }
 0xcc2   : > { %v22125_v4 = vld [vmem:[#allocation42_spill] sm:$0xff]  ;;  %11829 = vst [vmem:[#allocation2 + $0x38] sm:$0xff] %v20796_v37  ;;  %v22126_v9 = vld [vmem:[#allocation47_spill] sm:$0xff]  ;;  %v22127_v43 = vld [vmem:[#allocation41_spill] sm:$0xff] }
 0xcc3   : > { %v20804_v56 = vadd.f32 %v11759_v8, %v22125_v4  ;;  %v20808_v3 = vadd.f32 %v11760_v44, %v22126_v9  ;;  %v20811_v26 = vadd.f32 %v11761_v57, %v22127_v43  ;;  %v22128_v24 = vld [vmem:[#allocation55_spill] sm:$0xff]  ;;  %v22129_v39 = vld [vmem:[#allocation53_spill] sm:$0xff]  ;;  %11830 = vst [vmem:[#allocation2 + $0x40] sm:$0xff] %v20800_v12  ;;  %v22130_v11 = vld [vmem:[#allocation56_spill] sm:$0xff] }
 0xcc4   : > { %v20814_v2 = vadd.f32 %v11762_v38, %v22128_v24  ;;  %v20817_v7 = vadd.f32 %v11763_v19, %v22129_v39  ;;  %v20821_v60 = vadd.f32 %v11764_v14, %v22130_v11  ;;  %v22131_v5 = vld [vmem:[#allocation45_spill] sm:$0xff]  ;;  %v22132_v30 = vld [vmem:[#allocation46_spill] sm:$0xff]  ;;  %v22133_v32 = vld [vmem:[#allocation67_spill] sm:$0xff] }
 0xcc5   : > { %v20824_v59 = vadd.f32 %v11765_v27, %v22131_v5  ;;  %v20827_v55 = vadd.f32 %v11766_v52, %v22132_v30  ;;  %v20830_v48 = vadd.f32 %v11767_v62, %v22133_v32  ;;  %11831 = vst [vmem:[#allocation2 + $0x48] sm:$0xff] %v20804_v56  ;;  %v22134_v21 = vld [vmem:[#allocation68_spill] sm:$0xff]  ;;  %v22136_v36 = vld [vmem:[#allocation51_spill] sm:$0xff]  ;;  %11832 = vst [vmem:[#allocation2 + $0x50] sm:$0xff] %v20808_v3 }
 0xcc6   : > { %v20834_v17 = vadd.f32 %v11768_v46, %v22134_v21  ;;  %v22135_v63 = vld [vmem:[#allocation48_spill] sm:$0xff]  ;;  %v20840_v45 = vadd.f32 %v11770_v31, %v22136_v36  ;;  %11833 = vst [vmem:[#allocation2 + $0x58] sm:$0xff] %v20811_v26  ;;  %11834 = vst [vmem:[#allocation2 + $0x60] sm:$0xff] %v20814_v2  ;;  %v22138_v42 = vld [vmem:[#allocation50_spill] sm:$0xff] }
 0xcc7   : > { %v20837_v51 = vadd.f32 %v11769_v23, %v22135_v63  ;;  %v22137_v0 = vld [vmem:[#allocation52_spill] sm:$0xff]  ;;  %11835 = vst [vmem:[#allocation2 + $0x68] sm:$0xff] %v20817_v7  ;;  %v11808_v8 = vadd.f32 %v11772_v18, %v22138_v42  ;;  %v22139_v44 = vld [vmem:[#allocation49_spill] sm:$0xff]  ;;  %v22140_v38 = vld [vmem:[#allocation54_spill] sm:$0xff] }
 0xcc8   : > { %v20843_v54 = vadd.f32 %v11771_v28, %v22137_v0  ;;  %v11809_v57 = vadd.f32 %v11773_v29, %v22139_v44  ;;  %v11810_v19 = vadd.f32 %v11774_v25, %v22140_v38  ;;  %v22141_v14 = vld [vmem:[#allocation70_spill] sm:$0xff]  ;;  %11836 = vst [vmem:[#allocation2 + $0x70] sm:$0xff] %v20821_v60  ;;  %11837 = vst [vmem:[#allocation2 + $0x78] sm:$0xff] %v20824_v59  ;;  %v22142_v52 = vld [vmem:[#allocation71_spill] sm:$0xff] }
 0xcc9   : > { %v11811_v27 = vadd.f32 %v11775_v6, %v22141_v14  ;;  %11838 = vst [vmem:[#allocation2 + $0x80] sm:$0xff] %v20827_v55  ;;  %11839 = vst [vmem:[#allocation2 + $0x88] sm:$0xff] %v20830_v48  ;;  %v11812_v62 = vadd.f32 %v11776_v40, %v22142_v52  ;;  %v22143_v46 = vld [vmem:[#allocation69_spill] sm:$0xff]  ;;  %v22144_v31 = vld [vmem:[#allocation59_spill] sm:$0xff]  ;;  %v20942_v11 = vpack.c.bf16 %v20840_v45, %v20840_v45 }
 0xcca   : > { %v11813_v23 = vadd.f32 %v11777_v16, %v22143_v46  ;;  %v11814_v28 = vadd.f32 %v11778_v47, %v22144_v31  ;;  %v22145_v18 = vld [vmem:[#allocation60_spill] sm:$0xff]  ;;  %11840 = vst [vmem:[#allocation2 + $0x90] sm:$0xff] %v20834_v17  ;;  %11841 = vst [vmem:[#allocation2 + $0x98] sm:$0xff] %v20837_v51  ;;  %v11709_v25 = vld [vmem:[#allocation2 + $0x118] sm:$0x3f]  ;;  %v20948_v5 = vpack.c.bf16 %v11808_v8, %v11808_v8 }
 0xccb   : > { %v11815_v29 = vadd.f32 %v11779_v10, %v22145_v18  ;;  %11842 = vst [vmem:[#allocation2 + $0xa0] sm:$0xff] %v20840_v45  ;;  %11843 = vst [vmem:[#allocation2 + $0xa8] sm:$0xff] %v20843_v54  ;;  %v22146_v6 = vld [vmem:[#allocation58_spill] sm:$0xff]  ;;  %v22147_v4 = vld [vmem:[#allocation57_spill] sm:$0xff]  ;;  %v11821_v39 = vadd.f32 %v11785_v34, %v11709_v25  ;;  %v20882_v34 = vpack.c.bf16 %v20788_v61, %v20788_v61 }
 0xccc   : > { %v11816_v50 = vadd.f32 %v11780_v20, %v22146_v6  ;;  %v11817_v9 = vadd.f32 %v11781_v35, %v22147_v4  ;;  %v22148_v40 = vld [vmem:[#allocation61_spill] sm:$0xff]  ;;  %v22149_v16 = vld [vmem:[#allocation63_spill] sm:$0xff]  ;;  %11844 = vst [vmem:[#allocation2 + $0xb0] sm:$0xff] %v11808_v8  ;;  %11845 = vst [vmem:[#allocation2 + $0xb8] sm:$0xff] %v11809_v57  ;;  %v13623_v20 = vpack.c.bf16 %v20770_v58, %v20770_v58 }
 0xccd   : > { %v11818_v43 = vadd.f32 %v11782_v33, %v22148_v40  ;;  %v11819_v24 = vadd.f32 %v11783_v41, %v22149_v16  ;;  %11846 = vst [vmem:[#allocation2 + $0xc0] sm:$0xff] %v11810_v19  ;;  %11847 = vst [vmem:[#allocation2 + $0xc8] sm:$0xff] %v11811_v27  ;;  %v22150_v47 = vld [vmem:[#allocation64_spill] sm:$0xff]  ;;  %v13624_v35 = vpack.c.bf16 %v20773_v53, %v20773_v53  ;;  %v12016_v40 = vshrl.u32 %v20882_v34, 16 }
 0xcce   : > { %v11820_v10 = vadd.f32 %v11784_v1, %v22150_v47  ;;  %11848 = vst [vmem:[#allocation2 + $0xd0] sm:$0xff] %v11812_v62  ;;  %11849 = vst [vmem:[#allocation2 + $0xd8] sm:$0xff] %v11813_v23  ;;  %v13625_v33 = vpack.c.bf16 %v20776_v49, %v20776_v49  ;;  %v13626_v41 = vpack.c.bf16 %v20780_v15, %v20780_v15  ;;  %v11967_v42 = vshrl.u32 %v13623_v20, 16 }
 0xccf   : > { %11850 = vst [vmem:[#allocation2 + $0xe0] sm:$0xff] %v11814_v28  ;;  %11851 = vst [vmem:[#allocation2 + $0xe8] sm:$0xff] %v11815_v29  ;;  %v13627_v1 = vpack.c.bf16 %v20784_v13, %v20784_v13  ;;  %v20886_v58 = vpack.c.bf16 %v20792_v22, %v20792_v22  ;;  %v20890_v53 = vpack.c.bf16 %v20796_v37, %v20796_v37  ;;  %v11970_v8 = vshll.u32 %v13623_v20, 16 }
 0xcd0   : > { %11852 = vst [vmem:[#allocation2 + $0xf0] sm:$0xff] %v11816_v50  ;;  %11853 = vst [vmem:[#allocation2 + $0xf8] sm:$0xff] %v11817_v9  ;;  %v20894_v49 = vpack.c.bf16 %v20800_v12, %v20800_v12  ;;  %v20898_v15 = vpack.c.bf16 %v20804_v56, %v20804_v56  ;;  %v20902_v13 = vpack.c.bf16 %v20808_v3, %v20808_v3  ;;  %v11976_v44 = vshrl.u32 %v13624_v35, 16 }
 0xcd1   : > { %11854 = vst [vmem:[#allocation2 + $0x100] sm:$0xff] %v11818_v43  ;;  %11855 = vst [vmem:[#allocation2 + $0x108] sm:$0xff] %v11819_v24  ;;  %v20906_v61 = vpack.c.bf16 %v20811_v26, %v20811_v26  ;;  %v20910_v22 = vpack.c.bf16 %v20814_v2, %v20814_v2  ;;  %v20914_v37 = vpack.c.bf16 %v20817_v7, %v20817_v7  ;;  %v11986_v38 = vshrl.u32 %v13625_v33, 16 }
 0xcd2   : > { %11856 = vst [vmem:[#allocation2 + $0x110] sm:$0xff] %v11820_v10  ;;  %11857 = vst [vmem:[#allocation2 + $0x118] sm:$0x3f] %v11821_v39  ;;  %v20918_v12 = vpack.c.bf16 %v20821_v60, %v20821_v60  ;;  %v20922_v56 = vpack.c.bf16 %v20824_v59, %v20824_v59  ;;  %v20926_v3 = vpack.c.bf16 %v20827_v55, %v20827_v55  ;;  %v11969_v14 = vrot.slane %v11967_v42, 6 }
 0xcd3   : > { %v20930_v26 = vpack.c.bf16 %v20830_v48, %v20830_v48  ;;  %v20934_v2 = vpack.c.bf16 %v20834_v17, %v20834_v17  ;;  %v20938_v7 = vpack.c.bf16 %v20837_v51, %v20837_v51  ;;  %v20946_v60 = vpack.c.bf16 %v20843_v54, %v20843_v54 }
 0xcd4   : > { %v20950_v59 = vpack.c.bf16 %v11809_v57, %v11809_v57  ;;  %v20952_v30 = vpack.c.bf16 %v11810_v19, %v11810_v19  ;;  %v20954_v55 = vpack.c.bf16 %v11811_v27, %v11811_v27  ;;  %v20956_v32 = vpack.c.bf16 %v11812_v62, %v11812_v62 }
 0xcd5   : > { %v20958_v48 = vpack.c.bf16 %v11813_v23, %v11813_v23  ;;  %v20960_v21 = vpack.c.bf16 %v11814_v28, %v11814_v28  ;;  %v20962_v17 = vpack.c.bf16 %v11815_v29, %v11815_v29  ;;  %v20964_v63 = vpack.c.bf16 %v11816_v50, %v11816_v50 }
 0xcd6   : > { %v20966_v51 = vpack.c.bf16 %v11817_v9, %v11817_v9  ;;  %v20968_v36 = vpack.c.bf16 %v11818_v43, %v11818_v43  ;;  %v20970_v45 = vpack.c.bf16 %v11819_v24, %v11819_v24  ;;  %v20972_v0 = vpack.c.bf16 %v11820_v10, %v11820_v10 }
 0xcd7   : > { %v20974_v54 = vpack.c.bf16 %v11821_v39, %v11821_v39  ;;  %v11979_v57 = vshll.u32 %v13624_v35, 16  ;;  %v11989_v19 = vshll.u32 %v13625_v33, 16  ;;  %v11972_v27 = vrot.slane %v11970_v8, 7  ;;  %v22151_v33 = vld [vmem:[#allocation66_spill] sm:$0xff] }
 0xcd8   : > { %v11996_v52 = vshrl.u32 %v13626_v41, 16  ;;  %v11999_v62 = vshll.u32 %v13626_v41, 16  ;;  %v11978_v46 = vrot.slane %v11976_v44, 6  ;;  %v11988_v31 = vrot.slane %v11986_v38, 6 }
 0xcd9   : > { %v11981_v23 = vrot.slane %v11979_v57, 7  ;;  %v11991_v28 = vrot.slane %v11989_v19, 7  ;;  %v20976_v18 = vor.u32 %v11972_v27, %v11969_v14  ;;  %v12006_v6 = vshrl.u32 %v13627_v1, 16 }
 0xcda   : > { %v11998_v29 = vrot.slane %v11996_v52, 6  ;;  %v12001_v25 = vrot.slane %v11999_v62, 7  ;;  %v12009_v9 = vshll.u32 %v13627_v1, 16  ;;  %v12019_v47 = vshll.u32 %v20882_v34, 16 }
 0xcdb   : > { %v11982_v50 = vor.u32 %v11981_v23, %v11978_v46  ;;  %v11992_v4 = vor.u32 %v11991_v28, %v11988_v31  ;;  %v11974_v43 = vrot.slane %v20976_v18, 4  ;;  %v12008_v24 = vrot.slane %v12006_v6, 6 }
 0xcdc   : > { %v12002_v16 = vor.u32 %v12001_v25, %v11998_v29  ;;  %v12011_v20 = vrot.slane %v12009_v9, 7  ;;  %v12018_v35 = vrot.slane %v12016_v40, 6  ;;  %vm22152_vm7 = vnez %v22151_v33  ;;  %v12408_v33 = vld [vmem:[#allocation2 + $0x8] sm:$0xff] (!%p13544_p5) }
 0xcdd   : > { %v11984_v10 = vrot.slane %v11982_v50, 4  ;;  %v11994_v39 = vrot.slane %v11992_v4, 4  ;;  %v11983_v41 = vsel %vm22152_vm7, %v11974_v43, %v11982_v50  ;;  %v12021_v8 = vrot.slane %v12019_v47, 7 }
 0xcde   : > { %v12004_v42 = vrot.slane %v12002_v16, 4  ;;  %v12026_v44 = vshrl.u32 %v20886_v58, 16  ;;  %v12012_v38 = vor.u32 %v12011_v20, %v12008_v24  ;;  %v12029_v34 = vshll.u32 %v20886_v58, 16  ;;  %12365 = vst [vmem:[#allocation3 + $0xc] sm:$0xf] %v11983_v41 }
 0xcdf   : > { %v11993_v1 = vsel %vm22152_vm7, %v11984_v10, %v11992_v4  ;;  %v12003_v57 = vsel %vm22152_vm7, %v11994_v39, %v12002_v16  ;;  %v12022_v19 = vor.u32 %v12021_v8, %v12018_v35  ;;  %v12036_v27 = vshrl.u32 %v20890_v53, 16 }
 0xce0   : > { %v12028_v14 = vrot.slane %v12026_v44, 6  ;;  %v12039_v52 = vshll.u32 %v20890_v53, 16  ;;  %12366 = vst [vmem:[#allocation3 + $0x10] sm:$0xf] %v11993_v1  ;;  %12367 = vst [vmem:[#allocation3 + $0x14] sm:$0xf] %v12003_v57  ;;  %v12013_v62 = vsel %vm22152_vm7, %v12004_v42, %v12012_v38 }
 0xce1   : > { %v12014_v46 = vrot.slane %v12012_v38, 4  ;;  %v12031_v23 = vrot.slane %v12029_v34, 7  ;;  %v12046_v31 = vshrl.u32 %v20894_v49, 16  ;;  %v12024_v28 = vrot.slane %v12022_v19, 4  ;;  %12368 = vst [vmem:[#allocation3 + $0x18] sm:$0xf] %v12013_v62 }
 0xce2   : > { %v12038_v29 = vrot.slane %v12036_v27, 6  ;;  %v12041_v25 = vrot.slane %v12039_v52, 7  ;;  %v12049_v58 = vshll.u32 %v20894_v49, 16  ;;  %v12056_v4 = vshrl.u32 %v20898_v15, 16 }
 0xce3   : > { %v12023_v6 = vsel %vm22152_vm7, %v12014_v46, %v12022_v19  ;;  %v12032_v50 = vor.u32 %v12031_v23, %v12028_v14  ;;  %v12048_v53 = vrot.slane %v12046_v31, 6  ;;  %v12059_v43 = vshll.u32 %v20898_v15, 16 }
 0xce4   : > { %v12042_v9 = vor.u32 %v12041_v25, %v12038_v29  ;;  %v12051_v40 = vrot.slane %v12049_v58, 7  ;;  %v12066_v16 = vshrl.u32 %v20902_v13, 16  ;;  %12369 = vst [vmem:[#allocation3 + $0x1c] sm:$0xf] %v12023_v6  ;;  %v12058_v49 = vrot.slane %v12056_v4, 6 }
 0xce5   : > { %v12033_v24 = vsel %vm22152_vm7, %v12024_v28, %v12032_v50  ;;  %v12034_v47 = vrot.slane %v12032_v50, 4  ;;  %v12069_v10 = vshll.u32 %v20902_v13, 16  ;;  %v12061_v35 = vrot.slane %v12059_v43, 7 }
 0xce6   : > { %v12044_v39 = vrot.slane %v12042_v9, 4  ;;  %v12052_v20 = vor.u32 %v12051_v40, %v12048_v53  ;;  %v12068_v41 = vrot.slane %v12066_v16, 6  ;;  %12370 = vst [vmem:[#allocation3 + $0x20] sm:$0xf] %v12033_v24  ;;  %v12076_v15 = vshrl.u32 %v20906_v61, 16 }
 0xce7   : > { %v12043_v42 = vsel %vm22152_vm7, %v12034_v47, %v12042_v9  ;;  %v12071_v8 = vrot.slane %v12069_v10, 7  ;;  %v12079_v44 = vshll.u32 %v20906_v61, 16  ;;  %v12062_v38 = vor.u32 %v12061_v35, %v12058_v49 }
 0xce8   : > { %v12053_v1 = vsel %vm22152_vm7, %v12044_v39, %v12052_v20  ;;  %v12054_v57 = vrot.slane %v12052_v20, 4  ;;  %v12086_v13 = vshrl.u32 %v20910_v22, 16  ;;  %12371 = vst [vmem:[#allocation3 + $0x24] sm:$0xf] %v12043_v42  ;;  %v12078_v19 = vrot.slane %v12076_v15, 6 }
 0xce9   : > { %v12072_v34 = vor.u32 %v12071_v8, %v12068_v41  ;;  %v12081_v14 = vrot.slane %v12079_v44, 7  ;;  %v12089_v27 = vshll.u32 %v20910_v22, 16  ;;  %12372 = vst [vmem:[#allocation3 + $0x28] sm:$0xf] %v12053_v1  ;;  %v12064_v62 = vrot.slane %v12062_v38, 4 }
 0xcea   : > { %v12063_v52 = vsel %vm22152_vm7, %v12054_v57, %v12062_v38  ;;  %v12088_v46 = vrot.slane %v12086_v13, 6  ;;  %v12096_v61 = vshrl.u32 %v20914_v37, 16  ;;  %v12099_v29 = vshll.u32 %v20914_v37, 16 }
 0xceb   : > { %v12074_v23 = vrot.slane %v12072_v34, 4  ;;  %v12082_v31 = vor.u32 %v12081_v14, %v12078_v19  ;;  %v12091_v28 = vrot.slane %v12089_v27, 7  ;;  %12373 = vst [vmem:[#allocation3 + $0x2c] sm:$0xf] %v12063_v52  ;;  %v12073_v25 = vsel %vm22152_vm7, %v12064_v62, %v12072_v34 }
 0xcec   : > { %v12098_v58 = vrot.slane %v12096_v61, 6  ;;  %v12106_v22 = vshrl.u32 %v20918_v12, 16  ;;  %v12109_v6 = vshll.u32 %v20918_v12, 16  ;;  %v12101_v9 = vrot.slane %v12099_v29, 7  ;;  %12374 = vst [vmem:[#allocation3 + $0x30] sm:$0xf] %v12073_v25 }
 0xced   : > { %v12083_v50 = vsel %vm22152_vm7, %v12074_v23, %v12082_v31  ;;  %v12084_v53 = vrot.slane %v12082_v31, 4  ;;  %v12092_v4 = vor.u32 %v12091_v28, %v12088_v46  ;;  %v12116_v37 = vshrl.u32 %v20922_v56, 16 }
 0xcee   : > { %v12108_v40 = vrot.slane %v12106_v22, 6  ;;  %v12111_v43 = vrot.slane %v12109_v6, 7  ;;  %v12119_v16 = vshll.u32 %v20922_v56, 16  ;;  %12375 = vst [vmem:[#allocation3 + $0x34] sm:$0xf] %v12083_v50  ;;  %v12102_v49 = vor.u32 %v12101_v9, %v12098_v58 }
 0xcef   : > { %v12093_v24 = vsel %vm22152_vm7, %v12084_v53, %v12092_v4  ;;  %v12094_v47 = vrot.slane %v12092_v4, 4  ;;  %v12126_v12 = vshrl.u32 %v20926_v3, 16  ;;  %v12118_v39 = vrot.slane %v12116_v37, 6 }
 0xcf0   : > { %v12112_v10 = vor.u32 %v12111_v43, %v12108_v40  ;;  %v12121_v20 = vrot.slane %v12119_v16, 7  ;;  %v12129_v35 = vshll.u32 %v20926_v3, 16  ;;  %12376 = vst [vmem:[#allocation3 + $0x38] sm:$0xf] %v12093_v24  ;;  %v12104_v42 = vrot.slane %v12102_v49, 4 }
 0xcf1   : > { %v12103_v41 = vsel %vm22152_vm7, %v12094_v47, %v12102_v49  ;;  %v12128_v8 = vrot.slane %v12126_v12, 6  ;;  %v12136_v56 = vshrl.u32 %v20930_v26, 16  ;;  %v12139_v57 = vshll.u32 %v20930_v26, 16 }
 0xcf2   : > { %v12114_v15 = vrot.slane %v12112_v10, 4  ;;  %v12122_v44 = vor.u32 %v12121_v20, %v12118_v39  ;;  %v12131_v1 = vrot.slane %v12129_v35, 7  ;;  %12377 = vst [vmem:[#allocation3 + $0x3c] sm:$0xf] %v12103_v41  ;;  %v12113_v38 = vsel %vm22152_vm7, %v12104_v42, %v12112_v10 }
 0xcf3   : > { %v12138_v13 = vrot.slane %v12136_v56, 6  ;;  %v12146_v3 = vshrl.u32 %v20934_v2, 16  ;;  %v12149_v34 = vshll.u32 %v20934_v2, 16  ;;  %v12141_v52 = vrot.slane %v12139_v57, 7  ;;  %12378 = vst [vmem:[#allocation3 + $0x40] sm:$0xf] %v12113_v38 }
 0xcf4   : > { %v12123_v19 = vsel %vm22152_vm7, %v12114_v15, %v12122_v44  ;;  %v12124_v14 = vrot.slane %v12122_v44, 4  ;;  %v12132_v27 = vor.u32 %v12131_v1, %v12128_v8  ;;  %v12156_v26 = vshrl.u32 %v20938_v7, 16 }
 0xcf5   : > { %v12148_v62 = vrot.slane %v12146_v3, 6  ;;  %v12151_v46 = vrot.slane %v12149_v34, 7  ;;  %v12159_v61 = vshll.u32 %v20938_v7, 16  ;;  %12379 = vst [vmem:[#allocation3 + $0x44] sm:$0xf] %v12123_v19  ;;  %v12142_v28 = vor.u32 %v12141_v52, %v12138_v13 }
 0xcf6   : > { %v12133_v23 = vsel %vm22152_vm7, %v12124_v14, %v12132_v27  ;;  %v12134_v31 = vrot.slane %v12132_v27, 4  ;;  %v12166_v2 = vshrl.u32 %v20942_v11, 16  ;;  %v12158_v25 = vrot.slane %v12156_v26, 6 }
 0xcf7   : > { %v12152_v29 = vor.u32 %v12151_v46, %v12148_v62  ;;  %v12161_v58 = vrot.slane %v12159_v61, 7  ;;  %v12169_v22 = vshll.u32 %v20942_v11, 16  ;;  %12380 = vst [vmem:[#allocation3 + $0x48] sm:$0xf] %v12133_v23  ;;  %v12144_v50 = vrot.slane %v12142_v28, 4 }
 0xcf8   : > { %v12143_v6 = vsel %vm22152_vm7, %v12134_v31, %v12142_v28  ;;  %v12168_v53 = vrot.slane %v12166_v2, 6  ;;  %v12176_v7 = vshrl.u32 %v20946_v60, 16  ;;  %v12179_v43 = vshll.u32 %v20946_v60, 16 }
 0xcf9   : > { %v12154_v4 = vrot.slane %v12152_v29, 4  ;;  %v12162_v9 = vor.u32 %v12161_v58, %v12158_v25  ;;  %v12171_v40 = vrot.slane %v12169_v22, 7  ;;  %12381 = vst [vmem:[#allocation3 + $0x4c] sm:$0xf] %v12143_v6  ;;  %v12153_v37 = vsel %vm22152_vm7, %v12144_v50, %v12152_v29 }
 0xcfa   : > { %v12178_v16 = vrot.slane %v12176_v7, 6  ;;  %v12186_v11 = vshrl.u32 %v20948_v5, 16  ;;  %v12189_v24 = vshll.u32 %v20948_v5, 16  ;;  %v12181_v10 = vrot.slane %v12179_v43, 7  ;;  %12382 = vst [vmem:[#allocation3 + $0x50] sm:$0xf] %v12153_v37 }
 0xcfb   : > { %v12163_v47 = vsel %vm22152_vm7, %v12154_v4, %v12162_v9  ;;  %v12164_v49 = vrot.slane %v12162_v9, 4  ;;  %v12172_v12 = vor.u32 %v12171_v40, %v12168_v53  ;;  %v12196_v60 = vshrl.u32 %v20950_v59, 16 }
 0xcfc   : > { %v12188_v39 = vrot.slane %v12186_v11, 6  ;;  %v12191_v20 = vrot.slane %v12189_v24, 7  ;;  %v12199_v35 = vshll.u32 %v20950_v59, 16  ;;  %12383 = vst [vmem:[#allocation3 + $0x54] sm:$0xf] %v12163_v47  ;;  %v12182_v8 = vor.u32 %v12181_v10, %v12178_v16 }
 0xcfd   : > { %v12173_v41 = vsel %vm22152_vm7, %v12164_v49, %v12172_v12  ;;  %v12174_v42 = vrot.slane %v12172_v12, 4  ;;  %v12206_v5 = vshrl.u32 %v20952_v30, 16  ;;  %v12198_v15 = vrot.slane %v12196_v60, 6 }
 0xcfe   : > { %v12192_v56 = vor.u32 %v12191_v20, %v12188_v39  ;;  %v12201_v44 = vrot.slane %v12199_v35, 7  ;;  %v12209_v1 = vshll.u32 %v20952_v30, 16  ;;  %12384 = vst [vmem:[#allocation3 + $0x58] sm:$0xf] %v12173_v41  ;;  %v12184_v38 = vrot.slane %v12182_v8, 4 }
 0xcff   : > { %v12183_v57 = vsel %vm22152_vm7, %v12174_v42, %v12182_v8  ;;  %v12208_v13 = vrot.slane %v12206_v5, 6  ;;  %v12216_v59 = vshrl.u32 %v20954_v55, 16  ;;  %v12219_v14 = vshll.u32 %v20954_v55, 16 }
 0xd00   : > { %v12194_v3 = vrot.slane %v12192_v56, 4  ;;  %v12202_v34 = vor.u32 %v12201_v44, %v12198_v15  ;;  %v12211_v19 = vrot.slane %v12209_v1, 7  ;;  %12385 = vst [vmem:[#allocation3 + $0x5c] sm:$0xf] %v12183_v57  ;;  %v12193_v27 = vsel %vm22152_vm7, %v12184_v38, %v12192_v56 }
 0xd01   : > { %v12218_v52 = vrot.slane %v12216_v59, 6  ;;  %v12226_v30 = vshrl.u32 %v20956_v32, 16  ;;  %v12229_v62 = vshll.u32 %v20956_v32, 16  ;;  %v12221_v23 = vrot.slane %v12219_v14, 7  ;;  %12386 = vst [vmem:[#allocation3 + $0x60] sm:$0xf] %v12193_v27 }
 0xd02   : > { %v12203_v46 = vsel %vm22152_vm7, %v12194_v3, %v12202_v34  ;;  %v12204_v26 = vrot.slane %v12202_v34, 4  ;;  %v12212_v61 = vor.u32 %v12211_v19, %v12208_v13  ;;  %v12236_v55 = vshrl.u32 %v20958_v48, 16 }
 0xd03   : > { %v12228_v31 = vrot.slane %v12226_v30, 6  ;;  %v12231_v28 = vrot.slane %v12229_v62, 7  ;;  %v12239_v2 = vshll.u32 %v20958_v48, 16  ;;  %12387 = vst [vmem:[#allocation3 + $0x64] sm:$0xf] %v12203_v46  ;;  %v12222_v58 = vor.u32 %v12221_v23, %v12218_v52 }
 0xd04   : > { %v12213_v29 = vsel %vm22152_vm7, %v12204_v26, %v12212_v61  ;;  %v12214_v25 = vrot.slane %v12212_v61, 4  ;;  %v12246_v32 = vshrl.u32 %v20960_v21, 16  ;;  %v12238_v6 = vrot.slane %v12236_v55, 6  ;;  %v12362_v26 = vld [vmem:[#allocation3 + $0x8] sm:$0xe] }
 0xd05   : > { %v12232_v22 = vor.u32 %v12231_v28, %v12228_v31  ;;  %v12241_v50 = vrot.slane %v12239_v2, 7  ;;  %v12249_v53 = vshll.u32 %v20960_v21, 16  ;;  %12388 = vst [vmem:[#allocation3 + $0x68] sm:$0xf] %v12213_v29  ;;  %v12224_v4 = vrot.slane %v12222_v58, 4  ;;  %v22153_v2 = vld [vmem:[#allocation65_spill] sm:$0xff] }
 0xd06   : > { %v12223_v7 = vsel %vm22152_vm7, %v12214_v25, %v12222_v58  ;;  %v12248_v9 = vrot.slane %v12246_v32, 6  ;;  %v12256_v48 = vshrl.u32 %v20962_v17, 16  ;;  %v12259_v16 = vshll.u32 %v20962_v17, 16 }
 0xd07   : > { %v12234_v40 = vrot.slane %v12232_v22, 4  ;;  %v12242_v43 = vor.u32 %v12241_v50, %v12238_v6  ;;  %v12251_v37 = vrot.slane %v12249_v53, 7  ;;  %12389 = vst [vmem:[#allocation3 + $0x6c] sm:$0xf] %v12223_v7  ;;  %v12233_v11 = vsel %vm22152_vm7, %v12224_v4, %v12232_v22  ;;  %v12400_v7 = vld [vmem:[#allocation3 + $0x98] sm:$0x1] }
 0xd08   : > { %v12258_v24 = vrot.slane %v12256_v48, 6  ;;  %v12266_v21 = vshrl.u32 %v20964_v63, 16  ;;  %v12269_v47 = vshll.u32 %v20964_v63, 16  ;;  %v12261_v39 = vrot.slane %v12259_v16, 7  ;;  %12390 = vst [vmem:[#allocation3 + $0x70] sm:$0xf] %v12233_v11 }
 0xd09   : > { %v12243_v49 = vsel %vm22152_vm7, %v12234_v40, %v12242_v43  ;;  %v12244_v12 = vrot.slane %v12242_v43, 4  ;;  %v12252_v10 = vor.u32 %v12251_v37, %v12248_v9  ;;  %v12276_v17 = vshrl.u32 %v20966_v51, 16  ;;  %v22155_v9 = vld [vmem:[#allocation43_spill] sm:$0xff]  ;;  %v12409_v43 = vld [vmem:[%s17302_s1] sm:$0xff] (!%p13544_p5)  ;;  %v12410_v16 = vld [vmem:[%s17302_s1 + $0x8] sm:$0xff] (!%p13544_p5) }
 0xd0a   : > { %v12268_v20 = vrot.slane %v12266_v21, 6  ;;  %v12271_v60 = vrot.slane %v12269_v47, 7  ;;  %v12279_v35 = vshll.u32 %v20966_v51, 16  ;;  %12391 = vst [vmem:[#allocation3 + $0x74] sm:$0xf] %v12243_v49  ;;  %v12262_v8 = vor.u32 %v12261_v39, %v12258_v24  ;;  %v12407_v40 = vld [vmem:[#allocation2] sm:$0xff] (!%p13544_p5) }
 0xd0b   : > { %v12253_v41 = vsel %vm22152_vm7, %v12244_v12, %v12252_v10  ;;  %v12254_v42 = vrot.slane %v12252_v10, 4  ;;  %v12286_v63 = vshrl.u32 %v20968_v36, 16  ;;  %v12278_v56 = vrot.slane %v12276_v17, 6  ;;  %v12415_v11 = vld [vmem:[#allocation2 + $0x12] sm:$0xff] (!%p13544_p5)  ;;  %v12416_v49 = vld [vmem:[#allocation2 + $0x1a] sm:$0xff] (!%p13544_p5)  ;;  %v12423_v10 = vld [vmem:[#allocation2 + $0x24] sm:$0xff] (!%p13544_p5) }
 0xd0c   : > { %v12272_v5 = vor.u32 %v12271_v60, %v12268_v20  ;;  %v12281_v15 = vrot.slane %v12279_v35, 7  ;;  %v12289_v44 = vshll.u32 %v20968_v36, 16  ;;  %12392 = vst [vmem:[#allocation3 + $0x78] sm:$0xf] %v12253_v41  ;;  %v12264_v57 = vrot.slane %v12262_v8, 4  ;;  %v12417_v24 = vld [vmem:[%s17302_s1 + $0x10] sm:$0xff] (!%p13544_p5) }
 0xd0d   : > { %v12263_v1 = vsel %vm22152_vm7, %v12254_v42, %v12262_v8  ;;  %v12288_v38 = vrot.slane %v12286_v63, 6  ;;  %v12296_v51 = vshrl.u32 %v20970_v45, 16  ;;  %v12299_v34 = vshll.u32 %v20970_v45, 16  ;;  %v12418_v12 = vld [vmem:[%s17302_s1 + $0x18] sm:$0xff] (!%p13544_p5)  ;;  %v12425_v20 = vld [vmem:[%s17302_s1 + $0x20] sm:$0xff] (!%p13544_p5)  ;;  %v12424_v60 = vld [vmem:[#allocation2 + $0x2c] sm:$0xff] (!%p13544_p5) }
 0xd0e   : > { %v12274_v13 = vrot.slane %v12272_v5, 4  ;;  %v12282_v59 = vor.u32 %v12281_v15, %v12278_v56  ;;  %v12291_v3 = vrot.slane %v12289_v44, 7  ;;  %12393 = vst [vmem:[#allocation3 + $0x7c] sm:$0xf] %v12263_v1  ;;  %v12273_v19 = vsel %vm22152_vm7, %v12264_v57, %v12272_v5  ;;  %v12426_v17 = vld [vmem:[%s17302_s1 + $0x28] sm:$0xff] (!%p13544_p5)  ;;  %v12431_v42 = vld [vmem:[#allocation2 + $0x36] sm:$0xff] (!%p13544_p5) }
 0xd0f   : > { %v12298_v14 = vrot.slane %v12296_v51, 6  ;;  %v12306_v36 = vshrl.u32 %v20972_v0, 16  ;;  %v12309_v27 = vshll.u32 %v20972_v0, 16  ;;  %v12301_v46 = vrot.slane %v12299_v34, 7  ;;  %12394 = vst [vmem:[#allocation3 + $0x80] sm:$0xf] %v12273_v19 }
 0xd10   : > { %v12283_v52 = vsel %vm22152_vm7, %v12274_v13, %v12282_v59  ;;  %v12284_v30 = vrot.slane %v12282_v59, 4  ;;  %v12292_v62 = vor.u32 %v12291_v3, %v12288_v38  ;;  %v12316_v45 = vshrl.u32 %v20974_v54, 16  ;;  %v12433_v8 = vld [vmem:[%s17302_s1 + $0x30] sm:$0xff] (!%p13544_p5)  ;;  %v12432_v63 = vld [vmem:[#allocation2 + $0x3e] sm:$0xff] (!%p13544_p5)  ;;  %v12439_v15 = vld [vmem:[#allocation2 + $0x48] sm:$0xff] (!%p13544_p5) }
 0xd11   : > { %v12308_v61 = vrot.slane %v12306_v36, 6  ;;  %v12311_v23 = vrot.slane %v12309_v27, 7  ;;  %v12319_v31 = vshll.u32 %v20974_v54, 16  ;;  %12395 = vst [vmem:[#allocation3 + $0x84] sm:$0xf] %v12283_v52  ;;  %v12302_v0 = vor.u32 %v12301_v46, %v12298_v14  ;;  %v12434_v56 = vld [vmem:[%s17302_s1 + $0x38] sm:$0xff] (!%p13544_p5) }
 0xd12   : > { %v12293_v28 = vsel %vm22152_vm7, %v12284_v30, %v12292_v62  ;;  %v12294_v55 = vrot.slane %v12292_v62, 4  ;;  %vm22154_vm0 = vnez %v22153_v2  ;;  %v12318_v58 = vrot.slane %v12316_v45, 6  ;;  %12406 = sbr.rel (%p13544_p5) target bundleno = 3370 (0xd2a), region = 108  ;;  %v12441_v44 = vld [vmem:[%s17302_s1 + $0x40] sm:$0xff] (!%p13544_p5)  ;;  %v12440_v38 = vld [vmem:[#allocation2 + $0x50] sm:$0xff] (!%p13544_p5)  ;;  %v12447_v13 = vld [vmem:[#allocation2 + $0x5a] sm:$0xff] (!%p13544_p5) }
 0xd13   : > { %v12363_v29 = vsel %vm22154_vm0, %v20976_v18, %v12362_v26  ;;  %v12312_v25 = vor.u32 %v12311_v23, %v12308_v61  ;;  %v12321_v32 = vrot.slane %v12319_v31, 7  ;;  %12396 = vst [vmem:[#allocation3 + $0x88] sm:$0xf] %v12293_v28  ;;  %v12304_v6 = vrot.slane %v12302_v0, 4  ;;  %v12442_v51 = vld [vmem:[%s17302_s1 + $0x48] sm:$0xff] (!%p13544_p5)  ;;  %v12449_v3 = vld [vmem:[%s17302_s1 + $0x50] sm:$0xff] (!%p13544_p5) }
 0xd14   : > { %12364 = vst [vmem:[#allocation3 + $0x8] sm:$0xe] %v12363_v29  ;;  %v12303_v22 = vsel %vm22152_vm7, %v12294_v55, %v12302_v0  ;;  %v12324_v53 = vrot.slane %v12318_v58, 4  ;;  %vm22156_vm6 = vnez %v22155_v9  ;;  %v12411_v37 = vadd.f32 (!%p13544_p5), %v12409_v43, %v12407_v40  ;;  %v12448_v34 = vld [vmem:[#allocation2 + $0x62] sm:$0xff] (!%p13544_p5)  ;;  %v12455_v27 = vld [vmem:[#allocation2 + $0x6c] sm:$0xff] (!%p13544_p5)  ;;  %v12456_v30 = vld [vmem:[#allocation2 + $0x74] sm:$0xff] (!%p13544_p5) }
 0xd15   : > { %v12314_v54 = vrot.slane %v12312_v25, 4  ;;  %v12322_v50 = vor.u32 %v12321_v32, %v12318_v58  ;;  %12397 = vst [vmem:[#allocation3 + $0x8c] sm:$0xf] %v12303_v22  ;;  %v12313_v4 = vsel %vm22152_vm7, %v12304_v6, %v12312_v25  ;;  %v12412_v21 = vadd.f32 (!%p13544_p5), %v12410_v16, %v12408_v33  ;;  %v12450_v19 = vld [vmem:[%s17302_s1 + $0x58] sm:$0xff] (!%p13544_p5)  ;;  %v12457_v52 = vld [vmem:[%s17302_s1 + $0x60] sm:$0xff] (!%p13544_p5)  ;;  %v12458_v46 = vld [vmem:[%s17302_s1 + $0x68] sm:$0xff] (!%p13544_p5) }
 0xd16   : > { %12398 = vst [vmem:[#allocation3 + $0x90] sm:$0xf] %v12313_v4  ;;  %v12401_v48 = vsel %vm22156_vm6, %v12324_v53, %v12400_v7  ;;  %v12419_v47 = vadd.f32 (!%p13544_p5), %v12417_v24, %v12415_v11  ;;  %12413 = vst [vmem:[%s18471_s5] sm:$0xff] (!%p13544_p5), %v12411_v37  ;;  %v12420_v39 = vadd.f32 (!%p13544_p5), %v12418_v12, %v12416_v49  ;;  %v12463_v26 = vld [vmem:[#allocation2 + $0x7e] sm:$0xff] (!%p13544_p5)  ;;  %v12465_v61 = vld [vmem:[%s17302_s1 + $0x70] sm:$0xff] (!%p13544_p5) }
 0xd17   : > { %v12323_v18 = vsel %vm22152_vm7, %v12314_v54, %v12322_v50  ;;  %12402 = vst [vmem:[#allocation3 + $0x98] sm:$0x1] %v12401_v48  ;;  %12414 = vst [vmem:[%s18471_s5 + $0x8] sm:$0xff] (!%p13544_p5), %v12412_v21  ;;  %v12427_v35 = vadd.f32 (!%p13544_p5), %v12425_v20, %v12423_v10  ;;  %v12428_v41 = vadd.f32 (!%p13544_p5), %v12426_v17, %v12424_v60  ;;  %v12464_v31 = vld [vmem:[#allocation2 + $0x86] sm:$0xff] (!%p13544_p5)  ;;  %v12466_v28 = vld [vmem:[%s17302_s1 + $0x78] sm:$0xff] (!%p13544_p5) }
 0xd18   : > { %12399 = vst [vmem:[#allocation3 + $0x94] sm:$0xf] %v12323_v18  ;;  %12421 = vst [vmem:[%s18471_s5 + $0x10] sm:$0xff] (!%p13544_p5), %v12419_v47  ;;  %v12435_v5 = vadd.f32 (!%p13544_p5), %v12433_v8, %v12431_v42  ;;  %v12436_v1 = vadd.f32 (!%p13544_p5), %v12434_v56, %v12432_v63  ;;  %v12443_v57 = vadd.f32 (!%p13544_p5), %v12441_v44, %v12439_v15  ;;  %v12471_v55 = vld [vmem:[#allocation2 + $0x90] sm:$0xff] (!%p13544_p5)  ;;  %v12473_v2 = vld [vmem:[%s17302_s1 + $0x80] sm:$0xff] (!%p13544_p5) }
 0xd19   : > { %12422 = vst [vmem:[%s18471_s5 + $0x18] sm:$0xff] %v12420_v39  ;;  %12429 = vst [vmem:[%s18471_s5 + $0x20] sm:$0xff] %v12427_v35  ;;  %v12444_v59 = vadd.f32 %v12442_v51, %v12440_v38  ;;  %v12451_v14 = vadd.f32 %v12449_v3, %v12447_v13  ;;  %v12452_v36 = vadd.f32 %v12450_v19, %v12448_v34  ;;  %v12472_v29 = vld [vmem:[#allocation2 + $0x98] sm:$0xff]  ;;  %v12474_v25 = vld [vmem:[%s17302_s1 + $0x88] sm:$0xff] }
 0xd1a   : > { %12430 = vst [vmem:[%s18471_s5 + $0x28] sm:$0xff] %v12428_v41  ;;  %12437 = vst [vmem:[%s18471_s5 + $0x30] sm:$0xff] %v12435_v5  ;;  %v12459_v62 = vadd.f32 %v12457_v52, %v12455_v27  ;;  %v12460_v23 = vadd.f32 %v12458_v46, %v12456_v30  ;;  %v12467_v45 = vadd.f32 %v12465_v61, %v12463_v26  ;;  %v12479_v22 = vld [vmem:[#allocation2 + $0xa2] sm:$0xff]  ;;  %v12481_v6 = vld [vmem:[%s17302_s1 + $0x90] sm:$0xff] }
 0xd1b   : > { %12438 = vst [vmem:[%s18471_s5 + $0x38] sm:$0xff] %v12436_v1  ;;  %12445 = vst [vmem:[%s18471_s5 + $0x40] sm:$0xff] %v12443_v57  ;;  %v12468_v0 = vadd.f32 %v12466_v28, %v12464_v31  ;;  %v12475_v58 = vadd.f32 %v12473_v2, %v12471_v55  ;;  %v12476_v32 = vadd.f32 %v12474_v25, %v12472_v29  ;;  %v12480_v54 = vld [vmem:[#allocation2 + $0xaa] sm:$0xff]  ;;  %v12482_v53 = vld [vmem:[%s17302_s1 + $0x98] sm:$0xff] }
 0xd1c   : > { %12446 = vst [vmem:[%s18471_s5 + $0x48] sm:$0xff] %v12444_v59  ;;  %12453 = vst [vmem:[%s18471_s5 + $0x50] sm:$0xff] %v12451_v14  ;;  %v12483_v50 = vadd.f32 %v12481_v6, %v12479_v22  ;;  %v12487_v7 = vld [vmem:[#allocation2 + $0xb4] sm:$0xff]  ;;  %v12489_v4 = vld [vmem:[%s17302_s1 + $0xa0] sm:$0xff]  ;;  %v12484_v18 = vadd.f32 %v12482_v53, %v12480_v54 }
 0xd1d   : > { %12454 = vst [vmem:[%s18471_s5 + $0x58] sm:$0xff] %v12452_v36  ;;  %12461 = vst [vmem:[%s18471_s5 + $0x60] sm:$0xff] %v12459_v62  ;;  %v12491_v9 = vadd.f32 %v12489_v4, %v12487_v7  ;;  %v12488_v48 = vld [vmem:[#allocation2 + $0xbc] sm:$0xff]  ;;  %v12490_v40 = vld [vmem:[%s17302_s1 + $0xa8] sm:$0xff] }
 0xd1e   : > { %12462 = vst [vmem:[%s18471_s5 + $0x68] sm:$0xff] %v12460_v23  ;;  %12469 = vst [vmem:[%s18471_s5 + $0x70] sm:$0xff] %v12467_v45  ;;  %v12495_v43 = vld [vmem:[#allocation2 + $0xc6] sm:$0xff]  ;;  %v12492_v33 = vadd.f32 %v12490_v40, %v12488_v48  ;;  %v12497_v37 = vld [vmem:[%s17302_s1 + $0xb0] sm:$0xff] }
 0xd1f   : > { %12470 = vst [vmem:[%s18471_s5 + $0x78] sm:$0xff] %v12468_v0  ;;  %12477 = vst [vmem:[%s18471_s5 + $0x80] sm:$0xff] %v12475_v58  ;;  %v12496_v16 = vld [vmem:[#allocation2 + $0xce] sm:$0xff]  ;;  %v12498_v11 = vld [vmem:[%s17302_s1 + $0xb8] sm:$0xff]  ;;  %v12499_v24 = vadd.f32 %v12497_v37, %v12495_v43 }
 0xd20   : > { %12478 = vst [vmem:[%s18471_s5 + $0x88] sm:$0xff] %v12476_v32  ;;  %12485 = vst [vmem:[%s18471_s5 + $0x90] sm:$0xff] %v12483_v50  ;;  %v12500_v21 = vadd.f32 %v12498_v11, %v12496_v16  ;;  %v12503_v47 = vld [vmem:[#allocation2 + $0xd8] sm:$0xff]  ;;  %v12505_v49 = vld [vmem:[%s17302_s1 + $0xc0] sm:$0xff] }
 0xd21   : > { %12486 = vst [vmem:[%s18471_s5 + $0x98] sm:$0xff] %v12484_v18  ;;  %12493 = vst [vmem:[%s18471_s5 + $0xa0] sm:$0xff] %v12491_v9  ;;  %v12504_v12 = vld [vmem:[#allocation2 + $0xe0] sm:$0xff]  ;;  %v12507_v10 = vadd.f32 %v12505_v49, %v12503_v47  ;;  %v12506_v39 = vld [vmem:[%s17302_s1 + $0xc8] sm:$0xff] }
 0xd22   : > { %12494 = vst [vmem:[%s18471_s5 + $0xa8] sm:$0xff] %v12492_v33  ;;  %v12511_v20 = vld [vmem:[#allocation2 + $0xea] sm:$0xff]  ;;  %v12513_v60 = vld [vmem:[%s17302_s1 + $0xd0] sm:$0xff]  ;;  %12501 = vst [vmem:[%s18471_s5 + $0xb0] sm:$0xff] %v12499_v24  ;;  %v12508_v17 = vadd.f32 %v12506_v39, %v12504_v12 }
 0xd23   : > { %12502 = vst [vmem:[%s18471_s5 + $0xb8] sm:$0xff] %v12500_v21  ;;  %v12515_v35 = vadd.f32 %v12513_v60, %v12511_v20  ;;  %v12512_v41 = vld [vmem:[#allocation2 + $0xf2] sm:$0xff]  ;;  %v12514_v42 = vld [vmem:[%s17302_s1 + $0xd8] sm:$0xff]  ;;  %12509 = vst [vmem:[%s18471_s5 + $0xc0] sm:$0xff] %v12507_v10 }
 0xd24   : > { %v12519_v8 = vld [vmem:[#allocation2 + $0xfc] sm:$0xff]  ;;  %v12516_v63 = vadd.f32 %v12514_v42, %v12512_v41  ;;  %v12521_v5 = vld [vmem:[%s17302_s1 + $0xe0] sm:$0xff]  ;;  %v12522_v15 = vld [vmem:[%s17302_s1 + $0xe8] sm:$0xff]  ;;  %12510 = vst [vmem:[%s18471_s5 + $0xc8] sm:$0xff] %v12508_v17 }
 0xd25   : > { %v12520_v56 = vld [vmem:[#allocation2 + $0x104] sm:$0xff]  ;;  %12517 = vst [vmem:[%s18471_s5 + $0xd0] sm:$0xff] %v12515_v35  ;;  %v12523_v44 = vadd.f32 %v12521_v5, %v12519_v8  ;;  %v12527_v57 = vld [vmem:[#allocation2 + $0x10e] sm:$0xff]  ;;  %v12528_v51 = vld [vmem:[#allocation2 + $0x116] sm:$0xff] }
 0xd26   : > { %v12524_v1 = vadd.f32 %v12522_v15, %v12520_v56  ;;  %v12529_v38 = vld [vmem:[%s17302_s1 + $0xf0] sm:$0xff]  ;;  %12518 = vst [vmem:[%s18471_s5 + $0xd8] sm:$0xff] %v12516_v63  ;;  %v12530_v59 = vld [vmem:[%s17302_s1 + $0xf8] sm:$0xff] }
 0xd27   : > { %v12531_v13 = vadd.f32 %v12529_v38, %v12527_v57  ;;  %12525 = vst [vmem:[%s18471_s5 + $0xe0] sm:$0xff] %v12523_v44  ;;  %v12532_v3 = vadd.f32 %v12530_v59, %v12528_v51 }
 0xd28   : > { %12526 = vst [vmem:[%s18471_s5 + $0xe8] sm:$0xff] %v12524_v1 }
 0xd29   : > { %12533 = vst [vmem:[%s18471_s5 + $0xf0] sm:$0xff] %v12531_v13  ;;  %12534 = vst [vmem:[%s18471_s5 + $0xf8] sm:$0xff] %v12532_v3 }
 0xd2a PF: > { %s22158_s14 = sld [smem:[#allocation28_spill]]  ;;  %s22159_s18 = sld [smem:[#allocation37_spill]] }
 0xd2b   : > { %s22160_s13 = sld [smem:[#allocation85_spill]]  ;;  %s12549_s19 = sshll.u32 %s18471_s5, 4  ;;  %s21188_s19 = int_to_ptr.vmem [resolvable:$true] %s12549_s19 }
 0xd2c   : > { %s12536_s1 = scalar_lea.sflag [#allocation6], %s17296_s4  ;;  %s16644_s25 = scalar_lea.vmem %s21188_s19, 4096 }
 0xd2d   : > { %p16645_p4 = scmp.ne.s32.totalorder %s21188_s19, %s16644_s25  ;;  %s16795_s2 = smov [#allocation16]  }
 0xd2e   : > { %s16648_s26 = sshll.u32 %s16795_s2, 4  ;;  %s16649_s26 = int_to_ptr.vmem [resolvable:$false] %s16648_s26 }
 0xd2f   : > { %s16650_s29 = scalar_lea.vmem %s16649_s26, 8192  ;;  %p16651_p12 = scmp.lt.s32.totalorder %s21188_s19, %s16649_s26 }
 0xd30   : > { %s13659_s21 = sshll.u32 %s22158_s14, 12  ;;  %p22161_p3 = scmp.ne.s32.totalorder %s22159_s18, 0 }
 0xd31   : > { %s21185_s30 = scalar_lea.hbm %s22160_s13, %s13659_s21  ;;  %p16652_p10 = scmp.lt.s32.totalorder %s16650_s29, %s16644_s25 }
 0xd32   : > { %p16646_p13 = pnand %p16645_p4, %p22161_p3 }
 0xd33   : > { %p16653_p8 = por %p16652_p10, %p16651_p12 }
 0xd34   : > { %p16647_p1 = pneg %p16646_p13 }
 0xd36   : > { %p16654_p0 = pnand %p16653_p8, %p16647_p1 }
 0xd38   : > { %16657 = shalt.err (!%p16654_p0)
}
 0xd39   : > { %s16658_s5 = scalar_lea.hbm %s21185_s30, 4096  ;;  %s16662_s17 = scalar_lea.hbm %s22160_s13, 8192 }
 0xd3a   : > { %p16659_p9 = scmp.ne.s32.totalorder %s21185_s30, %s16658_s5  ;;  %p16663_p7 = scmp.lt.u32.totalorder %s21185_s30, %s22160_s13 }
 0xd3b   : > { %p16664_p6 = scmp.lt.u32.totalorder %s16662_s17, %s16658_s5  ;;  %p16666_p4 = scmp.lt.u32.totalorder %s16658_s5, %s21185_s30 }
 0xd3c   : > { %p16660_p11 = pnand %p16659_p9, %p22161_p3 }
 0xd3d   : > { %p16665_p5 = por %p16664_p6, %p16663_p7 }
 0xd3e   : > { %p16661_p2 = pneg %p16660_p11 }
 0xd3f   : > { %p16667_p13 = por %p16666_p4, %p16665_p5 }
 0xd41   : > { %p16668_p1 = pnand %p16667_p13, %p16661_p2 }
 0xd43   : > { %16671 = shalt.err (!%p16668_p1)
}
 0xd44   : > { %s16796_s9 = smov 128   ;;  %s16797_s28 = smov 8  }
 0xd45   : > { %15945 = dma.vmem_to_hbm [thread:$0]  (%p22161_p3), %s21188_s19, 4096, %s21185_s30, %s12536_s1, %s16796_s9, %s16796_s9, %s16797_s28  }
 0xd46 PF: > { %s22162_s15 = sld [smem:[#allocation31_spill]]  ;;  %s22163_s6 = sld [smem:[#allocation24_spill]] }
 0xd47   : > { %s22164_s7 = sld [smem:[#allocation39_spill]] }
 0xd4c   : > { %p15974_p12 = scmp.ge.s32.totalorder %s22162_s15, 2  ;;  %s12564_s8 = sand.u32 1, %s22163_s6  }
 0xd4d   : > { %p22165_p10 = scmp.ne.s32.totalorder %s22164_s7, 0  ;;  %s12565_s12 = scalar_lea.sflag [#allocation6], %s12564_s8 }
 0xd4f   : > { %p15970_p8 = pnand %p15974_p12, %p22165_p10 }
 0xd51   : > { %16733 = dma.done.wait (!%p15970_p8), %s12565_s12, 4096  }
 0xd52   : > { %16735 = vsyncadd (!%p15970_p8), %s12565_s12, 4294963200  ;;  %s38_s18 = sadd.s32 1, %s22162_s15   ;;  %s22166_s25 = sld [smem:[#allocation22_spill]] }
 0xd53   : > { %p35_p0 = scmp.ge.s32.totalorder %s38_s18, 6   ;;  %s22167_s26 = sld [smem:[#allocation23_spill]] }
 0xd54   : > { %s22168_s27 = sld [smem:[#allocation33_spill]]  ;;  %s22169_s28 = sld [smem:[#allocation25_spill]] }
 0xd55   : > { %s22170_s29 = sld [smem:[#allocation26_spill]]  ;;  %s22171_s30 = sld [smem:[#allocation38_spill]] }
 0xd56   : > { %s22172_s14 = sld [smem:[#allocation29_spill]]  ;;  %s22173_s15 = sld [smem:[#allocation30_spill]] }
 0xd57   : > { %s22174_s16 = sld [smem:[#allocation32_spill]]  ;;  %s22175_s17 = sld [smem:[#allocation35_spill]] }
 0xd58   :  { %37 = sbr.rel (!%p35_p0) target bundleno = 30 (0x1e), region = 231 }
 0xd5f   :  { %12570 = vsyncpa [#allocation5], 1 }
 0xd60   :  { %12572 = vsyncpa [#allocation5 + $0x1], 1 }
 0xd61   :  { %12573 = vsyncpa [#allocation8], 1 }
 0xd62   :  { %12575 = vsyncpa [#allocation8 + $0x1], 1 }
 0xd63   :  { %12576 = vsyncpa [#allocation11], 1 }
 0xd64   :  { %12578 = vsyncpa [#allocation11 + $0x1], 1 }
 0xd65   :  { %12579 = vsyncpa [#allocation14], 1 }
 0xd66   :  { %12581 = vsyncpa [#allocation14 + $0x1], 1 }
 0xd67   :  { %12582 = vsyncpa [#allocation6], 1 }
 0xd68   :  { %12584 = vsyncpa [#allocation6 + $0x1], 1 }

</bundles_post_ra>
